<compile_context>
chip_gen: v7x
topology: tpu7x:2x2x1
jax: 0.10.0
libtpu: 0.0.40
codegen_flags: <defaults>
</compile_context>

<pallas_src>
import jax
import jax.numpy as jnp
from jax import lax
from jax.experimental import pallas as pl
from jax.experimental.pallas import tpu as pltpu


# ---------------------------------------------------------------------------
# Pallas kernels:  Y = relu(X @ W + b)   (optionally also  Y / ||Y||_2 per row)
# ---------------------------------------------------------------------------
def _matmul_bias_relu_kernel(x_ref, w_ref, b_ref, o_ref, acc_ref):
    k = pl.program_id(2)

    @pl.when(k == 0)
    def _init():
        acc_ref[...] = jnp.zeros_like(acc_ref)

    acc_ref[...] += jnp.dot(x_ref[...], w_ref[...],
                            preferred_element_type=jnp.float32)

    @pl.when(k == pl.num_programs(2) - 1)
    def _finalize():
        y = jnp.maximum(acc_ref[...] + b_ref[...], 0.0)
        o_ref[...] = y.astype(o_ref.dtype)


def _matmul_bias_relu_l2norm_kernel(x_ref, w_ref, b_ref, o_ref, on_ref, acc_ref):
    k = pl.program_id(2)

    @pl.when(k == 0)
    def _init():
        acc_ref[...] = jnp.zeros_like(acc_ref)

    acc_ref[...] += jnp.dot(x_ref[...], w_ref[...],
                            preferred_element_type=jnp.float32)

    @pl.when(k == pl.num_programs(2) - 1)
    def _finalize():
        y = jnp.maximum(acc_ref[...] + b_ref[...], 0.0)
        o_ref[...] = y.astype(o_ref.dtype)
        # F.normalize(dim=-1): y / max(||y||, 1e-12) == y * rsqrt(max(||y||^2, 1e-24))
        ss = jnp.sum(y * y, axis=-1, keepdims=True)
        on_ref[...] = (y * lax.rsqrt(jnp.maximum(ss, 1e-24))).astype(on_ref.dtype)


# ---------------------------------------------------------------------------
# pallas_call plumbing
# ---------------------------------------------------------------------------
def _round_up(v, m):
    return (v + m - 1) // m * m


def _pick_tile(dim, candidates):
    for c in candidates:
        if dim % c == 0:
            return c
    return dim  # fall back to the full (untiled) dimension (legal: equals array dim)


def _tiled_matmul_call(kernel, x, w, b, n_outputs, tn_full):
    m, k = x.shape
    k2, n = w.shape
    assert k == k2
    tm = 256 if m >= 256 else _round_up(m, 8)
    mp = _round_up(m, tm)
    if mp != m:
        x = jnp.pad(x, ((0, mp - m), (0, 0)))
    tk = _pick_tile(k, (512, 256, 128))
    tn = n if tn_full else _pick_tile(n, (256, 128))
    grid = (mp // tm, n // tn, k // tk)

    out_block = pl.BlockSpec((tm, tn), lambda i, j, kk: (i, j))
    out_shape = jax.ShapeDtypeStruct((mp, n), jnp.float32)
    if n_outputs == 1:
        out_shapes, out_specs = out_shape, out_block
    else:
        out_shapes = (out_shape,) * n_outputs
        out_specs = [out_block] * n_outputs

    res = pl.pallas_call(
        kernel,
        out_shape=out_shapes,
        grid_spec=pltpu.PrefetchScalarGridSpec(
            num_scalar_prefetch=0,
            grid=grid,
            in_specs=[
                pl.BlockSpec((tm, tk), lambda i, j, kk: (i, kk)),
                pl.BlockSpec((tk, tn), lambda i, j, kk: (kk, j)),
                pl.BlockSpec((1, tn), lambda i, j, kk: (0, j)),
            ],
            out_specs=out_specs,
            scratch_shapes=[pltpu.VMEM((tm, tn), jnp.float32)],
        ),
        compiler_params=pltpu.CompilerParams(
            dimension_semantics=("parallel", "parallel", "arbitrary")),
    )(x, w, b.reshape(1, n))

    if n_outputs == 1:
        return res[:m]
    return tuple(r[:m] for r in res)


def matmul_bias_relu(x, w, b):
    return _tiled_matmul_call(_matmul_bias_relu_kernel, x, w, b, 1, tn_full=False)


def matmul_bias_relu_l2norm(x, w, b):
    # Row normalization needs the full output row resident in one tile -> tn = N.
    return _tiled_matmul_call(_matmul_bias_relu_l2norm_kernel, x, w, b, 2, tn_full=True)


# ---------------------------------------------------------------------------
# Conv2d(k=3, stride=2, padding=0) as im2col + fused Pallas matmul
# ---------------------------------------------------------------------------
def _im2col_3x3_s2(x_nhwc):
    """3x3 / stride-2 / VALID patch extraction (layout-only wrapper op)."""
    b, h, w, c = x_nhwc.shape
    oh = (h - 3) // 2 + 1
    ow = (w - 3) // 2 + 1
    cols = []
    for kh in range(3):
        for kw in range(3):
            cols.append(x_nhwc[:, kh:kh + 2 * oh - 1:2, kw:kw + 2 * ow - 1:2, :])
    patches = jnp.concatenate(cols, axis=-1)           # (B, OH, OW, 9*C)
    return patches.reshape(b * oh * ow, 9 * c), (b, oh, ow)


# ---------------------------------------------------------------------------
# Full forward pass (matches SimCLRStage1.forward)
# ---------------------------------------------------------------------------
@jax.jit
def simclr_stage1_forward(x, params):
    """x: (B, 3, H, W) NCHW float32 (PyTorch layout). Returns (feature_n, out_n)."""
    h = jnp.transpose(x, (0, 2, 3, 1))                  # NHWC: channels on lanes
    for w, b in params["convs"]:
        patches, (bsz, oh, ow) = _im2col_3x3_s2(h)
        cout = w.shape[-1]
        y = matmul_bias_relu(patches, w.reshape(-1, cout), b)   # conv + bias + ReLU
        h = y.reshape(bsz, oh, ow, cout)
    bsz = h.shape[0]
    # torch.flatten on NCHW -> channel-major feature ordering (matches Linear(6400,512))
    flat = jnp.transpose(h, (0, 3, 1, 2)).reshape(bsz, -1)      # (B, 6400)
    feature, feature_n = matmul_bias_relu_l2norm(flat, params["fc_w"], params["fc_b"])
    h1 = matmul_bias_relu(feature, params["g1_w"], params["g1_b"])
    _, out_n = matmul_bias_relu_l2norm(h1, params["g2_w"], params["g2_b"])
    return feature_n, out_n


# ---------------------------------------------------------------------------
# Parameters and pure-JAX reference (for the in-script correctness check)
# ---------------------------------------------------------------------------
def init_params(key):
    ks = jax.random.split(key, 14)
    cfg = [(3, 64), (64, 128), (128, 256), (256, 256)]
    convs = []
    i = 0
    for cin, cout in cfg:
        w = jax.random.normal(ks[i], (3, 3, cin, cout), jnp.float32) * (9 * cin) ** -0.5
        b = jax.random.normal(ks[i + 1], (cout,), jnp.float32) * 0.01
        convs.append((w, b))
        i += 2

    def lin(kw, kb, fin, fout):
        return (jax.random.normal(kw, (fin, fout), jnp.float32) * fin ** -0.5,
                jax.random.normal(kb, (fout,), jnp.float32) * 0.01)

    fc_w, fc_b = lin(ks[i], ks[i + 1], 6400, 512); i += 2
    g1_w, g1_b = lin(ks[i], ks[i + 1], 512, 512); i += 2
    g2_w, g2_b = lin(ks[i], ks[i + 1], 512, 512); i += 2
    return {"convs": convs, "fc_w": fc_w, "fc_b": fc_b,
            "g1_w": g1_w, "g1_b": g1_b, "g2_w": g2_w, "g2_b": g2_b}


def _reference_forward(x, params):
    h = jnp.transpose(x, (0, 2, 3, 1))
    for w, b in params["convs"]:
        h = lax.conv_general_dilated(
            h, w, window_strides=(2, 2), padding="VALID",
            dimension_numbers=("NHWC", "HWIO", "NHWC"),
            precision=lax.Precision.HIGHEST)
        h = jnp.maximum(h + b, 0.0)
    bsz = h.shape[0]
    flat = jnp.transpose(h, (0, 3, 1, 2)).reshape(bsz, -1)

    def dense(v, w, b):
        return jnp.maximum(jnp.dot(v, w, precision=lax.Precision.HIGHEST) + b, 0.0)

    feature = dense(flat, params["fc_w"], params["fc_b"])
    h1 = dense(feature, params["g1_w"], params["g1_b"])
    out = dense(h1, params["g2_w"], params["g2_b"])

    def l2n(v):
        return v / jnp.maximum(jnp.linalg.norm(v, axis=-1, keepdims=True), 1e-12)

    return l2n(feature), l2n(out)


if __name__ == "__main__":
    key = jax.random.PRNGKey(0)
    kx, kp = jax.random.split(key)
    # Smallest spatial size consistent with Linear(6400 = 256*5*5, 512): 96x96; batch 2.
    x = jax.random.normal(kx, (2, 3, 96, 96), dtype=jnp.float32)
    params = init_params(kp)

    feature_n, out_n = simclr_stage1_forward(x, params)
    feature_n = jax.block_until_ready(feature_n)
    out_n = jax.block_until_ready(out_n)

    ref_f, ref_o = _reference_forward(x, params)
    assert feature_n.shape == (2, 512) and out_n.shape == (2, 512)
    assert jnp.allclose(feature_n, ref_f, atol=1e-2, rtol=1e-2), \
        float(jnp.max(jnp.abs(feature_n - ref_f)))
    assert jnp.allclose(out_n, ref_o, atol=1e-2, rtol=1e-2), \
        float(jnp.max(jnp.abs(out_n - ref_o)))
    print("KERNEL_OK")
</pallas_src>

<mosaic_0001>
module attributes {stable_mosaic.version = 11 : i64} {
  func.func @_matmul_bias_relu_kernel(%arg0: i32, %arg1: i32, %arg2: i32, %arg3: memref<256x27xf32, #tpu.memory_space<vmem>>, %arg4: memref<27x64xf32, #tpu.memory_space<vmem>>, %arg5: memref<1x64xf32, #tpu.memory_space<vmem>>, %arg6: memref<256x64xf32, #tpu.memory_space<vmem>>, %arg7: memref<256x64xf32, #tpu.memory_space<vmem>>) attributes {dimension_semantics = [#tpu.dimension_semantics<parallel>, #tpu.dimension_semantics<parallel>, #tpu.dimension_semantics<arbitrary>], iteration_bounds = array<i64: 18, 1, 1>, scalar_prefetch = 0 : i64, scratch_operands = 1 : i64, tpu.core_type = #tpu.core_type<tc>, window_params = [{transform_indices = @transform_0, window_bounds = array<i64: 256, 27>}, {transform_indices = @transform_1, window_bounds = array<i64: 27, 64>}, {transform_indices = @transform_2, window_bounds = array<i64: 1, 64>}, {transform_indices = @transform_3, window_bounds = array<i64: 256, 64>}]} {
    %c0_i32 = arith.constant 0 : i32
    %0 = arith.cmpi eq, %arg2, %c0_i32 : i32
    %1 = arith.extui %0 : i1 to i32
    %c0_i32_0 = arith.constant 0 : i32
    %2 = arith.cmpi ne, %1, %c0_i32_0 : i32
    scf.if %2 {
      %cst_10 = arith.constant 0.000000e+00 : f32
      %12 = vector.broadcast %cst_10 : f32 to vector<256x64xf32>
      %c0_11 = arith.constant 0 : index
      %c0_12 = arith.constant 0 : index
      %13 = vector.load %arg7[%c0_11, %c0_12] : memref<256x64xf32, #tpu.memory_space<vmem>>, vector<256x64xf32>
      tpu.vector_store %arg7[%c0_11, %c0_12], %12 {strides = array<i32>} : memref<256x64xf32, #tpu.memory_space<vmem>>, vector<256x64xf32>,
    } else {
    }
    %c0 = arith.constant 0 : index
    %c0_1 = arith.constant 0 : index
    %3 = vector.load %arg7[%c0, %c0_1] : memref<256x64xf32, #tpu.memory_space<vmem>>, vector<256x64xf32>
    %c0_2 = arith.constant 0 : index
    %c0_3 = arith.constant 0 : index
    %4 = vector.load %arg3[%c0_2, %c0_3] : memref<256x27xf32, #tpu.memory_space<vmem>>, vector<256x27xf32>
    %c0_4 = arith.constant 0 : index
    %c0_5 = arith.constant 0 : index
    %5 = vector.load %arg4[%c0_4, %c0_5] : memref<27x64xf32, #tpu.memory_space<vmem>>, vector<27x64xf32>
    %cst = arith.constant dense<0.000000e+00> : vector<256x64xf32>
    %6 = tpu.matmul %4, %5, %cst {dimension_numbers = #tpu.dot_dimension_numbers<[1], [0], [0], [1], [0, 0, 1, 1], [], []>} : vector<256x27xf32>, vector<27x64xf32>, vector<256x64xf32> -> vector<256x64xf32>
    %7 = arith.addf %3, %6 : vector<256x64xf32>
    %c0_6 = arith.constant 0 : index
    %c0_7 = arith.constant 0 : index
    %8 = vector.load %arg7[%c0_6, %c0_7] : memref<256x64xf32, #tpu.memory_space<vmem>>, vector<256x64xf32>
    tpu.vector_store %arg7[%c0_6, %c0_7], %7 {strides = array<i32>} : memref<256x64xf32, #tpu.memory_space<vmem>>, vector<256x64xf32>,
    %c0_i32_8 = arith.constant 0 : i32
    %9 = arith.cmpi eq, %arg2, %c0_i32_8 : i32
    %10 = arith.extui %9 : i1 to i32
    %c0_i32_9 = arith.constant 0 : i32
    %11 = arith.cmpi ne, %10, %c0_i32_9 : i32
    scf.if %11 {
      %c0_10 = arith.constant 0 : index
      %c0_11 = arith.constant 0 : index
      %12 = vector.load %arg7[%c0_10, %c0_11] : memref<256x64xf32, #tpu.memory_space<vmem>>, vector<256x64xf32>
      %c0_12 = arith.constant 0 : index
      %c0_13 = arith.constant 0 : index
      %13 = vector.load %arg5[%c0_12, %c0_13] : memref<1x64xf32, #tpu.memory_space<vmem>>, vector<1x64xf32>
      %14 = vector.broadcast %13 : vector<1x64xf32> to vector<256x64xf32>
      %15 = arith.addf %12, %14 : vector<256x64xf32>
      %cst_14 = arith.constant 0.000000e+00 : f32
      %16 = vector.broadcast %cst_14 : f32 to vector<256x64xf32>
      %17 = arith.maximumf %15, %16 : vector<256x64xf32>
      %c0_15 = arith.constant 0 : index
      %c0_16 = arith.constant 0 : index
      %18 = vector.load %arg6[%c0_15, %c0_16] : memref<256x64xf32, #tpu.memory_space<vmem>>, vector<256x64xf32>
      tpu.vector_store %arg6[%c0_15, %c0_16], %17 {strides = array<i32>} : memref<256x64xf32, #tpu.memory_space<vmem>>, vector<256x64xf32>,
    } else {
    }
    return
  }
  func.func @transform_0(%arg0: i32, %arg1: i32, %arg2: i32) -> (i32, i32) {
    %c0_i32 = arith.constant 0 : i32
    return %arg0, %arg2 : i32, i32
  }
  func.func @transform_1(%arg0: i32, %arg1: i32, %arg2: i32) -> (i32, i32) {
    %c0_i32 = arith.constant 0 : i32
    return %arg2, %arg1 : i32, i32
  }
  func.func @transform_2(%arg0: i32, %arg1: i32, %arg2: i32) -> (i32, i32) {
    %c0_i32 = arith.constant 0 : i32
    %c0_i32_0 = arith.constant 0 : i32
    return %c0_i32, %arg1 : i32, i32
  }
  func.func @transform_3(%arg0: i32, %arg1: i32, %arg2: i32) -> (i32, i32) {
    %c0_i32 = arith.constant 0 : i32
    return %arg0, %arg1 : i32, i32
  }
}

module attributes {stable_mosaic.version = 11 : i64} {
  func.func @_matmul_bias_relu_kernel(%arg0: i32, %arg1: i32, %arg2: i32, %arg3: memref<256x576xf32, #tpu.memory_space<vmem>>, %arg4: memref<576x128xf32, #tpu.memory_space<vmem>>, %arg5: memref<1x128xf32, #tpu.memory_space<vmem>>, %arg6: memref<256x128xf32, #tpu.memory_space<vmem>>, %arg7: memref<256x128xf32, #tpu.memory_space<vmem>>) attributes {dimension_semantics = [#tpu.dimension_semantics<parallel>, #tpu.dimension_semantics<parallel>, #tpu.dimension_semantics<arbitrary>], iteration_bounds = array<i64: 5, 1, 1>, scalar_prefetch = 0 : i64, scratch_operands = 1 : i64, tpu.core_type = #tpu.core_type<tc>, window_params = [{transform_indices = @transform_0, window_bounds = array<i64: 256, 576>}, {transform_indices = @transform_1, window_bounds = array<i64: 576, 128>}, {transform_indices = @transform_2, window_bounds = array<i64: 1, 128>}, {transform_indices = @transform_3, window_bounds = array<i64: 256, 128>}]} {
    %c0_i32 = arith.constant 0 : i32
    %0 = arith.cmpi eq, %arg2, %c0_i32 : i32
    %1 = arith.extui %0 : i1 to i32
    %c0_i32_0 = arith.constant 0 : i32
    %2 = arith.cmpi ne, %1, %c0_i32_0 : i32
    scf.if %2 {
      %cst_10 = arith.constant 0.000000e+00 : f32
      %12 = vector.broadcast %cst_10 : f32 to vector<256x128xf32>
      %c0_11 = arith.constant 0 : index
      %c0_12 = arith.constant 0 : index
      %13 = vector.load %arg7[%c0_11, %c0_12] : memref<256x128xf32, #tpu.memory_space<vmem>>, vector<256x128xf32>
      tpu.vector_store %arg7[%c0_11, %c0_12], %12 {strides = array<i32>} : memref<256x128xf32, #tpu.memory_space<vmem>>, vector<256x128xf32>,
    } else {
    }
    %c0 = arith.constant 0 : index
    %c0_1 = arith.constant 0 : index
    %3 = vector.load %arg7[%c0, %c0_1] : memref<256x128xf32, #tpu.memory_space<vmem>>, vector<256x128xf32>
    %c0_2 = arith.constant 0 : index
    %c0_3 = arith.constant 0 : index
    %4 = vector.load %arg3[%c0_2, %c0_3] : memref<256x576xf32, #tpu.memory_space<vmem>>, vector<256x576xf32>
    %c0_4 = arith.constant 0 : index
    %c0_5 = arith.constant 0 : index
    %5 = vector.load %arg4[%c0_4, %c0_5] : memref<576x128xf32, #tpu.memory_space<vmem>>, vector<576x128xf32>
    %cst = arith.constant dense<0.000000e+00> : vector<256x128xf32>
    %6 = tpu.matmul %4, %5, %cst {dimension_numbers = #tpu.dot_dimension_numbers<[1], [0], [0], [1], [0, 0, 1, 1], [], []>} : vector<256x576xf32>, vector<576x128xf32>, vector<256x128xf32> -> vector<256x128xf32>
    %7 = arith.addf %3, %6 : vector<256x128xf32>
    %c0_6 = arith.constant 0 : index
    %c0_7 = arith.constant 0 : index
    %8 = vector.load %arg7[%c0_6, %c0_7] : memref<256x128xf32, #tpu.memory_space<vmem>>, vector<256x128xf32>
    tpu.vector_store %arg7[%c0_6, %c0_7], %7 {strides = array<i32>} : memref<256x128xf32, #tpu.memory_space<vmem>>, vector<256x128xf32>,
    %c0_i32_8 = arith.constant 0 : i32
    %9 = arith.cmpi eq, %arg2, %c0_i32_8 : i32
    %10 = arith.extui %9 : i1 to i32
    %c0_i32_9 = arith.constant 0 : i32
    %11 = arith.cmpi ne, %10, %c0_i32_9 : i32
    scf.if %11 {
      %c0_10 = arith.constant 0 : index
      %c0_11 = arith.constant 0 : index
      %12 = vector.load %arg7[%c0_10, %c0_11] : memref<256x128xf32, #tpu.memory_space<vmem>>, vector<256x128xf32>
      %c0_12 = arith.constant 0 : index
      %c0_13 = arith.constant 0 : index
      %13 = vector.load %arg5[%c0_12, %c0_13] : memref<1x128xf32, #tpu.memory_space<vmem>>, vector<1x128xf32>
      %14 = vector.broadcast %13 : vector<1x128xf32> to vector<256x128xf32>
      %15 = arith.addf %12, %14 : vector<256x128xf32>
      %cst_14 = arith.constant 0.000000e+00 : f32
      %16 = vector.broadcast %cst_14 : f32 to vector<256x128xf32>
      %17 = arith.maximumf %15, %16 : vector<256x128xf32>
      %c0_15 = arith.constant 0 : index
      %c0_16 = arith.constant 0 : index
      %18 = vector.load %arg6[%c0_15, %c0_16] : memref<256x128xf32, #tpu.memory_space<vmem>>, vector<256x128xf32>
      tpu.vector_store %arg6[%c0_15, %c0_16], %17 {strides = array<i32>} : memref<256x128xf32, #tpu.memory_space<vmem>>, vector<256x128xf32>,
    } else {
    }
    return
  }
  func.func @transform_0(%arg0: i32, %arg1: i32, %arg2: i32) -> (i32, i32) {
    %c0_i32 = arith.constant 0 : i32
    return %arg0, %arg2 : i32, i32
  }
  func.func @transform_1(%arg0: i32, %arg1: i32, %arg2: i32) -> (i32, i32) {
    %c0_i32 = arith.constant 0 : i32
    return %arg2, %arg1 : i32, i32
  }
  func.func @transform_2(%arg0: i32, %arg1: i32, %arg2: i32) -> (i32, i32) {
    %c0_i32 = arith.constant 0 : i32
    %c0_i32_0 = arith.constant 0 : i32
    return %c0_i32, %arg1 : i32, i32
  }
  func.func @transform_3(%arg0: i32, %arg1: i32, %arg2: i32) -> (i32, i32) {
    %c0_i32 = arith.constant 0 : i32
    return %arg0, %arg1 : i32, i32
  }
}

module attributes {stable_mosaic.version = 11 : i64} {
  func.func @_matmul_bias_relu_kernel(%arg0: i32, %arg1: i32, %arg2: i32, %arg3: memref<248x128xf32, #tpu.memory_space<vmem>>, %arg4: memref<128x256xf32, #tpu.memory_space<vmem>>, %arg5: memref<1x256xf32, #tpu.memory_space<vmem>>, %arg6: memref<248x256xf32, #tpu.memory_space<vmem>>, %arg7: memref<248x256xf32, #tpu.memory_space<vmem>>) attributes {dimension_semantics = [#tpu.dimension_semantics<parallel>, #tpu.dimension_semantics<parallel>, #tpu.dimension_semantics<arbitrary>], iteration_bounds = array<i64: 1, 1, 9>, scalar_prefetch = 0 : i64, scratch_operands = 1 : i64, tpu.core_type = #tpu.core_type<tc>, window_params = [{transform_indices = @transform_0, window_bounds = array<i64: 248, 128>}, {transform_indices = @transform_1, window_bounds = array<i64: 128, 256>}, {transform_indices = @transform_2, window_bounds = array<i64: 1, 256>}, {transform_indices = @transform_3, window_bounds = array<i64: 248, 256>}]} {
    %c0_i32 = arith.constant 0 : i32
    %0 = arith.cmpi eq, %arg2, %c0_i32 : i32
    %1 = arith.extui %0 : i1 to i32
    %c0_i32_0 = arith.constant 0 : i32
    %2 = arith.cmpi ne, %1, %c0_i32_0 : i32
    scf.if %2 {
      %cst_9 = arith.constant 0.000000e+00 : f32
      %12 = vector.broadcast %cst_9 : f32 to vector<248x256xf32>
      %c0_10 = arith.constant 0 : index
      %c0_11 = arith.constant 0 : index
      %13 = vector.load %arg7[%c0_10, %c0_11] : memref<248x256xf32, #tpu.memory_space<vmem>>, vector<248x256xf32>
      tpu.vector_store %arg7[%c0_10, %c0_11], %12 {strides = array<i32>} : memref<248x256xf32, #tpu.memory_space<vmem>>, vector<248x256xf32>,
    } else {
    }
    %c0 = arith.constant 0 : index
    %c0_1 = arith.constant 0 : index
    %3 = vector.load %arg7[%c0, %c0_1] : memref<248x256xf32, #tpu.memory_space<vmem>>, vector<248x256xf32>
    %c0_2 = arith.constant 0 : index
    %c0_3 = arith.constant 0 : index
    %4 = vector.load %arg3[%c0_2, %c0_3] : memref<248x128xf32, #tpu.memory_space<vmem>>, vector<248x128xf32>
    %c0_4 = arith.constant 0 : index
    %c0_5 = arith.constant 0 : index
    %5 = vector.load %arg4[%c0_4, %c0_5] : memref<128x256xf32, #tpu.memory_space<vmem>>, vector<128x256xf32>
    %cst = arith.constant dense<0.000000e+00> : vector<248x256xf32>
    %6 = tpu.matmul %4, %5, %cst {dimension_numbers = #tpu.dot_dimension_numbers<[1], [0], [0], [1], [0, 0, 1, 1], [], []>} : vector<248x128xf32>, vector<128x256xf32>, vector<248x256xf32> -> vector<248x256xf32>
    %7 = arith.addf %3, %6 : vector<248x256xf32>
    %c0_6 = arith.constant 0 : index
    %c0_7 = arith.constant 0 : index
    %8 = vector.load %arg7[%c0_6, %c0_7] : memref<248x256xf32, #tpu.memory_space<vmem>>, vector<248x256xf32>
    tpu.vector_store %arg7[%c0_6, %c0_7], %7 {strides = array<i32>} : memref<248x256xf32, #tpu.memory_space<vmem>>, vector<248x256xf32>,
    %c8_i32 = arith.constant 8 : i32
    %9 = arith.cmpi eq, %arg2, %c8_i32 : i32
    %10 = arith.extui %9 : i1 to i32
    %c0_i32_8 = arith.constant 0 : i32
    %11 = arith.cmpi ne, %10, %c0_i32_8 : i32
    scf.if %11 {
      %c0_9 = arith.constant 0 : index
      %c0_10 = arith.constant 0 : index
      %12 = vector.load %arg7[%c0_9, %c0_10] : memref<248x256xf32, #tpu.memory_space<vmem>>, vector<248x256xf32>
      %c0_11 = arith.constant 0 : index
      %c0_12 = arith.constant 0 : index
      %13 = vector.load %arg5[%c0_11, %c0_12] : memref<1x256xf32, #tpu.memory_space<vmem>>, vector<1x256xf32>
      %14 = vector.broadcast %13 : vector<1x256xf32> to vector<248x256xf32>
      %15 = arith.addf %12, %14 : vector<248x256xf32>
      %cst_13 = arith.constant 0.000000e+00 : f32
      %16 = vector.broadcast %cst_13 : f32 to vector<248x256xf32>
      %17 = arith.maximumf %15, %16 : vector<248x256xf32>
      %c0_14 = arith.constant 0 : index
      %c0_15 = arith.constant 0 : index
      %18 = vector.load %arg6[%c0_14, %c0_15] : memref<248x256xf32, #tpu.memory_space<vmem>>, vector<248x256xf32>
      tpu.vector_store %arg6[%c0_14, %c0_15], %17 {strides = array<i32>} : memref<248x256xf32, #tpu.memory_space<vmem>>, vector<248x256xf32>,
    } else {
    }
    return
  }
  func.func @transform_0(%arg0: i32, %arg1: i32, %arg2: i32) -> (i32, i32) {
    %c0_i32 = arith.constant 0 : i32
    return %arg0, %arg2 : i32, i32
  }
  func.func @transform_1(%arg0: i32, %arg1: i32, %arg2: i32) -> (i32, i32) {
    %c0_i32 = arith.constant 0 : i32
    return %arg2, %arg1 : i32, i32
  }
  func.func @transform_2(%arg0: i32, %arg1: i32, %arg2: i32) -> (i32, i32) {
    %c0_i32 = arith.constant 0 : i32
    %c0_i32_0 = arith.constant 0 : i32
    return %c0_i32, %arg1 : i32, i32
  }
  func.func @transform_3(%arg0: i32, %arg1: i32, %arg2: i32) -> (i32, i32) {
    %c0_i32 = arith.constant 0 : i32
    return %arg0, %arg1 : i32, i32
  }
}

module attributes {stable_mosaic.version = 11 : i64} {
  func.func @_matmul_bias_relu_kernel(%arg0: i32, %arg1: i32, %arg2: i32, %arg3: memref<56x256xf32, #tpu.memory_space<vmem>>, %arg4: memref<256x256xf32, #tpu.memory_space<vmem>>, %arg5: memref<1x256xf32, #tpu.memory_space<vmem>>, %arg6: memref<56x256xf32, #tpu.memory_space<vmem>>, %arg7: memref<56x256xf32, #tpu.memory_space<vmem>>) attributes {dimension_semantics = [#tpu.dimension_semantics<parallel>, #tpu.dimension_semantics<parallel>, #tpu.dimension_semantics<arbitrary>], iteration_bounds = array<i64: 1, 1, 9>, scalar_prefetch = 0 : i64, scratch_operands = 1 : i64, tpu.core_type = #tpu.core_type<tc>, window_params = [{transform_indices = @transform_0, window_bounds = array<i64: 56, 256>}, {transform_indices = @transform_1, window_bounds = array<i64: 256, 256>}, {transform_indices = @transform_2, window_bounds = array<i64: 1, 256>}, {transform_indices = @transform_3, window_bounds = array<i64: 56, 256>}]} {
    %c0_i32 = arith.constant 0 : i32
    %0 = arith.cmpi eq, %arg2, %c0_i32 : i32
    %1 = arith.extui %0 : i1 to i32
    %c0_i32_0 = arith.constant 0 : i32
    %2 = arith.cmpi ne, %1, %c0_i32_0 : i32
    scf.if %2 {
      %cst_9 = arith.constant 0.000000e+00 : f32
      %12 = vector.broadcast %cst_9 : f32 to vector<56x256xf32>
      %c0_10 = arith.constant 0 : index
      %c0_11 = arith.constant 0 : index
      %13 = vector.load %arg7[%c0_10, %c0_11] : memref<56x256xf32, #tpu.memory_space<vmem>>, vector<56x256xf32>
      tpu.vector_store %arg7[%c0_10, %c0_11], %12 {strides = array<i32>} : memref<56x256xf32, #tpu.memory_space<vmem>>, vector<56x256xf32>,
    } else {
    }
    %c0 = arith.constant 0 : index
    %c0_1 = arith.constant 0 : index
    %3 = vector.load %arg7[%c0, %c0_1] : memref<56x256xf32, #tpu.memory_space<vmem>>, vector<56x256xf32>
    %c0_2 = arith.constant 0 : index
    %c0_3 = arith.constant 0 : index
    %4 = vector.load %arg3[%c0_2, %c0_3] : memref<56x256xf32, #tpu.memory_space<vmem>>, vector<56x256xf32>
    %c0_4 = arith.constant 0 : index
    %c0_5 = arith.constant 0 : index
    %5 = vector.load %arg4[%c0_4, %c0_5] : memref<256x256xf32, #tpu.memory_space<vmem>>, vector<256x256xf32>
    %cst = arith.constant dense<0.000000e+00> : vector<56x256xf32>
    %6 = tpu.matmul %4, %5, %cst {dimension_numbers = #tpu.dot_dimension_numbers<[1], [0], [0], [1], [0, 0, 1, 1], [], []>} : vector<56x256xf32>, vector<256x256xf32>, vector<56x256xf32> -> vector<56x256xf32>
    %7 = arith.addf %3, %6 : vector<56x256xf32>
    %c0_6 = arith.constant 0 : index
    %c0_7 = arith.constant 0 : index
    %8 = vector.load %arg7[%c0_6, %c0_7] : memref<56x256xf32, #tpu.memory_space<vmem>>, vector<56x256xf32>
    tpu.vector_store %arg7[%c0_6, %c0_7], %7 {strides = array<i32>} : memref<56x256xf32, #tpu.memory_space<vmem>>, vector<56x256xf32>,
    %c8_i32 = arith.constant 8 : i32
    %9 = arith.cmpi eq, %arg2, %c8_i32 : i32
    %10 = arith.extui %9 : i1 to i32
    %c0_i32_8 = arith.constant 0 : i32
    %11 = arith.cmpi ne, %10, %c0_i32_8 : i32
    scf.if %11 {
      %c0_9 = arith.constant 0 : index
      %c0_10 = arith.constant 0 : index
      %12 = vector.load %arg7[%c0_9, %c0_10] : memref<56x256xf32, #tpu.memory_space<vmem>>, vector<56x256xf32>
      %c0_11 = arith.constant 0 : index
      %c0_12 = arith.constant 0 : index
      %13 = vector.load %arg5[%c0_11, %c0_12] : memref<1x256xf32, #tpu.memory_space<vmem>>, vector<1x256xf32>
      %14 = vector.broadcast %13 : vector<1x256xf32> to vector<56x256xf32>
      %15 = arith.addf %12, %14 : vector<56x256xf32>
      %cst_13 = arith.constant 0.000000e+00 : f32
      %16 = vector.broadcast %cst_13 : f32 to vector<56x256xf32>
      %17 = arith.maximumf %15, %16 : vector<56x256xf32>
      %c0_14 = arith.constant 0 : index
      %c0_15 = arith.constant 0 : index
      %18 = vector.load %arg6[%c0_14, %c0_15] : memref<56x256xf32, #tpu.memory_space<vmem>>, vector<56x256xf32>
      tpu.vector_store %arg6[%c0_14, %c0_15], %17 {strides = array<i32>} : memref<56x256xf32, #tpu.memory_space<vmem>>, vector<56x256xf32>,
    } else {
    }
    return
  }
  func.func @transform_0(%arg0: i32, %arg1: i32, %arg2: i32) -> (i32, i32) {
    %c0_i32 = arith.constant 0 : i32
    return %arg0, %arg2 : i32, i32
  }
  func.func @transform_1(%arg0: i32, %arg1: i32, %arg2: i32) -> (i32, i32) {
    %c0_i32 = arith.constant 0 : i32
    return %arg2, %arg1 : i32, i32
  }
  func.func @transform_2(%arg0: i32, %arg1: i32, %arg2: i32) -> (i32, i32) {
    %c0_i32 = arith.constant 0 : i32
    %c0_i32_0 = arith.constant 0 : i32
    return %c0_i32, %arg1 : i32, i32
  }
  func.func @transform_3(%arg0: i32, %arg1: i32, %arg2: i32) -> (i32, i32) {
    %c0_i32 = arith.constant 0 : i32
    return %arg0, %arg1 : i32, i32
  }
}

module attributes {stable_mosaic.version = 11 : i64} {
  func.func @_matmul_bias_relu_l2norm_kernel(%arg0: i32, %arg1: i32, %arg2: i32, %arg3: memref<8x256xf32, #tpu.memory_space<vmem>>, %arg4: memref<256x512xf32, #tpu.memory_space<vmem>>, %arg5: memref<1x512xf32, #tpu.memory_space<vmem>>, %arg6: memref<8x512xf32, #tpu.memory_space<vmem>>, %arg7: memref<8x512xf32, #tpu.memory_space<vmem>>, %arg8: memref<8x512xf32, #tpu.memory_space<vmem>>) attributes {dimension_semantics = [#tpu.dimension_semantics<parallel>, #tpu.dimension_semantics<parallel>, #tpu.dimension_semantics<arbitrary>], iteration_bounds = array<i64: 1, 1, 25>, scalar_prefetch = 0 : i64, scratch_operands = 1 : i64, tpu.core_type = #tpu.core_type<tc>, window_params = [{transform_indices = @transform_0, window_bounds = array<i64: 8, 256>}, {transform_indices = @transform_1, window_bounds = array<i64: 256, 512>}, {transform_indices = @transform_2, window_bounds = array<i64: 1, 512>}, {transform_indices = @transform_3, window_bounds = array<i64: 8, 512>}, {transform_indices = @transform_4, window_bounds = array<i64: 8, 512>}]} {
    %c0_i32 = arith.constant 0 : i32
    %0 = arith.cmpi eq, %arg2, %c0_i32 : i32
    %1 = arith.extui %0 : i1 to i32
    %c0_i32_0 = arith.constant 0 : i32
    %2 = arith.cmpi ne, %1, %c0_i32_0 : i32
    scf.if %2 {
      %cst_9 = arith.constant 0.000000e+00 : f32
      %12 = vector.broadcast %cst_9 : f32 to vector<8x512xf32>
      %c0_10 = arith.constant 0 : index
      %c0_11 = arith.constant 0 : index
      %13 = vector.load %arg8[%c0_10, %c0_11] : memref<8x512xf32, #tpu.memory_space<vmem>>, vector<8x512xf32>
      tpu.vector_store %arg8[%c0_10, %c0_11], %12 {strides = array<i32>} : memref<8x512xf32, #tpu.memory_space<vmem>>, vector<8x512xf32>,
    } else {
    }
    %c0 = arith.constant 0 : index
    %c0_1 = arith.constant 0 : index
    %3 = vector.load %arg8[%c0, %c0_1] : memref<8x512xf32, #tpu.memory_space<vmem>>, vector<8x512xf32>
    %c0_2 = arith.constant 0 : index
    %c0_3 = arith.constant 0 : index
    %4 = vector.load %arg3[%c0_2, %c0_3] : memref<8x256xf32, #tpu.memory_space<vmem>>, vector<8x256xf32>
    %c0_4 = arith.constant 0 : index
    %c0_5 = arith.constant 0 : index
    %5 = vector.load %arg4[%c0_4, %c0_5] : memref<256x512xf32, #tpu.memory_space<vmem>>, vector<256x512xf32>
    %cst = arith.constant dense<0.000000e+00> : vector<8x512xf32>
    %6 = tpu.matmul %4, %5, %cst {dimension_numbers = #tpu.dot_dimension_numbers<[1], [0], [0], [1], [0, 0, 1, 1], [], []>} : vector<8x256xf32>, vector<256x512xf32>, vector<8x512xf32> -> vector<8x512xf32>
    %7 = arith.addf %3, %6 : vector<8x512xf32>
    %c0_6 = arith.constant 0 : index
    %c0_7 = arith.constant 0 : index
    %8 = vector.load %arg8[%c0_6, %c0_7] : memref<8x512xf32, #tpu.memory_space<vmem>>, vector<8x512xf32>
    tpu.vector_store %arg8[%c0_6, %c0_7], %7 {strides = array<i32>} : memref<8x512xf32, #tpu.memory_space<vmem>>, vector<8x512xf32>,
    %c24_i32 = arith.constant 24 : i32
    %9 = arith.cmpi eq, %arg2, %c24_i32 : i32
    %10 = arith.extui %9 : i1 to i32
    %c0_i32_8 = arith.constant 0 : i32
    %11 = arith.cmpi ne, %10, %c0_i32_8 : i32
    scf.if %11 {
      %c0_9 = arith.constant 0 : index
      %c0_10 = arith.constant 0 : index
      %12 = vector.load %arg8[%c0_9, %c0_10] : memref<8x512xf32, #tpu.memory_space<vmem>>, vector<8x512xf32>
      %c0_11 = arith.constant 0 : index
      %c0_12 = arith.constant 0 : index
      %13 = vector.load %arg5[%c0_11, %c0_12] : memref<1x512xf32, #tpu.memory_space<vmem>>, vector<1x512xf32>
      %14 = vector.broadcast %13 : vector<1x512xf32> to vector<8x512xf32>
      %15 = arith.addf %12, %14 : vector<8x512xf32>
      %cst_13 = arith.constant 0.000000e+00 : f32
      %16 = vector.broadcast %cst_13 : f32 to vector<8x512xf32>
      %17 = arith.maximumf %15, %16 : vector<8x512xf32>
      %c0_14 = arith.constant 0 : index
      %c0_15 = arith.constant 0 : index
      %18 = vector.load %arg6[%c0_14, %c0_15] : memref<8x512xf32, #tpu.memory_space<vmem>>, vector<8x512xf32>
      tpu.vector_store %arg6[%c0_14, %c0_15], %17 {strides = array<i32>} : memref<8x512xf32, #tpu.memory_space<vmem>>, vector<8x512xf32>,
      %19 = arith.mulf %17, %17 : vector<8x512xf32>
      %cst_16 = arith.constant dense<0.000000e+00> : vector<8xf32>
      %20 = vector.multi_reduction <add>, %19, %cst_16 [1] : vector<8x512xf32> to vector<8xf32>
      %21 = vector.shape_cast %20 : vector<8xf32> to vector<8x1xf32>
      %cst_17 = arith.constant 1.000000e-24 : f32
      %22 = vector.broadcast %cst_17 : f32 to vector<8x1xf32>
      %23 = arith.maximumf %21, %22 : vector<8x1xf32>
      %24 = math.rsqrt %23 : vector<8x1xf32>
      %25 = vector.broadcast %24 : vector<8x1xf32> to vector<8x512xf32>
      %26 = arith.mulf %17, %25 : vector<8x512xf32>
      %c0_18 = arith.constant 0 : index
      %c0_19 = arith.constant 0 : index
      %27 = vector.load %arg7[%c0_18, %c0_19] : memref<8x512xf32, #tpu.memory_space<vmem>>, vector<8x512xf32>
      tpu.vector_store %arg7[%c0_18, %c0_19], %26 {strides = array<i32>} : memref<8x512xf32, #tpu.memory_space<vmem>>, vector<8x512xf32>,
    } else {
    }
    return
  }
  func.func @transform_0(%arg0: i32, %arg1: i32, %arg2: i32) -> (i32, i32) {
    %c0_i32 = arith.constant 0 : i32
    return %arg0, %arg2 : i32, i32
  }
  func.func @transform_1(%arg0: i32, %arg1: i32, %arg2: i32) -> (i32, i32) {
    %c0_i32 = arith.constant 0 : i32
    return %arg2, %arg1 : i32, i32
  }
  func.func @transform_2(%arg0: i32, %arg1: i32, %arg2: i32) -> (i32, i32) {
    %c0_i32 = arith.constant 0 : i32
    %c0_i32_0 = arith.constant 0 : i32
    return %c0_i32, %arg1 : i32, i32
  }
  func.func @transform_3(%arg0: i32, %arg1: i32, %arg2: i32) -> (i32, i32) {
    %c0_i32 = arith.constant 0 : i32
    return %arg0, %arg1 : i32, i32
  }
  func.func @transform_4(%arg0: i32, %arg1: i32, %arg2: i32) -> (i32, i32) {
    %c0_i32 = arith.constant 0 : i32
    return %arg0, %arg1 : i32, i32
  }
}

module attributes {stable_mosaic.version = 11 : i64} {
  func.func @_matmul_bias_relu_kernel(%arg0: i32, %arg1: i32, %arg2: i32, %arg3: memref<8x512xf32, #tpu.memory_space<vmem>>, %arg4: memref<512x256xf32, #tpu.memory_space<vmem>>, %arg5: memref<1x256xf32, #tpu.memory_space<vmem>>, %arg6: memref<8x256xf32, #tpu.memory_space<vmem>>, %arg7: memref<8x256xf32, #tpu.memory_space<vmem>>) attributes {dimension_semantics = [#tpu.dimension_semantics<parallel>, #tpu.dimension_semantics<parallel>, #tpu.dimension_semantics<arbitrary>], iteration_bounds = array<i64: 1, 2, 1>, scalar_prefetch = 0 : i64, scratch_operands = 1 : i64, tpu.core_type = #tpu.core_type<tc>, window_params = [{transform_indices = @transform_0, window_bounds = array<i64: 8, 512>}, {transform_indices = @transform_1, window_bounds = array<i64: 512, 256>}, {transform_indices = @transform_2, window_bounds = array<i64: 1, 256>}, {transform_indices = @transform_3, window_bounds = array<i64: 8, 256>}]} {
    %c0_i32 = arith.constant 0 : i32
    %0 = arith.cmpi eq, %arg2, %c0_i32 : i32
    %1 = arith.extui %0 : i1 to i32
    %c0_i32_0 = arith.constant 0 : i32
    %2 = arith.cmpi ne, %1, %c0_i32_0 : i32
    scf.if %2 {
      %cst_10 = arith.constant 0.000000e+00 : f32
      %12 = vector.broadcast %cst_10 : f32 to vector<8x256xf32>
      %c0_11 = arith.constant 0 : index
      %c0_12 = arith.constant 0 : index
      %13 = vector.load %arg7[%c0_11, %c0_12] : memref<8x256xf32, #tpu.memory_space<vmem>>, vector<8x256xf32>
      tpu.vector_store %arg7[%c0_11, %c0_12], %12 {strides = array<i32>} : memref<8x256xf32, #tpu.memory_space<vmem>>, vector<8x256xf32>,
    } else {
    }
    %c0 = arith.constant 0 : index
    %c0_1 = arith.constant 0 : index
    %3 = vector.load %arg7[%c0, %c0_1] : memref<8x256xf32, #tpu.memory_space<vmem>>, vector<8x256xf32>
    %c0_2 = arith.constant 0 : index
    %c0_3 = arith.constant 0 : index
    %4 = vector.load %arg3[%c0_2, %c0_3] : memref<8x512xf32, #tpu.memory_space<vmem>>, vector<8x512xf32>
    %c0_4 = arith.constant 0 : index
    %c0_5 = arith.constant 0 : index
    %5 = vector.load %arg4[%c0_4, %c0_5] : memref<512x256xf32, #tpu.memory_space<vmem>>, vector<512x256xf32>
    %cst = arith.constant dense<0.000000e+00> : vector<8x256xf32>
    %6 = tpu.matmul %4, %5, %cst {dimension_numbers = #tpu.dot_dimension_numbers<[1], [0], [0], [1], [0, 0, 1, 1], [], []>} : vector<8x512xf32>, vector<512x256xf32>, vector<8x256xf32> -> vector<8x256xf32>
    %7 = arith.addf %3, %6 : vector<8x256xf32>
    %c0_6 = arith.constant 0 : index
    %c0_7 = arith.constant 0 : index
    %8 = vector.load %arg7[%c0_6, %c0_7] : memref<8x256xf32, #tpu.memory_space<vmem>>, vector<8x256xf32>
    tpu.vector_store %arg7[%c0_6, %c0_7], %7 {strides = array<i32>} : memref<8x256xf32, #tpu.memory_space<vmem>>, vector<8x256xf32>,
    %c0_i32_8 = arith.constant 0 : i32
    %9 = arith.cmpi eq, %arg2, %c0_i32_8 : i32
    %10 = arith.extui %9 : i1 to i32
    %c0_i32_9 = arith.constant 0 : i32
    %11 = arith.cmpi ne, %10, %c0_i32_9 : i32
    scf.if %11 {
      %c0_10 = arith.constant 0 : index
      %c0_11 = arith.constant 0 : index
      %12 = vector.load %arg7[%c0_10, %c0_11] : memref<8x256xf32, #tpu.memory_space<vmem>>, vector<8x256xf32>
      %c0_12 = arith.constant 0 : index
      %c0_13 = arith.constant 0 : index
      %13 = vector.load %arg5[%c0_12, %c0_13] : memref<1x256xf32, #tpu.memory_space<vmem>>, vector<1x256xf32>
      %14 = vector.broadcast %13 : vector<1x256xf32> to vector<8x256xf32>
      %15 = arith.addf %12, %14 : vector<8x256xf32>
      %cst_14 = arith.constant 0.000000e+00 : f32
      %16 = vector.broadcast %cst_14 : f32 to vector<8x256xf32>
      %17 = arith.maximumf %15, %16 : vector<8x256xf32>
      %c0_15 = arith.constant 0 : index
      %c0_16 = arith.constant 0 : index
      %18 = vector.load %arg6[%c0_15, %c0_16] : memref<8x256xf32, #tpu.memory_space<vmem>>, vector<8x256xf32>
      tpu.vector_store %arg6[%c0_15, %c0_16], %17 {strides = array<i32>} : memref<8x256xf32, #tpu.memory_space<vmem>>, vector<8x256xf32>,
    } else {
    }
    return
  }
  func.func @transform_0(%arg0: i32, %arg1: i32, %arg2: i32) -> (i32, i32) {
    %c0_i32 = arith.constant 0 : i32
    return %arg0, %arg2 : i32, i32
  }
  func.func @transform_1(%arg0: i32, %arg1: i32, %arg2: i32) -> (i32, i32) {
    %c0_i32 = arith.constant 0 : i32
    return %arg2, %arg1 : i32, i32
  }
  func.func @transform_2(%arg0: i32, %arg1: i32, %arg2: i32) -> (i32, i32) {
    %c0_i32 = arith.constant 0 : i32
    %c0_i32_0 = arith.constant 0 : i32
    return %c0_i32, %arg1 : i32, i32
  }
  func.func @transform_3(%arg0: i32, %arg1: i32, %arg2: i32) -> (i32, i32) {
    %c0_i32 = arith.constant 0 : i32
    return %arg0, %arg1 : i32, i32
  }
}

module attributes {stable_mosaic.version = 11 : i64} {
  func.func @_matmul_bias_relu_l2norm_kernel(%arg0: i32, %arg1: i32, %arg2: i32, %arg3: memref<8x512xf32, #tpu.memory_space<vmem>>, %arg4: memref<512x512xf32, #tpu.memory_space<vmem>>, %arg5: memref<1x512xf32, #tpu.memory_space<vmem>>, %arg6: memref<8x512xf32, #tpu.memory_space<vmem>>, %arg7: memref<8x512xf32, #tpu.memory_space<vmem>>, %arg8: memref<8x512xf32, #tpu.memory_space<vmem>>) attributes {dimension_semantics = [#tpu.dimension_semantics<parallel>, #tpu.dimension_semantics<parallel>, #tpu.dimension_semantics<arbitrary>], iteration_bounds = array<i64: 1, 1, 1>, scalar_prefetch = 0 : i64, scratch_operands = 1 : i64, tpu.core_type = #tpu.core_type<tc>, window_params = [{transform_indices = @transform_0, window_bounds = array<i64: 8, 512>}, {transform_indices = @transform_1, window_bounds = array<i64: 512, 512>}, {transform_indices = @transform_2, window_bounds = array<i64: 1, 512>}, {transform_indices = @transform_3, window_bounds = array<i64: 8, 512>}, {transform_indices = @transform_4, window_bounds = array<i64: 8, 512>}]} {
    %c0_i32 = arith.constant 0 : i32
    %0 = arith.cmpi eq, %arg2, %c0_i32 : i32
    %1 = arith.extui %0 : i1 to i32
    %c0_i32_0 = arith.constant 0 : i32
    %2 = arith.cmpi ne, %1, %c0_i32_0 : i32
    scf.if %2 {
      %cst_10 = arith.constant 0.000000e+00 : f32
      %12 = vector.broadcast %cst_10 : f32 to vector<8x512xf32>
      %c0_11 = arith.constant 0 : index
      %c0_12 = arith.constant 0 : index
      %13 = vector.load %arg8[%c0_11, %c0_12] : memref<8x512xf32, #tpu.memory_space<vmem>>, vector<8x512xf32>
      tpu.vector_store %arg8[%c0_11, %c0_12], %12 {strides = array<i32>} : memref<8x512xf32, #tpu.memory_space<vmem>>, vector<8x512xf32>,
    } else {
    }
    %c0 = arith.constant 0 : index
    %c0_1 = arith.constant 0 : index
    %3 = vector.load %arg8[%c0, %c0_1] : memref<8x512xf32, #tpu.memory_space<vmem>>, vector<8x512xf32>
    %c0_2 = arith.constant 0 : index
    %c0_3 = arith.constant 0 : index
    %4 = vector.load %arg3[%c0_2, %c0_3] : memref<8x512xf32, #tpu.memory_space<vmem>>, vector<8x512xf32>
    %c0_4 = arith.constant 0 : index
    %c0_5 = arith.constant 0 : index
    %5 = vector.load %arg4[%c0_4, %c0_5] : memref<512x512xf32, #tpu.memory_space<vmem>>, vector<512x512xf32>
    %cst = arith.constant dense<0.000000e+00> : vector<8x512xf32>
    %6 = tpu.matmul %4, %5, %cst {dimension_numbers = #tpu.dot_dimension_numbers<[1], [0], [0], [1], [0, 0, 1, 1], [], []>} : vector<8x512xf32>, vector<512x512xf32>, vector<8x512xf32> -> vector<8x512xf32>
    %7 = arith.addf %3, %6 : vector<8x512xf32>
    %c0_6 = arith.constant 0 : index
    %c0_7 = arith.constant 0 : index
    %8 = vector.load %arg8[%c0_6, %c0_7] : memref<8x512xf32, #tpu.memory_space<vmem>>, vector<8x512xf32>
    tpu.vector_store %arg8[%c0_6, %c0_7], %7 {strides = array<i32>} : memref<8x512xf32, #tpu.memory_space<vmem>>, vector<8x512xf32>,
    %c0_i32_8 = arith.constant 0 : i32
    %9 = arith.cmpi eq, %arg2, %c0_i32_8 : i32
    %10 = arith.extui %9 : i1 to i32
    %c0_i32_9 = arith.constant 0 : i32
    %11 = arith.cmpi ne, %10, %c0_i32_9 : i32
    scf.if %11 {
      %c0_10 = arith.constant 0 : index
      %c0_11 = arith.constant 0 : index
      %12 = vector.load %arg8[%c0_10, %c0_11] : memref<8x512xf32, #tpu.memory_space<vmem>>, vector<8x512xf32>
      %c0_12 = arith.constant 0 : index
      %c0_13 = arith.constant 0 : index
      %13 = vector.load %arg5[%c0_12, %c0_13] : memref<1x512xf32, #tpu.memory_space<vmem>>, vector<1x512xf32>
      %14 = vector.broadcast %13 : vector<1x512xf32> to vector<8x512xf32>
      %15 = arith.addf %12, %14 : vector<8x512xf32>
      %cst_14 = arith.constant 0.000000e+00 : f32
      %16 = vector.broadcast %cst_14 : f32 to vector<8x512xf32>
      %17 = arith.maximumf %15, %16 : vector<8x512xf32>
      %c0_15 = arith.constant 0 : index
      %c0_16 = arith.constant 0 : index
      %18 = vector.load %arg6[%c0_15, %c0_16] : memref<8x512xf32, #tpu.memory_space<vmem>>, vector<8x512xf32>
      tpu.vector_store %arg6[%c0_15, %c0_16], %17 {strides = array<i32>} : memref<8x512xf32, #tpu.memory_space<vmem>>, vector<8x512xf32>,
      %19 = arith.mulf %17, %17 : vector<8x512xf32>
      %cst_17 = arith.constant dense<0.000000e+00> : vector<8xf32>
      %20 = vector.multi_reduction <add>, %19, %cst_17 [1] : vector<8x512xf32> to vector<8xf32>
      %21 = vector.shape_cast %20 : vector<8xf32> to vector<8x1xf32>
      %cst_18 = arith.constant 1.000000e-24 : f32
      %22 = vector.broadcast %cst_18 : f32 to vector<8x1xf32>
      %23 = arith.maximumf %21, %22 : vector<8x1xf32>
      %24 = math.rsqrt %23 : vector<8x1xf32>
      %25 = vector.broadcast %24 : vector<8x1xf32> to vector<8x512xf32>
      %26 = arith.mulf %17, %25 : vector<8x512xf32>
      %c0_19 = arith.constant 0 : index
      %c0_20 = arith.constant 0 : index
      %27 = vector.load %arg7[%c0_19, %c0_20] : memref<8x512xf32, #tpu.memory_space<vmem>>, vector<8x512xf32>
      tpu.vector_store %arg7[%c0_19, %c0_20], %26 {strides = array<i32>} : memref<8x512xf32, #tpu.memory_space<vmem>>, vector<8x512xf32>,
    } else {
    }
    return
  }
  func.func @transform_0(%arg0: i32, %arg1: i32, %arg2: i32) -> (i32, i32) {
    %c0_i32 = arith.constant 0 : i32
    return %arg0, %arg2 : i32, i32
  }
  func.func @transform_1(%arg0: i32, %arg1: i32, %arg2: i32) -> (i32, i32) {
    %c0_i32 = arith.constant 0 : i32
    return %arg2, %arg1 : i32, i32
  }
  func.func @transform_2(%arg0: i32, %arg1: i32, %arg2: i32) -> (i32, i32) {
    %c0_i32 = arith.constant 0 : i32
    %c0_i32_0 = arith.constant 0 : i32
    return %c0_i32, %arg1 : i32, i32
  }
  func.func @transform_3(%arg0: i32, %arg1: i32, %arg2: i32) -> (i32, i32) {
    %c0_i32 = arith.constant 0 : i32
    return %arg0, %arg1 : i32, i32
  }
  func.func @transform_4(%arg0: i32, %arg1: i32, %arg2: i32) -> (i32, i32) {
    %c0_i32 = arith.constant 0 : i32
    return %arg0, %arg1 : i32, i32
  }
}

</mosaic_0001>

<bundles_post_ra>
// kernel: simclr_stage1_forward.7
= control target key start
LH: loop header
LB: loop body
LE: loop exit
PB: predicated region body
PF: predicated region fallthrough
CT: control target
= control target key end

     0   :  { %s1229_s12 = smov 0   ;;  %s1231_s13 = smov 0   ;;  %s1539_s0 = inlined_call_operand.vmem [shape: f32[4608,27], index: 0, kind: input, shape index: {}]   ;;  %s1540_s1 = inlined_call_operand.vmem [shape: f32[27,64], index: 1, kind: input, shape index: {}]   ;;  %s1541_s2 = inlined_call_operand.vmem [shape: f32[1,64], index: 2, kind: input, shape index: {}]   ;;  %s1542_s3 = inlined_call_operand.vmem [shape: f32[4608,64], index: 3, kind: output, shape index: {}]  }
   0x1   :  { %s1233_s14 = smov 0  }
   0x2 LB: > { %s32_s15 = sadd.s32 1, %s1201_s13  ;;  %p1010_p0 = scmp.ge.s32.totalorder %s1205_s14, 1  ;;  %s1205_s14 = sphi %s1233_s14, %s13_s14   ;;  %s1201_s13 = sphi %s1231_s13, %s1547_s13   ;;  %s1197_s12 = sphi %s1229_s12, %s1546_s12  }
   0x3   : > { %p34_p1 = scmp.ge.s32.totalorder %s32_s15, 18  ;;  %p188_p2 = scmp.lt.s32.totalorder %s1205_s14, 19 }
   0x5   : > { %s1549_s15 = smov (%p34_p1, %s32_s15), 0  ;;  %p189_p3 = pnand %p1010_p0, %p188_p2 }
   0x6   : > { %v360_v0 = vld [vmem:[%s1540_s1] sm:$0xff] (!%p189_p3)  ;;  %v361_v1 = vld [vmem:[%s1540_s1 + $0x8] sm:$0xff] (!%p189_p3)  ;;  %v362_v2 = vld [vmem:[%s1540_s1 + $0x10] sm:$0xff] (!%p189_p3)  ;;  %vm461_vm0 = vcmask (!%p189_p3), 1042432   ;;  %s1011_s22 = sshll.u32 (!%p189_p3), %s1197_s12, 5  ;;  %vm263_vm1 = vcmask (!%p189_p3), 523264  }
   0x7   : > { %192 = sbr.rel (%p189_p3) target bundleno = 277 (0x115), region = 32  ;;  %v1143_v3 = vpack.c.bf16 (!%p189_p3), %v361_v1, %v360_v0  ;;  %v363_v4 = vld [vmem:[%s1540_s1 + $0x18] sm:$0x7] (!%p189_p3)  ;;  %p1264_p4 = scmp.lt.s32.totalorder (!%p189_p3), %s1011_s22, 575  ;;  %vm1207_vm2 = vmmov (!%p189_p3), 1   ;;  %v1208_v7 = vmov (!%p189_p3), 0.0  }
   0x8   : > { %v1147_v5 = vpack.c.bf16 (!%p189_p3), %v363_v4, %v362_v2  ;;  %vm1268_vm3 = vmpackc.low (!%p189_p3), %vm461_vm0, %vm1207_vm2  ;;  %265 = vst.msk [vmem:[#allocation2 + $0x8] sm:$0xff] (!%p189_p3), %vm263_vm1, %v1208_v7  ;;  %vm364_vm4 = vcmask (!%p189_p3), 220160   ;;  %v1399_v4 = vld [vmem:[%s1541_s2] ss:$0 sm:$0xff] (!%p189_p3) }
   0x9   : > { %264 = vst.msk [vmem:[#allocation2] sm:$0xff] (!%p189_p3), %vm263_vm1, %v1208_v7  ;;  %266 = vst.msk [vmem:[#allocation2 + $0x10] sm:$0xff] (!%p189_p3), %vm263_vm1, %v1208_v7  ;;  %1144 = vmatprep.subr.bf16.mxu0 (!%p189_p3), %v1143_v3  ;;  %1153 = vmatprep.subr.bf16.mxu1 (!%p189_p3), %v1143_v3 }
   0xa   : > { %267 = vst.msk [vmem:[#allocation2 + $0x18] sm:$0xff] (!%p189_p3), %vm263_vm1, %v1208_v7  ;;  %268 = vst.msk [vmem:[#allocation2 + $0x20] sm:$0xff] (!%p189_p3), %vm263_vm1, %v1208_v7  ;;  %1146 = vmatpush3.bf16.msra.mxu0 (!%p189_p3), %v1143_v3  ;;  %1155 = vmatpush3.bf16.msra.mxu1 (!%p189_p3), %v1143_v3 }
   0xb   : > { %269 = vst.msk [vmem:[#allocation2 + $0x28] sm:$0xff] (!%p189_p3), %vm263_vm1, %v1208_v7  ;;  %270 = vst.msk [vmem:[#allocation2 + $0x30] sm:$0xff] (!%p189_p3), %vm263_vm1, %v1208_v7  ;;  %1149 = vmatprep.subr.msk.bf16.mxu0 (!%p189_p3), %vm1268_vm3, %v1147_v5  ;;  %1154 = vmatprep.subr.msk.bf16.mxu1 (!%p189_p3), %vm1268_vm3, %v1147_v5 }
   0xc   : > { %271 = vst.msk [vmem:[#allocation2 + $0x38] sm:$0xff] (!%p189_p3), %vm263_vm1, %v1208_v7  ;;  %272 = vst.msk [vmem:[#allocation2 + $0x40] sm:$0xff] (!%p189_p3), %vm263_vm1, %v1208_v7 }
   0xd   : > { %273 = vst.msk [vmem:[#allocation2 + $0x48] sm:$0xff] (!%p189_p3), %vm263_vm1, %v1208_v7  ;;  %274 = vst.msk [vmem:[#allocation2 + $0x50] sm:$0xff] (!%p189_p3), %vm263_vm1, %v1208_v7 }
   0xe   : > { %275 = vst.msk [vmem:[#allocation2 + $0x58] sm:$0xff] %vm263_vm1, %v1208_v7  ;;  %276 = vst.msk [vmem:[#allocation2 + $0x60] sm:$0xff] %vm263_vm1, %v1208_v7  ;;  %s1551_s22 = smov (!%p1264_p4, %s1011_s22), 575  ;;  %1152 = vmatpush3.bf16.msk.msra.mxu0 %vm1268_vm3, %v1147_v5  ;;  %1156 = vmatpush3.bf16.msk.msra.mxu1 %vm1268_vm3, %v1147_v5 }
   0xf   : > { %277 = vst.msk [vmem:[#allocation2 + $0x68] sm:$0xff] %vm263_vm1, %v1208_v7  ;;  %278 = vst.msk [vmem:[#allocation2 + $0x70] sm:$0xff] %vm263_vm1, %v1208_v7  ;;  %s1012_s26 = sshll.u32 %s1551_s22, 3  ;;  %v297_v40 = vld [vmem:[#allocation2 + $0x8] sm:$0xff] }
  0x10   : > { %279 = vst.msk [vmem:[#allocation2 + $0x78] sm:$0xff] %vm263_vm1, %v1208_v7  ;;  %280 = vst.msk [vmem:[#allocation2 + $0x80] sm:$0xff] %vm263_vm1, %v1208_v7  ;;  %s1320_s29 = scalar_lea.vmem %s1539_s0, %s1012_s26  ;;  %v296_v42 = vld [vmem:[#allocation2] sm:$0xff]  ;;  %v298_v54 = vld [vmem:[#allocation2 + $0x10] sm:$0xff]  ;;  %s1412_s7 = scalar_lea.vmem %s1542_s3, %s1012_s26 }
  0x11   : > { %281 = vst.msk [vmem:[#allocation2 + $0x88] sm:$0xff] %vm263_vm1, %v1208_v7  ;;  %282 = vst.msk [vmem:[#allocation2 + $0x90] sm:$0xff] %vm263_vm1, %v1208_v7  ;;  %v328_v8 = vld [vmem:[%s1320_s29] sm:$0xff]  ;;  %v329_v10 = vld [vmem:[%s1320_s29 + $0x8] sm:$0xff] }
  0x12   : > { %283 = vst.msk [vmem:[#allocation2 + $0x98] sm:$0xff] %vm263_vm1, %v1208_v7  ;;  %284 = vst.msk [vmem:[#allocation2 + $0xa0] sm:$0xff] %vm263_vm1, %v1208_v7  ;;  %v344_v9 = vld [vmem:[%s1320_s29 + $0x80] sm:$0xff]  ;;  %v345_v11 = vld [vmem:[%s1320_s29 + $0x88] sm:$0xff]  ;;  %1095 = vmatprep.mubr.msk.f32.mxu0 %vm364_vm4, %v328_v8 }
  0x13   : > { %285 = vst.msk [vmem:[#allocation2 + $0xa8] sm:$0xff] %vm263_vm1, %v1208_v7  ;;  %286 = vst.msk [vmem:[#allocation2 + $0xb0] sm:$0xff] %vm263_vm1, %v1208_v7  ;;  %1119 = vmatprep.mubr.msk.f32.mxu1 %vm364_vm4, %v344_v9  ;;  %v330_v12 = vld [vmem:[%s1320_s29 + $0x10] sm:$0xff]  ;;  %1096 = vmatmul.mubr.msk.f32.vlgmr.msra.gmra.mrb[0].mxu0 %vm364_vm4, %v329_v10  ;;  %v331_v14 = vld [vmem:[%s1320_s29 + $0x18] sm:$0xff] }
  0x14   : > { %287 = vst.msk [vmem:[#allocation2 + $0xb8] sm:$0xff] %vm263_vm1, %v1208_v7  ;;  %288 = vst.msk [vmem:[#allocation2 + $0xc0] sm:$0xff] %vm263_vm1, %v1208_v7  ;;  %v346_v13 = vld [vmem:[%s1320_s29 + $0x90] sm:$0xff]  ;;  %1120 = vmatmul.mubr.msk.f32.vlgmr.msra.gmra.mrb[0].mxu1 %vm364_vm4, %v345_v11  ;;  %1098 = vmatprep.mubr.msk.f32.mxu0 %vm364_vm4, %v330_v12  ;;  %v347_v15 = vld [vmem:[%s1320_s29 + $0x98] sm:$0xff] }
  0x15   : > { %289 = vst.msk [vmem:[#allocation2 + $0xc8] sm:$0xff] %vm263_vm1, %v1208_v7  ;;  %290 = vst.msk [vmem:[#allocation2 + $0xd0] sm:$0xff] %vm263_vm1, %v1208_v7  ;;  %1122 = vmatprep.mubr.msk.f32.mxu1 %vm364_vm4, %v346_v13  ;;  %v332_v16 = vld [vmem:[%s1320_s29 + $0x20] sm:$0xff]  ;;  %v333_v18 = vld [vmem:[%s1320_s29 + $0x28] sm:$0xff] }
  0x16   : > { %291 = vst.msk [vmem:[#allocation2 + $0xd8] sm:$0xff] %vm263_vm1, %v1208_v7  ;;  %292 = vst.msk [vmem:[#allocation2 + $0xe0] sm:$0xff] %vm263_vm1, %v1208_v7  ;;  %v348_v17 = vld [vmem:[%s1320_s29 + $0xa0] sm:$0xff]  ;;  %v349_v19 = vld [vmem:[%s1320_s29 + $0xa8] sm:$0xff] }
  0x17   : > { %293 = vst.msk [vmem:[#allocation2 + $0xe8] sm:$0xff] %vm263_vm1, %v1208_v7  ;;  %294 = vst.msk [vmem:[#allocation2 + $0xf0] sm:$0xff] %vm263_vm1, %v1208_v7  ;;  %1099 = vmatmul.mubr.msk.f32.gmra.mrb[2].mxu0 %vm364_vm4, %v331_v14  ;;  %v334_v20 = vld [vmem:[%s1320_s29 + $0x30] sm:$0xff]  ;;  %v335_v22 = vld [vmem:[%s1320_s29 + $0x38] sm:$0xff] }
  0x18   : > { %295 = vst.msk [vmem:[#allocation2 + $0xf8] sm:$0xff] %vm263_vm1, %v1208_v7  ;;  %1123 = vmatmul.mubr.msk.f32.gmra.mrb[2].mxu1 %vm364_vm4, %v347_v15  ;;  %1101 = vmatprep.mubr.msk.f32.mxu0 %vm364_vm4, %v332_v16  ;;  %v350_v21 = vld [vmem:[%s1320_s29 + $0xb0] sm:$0xff]  ;;  %v351_v23 = vld [vmem:[%s1320_s29 + $0xb8] sm:$0xff]  ;;  %v336_v24 = vld [vmem:[%s1320_s29 + $0x40] sm:$0xff] }
  0x19   : > { %1125 = vmatprep.mubr.msk.f32.mxu1 %vm364_vm4, %v348_v17  ;;  %v352_v25 = vld [vmem:[%s1320_s29 + $0xc0] sm:$0xff]  ;;  %v337_v26 = vld [vmem:[%s1320_s29 + $0x48] sm:$0xff]  ;;  %v338_v28 = vld [vmem:[%s1320_s29 + $0x50] sm:$0xff] }
  0x1a   : > { %v353_v27 = vld [vmem:[%s1320_s29 + $0xc8] sm:$0xff]  ;;  %v354_v29 = vld [vmem:[%s1320_s29 + $0xd0] sm:$0xff]  ;;  %v339_v30 = vld [vmem:[%s1320_s29 + $0x58] sm:$0xff] }
  0x1b   : > { %1102 = vmatmul.mubr.msk.f32.gmra.mrb[4].mxu0 %vm364_vm4, %v333_v18  ;;  %v355_v31 = vld [vmem:[%s1320_s29 + $0xd8] sm:$0xff]  ;;  %v340_v32 = vld [vmem:[%s1320_s29 + $0x60] sm:$0xff]  ;;  %v341_v34 = vld [vmem:[%s1320_s29 + $0x68] sm:$0xff] }
  0x1c   : > { %1126 = vmatmul.mubr.msk.f32.gmra.mrb[4].mxu1 %vm364_vm4, %v349_v19  ;;  %1104 = vmatprep.mubr.msk.f32.mxu0 %vm364_vm4, %v334_v20  ;;  %v356_v33 = vld [vmem:[%s1320_s29 + $0xe0] sm:$0xff]  ;;  %v357_v35 = vld [vmem:[%s1320_s29 + $0xe8] sm:$0xff]  ;;  %v342_v36 = vld [vmem:[%s1320_s29 + $0x70] sm:$0xff] }
  0x1d   : > { %1128 = vmatprep.mubr.msk.f32.mxu1 %vm364_vm4, %v350_v21  ;;  %v358_v37 = vld [vmem:[%s1320_s29 + $0xf0] sm:$0xff]  ;;  %v343_v38 = vld [vmem:[%s1320_s29 + $0x78] sm:$0xff]  ;;  %v313_v41 = vld [vmem:[#allocation2 + $0x88] sm:$0xff] }
  0x1e   : > { %v359_v39 = vld [vmem:[%s1320_s29 + $0xf8] sm:$0xff]  ;;  %v312_v43 = vld [vmem:[#allocation2 + $0x80] sm:$0xff]  ;;  %v314_v55 = vld [vmem:[#allocation2 + $0x90] sm:$0xff] }
  0x1f   : > { %1105 = vmatmul.mubr.msk.f32.gmra.mrb[6].mxu0 %vm364_vm4, %v335_v22  ;;  %v299_v52 = vld [vmem:[#allocation2 + $0x18] sm:$0xff]  ;;  %v301_v0 = vld [vmem:[#allocation2 + $0x28] sm:$0xff]  ;;  %v300_v2 = vld [vmem:[#allocation2 + $0x20] sm:$0xff] }
  0x20   : > { %1129 = vmatmul.mubr.msk.f32.gmra.mrb[6].mxu1 %vm364_vm4, %v351_v23  ;;  %1107 = vmatprep.mubr.msk.f32.mxu0 %vm364_vm4, %v336_v24  ;;  %v315_v53 = vld [vmem:[#allocation2 + $0x98] sm:$0xff]  ;;  %v317_v1 = vld [vmem:[#allocation2 + $0xa8] sm:$0xff]  ;;  %v316_v3 = vld [vmem:[#allocation2 + $0xa0] sm:$0xff] }
  0x21   : > { %1131 = vmatprep.mubr.msk.f32.mxu1 %vm364_vm4, %v352_v25  ;;  %v303_v11 = vld [vmem:[#allocation2 + $0x38] sm:$0xff]  ;;  %v302_v17 = vld [vmem:[#allocation2 + $0x30] sm:$0xff] }
  0x22   : > { %v319_v12 = vld [vmem:[#allocation2 + $0xb8] sm:$0xff]  ;;  %v318_v22 = vld [vmem:[#allocation2 + $0xb0] sm:$0xff] }
  0x23   : > { %1108 = vmatmul.mubr.msk.f32.gmra.mrb[8].mxu0 %vm364_vm4, %v337_v26 }
  0x24   : > { %1132 = vmatmul.mubr.msk.f32.gmra.mrb[8].mxu1 %vm364_vm4, %v353_v27  ;;  %1110 = vmatprep.mubr.msk.f32.mxu0 %vm364_vm4, %v338_v28 }
  0x25   : > { %1134 = vmatprep.mubr.msk.f32.mxu1 %vm364_vm4, %v354_v29 }
  0x27   : > { %1111 = vmatmul.mubr.msk.f32.gmra.mrb[10].mxu0 %vm364_vm4, %v339_v30 }
  0x28   : > { %1135 = vmatmul.mubr.msk.f32.gmra.mrb[10].mxu1 %vm364_vm4, %v355_v31  ;;  %1113 = vmatprep.mubr.msk.f32.mxu0 %vm364_vm4, %v340_v32 }
  0x29   : > { %1137 = vmatprep.mubr.msk.f32.mxu1 %vm364_vm4, %v356_v33  ;;  %v305_v33 = vld [vmem:[#allocation2 + $0x48] sm:$0xff] }
  0x2b   : > { %1114 = vmatmul.mubr.msk.f32.gmra.mrb[12].mxu0 %vm364_vm4, %v341_v34  ;;  %v321_v34 = vld [vmem:[#allocation2 + $0xc8] sm:$0xff] }
  0x2c   : > { %1138 = vmatmul.mubr.msk.f32.gmra.mrb[12].mxu1 %vm364_vm4, %v357_v35  ;;  %1116 = vmatprep.mubr.msk.f32.mxu0 %vm364_vm4, %v342_v36 }
  0x2d   : > { %1140 = vmatprep.mubr.msk.f32.mxu1 %vm364_vm4, %v358_v37 }
  0x2f   : > { %1117 = vmatmul.mubr.msk.f32.gmra.mrb[14].mxu0 %vm364_vm4, %v343_v38 }
  0x30   : > { %1141 = vmatmul.mubr.msk.f32.gmra.mrb[14].mxu1 %vm364_vm4, %v359_v39 }
  0xe6   : > { %v1097_v44 = vpop.f32.mrb[0].mxu0 }
  0xe7   : > { %v1121_v45 = vpop.f32.mrb[0].mxu1  ;;  %v691_v46 = vadd.f32 %v1097_v44, %v297_v40  ;;  %v531_v48 = vpop.f32.mrb[1].mxu0 }
  0xe8   : > { %v707_v47 = vadd.f32 %v1121_v45, %v313_v41  ;;  %v611_v49 = vpop.f32.mrb[1].mxu1  ;;  %v690_v50 = vadd.f32 %v531_v48, %v296_v42  ;;  %v304_v41 = vld [vmem:[#allocation2 + $0x40] sm:$0xff] }
  0xe9   : > { %v706_v51 = vadd.f32 %v611_v49, %v312_v43  ;;  %724 = vst.msk [vmem:[#allocation2 + $0x8] sm:$0xff] %vm263_vm1, %v691_v46  ;;  %v320_v46 = vld [vmem:[#allocation2 + $0xc0] sm:$0xff] }
  0xea   : > { %740 = vst.msk [vmem:[#allocation2 + $0x88] sm:$0xff] %vm263_vm1, %v707_v47  ;;  %723 = vst.msk [vmem:[#allocation2] sm:$0xff] %vm263_vm1, %v690_v50  ;;  %v1100_v56 = vpop.f32.mrb[2].mxu0 }
  0xeb   : > { %739 = vst.msk [vmem:[#allocation2 + $0x80] sm:$0xff] %vm263_vm1, %v706_v51  ;;  %v1124_v57 = vpop.f32.mrb[2].mxu1  ;;  %v693_v58 = vadd.f32 %v1100_v56, %v299_v52  ;;  %v541_v60 = vpop.f32.mrb[3].mxu0 }
  0xec   : > { %v709_v59 = vadd.f32 %v1124_v57, %v315_v53  ;;  %v621_v61 = vpop.f32.mrb[3].mxu1  ;;  %v692_v62 = vadd.f32 %v541_v60, %v298_v54  ;;  %v307_v57 = vld [vmem:[#allocation2 + $0x58] sm:$0xff] }
  0xed   : > { %v708_v63 = vadd.f32 %v621_v61, %v314_v55  ;;  %726 = vst.msk [vmem:[#allocation2 + $0x18] sm:$0xff] %vm263_vm1, %v693_v58  ;;  %v323_v58 = vld [vmem:[#allocation2 + $0xd8] sm:$0xff] }
  0xee   : > { %742 = vst.msk [vmem:[#allocation2 + $0x98] sm:$0xff] %vm263_vm1, %v709_v59  ;;  %725 = vst.msk [vmem:[#allocation2 + $0x10] sm:$0xff] %vm263_vm1, %v692_v62  ;;  %v1103_v5 = vpop.f32.mrb[4].mxu0 }
  0xef   : > { %741 = vst.msk [vmem:[#allocation2 + $0x90] sm:$0xff] %vm263_vm1, %v708_v63  ;;  %v1127_v6 = vpop.f32.mrb[4].mxu1  ;;  %v695_v7 = vadd.f32 %v1103_v5, %v301_v0  ;;  %v551_v9 = vpop.f32.mrb[5].mxu0 }
  0xf0   : > { %v711_v8 = vadd.f32 %v1127_v6, %v317_v1  ;;  %v631_v10 = vpop.f32.mrb[5].mxu1  ;;  %v759_v13 = vld [vmem:[#allocation2 + $0x8] sm:$0xff]  ;;  %v694_v15 = vadd.f32 %v551_v9, %v300_v2  ;;  %v306_v1 = vld [vmem:[#allocation2 + $0x50] sm:$0xff] }
  0xf1   : > { %v775_v14 = vld [vmem:[#allocation2 + $0x88] sm:$0xff]  ;;  %v710_v16 = vadd.f32 %v631_v10, %v316_v3  ;;  %v798_v18 = vadd.f32 %v1399_v4, %v759_v13  ;;  %v758_v20 = vld [vmem:[#allocation2] sm:$0xff]  ;;  %728 = vst.msk [vmem:[#allocation2 + $0x28] sm:$0xff] %vm263_vm1, %v695_v7  ;;  %v322_v7 = vld [vmem:[#allocation2 + $0xd0] sm:$0xff] }
  0xf2   : > { %v814_v19 = vadd.f32 %v1399_v4, %v775_v14  ;;  %v774_v21 = vld [vmem:[#allocation2 + $0x80] sm:$0xff]  ;;  %744 = vst.msk [vmem:[#allocation2 + $0xa8] sm:$0xff] %vm263_vm1, %v711_v8  ;;  %v797_v23 = vadd.f32 %v1399_v4, %v758_v20  ;;  %727 = vst.msk [vmem:[#allocation2 + $0x20] sm:$0xff] %vm263_vm1, %v694_v15  ;;  %v1106_v25 = vpop.f32.mrb[6].mxu0 }
  0xf3   : > { %v813_v24 = vadd.f32 %v1399_v4, %v774_v21  ;;  %743 = vst.msk [vmem:[#allocation2 + $0xa0] sm:$0xff] %vm263_vm1, %v710_v16  ;;  %v1130_v26 = vpop.f32.mrb[6].mxu1  ;;  %v830_v27 = vmax.f32 %v798_v18, 0.0  ;;  %v697_v29 = vadd.f32 %v1106_v25, %v303_v11  ;;  %v561_v31 = vpop.f32.mrb[7].mxu0  ;;  %v309_v18 = vld [vmem:[#allocation2 + $0x68] sm:$0xff] }
  0xf4   : > { %v846_v28 = vmax.f32 %v814_v19, 0.0  ;;  %v713_v30 = vadd.f32 %v1130_v26, %v319_v12  ;;  %v641_v32 = vpop.f32.mrb[7].mxu1  ;;  %v829_v35 = vmax.f32 %v797_v23, 0.0  ;;  %v761_v37 = vld [vmem:[#allocation2 + $0x18] sm:$0xff]  ;;  %v696_v39 = vadd.f32 %v561_v31, %v302_v17  ;;  %v325_v19 = vld [vmem:[#allocation2 + $0xe8] sm:$0xff]  ;;  %v308_v26 = vld [vmem:[#allocation2 + $0x60] sm:$0xff] }
  0xf5   : > { %v845_v36 = vmax.f32 %v813_v24, 0.0  ;;  %v777_v38 = vld [vmem:[#allocation2 + $0x98] sm:$0xff]  ;;  %v712_v40 = vadd.f32 %v641_v32, %v318_v22  ;;  %862 = vst.msk [vmem:[%s1412_s7 + $0x8] sm:$0xff] %vm263_vm1, %v830_v27  ;;  %v800_v42 = vadd.f32 %v1399_v4, %v761_v37  ;;  %v760_v44 = vld [vmem:[#allocation2 + $0x10] sm:$0xff]  ;;  %730 = vst.msk [vmem:[#allocation2 + $0x38] sm:$0xff] %vm263_vm1, %v697_v29 }
  0xf6   : > { %878 = vst.msk [vmem:[%s1412_s7 + $0x88] sm:$0xff] %vm263_vm1, %v846_v28  ;;  %v816_v43 = vadd.f32 %v1399_v4, %v777_v38  ;;  %v776_v45 = vld [vmem:[#allocation2 + $0x90] sm:$0xff]  ;;  %746 = vst.msk [vmem:[#allocation2 + $0xb8] sm:$0xff] %vm263_vm1, %v713_v30  ;;  %v799_v47 = vadd.f32 %v1399_v4, %v760_v44  ;;  %v1109_v49 = vpop.f32.mrb[8].mxu0  ;;  %v324_v31 = vld [vmem:[#allocation2 + $0xe0] sm:$0xff] }
  0xf7   : > { %861 = vst.msk [vmem:[%s1412_s7] sm:$0xff] %vm263_vm1, %v829_v35  ;;  %877 = vst.msk [vmem:[%s1412_s7 + $0x80] sm:$0xff] %vm263_vm1, %v845_v36  ;;  %v815_v48 = vadd.f32 %v1399_v4, %v776_v45  ;;  %v1133_v50 = vpop.f32.mrb[8].mxu1  ;;  %v832_v51 = vmax.f32 %v800_v42, 0.0  ;;  %v699_v53 = vadd.f32 %v1109_v49, %v305_v33  ;;  %v571_v55 = vpop.f32.mrb[9].mxu0  ;;  %v311_v42 = vld [vmem:[#allocation2 + $0x78] sm:$0xff] }
  0xf8   : > { %729 = vst.msk [vmem:[#allocation2 + $0x30] sm:$0xff] %vm263_vm1, %v696_v39  ;;  %745 = vst.msk [vmem:[#allocation2 + $0xb0] sm:$0xff] %vm263_vm1, %v712_v40  ;;  %v848_v52 = vmax.f32 %v816_v43, 0.0  ;;  %v715_v54 = vadd.f32 %v1133_v50, %v321_v34  ;;  %v651_v56 = vpop.f32.mrb[9].mxu1  ;;  %v831_v59 = vmax.f32 %v799_v47, 0.0  ;;  %v763_v61 = vld [vmem:[#allocation2 + $0x28] sm:$0xff]  ;;  %v698_v63 = vadd.f32 %v571_v55, %v304_v41 }
  0xf9   : > { %v847_v60 = vmax.f32 %v815_v48, 0.0  ;;  %v779_v62 = vld [vmem:[#allocation2 + $0xa8] sm:$0xff]  ;;  %v714_v0 = vadd.f32 %v651_v56, %v320_v46  ;;  %864 = vst.msk [vmem:[%s1412_s7 + $0x18] sm:$0xff] %vm263_vm1, %v832_v51  ;;  %v802_v2 = vadd.f32 %v1399_v4, %v763_v61  ;;  %v762_v5 = vld [vmem:[#allocation2 + $0x20] sm:$0xff]  ;;  %732 = vst.msk [vmem:[#allocation2 + $0x48] sm:$0xff] %vm263_vm1, %v699_v53 }
  0xfa   : > { %880 = vst.msk [vmem:[%s1412_s7 + $0x98] sm:$0xff] %vm263_vm1, %v848_v52  ;;  %v818_v3 = vadd.f32 %v1399_v4, %v779_v62  ;;  %v778_v6 = vld [vmem:[#allocation2 + $0xa0] sm:$0xff]  ;;  %748 = vst.msk [vmem:[#allocation2 + $0xc8] sm:$0xff] %vm263_vm1, %v715_v54  ;;  %v801_v8 = vadd.f32 %v1399_v4, %v762_v5  ;;  %v1112_v10 = vpop.f32.mrb[10].mxu0  ;;  %v327_v43 = vld [vmem:[#allocation2 + $0xf8] sm:$0xff] }
  0xfb   : > { %863 = vst.msk [vmem:[%s1412_s7 + $0x10] sm:$0xff] %vm263_vm1, %v831_v59  ;;  %879 = vst.msk [vmem:[%s1412_s7 + $0x90] sm:$0xff] %vm263_vm1, %v847_v60  ;;  %v817_v9 = vadd.f32 %v1399_v4, %v778_v6  ;;  %v1136_v11 = vpop.f32.mrb[10].mxu1  ;;  %v834_v12 = vmax.f32 %v802_v2, 0.0  ;;  %v701_v14 = vadd.f32 %v1112_v10, %v307_v57  ;;  %v581_v16 = vpop.f32.mrb[11].mxu0  ;;  %v310_v50 = vld [vmem:[#allocation2 + $0x70] sm:$0xff] }
  0xfc   : > { %731 = vst.msk [vmem:[#allocation2 + $0x40] sm:$0xff] %vm263_vm1, %v698_v63  ;;  %747 = vst.msk [vmem:[#allocation2 + $0xc0] sm:$0xff] %vm263_vm1, %v714_v0  ;;  %v850_v13 = vmax.f32 %v818_v3, 0.0  ;;  %v717_v15 = vadd.f32 %v1136_v11, %v323_v58  ;;  %v661_v17 = vpop.f32.mrb[11].mxu1  ;;  %v833_v20 = vmax.f32 %v801_v8, 0.0  ;;  %v765_v22 = vld [vmem:[#allocation2 + $0x38] sm:$0xff]  ;;  %v700_v24 = vadd.f32 %v581_v16, %v306_v1 }
  0xfd   : > { %v849_v21 = vmax.f32 %v817_v9, 0.0  ;;  %v781_v23 = vld [vmem:[#allocation2 + $0xb8] sm:$0xff]  ;;  %v716_v25 = vadd.f32 %v661_v17, %v322_v7  ;;  %866 = vst.msk [vmem:[%s1412_s7 + $0x28] sm:$0xff] %vm263_vm1, %v834_v12  ;;  %v804_v27 = vadd.f32 %v1399_v4, %v765_v22  ;;  %734 = vst.msk [vmem:[#allocation2 + $0x58] sm:$0xff] %vm263_vm1, %v701_v14  ;;  %v326_v55 = vld [vmem:[#allocation2 + $0xf0] sm:$0xff] }
  0xfe   : > { %882 = vst.msk [vmem:[%s1412_s7 + $0xa8] sm:$0xff] %vm263_vm1, %v850_v13  ;;  %v820_v28 = vadd.f32 %v1399_v4, %v781_v23  ;;  %750 = vst.msk [vmem:[#allocation2 + $0xd8] sm:$0xff] %vm263_vm1, %v717_v15  ;;  %v1115_v34 = vpop.f32.mrb[12].mxu0 }
  0xff   : > { %v764_v29 = vld [vmem:[#allocation2 + $0x30] sm:$0xff]  ;;  %865 = vst.msk [vmem:[%s1412_s7 + $0x20] sm:$0xff] %vm263_vm1, %v833_v20  ;;  %881 = vst.msk [vmem:[%s1412_s7 + $0xa0] sm:$0xff] %vm263_vm1, %v849_v21  ;;  %v1139_v35 = vpop.f32.mrb[12].mxu1  ;;  %v836_v36 = vmax.f32 %v804_v27, 0.0  ;;  %v703_v38 = vadd.f32 %v1115_v34, %v309_v18  ;;  %v591_v40 = vpop.f32.mrb[13].mxu0 }
 0x100   : > { %v780_v30 = vld [vmem:[#allocation2 + $0xb0] sm:$0xff]  ;;  %v803_v32 = vadd.f32 %v1399_v4, %v764_v29  ;;  %733 = vst.msk [vmem:[#allocation2 + $0x50] sm:$0xff] %vm263_vm1, %v700_v24  ;;  %749 = vst.msk [vmem:[#allocation2 + $0xd0] sm:$0xff] %vm263_vm1, %v716_v25  ;;  %v852_v37 = vmax.f32 %v820_v28, 0.0  ;;  %v719_v39 = vadd.f32 %v1139_v35, %v325_v19  ;;  %v671_v41 = vpop.f32.mrb[13].mxu1  ;;  %v767_v46 = vld [vmem:[#allocation2 + $0x48] sm:$0xff]  ;;  %v702_v48 = vadd.f32 %v591_v40, %v308_v26 }
 0x101   : > { %v819_v33 = vadd.f32 %v1399_v4, %v780_v30  ;;  %v783_v47 = vld [vmem:[#allocation2 + $0xc8] sm:$0xff]  ;;  %v718_v49 = vadd.f32 %v671_v41, %v324_v31  ;;  %868 = vst.msk [vmem:[%s1412_s7 + $0x38] sm:$0xff] %vm263_vm1, %v836_v36  ;;  %v806_v51 = vadd.f32 %v1399_v4, %v767_v46  ;;  %736 = vst.msk [vmem:[#allocation2 + $0x68] sm:$0xff] %vm263_vm1, %v703_v38 }
 0x102   : > { %v835_v44 = vmax.f32 %v803_v32, 0.0  ;;  %884 = vst.msk [vmem:[%s1412_s7 + $0xb8] sm:$0xff] %vm263_vm1, %v852_v37  ;;  %v822_v52 = vadd.f32 %v1399_v4, %v783_v47  ;;  %752 = vst.msk [vmem:[#allocation2 + $0xe8] sm:$0xff] %vm263_vm1, %v719_v39  ;;  %v1118_v58 = vpop.f32.mrb[14].mxu0 }
 0x103   : > { %v851_v45 = vmax.f32 %v819_v33, 0.0  ;;  %v766_v53 = vld [vmem:[#allocation2 + $0x40] sm:$0xff]  ;;  %735 = vst.msk [vmem:[#allocation2 + $0x60] sm:$0xff] %vm263_vm1, %v702_v48  ;;  %751 = vst.msk [vmem:[#allocation2 + $0xe0] sm:$0xff] %vm263_vm1, %v718_v49  ;;  %v1142_v59 = vpop.f32.mrb[14].mxu1  ;;  %v838_v60 = vmax.f32 %v806_v51, 0.0  ;;  %v705_v62 = vadd.f32 %v1118_v58, %v311_v42 }
 0x104   : > { %v782_v54 = vld [vmem:[#allocation2 + $0xc0] sm:$0xff]  ;;  %867 = vst.msk [vmem:[%s1412_s7 + $0x30] sm:$0xff] %vm263_vm1, %v835_v44  ;;  %v805_v56 = vadd.f32 %v1399_v4, %v766_v53  ;;  %v854_v61 = vmax.f32 %v822_v52, 0.0  ;;  %v721_v63 = vadd.f32 %v1142_v59, %v327_v43  ;;  %v601_v0 = vpop.f32.mrb[15].mxu0  ;;  %v681_v1 = vpop.f32.mrb[15].mxu1  ;;  %v769_v5 = vld [vmem:[#allocation2 + $0x58] sm:$0xff] }
 0x105   : > { %883 = vst.msk [vmem:[%s1412_s7 + $0xb0] sm:$0xff] %vm263_vm1, %v851_v45  ;;  %v821_v57 = vadd.f32 %v1399_v4, %v782_v54  ;;  %v785_v6 = vld [vmem:[#allocation2 + $0xd8] sm:$0xff]  ;;  %v704_v7 = vadd.f32 %v601_v0, %v310_v50  ;;  %v720_v8 = vadd.f32 %v681_v1, %v326_v55  ;;  %870 = vst.msk [vmem:[%s1412_s7 + $0x48] sm:$0xff] %vm263_vm1, %v838_v60 }
 0x106   : > { %v837_v2 = vmax.f32 %v805_v56, 0.0  ;;  %886 = vst.msk [vmem:[%s1412_s7 + $0xc8] sm:$0xff] %vm263_vm1, %v854_v61  ;;  %v808_v9 = vadd.f32 %v1399_v4, %v769_v5  ;;  %v824_v10 = vadd.f32 %v1399_v4, %v785_v6  ;;  %738 = vst.msk [vmem:[#allocation2 + $0x78] sm:$0xff] %vm263_vm1, %v705_v62 }
 0x107   : > { %v853_v3 = vmax.f32 %v821_v57, 0.0  ;;  %v768_v11 = vld [vmem:[#allocation2 + $0x50] sm:$0xff]  ;;  %754 = vst.msk [vmem:[#allocation2 + $0xf8] sm:$0xff] %vm263_vm1, %v721_v63  ;;  %737 = vst.msk [vmem:[#allocation2 + $0x70] sm:$0xff] %vm263_vm1, %v704_v7 }
 0x108   : > { %v784_v12 = vld [vmem:[#allocation2 + $0xd0] sm:$0xff]  ;;  %869 = vst.msk [vmem:[%s1412_s7 + $0x40] sm:$0xff] %vm263_vm1, %v837_v2  ;;  %v807_v13 = vadd.f32 %v1399_v4, %v768_v11  ;;  %753 = vst.msk [vmem:[#allocation2 + $0xf0] sm:$0xff] %vm263_vm1, %v720_v8  ;;  %v840_v15 = vmax.f32 %v808_v9, 0.0  ;;  %v856_v16 = vmax.f32 %v824_v10, 0.0  ;;  %v771_v19 = vld [vmem:[#allocation2 + $0x68] sm:$0xff] }
 0x109   : > { %885 = vst.msk [vmem:[%s1412_s7 + $0xc0] sm:$0xff] %vm263_vm1, %v853_v3  ;;  %v823_v14 = vadd.f32 %v1399_v4, %v784_v12  ;;  %v787_v20 = vld [vmem:[#allocation2 + $0xe8] sm:$0xff]  ;;  %v810_v21 = vadd.f32 %v1399_v4, %v771_v19 }
 0x10a   : > { %v839_v17 = vmax.f32 %v807_v13, 0.0  ;;  %872 = vst.msk [vmem:[%s1412_s7 + $0x58] sm:$0xff] %vm263_vm1, %v840_v15  ;;  %888 = vst.msk [vmem:[%s1412_s7 + $0xd8] sm:$0xff] %vm263_vm1, %v856_v16  ;;  %v826_v22 = vadd.f32 %v1399_v4, %v787_v20  ;;  %v770_v23 = vld [vmem:[#allocation2 + $0x60] sm:$0xff] }
 0x10b   : > { %v855_v18 = vmax.f32 %v823_v14, 0.0  ;;  %v786_v24 = vld [vmem:[#allocation2 + $0xe0] sm:$0xff]  ;;  %v809_v25 = vadd.f32 %v1399_v4, %v770_v23  ;;  %v842_v27 = vmax.f32 %v810_v21, 0.0 }
 0x10c   : > { %871 = vst.msk [vmem:[%s1412_s7 + $0x50] sm:$0xff] %vm263_vm1, %v839_v17  ;;  %v825_v26 = vadd.f32 %v1399_v4, %v786_v24  ;;  %v858_v28 = vmax.f32 %v826_v22, 0.0 }
 0x10d   : > { %887 = vst.msk [vmem:[%s1412_s7 + $0xd0] sm:$0xff] %vm263_vm1, %v855_v18  ;;  %v841_v29 = vmax.f32 %v809_v25, 0.0  ;;  %v773_v31 = vld [vmem:[#allocation2 + $0x78] sm:$0xff]  ;;  %874 = vst.msk [vmem:[%s1412_s7 + $0x68] sm:$0xff] %vm263_vm1, %v842_v27 }
 0x10e   : > { %v857_v30 = vmax.f32 %v825_v26, 0.0  ;;  %v789_v32 = vld [vmem:[#allocation2 + $0xf8] sm:$0xff]  ;;  %890 = vst.msk [vmem:[%s1412_s7 + $0xe8] sm:$0xff] %vm263_vm1, %v858_v28  ;;  %v812_v33 = vadd.f32 %v1399_v4, %v773_v31  ;;  %v772_v35 = vld [vmem:[#allocation2 + $0x70] sm:$0xff] }
 0x10f   : > { %v828_v34 = vadd.f32 %v1399_v4, %v789_v32  ;;  %v788_v36 = vld [vmem:[#allocation2 + $0xf0] sm:$0xff]  ;;  %873 = vst.msk [vmem:[%s1412_s7 + $0x60] sm:$0xff] %vm263_vm1, %v841_v29  ;;  %v811_v37 = vadd.f32 %v1399_v4, %v772_v35 }
 0x110   : > { %889 = vst.msk [vmem:[%s1412_s7 + $0xe0] sm:$0xff] %vm263_vm1, %v857_v30  ;;  %v827_v38 = vadd.f32 %v1399_v4, %v788_v36  ;;  %v844_v39 = vmax.f32 %v812_v33, 0.0 }
 0x111   : > { %v860_v40 = vmax.f32 %v828_v34, 0.0  ;;  %v843_v41 = vmax.f32 %v811_v37, 0.0 }
 0x112   : > { %v859_v42 = vmax.f32 %v827_v38, 0.0  ;;  %876 = vst.msk [vmem:[%s1412_s7 + $0x78] sm:$0xff] %vm263_vm1, %v844_v39 }
 0x113   : > { %892 = vst.msk [vmem:[%s1412_s7 + $0xf8] sm:$0xff] %vm263_vm1, %v860_v40  ;;  %875 = vst.msk [vmem:[%s1412_s7 + $0x70] sm:$0xff] %vm263_vm1, %v843_v41 }
 0x114   : > { %891 = vst.msk [vmem:[%s1412_s7 + $0xf0] sm:$0xff] %vm263_vm1, %v859_v42 }
 0x115 PF: > { %s13_s14 = sadd.s32 1, %s1205_s14   ;;  %s1546_s12 = smov %s1201_s13 }
 0x116   : > { %p10_p5 = scmp.ge.s32.totalorder %s13_s14, 20   ;;  %s1547_s13 = smov %s1549_s15 }
 0x118   :  { %12 = sbr.rel (!%p10_p5) target bundleno = 2 (0x2), region = 76 }

// kernel: simclr_stage1_forward.8
= control target key start
LH: loop header
LB: loop body
LE: loop exit
PB: predicated region body
PF: predicated region fallthrough
CT: control target
= control target key end

     0   :  { %s2060_s12 = smov 0   ;;  %s2062_s13 = smov 0   ;;  %s2789_s0 = inlined_call_operand.vmem [shape: f32[1280,576], index: 0, kind: input, shape index: {}]   ;;  %s2790_s1 = inlined_call_operand.vmem [shape: f32[576,128], index: 1, kind: input, shape index: {}]   ;;  %s2791_s2 = inlined_call_operand.vmem [shape: f32[1,128], index: 2, kind: input, shape index: {}]   ;;  %s2792_s3 = inlined_call_operand.vmem [shape: f32[1280,128], index: 3, kind: output, shape index: {}]  }
   0x1   :  { %s2064_s14 = smov 0  }
   0x2 LB: > { %s32_s15 = sadd.s32 1, %s2033_s13  ;;  %p1661_p0 = scmp.ge.s32.totalorder %s2037_s14, 1  ;;  %s2037_s14 = sphi %s2064_s14, %s13_s14   ;;  %s2033_s13 = sphi %s2062_s13, %s2794_s13   ;;  %s2029_s12 = sphi %s2060_s12, %s2793_s12  }
   0x3   : > { %p34_p1 = scmp.ge.s32.totalorder %s32_s15, 5  ;;  %p191_p2 = scmp.lt.s32.totalorder %s2037_s14, 6 }
   0x5   : > { %s2796_s15 = smov (%p34_p1, %s32_s15), 0  ;;  %p192_p3 = pnand %p1661_p0, %p191_p2 }
   0x6   : > { %v495_v0 = vld [vmem:[%s2790_s1] sm:$0xff] (!%p192_p3)  ;;  %v496_v1 = vld [vmem:[%s2790_s1 + $0x8] sm:$0xff] (!%p192_p3)  ;;  %v2039_v3 = vmov (!%p192_p3), 0.0|0.0   ;;  %v497_v6 = vld [vmem:[%s2790_s1 + $0x10] sm:$0xff] (!%p192_p3)  ;;  %s1662_s5 = sshll.u32 (!%p192_p3), %s2029_s12, 5  ;;  %vm567_vm0 = vcmask (!%p192_p3), 523264  }
   0x7   : > { %195 = sbr.rel (%p192_p3) target bundleno = 449 (0x1c1), region = 32  ;;  %v527_v2 = vld [vmem:[%s2790_s1 + $0x100] sm:$0xff] (!%p192_p3)  ;;  %1805 = vmatprep.subr.bf16.mxu0 (!%p192_p3), %v2039_v3  ;;  %1917 = vmatprep.subr.bf16.mxu1 (!%p192_p3), %v2039_v3  ;;  %v1806_v4 = vpack.c.bf16 (!%p192_p3), %v496_v1, %v495_v0  ;;  %v528_v5 = vld [vmem:[%s2790_s1 + $0x108] sm:$0xff] (!%p192_p3)  ;;  %v498_v7 = vld [vmem:[%s2790_s1 + $0x18] sm:$0xff] (!%p192_p3)  ;;  %p236_p4 = scmp.lt.s32.totalorder (!%p192_p3), %s1662_s5, 159 }
   0x8   : > { %v2100_v8 = vpack.c.bf16 (!%p192_p3), %v528_v5, %v527_v2  ;;  %v529_v9 = vld [vmem:[%s2790_s1 + $0x110] sm:$0xff] (!%p192_p3)  ;;  %v530_v10 = vld [vmem:[%s2790_s1 + $0x118] sm:$0xff] (!%p192_p3)  ;;  %v1809_v11 = vpack.c.bf16 (!%p192_p3), %v498_v7, %v497_v6  ;;  %v499_v13 = vld [vmem:[%s2790_s1 + $0x20] sm:$0xff] (!%p192_p3) }
   0x9   : > { %1807 = vmatpush1.bf16.msra.mxu0 (!%p192_p3), %v1806_v4  ;;  %v2111_v12 = vpack.c.bf16 (!%p192_p3), %v530_v10, %v529_v9  ;;  %v500_v14 = vld [vmem:[%s2790_s1 + $0x28] sm:$0xff] (!%p192_p3)  ;;  %v531_v15 = vld [vmem:[%s2790_s1 + $0x120] sm:$0xff] (!%p192_p3)  ;;  %v501_v19 = vld [vmem:[%s2790_s1 + $0x30] sm:$0xff] (!%p192_p3) }
   0xa   : > { %1933 = vmatpush1.bf16.msra.mxu1 (!%p192_p3), %v2100_v8  ;;  %1808 = vmatprep.subr.bf16.mxu0 (!%p192_p3), %v2039_v3  ;;  %v532_v16 = vld [vmem:[%s2790_s1 + $0x128] sm:$0xff] (!%p192_p3)  ;;  %v1812_v17 = vpack.c.bf16 (!%p192_p3), %v500_v14, %v499_v13  ;;  %v502_v20 = vld [vmem:[%s2790_s1 + $0x38] sm:$0xff] (!%p192_p3)  ;;  %v533_v21 = vld [vmem:[%s2790_s1 + $0x130] sm:$0xff] (!%p192_p3) }
   0xb   : > { %1918 = vmatprep.subr.bf16.mxu1 (!%p192_p3), %v2039_v3  ;;  %v2128_v18 = vpack.c.bf16 (!%p192_p3), %v532_v16, %v531_v15  ;;  %v534_v22 = vld [vmem:[%s2790_s1 + $0x138] sm:$0xff] (!%p192_p3)  ;;  %v1815_v23 = vpack.c.bf16 (!%p192_p3), %v502_v20, %v501_v19  ;;  %v503_v25 = vld [vmem:[%s2790_s1 + $0x40] sm:$0xff] (!%p192_p3)  ;;  %v504_v26 = vld [vmem:[%s2790_s1 + $0x48] sm:$0xff] (!%p192_p3) }
   0xc   : > { %v2147_v24 = vpack.c.bf16 (!%p192_p3), %v534_v22, %v533_v21  ;;  %v535_v27 = vld [vmem:[%s2790_s1 + $0x140] sm:$0xff] (!%p192_p3)  ;;  %v536_v28 = vld [vmem:[%s2790_s1 + $0x148] sm:$0xff] (!%p192_p3)  ;;  %v1818_v29 = vpack.c.bf16 (!%p192_p3), %v504_v26, %v503_v25  ;;  %v505_v31 = vld [vmem:[%s2790_s1 + $0x50] sm:$0xff] (!%p192_p3) }
   0xd   : > { %1810 = vmatpush1.bf16.msra.mxu0 (!%p192_p3), %v1809_v11  ;;  %v2165_v30 = vpack.c.bf16 (!%p192_p3), %v536_v28, %v535_v27  ;;  %v506_v32 = vld [vmem:[%s2790_s1 + $0x58] sm:$0xff] (!%p192_p3)  ;;  %v537_v33 = vld [vmem:[%s2790_s1 + $0x150] sm:$0xff] (!%p192_p3)  ;;  %v507_v37 = vld [vmem:[%s2790_s1 + $0x60] sm:$0xff] (!%p192_p3) }
   0xe   : > { %1934 = vmatpush1.bf16.msra.mxu1 %v2111_v12  ;;  %1811 = vmatprep.subr.bf16.mxu0 %v2039_v3  ;;  %s2798_s5 = smov (!%p236_p4, %s1662_s5), 159  ;;  %v538_v34 = vld [vmem:[%s2790_s1 + $0x158] sm:$0xff]  ;;  %v1821_v35 = vpack.c.bf16 %v506_v32, %v505_v31  ;;  %v508_v38 = vld [vmem:[%s2790_s1 + $0x68] sm:$0xff]  ;;  %v539_v39 = vld [vmem:[%s2790_s1 + $0x160] sm:$0xff] }
   0xf   : > { %1919 = vmatprep.subr.bf16.mxu1 %v2039_v3  ;;  %s1989_s7 = smul.u32 40, %s2798_s5  ;;  %v2187_v36 = vpack.c.bf16 %v538_v34, %v537_v33  ;;  %v540_v40 = vld [vmem:[%s2790_s1 + $0x168] sm:$0xff]  ;;  %v1824_v43 = vpack.c.bf16 %v508_v38, %v507_v37  ;;  %v509_v45 = vld [vmem:[%s2790_s1 + $0x70] sm:$0xff]  ;;  %v510_v46 = vld [vmem:[%s2790_s1 + $0x78] sm:$0xff]  ;;  %s1665_s4 = sshll.u32 %s2798_s5, 3 }
  0x10   : > { %v2206_v44 = vpack.c.bf16 %v540_v40, %v539_v39  ;;  %v541_v47 = vld [vmem:[%s2790_s1 + $0x170] sm:$0xff]  ;;  %v542_v48 = vld [vmem:[%s2790_s1 + $0x178] sm:$0xff]  ;;  %v1827_v49 = vpack.c.bf16 %v510_v46, %v509_v45  ;;  %v511_v51 = vld [vmem:[%s2790_s1 + $0x80] sm:$0xff]  ;;  %s2679_s8 = scalar_lea.vmem %s2792_s3, %s1665_s4 }
  0x11   : > { %1813 = vmatpush1.bf16.msra.mxu0 %v1812_v17  ;;  %s2183_s21 = scalar_lea.vmem %s2789_s0, %s1989_s7  ;;  %v2223_v50 = vpack.c.bf16 %v542_v48, %v541_v47  ;;  %v512_v52 = vld [vmem:[%s2790_s1 + $0x88] sm:$0xff]  ;;  %v543_v53 = vld [vmem:[%s2790_s1 + $0x180] sm:$0xff]  ;;  %v513_v57 = vld [vmem:[%s2790_s1 + $0x90] sm:$0xff] }
  0x12   : > { %1935 = vmatpush1.bf16.msra.mxu1 %v2128_v18  ;;  %1814 = vmatprep.subr.bf16.mxu0 %v2039_v3  ;;  %v336_v41 = vld [vmem:[%s2183_s21 + $0x8] sm:$0xff]  ;;  %v378_v42 = vld [vmem:[%s2183_s21 + $0x158] sm:$0xff]  ;;  %v1830_v55 = vpack.c.bf16 %v512_v52, %v511_v51  ;;  %v545_v59 = vld [vmem:[%s2790_s1 + $0x190] sm:$0xff] }
  0x13   : > { %1920 = vmatprep.subr.bf16.mxu1 %v2039_v3  ;;  %728 = vmatprep.mubr.f32.mxu0 %v336_v41  ;;  %v544_v54 = vld [vmem:[%s2790_s1 + $0x188] sm:$0xff]  ;;  %v514_v58 = vld [vmem:[%s2790_s1 + $0x98] sm:$0xff]  ;;  %v515_v63 = vld [vmem:[%s2790_s1 + $0xa0] sm:$0xff] }
  0x14   : > { %993 = vmatprep.mubr.f32.mxu1 %v378_v42  ;;  %v2240_v56 = vpack.c.bf16 %v544_v54, %v543_v53  ;;  %v546_v60 = vld [vmem:[%s2790_s1 + $0x198] sm:$0xff]  ;;  %v1833_v61 = vpack.c.bf16 %v514_v58, %v513_v57  ;;  %v516_v0 = vld [vmem:[%s2790_s1 + $0xa8] sm:$0xff]  ;;  %v547_v1 = vld [vmem:[%s2790_s1 + $0x1a0] sm:$0xff] }
  0x15   : > { %1816 = vmatpush1.bf16.msra.mxu0 %v1815_v23  ;;  %v2257_v62 = vpack.c.bf16 %v546_v60, %v545_v59  ;;  %v548_v2 = vld [vmem:[%s2790_s1 + $0x1a8] sm:$0xff]  ;;  %v1836_v4 = vpack.c.bf16 %v516_v0, %v515_v63  ;;  %v517_v6 = vld [vmem:[%s2790_s1 + $0xb0] sm:$0xff]  ;;  %v518_v7 = vld [vmem:[%s2790_s1 + $0xb8] sm:$0xff] }
  0x16   : > { %1936 = vmatpush1.bf16.msra.mxu1 %v2147_v24  ;;  %1817 = vmatprep.subr.bf16.mxu0 %v2039_v3  ;;  %v2274_v5 = vpack.c.bf16 %v548_v2, %v547_v1  ;;  %v549_v9 = vld [vmem:[%s2790_s1 + $0x1b0] sm:$0xff]  ;;  %v550_v10 = vld [vmem:[%s2790_s1 + $0x1b8] sm:$0xff]  ;;  %v1839_v11 = vpack.c.bf16 %v518_v7, %v517_v6  ;;  %v519_v14 = vld [vmem:[%s2790_s1 + $0xc0] sm:$0xff] }
  0x17   : > { %1921 = vmatprep.subr.bf16.mxu1 %v2039_v3  ;;  %v2291_v13 = vpack.c.bf16 %v550_v10, %v549_v9  ;;  %v520_v15 = vld [vmem:[%s2790_s1 + $0xc8] sm:$0xff]  ;;  %v551_v16 = vld [vmem:[%s2790_s1 + $0x1c0] sm:$0xff]  ;;  %v521_v21 = vld [vmem:[%s2790_s1 + $0xd0] sm:$0xff] }
  0x18   : > { %v552_v17 = vld [vmem:[%s2790_s1 + $0x1c8] sm:$0xff]  ;;  %v1842_v19 = vpack.c.bf16 %v520_v15, %v519_v14  ;;  %v522_v22 = vld [vmem:[%s2790_s1 + $0xd8] sm:$0xff]  ;;  %v553_v23 = vld [vmem:[%s2790_s1 + $0x1d0] sm:$0xff] }
  0x19   : > { %1819 = vmatpush1.bf16.msra.mxu0 %v1818_v29  ;;  %v2308_v20 = vpack.c.bf16 %v552_v17, %v551_v16  ;;  %v554_v25 = vld [vmem:[%s2790_s1 + $0x1d8] sm:$0xff]  ;;  %v1845_v26 = vpack.c.bf16 %v522_v22, %v521_v21  ;;  %v523_v28 = vld [vmem:[%s2790_s1 + $0xe0] sm:$0xff]  ;;  %v524_v29 = vld [vmem:[%s2790_s1 + $0xe8] sm:$0xff] }
  0x1a   : > { %1937 = vmatpush1.bf16.msra.mxu1 %v2165_v30  ;;  %1820 = vmatprep.subr.bf16.mxu0 %v2039_v3  ;;  %v2325_v27 = vpack.c.bf16 %v554_v25, %v553_v23  ;;  %v555_v31 = vld [vmem:[%s2790_s1 + $0x1e0] sm:$0xff]  ;;  %v556_v32 = vld [vmem:[%s2790_s1 + $0x1e8] sm:$0xff]  ;;  %v1848_v33 = vpack.c.bf16 %v524_v29, %v523_v28  ;;  %v526_v37 = vld [vmem:[%s2790_s1 + $0xf8] sm:$0xff] }
  0x1b   : > { %1922 = vmatprep.subr.bf16.mxu1 %v2039_v3  ;;  %v2342_v34 = vpack.c.bf16 %v556_v32, %v555_v31  ;;  %v557_v38 = vld [vmem:[%s2790_s1 + $0x1f0] sm:$0xff]  ;;  %v558_v39 = vld [vmem:[%s2790_s1 + $0x1f8] sm:$0xff]  ;;  %v559_v40 = vld [vmem:[%s2790_s1 + $0x200] sm:$0xff] }
  0x1c   : > { %v560_v41 = vld [vmem:[%s2790_s1 + $0x208] sm:$0xff]  ;;  %v335_v46 = vld [vmem:[%s2183_s21] sm:$0xff]  ;;  %v561_v47 = vld [vmem:[%s2790_s1 + $0x210] sm:$0xff] }
  0x1d   : > { %1822 = vmatpush1.bf16.msra.mxu0 %v1821_v35  ;;  %v525_v35 = vld [vmem:[%s2790_s1 + $0xf0] sm:$0xff]  ;;  %v1901_v45 = vpack.c.bf16 %v560_v41, %v559_v40  ;;  %v562_v48 = vld [vmem:[%s2790_s1 + $0x218] sm:$0xff]  ;;  %v383_v52 = vld [vmem:[%s2183_s21 + $0x180] sm:$0xff] }
  0x1e   : > { %1938 = vmatpush1.bf16.msra.mxu1 %v2187_v36  ;;  %1823 = vmatprep.subr.bf16.mxu0 %v2039_v3  ;;  %v1851_v42 = vpack.c.bf16 %v526_v37, %v525_v35  ;;  %v341_v51 = vld [vmem:[%s2183_s21 + $0x30] sm:$0xff]  ;;  %v1905_v53 = vpack.c.bf16 %v562_v48, %v561_v47  ;;  %v340_v54 = vld [vmem:[%s2183_s21 + $0x28] sm:$0xff]  ;;  %v382_v58 = vld [vmem:[%s2183_s21 + $0x178] sm:$0xff] }
  0x1f   : > { %1923 = vmatprep.subr.bf16.mxu1 %v2039_v3  ;;  %v564_v57 = vld [vmem:[%s2790_s1 + $0x228] sm:$0xff]  ;;  %v346_v59 = vld [vmem:[%s2183_s21 + $0x58] sm:$0xff]  ;;  %v565_v63 = vld [vmem:[%s2790_s1 + $0x230] sm:$0xff] }
  0x20   : > { %v388_v60 = vld [vmem:[%s2183_s21 + $0x1a8] sm:$0xff]  ;;  %v566_v0 = vld [vmem:[%s2790_s1 + $0x238] sm:$0xff]  ;;  %v387_v1 = vld [vmem:[%s2183_s21 + $0x1a0] sm:$0xff] }
  0x21   : > { %1825 = vmatpush1.bf16.msra.mxu0 %v1824_v43  ;;  %v2365_v43 = vpack.c.bf16 %v558_v39, %v557_v38  ;;  %v351_v2 = vld [vmem:[%s2183_s21 + $0x80] sm:$0xff]  ;;  %v1913_v6 = vpack.c.bf16 %v566_v0, %v565_v63  ;;  %v350_v7 = vld [vmem:[%s2183_s21 + $0x78] sm:$0xff]  ;;  %v392_v9 = vld [vmem:[%s2183_s21 + $0x1c8] sm:$0xff] }
  0x22   : > { %1939 = vmatpush1.bf16.msra.mxu1 %v2206_v44  ;;  %1826 = vmatprep.subr.bf16.mxu0 %v2039_v3  ;;  %v356_v10 = vld [vmem:[%s2183_s21 + $0xa8] sm:$0xff]  ;;  %v397_v14 = vld [vmem:[%s2183_s21 + $0x1f0] sm:$0xff]  ;;  %v403_v16 = vld [vmem:[%s2183_s21 + $0x220] sm:$0xff] }
  0x23   : > { %1924 = vmatprep.subr.bf16.mxu1 %v2039_v3  ;;  %v361_v15 = vld [vmem:[%s2183_s21 + $0xd0] sm:$0xff]  ;;  %v402_v17 = vld [vmem:[%s2183_s21 + $0x218] sm:$0xff]  ;;  %v408_v21 = vld [vmem:[%s2183_s21 + $0x248] sm:$0xff] }
  0x24   : > { %v407_v22 = vld [vmem:[%s2183_s21 + $0x240] sm:$0xff]  ;;  %v413_v25 = vld [vmem:[%s2183_s21 + $0x270] sm:$0xff]  ;;  %v376_v28 = vld [vmem:[%s2183_s21 + $0x148] sm:$0xff] }
  0x25   : > { %1828 = vmatpush1.bf16.msra.mxu0 %v1827_v49  ;;  %v377_v49 = vld [vmem:[%s2183_s21 + $0x150] sm:$0xff]  ;;  %v371_v23 = vld [vmem:[%s2183_s21 + $0x120] sm:$0xff]  ;;  %v418_v29 = vld [vmem:[%s2183_s21 + $0x298] sm:$0xff] }
  0x26   : > { %1940 = vmatpush1.bf16.msra.mxu1 %v2223_v50  ;;  %1829 = vmatprep.subr.bf16.mxu0 %v2039_v3  ;;  %v417_v31 = vld [vmem:[%s2183_s21 + $0x290] sm:$0xff]  ;;  %v422_v35 = vld [vmem:[%s2183_s21 + $0x2b8] sm:$0xff]  ;;  %v428_v38 = vld [vmem:[%s2183_s21 + $0x2e8] sm:$0xff] }
  0x27   : > { %1925 = vmatprep.subr.bf16.mxu1 %v2039_v3  ;;  %v381_v32 = vld [vmem:[%s2183_s21 + $0x170] sm:$0xff]  ;;  %v386_v37 = vld [vmem:[%s2183_s21 + $0x198] sm:$0xff]  ;;  %v427_v39 = vld [vmem:[%s2183_s21 + $0x2e0] sm:$0xff] }
  0x28   : > { %v391_v40 = vld [vmem:[%s2183_s21 + $0x1c0] sm:$0xff]  ;;  %v433_v41 = vld [vmem:[%s2183_s21 + $0x310] sm:$0xff]  ;;  %v426_v0 = vld [vmem:[%s2183_s21 + $0x2d8] sm:$0xff] }
  0x29   : > { %1831 = vmatpush1.bf16.msra.mxu0 %v1830_v55  ;;  %v563_v55 = vld [vmem:[%s2790_s1 + $0x220] sm:$0xff]  ;;  %v437_v47 = vld [vmem:[%s2183_s21 + $0x330] sm:$0xff] }
  0x2a   : > { %1941 = vmatpush1.bf16.msra.mxu1 %v2240_v56  ;;  %1832 = vmatprep.subr.bf16.mxu0 %v2039_v3  ;;  %v401_v48 = vld [vmem:[%s2183_s21 + $0x210] sm:$0xff]  ;;  %v463_v63 = vld [vmem:[%s2183_s21 + $0x400] sm:$0xff] }
  0x2b   : > { %1926 = vmatprep.subr.bf16.mxu1 %v2039_v3 }
  0x2d   : > { %1834 = vmatpush1.bf16.msra.mxu0 %v1833_v61  ;;  %v345_v61 = vld [vmem:[%s2183_s21 + $0x50] sm:$0xff] }
  0x2e   : > { %1942 = vmatpush1.bf16.msra.mxu1 %v2257_v62  ;;  %1835 = vmatprep.subr.bf16.mxu0 %v2039_v3 }
  0x2f   : > { %1927 = vmatprep.subr.bf16.mxu1 %v2039_v3 }
  0x31   : > { %1837 = vmatpush1.bf16.msra.mxu0 %v1836_v4  ;;  %v393_v4 = vld [vmem:[%s2183_s21 + $0x1d0] sm:$0xff] }
  0x32   : > { %1943 = vmatpush1.bf16.msra.mxu1 %v2274_v5  ;;  %1838 = vmatprep.subr.bf16.mxu0 %v2039_v3 }
  0x33   : > { %1928 = vmatprep.subr.bf16.mxu1 %v2039_v3 }
  0x35   : > { %1840 = vmatpush1.bf16.msra.mxu0 %v1839_v11  ;;  %v355_v11 = vld [vmem:[%s2183_s21 + $0xa0] sm:$0xff] }
  0x36   : > { %1944 = vmatpush1.bf16.msra.mxu1 %v2291_v13  ;;  %1841 = vmatprep.subr.bf16.mxu0 %v2039_v3 }
  0x37   : > { %1929 = vmatprep.subr.bf16.mxu1 %v2039_v3 }
  0x39   : > { %1843 = vmatpush1.bf16.msra.mxu0 %v1842_v19  ;;  %v366_v19 = vld [vmem:[%s2183_s21 + $0xf8] sm:$0xff] }
  0x3a   : > { %1945 = vmatpush1.bf16.msra.mxu1 %v2308_v20  ;;  %1844 = vmatprep.subr.bf16.mxu0 %v2039_v3 }
  0x3b   : > { %1930 = vmatprep.subr.bf16.mxu1 %v2039_v3 }
  0x3d   : > { %1846 = vmatpush1.bf16.msra.mxu0 %v1845_v26  ;;  %v412_v26 = vld [vmem:[%s2183_s21 + $0x268] sm:$0xff] }
  0x3e   : > { %1946 = vmatpush1.bf16.msra.mxu1 %v2325_v27  ;;  %1847 = vmatprep.subr.bf16.mxu0 %v2039_v3 }
  0x3f   : > { %1931 = vmatprep.subr.bf16.mxu1 %v2039_v3 }
  0x41   : > { %1849 = vmatpush1.bf16.msra.mxu0 %v1848_v33  ;;  %v423_v33 = vld [vmem:[%s2183_s21 + $0x2c0] sm:$0xff] }
  0x42   : > { %1947 = vmatpush1.bf16.msra.mxu1 %v2342_v34  ;;  %1850 = vmatprep.subr.bf16.mxu0 %v2039_v3 }
  0x43   : > { %1932 = vmatprep.subr.bf16.mxu1 %v2039_v3 }
  0x45   : > { %1852 = vmatpush1.bf16.msra.mxu0 %v1851_v42  ;;  %v432_v42 = vld [vmem:[%s2183_s21 + $0x308] sm:$0xff] }
  0x46   : > { %1948 = vmatpush1.bf16.msra.mxu1 %v2365_v43  ;;  %1853 = vmatprep.subr.bf16.mxu0 %v2039_v3 }
  0x47   : > { %1902 = vmatprep.subr.bf16.mxu1 %v1901_v45 }
  0x48   : > { %729 = vmatmul.mubr.f32.vlgmr.msra.gmra.mrb[0].mxu0 %v335_v46  ;;  %v438_v46 = vld [vmem:[%s2183_s21 + $0x338] sm:$0xff] }
  0x49   : > { %994 = vmatmul.mubr.f32.vlgmr.msra.gmra.mrb[0].mxu1 %v377_v49  ;;  %1855 = vmatpush1.bf16.msra.mxu0 %v2100_v8  ;;  %v1909_v8 = vpack.c.bf16 %v564_v57, %v563_v55  ;;  %v443_v49 = vld [vmem:[%s2183_s21 + $0x360] sm:$0xff]  ;;  %v453_v57 = vld [vmem:[%s2183_s21 + $0x3b0] sm:$0xff] }
  0x4a   : > { %1904 = vmatpush3.bf16.msra.mxu1 %v1901_v45  ;;  %733 = vmatprep.mubr.f32.mxu0 %v341_v51  ;;  %v396_v45 = vld [vmem:[%s2183_s21 + $0x1e8] sm:$0xff]  ;;  %v442_v51 = vld [vmem:[%s2183_s21 + $0x358] sm:$0xff]  ;;  %v411_v55 = vld [vmem:[%s2183_s21 + $0x260] sm:$0xff] }
  0x4b   : > { %998 = vmatprep.mubr.f32.mxu1 %v383_v52  ;;  %1856 = vmatprep.subr.bf16.mxu0 %v2039_v3  ;;  %v406_v52 = vld [vmem:[%s2183_s21 + $0x238] sm:$0xff] }
  0x4c   : > { %734 = vmatmul.mubr.f32.gmra.mrb[2].mxu0 %v340_v54  ;;  %1906 = vmatprep.subr.bf16.mxu1 %v1905_v53  ;;  %v447_v54 = vld [vmem:[%s2183_s21 + $0x380] sm:$0xff] }
  0x4d   : > { %999 = vmatmul.mubr.f32.gmra.mrb[2].mxu1 %v382_v58  ;;  %738 = vmatprep.mubr.f32.mxu0 %v346_v59  ;;  %v452_v58 = vld [vmem:[%s2183_s21 + $0x3a8] sm:$0xff] }
  0x4e   : > { %1003 = vmatprep.mubr.f32.mxu1 %v388_v60  ;;  %1858 = vmatpush1.bf16.msra.mxu0 %v2111_v12  ;;  %v398_v12 = vld [vmem:[%s2183_s21 + $0x1f8] sm:$0xff]  ;;  %v416_v59 = vld [vmem:[%s2183_s21 + $0x288] sm:$0xff] }
  0x4f   : > { %1859 = vmatprep.subr.bf16.mxu0 %v2039_v3  ;;  %1908 = vmatpush3.bf16.msra.mxu1 %v1905_v53  ;;  %v448_v53 = vld [vmem:[%s2183_s21 + $0x388] sm:$0xff]  ;;  %v458_v60 = vld [vmem:[%s2183_s21 + $0x3d8] sm:$0xff] }
  0x50   : > { %739 = vmatmul.mubr.f32.gmra.mrb[4].mxu0 %v345_v61  ;;  %1910 = vmatprep.subr.bf16.mxu1 %v1909_v8  ;;  %v421_v61 = vld [vmem:[%s2183_s21 + $0x2b0] sm:$0xff] }
  0x51   : > { %1004 = vmatmul.mubr.f32.gmra.mrb[4].mxu1 %v387_v1  ;;  %743 = vmatprep.mubr.f32.mxu0 %v351_v2  ;;  %v468_v1 = vld [vmem:[%s2183_s21 + $0x428] sm:$0xff]  ;;  %v425_v2 = vld [vmem:[%s2183_s21 + $0x2d0] sm:$0xff] }
  0x52   : > { %1008 = vmatprep.mubr.f32.mxu1 %v393_v4  ;;  %1861 = vmatpush1.bf16.msra.mxu0 %v2128_v18  ;;  %v360_v18 = vld [vmem:[%s2183_s21 + $0xc8] sm:$0xff]  ;;  %v431_v4 = vld [vmem:[%s2183_s21 + $0x300] sm:$0xff] }
  0x53   : > { %1862 = vmatprep.subr.bf16.mxu0 %v2039_v3  ;;  %1912 = vmatpush3.bf16.msra.mxu1 %v1909_v8  ;;  %v457_v8 = vld [vmem:[%s2183_s21 + $0x3d0] sm:$0xff] }
  0x54   : > { %744 = vmatmul.mubr.f32.gmra.mrb[6].mxu0 %v350_v7  ;;  %1914 = vmatprep.subr.bf16.mxu1 %v1913_v6  ;;  %v430_v7 = vld [vmem:[%s2183_s21 + $0x2f8] sm:$0xff] }
  0x55   : > { %1009 = vmatmul.mubr.f32.gmra.mrb[6].mxu1 %v392_v9  ;;  %748 = vmatprep.mubr.f32.mxu0 %v356_v10  ;;  %v472_v9 = vld [vmem:[%s2183_s21 + $0x448] sm:$0xff] }
  0x56   : > { %1013 = vmatprep.mubr.f32.mxu1 %v398_v12  ;;  %1864 = vmatpush1.bf16.msra.mxu0 %v2147_v24  ;;  %v365_v24 = vld [vmem:[%s2183_s21 + $0xf0] sm:$0xff]  ;;  %v436_v10 = vld [vmem:[%s2183_s21 + $0x328] sm:$0xff]  ;;  %v478_v12 = vld [vmem:[%s2183_s21 + $0x478] sm:$0xff] }
  0x57   : > { %1865 = vmatprep.subr.bf16.mxu0 %v2039_v3  ;;  %1916 = vmatpush3.bf16.msra.mxu1 %v1913_v6  ;;  %v473_v6 = vld [vmem:[%s2183_s21 + $0x450] sm:$0xff] }
  0x58   : > { %749 = vmatmul.mubr.f32.gmra.mrb[8].mxu0 %v355_v11  ;;  %v435_v11 = vld [vmem:[%s2183_s21 + $0x320] sm:$0xff] }
  0x59   : > { %1014 = vmatmul.mubr.f32.gmra.mrb[8].mxu1 %v397_v14  ;;  %753 = vmatprep.mubr.f32.mxu0 %v361_v15  ;;  %v477_v14 = vld [vmem:[%s2183_s21 + $0x470] sm:$0xff] }
  0x5a   : > { %1018 = vmatprep.mubr.f32.mxu1 %v403_v16  ;;  %1867 = vmatpush1.bf16.msra.mxu0 %v2165_v30  ;;  %v370_v30 = vld [vmem:[%s2183_s21 + $0x118] sm:$0xff]  ;;  %v441_v15 = vld [vmem:[%s2183_s21 + $0x350] sm:$0xff]  ;;  %v483_v16 = vld [vmem:[%s2183_s21 + $0x4a0] sm:$0xff] }
  0x5b   : > { %1868 = vmatprep.subr.bf16.mxu0 %v2039_v3 }
  0x5c   : > { %754 = vmatmul.mubr.f32.gmra.mrb[10].mxu0 %v360_v18  ;;  %v440_v18 = vld [vmem:[%s2183_s21 + $0x348] sm:$0xff] }
  0x5d   : > { %1019 = vmatmul.mubr.f32.gmra.mrb[10].mxu1 %v402_v17  ;;  %758 = vmatprep.mubr.f32.mxu0 %v366_v19  ;;  %v482_v17 = vld [vmem:[%s2183_s21 + $0x498] sm:$0xff] }
  0x5e   : > { %1023 = vmatprep.mubr.f32.mxu1 %v408_v21  ;;  %1870 = vmatpush1.bf16.msra.mxu0 %v2187_v36  ;;  %v375_v36 = vld [vmem:[%s2183_s21 + $0x140] sm:$0xff]  ;;  %v446_v19 = vld [vmem:[%s2183_s21 + $0x378] sm:$0xff]  ;;  %v488_v21 = vld [vmem:[%s2183_s21 + $0x4c8] sm:$0xff] }
  0x5f   : > { %1871 = vmatprep.subr.bf16.mxu0 %v2039_v3 }
  0x60   : > { %759 = vmatmul.mubr.f32.gmra.mrb[12].mxu0 %v365_v24  ;;  %v445_v24 = vld [vmem:[%s2183_s21 + $0x370] sm:$0xff] }
  0x61   : > { %1024 = vmatmul.mubr.f32.gmra.mrb[12].mxu1 %v407_v22  ;;  %763 = vmatprep.mubr.f32.mxu0 %v371_v23  ;;  %v487_v22 = vld [vmem:[%s2183_s21 + $0x4c0] sm:$0xff] }
  0x62   : > { %1028 = vmatprep.mubr.f32.mxu1 %v413_v25  ;;  %1873 = vmatpush1.bf16.msra.mxu0 %v2206_v44  ;;  %v380_v44 = vld [vmem:[%s2183_s21 + $0x168] sm:$0xff]  ;;  %v451_v23 = vld [vmem:[%s2183_s21 + $0x3a0] sm:$0xff]  ;;  %v493_v25 = vld [vmem:[%s2183_s21 + $0x4f0] sm:$0xff] }
  0x63   : > { %1874 = vmatprep.subr.bf16.mxu0 %v2039_v3 }
  0x64   : > { %764 = vmatmul.mubr.f32.gmra.mrb[14].mxu0 %v370_v30  ;;  %v450_v30 = vld [vmem:[%s2183_s21 + $0x398] sm:$0xff] }
  0x65   : > { %1029 = vmatmul.mubr.f32.gmra.mrb[14].mxu1 %v412_v26  ;;  %768 = vmatprep.mubr.f32.mxu0 %v376_v28  ;;  %v492_v26 = vld [vmem:[%s2183_s21 + $0x4e8] sm:$0xff] }
  0x66   : > { %1033 = vmatprep.mubr.f32.mxu1 %v418_v29  ;;  %1876 = vmatpush1.bf16.msra.mxu0 %v2223_v50  ;;  %v385_v50 = vld [vmem:[%s2183_s21 + $0x190] sm:$0xff]  ;;  %v456_v28 = vld [vmem:[%s2183_s21 + $0x3c8] sm:$0xff]  ;;  %v339_v29 = vld [vmem:[%s2183_s21 + $0x20] sm:$0xff] }
  0x67   : > { %1877 = vmatprep.subr.bf16.mxu0 %v2039_v3 }
  0x68   : > { %769 = vmatmul.mubr.f32.gmra.mrb[16].mxu0 %v375_v36  ;;  %v455_v36 = vld [vmem:[%s2183_s21 + $0x3c0] sm:$0xff] }
  0x69   : > { %1034 = vmatmul.mubr.f32.gmra.mrb[16].mxu1 %v417_v31  ;;  %773 = vmatprep.mubr.f32.mxu0 %v381_v32  ;;  %v344_v31 = vld [vmem:[%s2183_s21 + $0x48] sm:$0xff]  ;;  %v461_v32 = vld [vmem:[%s2183_s21 + $0x3f0] sm:$0xff] }
  0x6a   : > { %1038 = vmatprep.mubr.f32.mxu1 %v423_v33  ;;  %1879 = vmatpush1.bf16.msra.mxu0 %v2240_v56  ;;  %v390_v56 = vld [vmem:[%s2183_s21 + $0x1b8] sm:$0xff]  ;;  %v349_v33 = vld [vmem:[%s2183_s21 + $0x70] sm:$0xff] }
  0x6b   : > { %1880 = vmatprep.subr.bf16.mxu0 %v2039_v3 }
  0x6c   : > { %774 = vmatmul.mubr.f32.gmra.mrb[18].mxu0 %v380_v44  ;;  %v460_v44 = vld [vmem:[%s2183_s21 + $0x3e8] sm:$0xff] }
  0x6d   : > { %1039 = vmatmul.mubr.f32.gmra.mrb[18].mxu1 %v422_v35  ;;  %778 = vmatprep.mubr.f32.mxu0 %v386_v37  ;;  %v354_v35 = vld [vmem:[%s2183_s21 + $0x98] sm:$0xff] }
  0x6e   : > { %1043 = vmatprep.mubr.f32.mxu1 %v428_v38  ;;  %1882 = vmatpush1.bf16.msra.mxu0 %v2257_v62  ;;  %v395_v62 = vld [vmem:[%s2183_s21 + $0x1e0] sm:$0xff]  ;;  %v466_v37 = vld [vmem:[%s2183_s21 + $0x418] sm:$0xff] }
  0x6f   : > { %1883 = vmatprep.subr.bf16.mxu0 %v2039_v3  ;;  %v359_v38 = vld [vmem:[%s2183_s21 + $0xc0] sm:$0xff] }
  0x70   : > { %779 = vmatmul.mubr.f32.gmra.mrb[20].mxu0 %v385_v50  ;;  %v465_v50 = vld [vmem:[%s2183_s21 + $0x410] sm:$0xff] }
  0x71   : > { %1044 = vmatmul.mubr.f32.gmra.mrb[20].mxu1 %v427_v39  ;;  %783 = vmatprep.mubr.f32.mxu0 %v391_v40  ;;  %v364_v39 = vld [vmem:[%s2183_s21 + $0xe8] sm:$0xff]  ;;  %v471_v40 = vld [vmem:[%s2183_s21 + $0x440] sm:$0xff] }
  0x72   : > { %1048 = vmatprep.mubr.f32.mxu1 %v433_v41  ;;  %1885 = vmatpush1.bf16.msra.mxu0 %v2274_v5  ;;  %v400_v5 = vld [vmem:[%s2183_s21 + $0x208] sm:$0xff]  ;;  %v369_v41 = vld [vmem:[%s2183_s21 + $0x110] sm:$0xff] }
  0x73   : > { %1886 = vmatprep.subr.bf16.mxu0 %v2039_v3 }
  0x74   : > { %784 = vmatmul.mubr.f32.gmra.mrb[22].mxu0 %v390_v56  ;;  %v470_v56 = vld [vmem:[%s2183_s21 + $0x438] sm:$0xff] }
  0x75   : > { %1049 = vmatmul.mubr.f32.gmra.mrb[22].mxu1 %v432_v42  ;;  %788 = vmatprep.mubr.f32.mxu0 %v396_v45  ;;  %v374_v42 = vld [vmem:[%s2183_s21 + $0x138] sm:$0xff]  ;;  %v476_v45 = vld [vmem:[%s2183_s21 + $0x468] sm:$0xff] }
  0x76   : > { %1053 = vmatprep.mubr.f32.mxu1 %v438_v46  ;;  %1888 = vmatpush1.bf16.msra.mxu0 %v2291_v13  ;;  %v405_v13 = vld [vmem:[%s2183_s21 + $0x230] sm:$0xff]  ;;  %v379_v46 = vld [vmem:[%s2183_s21 + $0x160] sm:$0xff] }
  0x77   : > { %1889 = vmatprep.subr.bf16.mxu0 %v2039_v3 }
  0x78   : > { %789 = vmatmul.mubr.f32.gmra.mrb[24].mxu0 %v395_v62  ;;  %v475_v62 = vld [vmem:[%s2183_s21 + $0x460] sm:$0xff] }
  0x79   : > { %1054 = vmatmul.mubr.f32.gmra.mrb[24].mxu1 %v437_v47  ;;  %793 = vmatprep.mubr.f32.mxu0 %v401_v48  ;;  %v384_v47 = vld [vmem:[%s2183_s21 + $0x188] sm:$0xff]  ;;  %v481_v48 = vld [vmem:[%s2183_s21 + $0x490] sm:$0xff] }
  0x7a   : > { %1058 = vmatprep.mubr.f32.mxu1 %v443_v49  ;;  %1891 = vmatpush1.bf16.msra.mxu0 %v2308_v20  ;;  %v410_v20 = vld [vmem:[%s2183_s21 + $0x258] sm:$0xff]  ;;  %v389_v49 = vld [vmem:[%s2183_s21 + $0x1b0] sm:$0xff] }
  0x7b   : > { %1892 = vmatprep.subr.bf16.mxu0 %v2039_v3 }
  0x7c   : > { %794 = vmatmul.mubr.f32.gmra.mrb[26].mxu0 %v400_v5  ;;  %v480_v5 = vld [vmem:[%s2183_s21 + $0x488] sm:$0xff] }
  0x7d   : > { %1059 = vmatmul.mubr.f32.gmra.mrb[26].mxu1 %v442_v51  ;;  %798 = vmatprep.mubr.f32.mxu0 %v406_v52  ;;  %v394_v51 = vld [vmem:[%s2183_s21 + $0x1d8] sm:$0xff] }
  0x7e   : > { %1063 = vmatprep.mubr.f32.mxu1 %v448_v53  ;;  %1894 = vmatpush1.bf16.msra.mxu0 %v2325_v27  ;;  %v415_v27 = vld [vmem:[%s2183_s21 + $0x280] sm:$0xff]  ;;  %v486_v52 = vld [vmem:[%s2183_s21 + $0x4b8] sm:$0xff] }
  0x7f   : > { %1895 = vmatprep.subr.bf16.mxu0 %v2039_v3  ;;  %v399_v53 = vld [vmem:[%s2183_s21 + $0x200] sm:$0xff] }
  0x80   : > { %799 = vmatmul.mubr.f32.gmra.mrb[28].mxu0 %v405_v13  ;;  %v485_v13 = vld [vmem:[%s2183_s21 + $0x4b0] sm:$0xff] }
  0x81   : > { %1064 = vmatmul.mubr.f32.gmra.mrb[28].mxu1 %v447_v54  ;;  %803 = vmatprep.mubr.f32.mxu0 %v411_v55  ;;  %v404_v54 = vld [vmem:[%s2183_s21 + $0x228] sm:$0xff]  ;;  %v491_v55 = vld [vmem:[%s2183_s21 + $0x4e0] sm:$0xff] }
  0x82   : > { %1068 = vmatprep.mubr.f32.mxu1 %v453_v57  ;;  %1897 = vmatpush1.bf16.msra.mxu0 %v2342_v34  ;;  %v462_v34 = vld [vmem:[%s2183_s21 + $0x3f8] sm:$0xff]  ;;  %v409_v57 = vld [vmem:[%s2183_s21 + $0x250] sm:$0xff] }
  0x83   : > { %1898 = vmatprep.subr.bf16.mxu0 %v2039_v3  ;;  %v420_v3 = vld [vmem:[%s2183_s21 + $0x2a8] sm:$0xff] }
  0x84   : > { %804 = vmatmul.mubr.f32.gmra.mrb[30].mxu0 %v410_v20  ;;  %v490_v20 = vld [vmem:[%s2183_s21 + $0x4d8] sm:$0xff] }
  0x85   : > { %1069 = vmatmul.mubr.f32.gmra.mrb[30].mxu1 %v452_v58  ;;  %808 = vmatprep.mubr.f32.mxu0 %v416_v59  ;;  %v414_v58 = vld [vmem:[%s2183_s21 + $0x278] sm:$0xff] }
  0x86   : > { %1073 = vmatprep.mubr.f32.mxu1 %v458_v60  ;;  %1900 = vmatpush1.bf16.msra.mxu0 %v2365_v43  ;;  %v467_v43 = vld [vmem:[%s2183_s21 + $0x420] sm:$0xff]  ;;  %v338_v59 = vld [vmem:[%s2183_s21 + $0x18] sm:$0xff] }
  0x87   : > { %v419_v60 = vld [vmem:[%s2183_s21 + $0x2a0] sm:$0xff] }
  0x88   : > { %809 = vmatmul.mubr.f32.gmra.mrb[32].mxu0 %v415_v27  ;;  %v337_v27 = vld [vmem:[%s2183_s21 + $0x10] sm:$0xff] }
  0x89   : > { %1074 = vmatmul.mubr.f32.gmra.mrb[32].mxu1 %v457_v8  ;;  %813 = vmatprep.mubr.f32.mxu0 %v421_v61  ;;  %v424_v8 = vld [vmem:[%s2183_s21 + $0x2c8] sm:$0xff]  ;;  %v343_v61 = vld [vmem:[%s2183_s21 + $0x40] sm:$0xff] }
  0x8a   : > { %1078 = vmatprep.mubr.f32.mxu1 %v463_v63  ;;  %v429_v63 = vld [vmem:[%s2183_s21 + $0x2f0] sm:$0xff] }
  0x8c   : > { %814 = vmatmul.mubr.f32.gmra.mrb[34].mxu0 %v420_v3  ;;  %v342_v3 = vld [vmem:[%s2183_s21 + $0x38] sm:$0xff] }
  0x8d   : > { %1079 = vmatmul.mubr.f32.gmra.mrb[34].mxu1 %v462_v34  ;;  %818 = vmatprep.mubr.f32.mxu0 %v426_v0  ;;  %v434_v34 = vld [vmem:[%s2183_s21 + $0x318] sm:$0xff]  ;;  %v348_v0 = vld [vmem:[%s2183_s21 + $0x68] sm:$0xff] }
  0x8e   : > { %1083 = vmatprep.mubr.f32.mxu1 %v468_v1  ;;  %v439_v1 = vld [vmem:[%s2183_s21 + $0x340] sm:$0xff] }
  0x90   : > { %819 = vmatmul.mubr.f32.gmra.mrb[36].mxu0 %v425_v2  ;;  %v347_v2 = vld [vmem:[%s2183_s21 + $0x60] sm:$0xff] }
  0x91   : > { %1084 = vmatmul.mubr.f32.gmra.mrb[36].mxu1 %v467_v43  ;;  %823 = vmatprep.mubr.f32.mxu0 %v431_v4  ;;  %v444_v43 = vld [vmem:[%s2183_s21 + $0x368] sm:$0xff]  ;;  %v353_v4 = vld [vmem:[%s2183_s21 + $0x90] sm:$0xff] }
  0x92   : > { %1088 = vmatprep.mubr.f32.mxu1 %v473_v6  ;;  %v449_v6 = vld [vmem:[%s2183_s21 + $0x390] sm:$0xff] }
  0x94   : > { %824 = vmatmul.mubr.f32.gmra.mrb[38].mxu0 %v430_v7  ;;  %v352_v7 = vld [vmem:[%s2183_s21 + $0x88] sm:$0xff] }
  0x95   : > { %1089 = vmatmul.mubr.f32.gmra.mrb[38].mxu1 %v472_v9  ;;  %828 = vmatprep.mubr.f32.mxu0 %v436_v10  ;;  %v454_v9 = vld [vmem:[%s2183_s21 + $0x3b8] sm:$0xff] }
  0x96   : > { %1093 = vmatprep.mubr.f32.mxu1 %v478_v12  ;;  %v358_v10 = vld [vmem:[%s2183_s21 + $0xb8] sm:$0xff]  ;;  %v459_v12 = vld [vmem:[%s2183_s21 + $0x3e0] sm:$0xff] }
  0x98   : > { %829 = vmatmul.mubr.f32.gmra.mrb[40].mxu0 %v435_v11  ;;  %v357_v11 = vld [vmem:[%s2183_s21 + $0xb0] sm:$0xff] }
  0x99   : > { %1094 = vmatmul.mubr.f32.gmra.mrb[40].mxu1 %v477_v14  ;;  %833 = vmatprep.mubr.f32.mxu0 %v441_v15  ;;  %v464_v14 = vld [vmem:[%s2183_s21 + $0x408] sm:$0xff]  ;;  %v363_v15 = vld [vmem:[%s2183_s21 + $0xe0] sm:$0xff] }
  0x9a   : > { %1098 = vmatprep.mubr.f32.mxu1 %v483_v16  ;;  %v469_v16 = vld [vmem:[%s2183_s21 + $0x430] sm:$0xff] }
  0x9c   : > { %834 = vmatmul.mubr.f32.gmra.mrb[42].mxu0 %v440_v18  ;;  %v362_v18 = vld [vmem:[%s2183_s21 + $0xd8] sm:$0xff] }
  0x9d   : > { %1099 = vmatmul.mubr.f32.gmra.mrb[42].mxu1 %v482_v17  ;;  %838 = vmatprep.mubr.f32.mxu0 %v446_v19  ;;  %v474_v17 = vld [vmem:[%s2183_s21 + $0x458] sm:$0xff]  ;;  %v368_v19 = vld [vmem:[%s2183_s21 + $0x108] sm:$0xff] }
  0x9e   : > { %1103 = vmatprep.mubr.f32.mxu1 %v488_v21  ;;  %v479_v21 = vld [vmem:[%s2183_s21 + $0x480] sm:$0xff] }
  0xa0   : > { %839 = vmatmul.mubr.f32.gmra.mrb[44].mxu0 %v445_v24  ;;  %v367_v24 = vld [vmem:[%s2183_s21 + $0x100] sm:$0xff] }
  0xa1   : > { %1104 = vmatmul.mubr.f32.gmra.mrb[44].mxu1 %v487_v22  ;;  %843 = vmatprep.mubr.f32.mxu0 %v451_v23  ;;  %v484_v22 = vld [vmem:[%s2183_s21 + $0x4a8] sm:$0xff]  ;;  %v373_v23 = vld [vmem:[%s2183_s21 + $0x130] sm:$0xff] }
  0xa2   : > { %1108 = vmatprep.mubr.f32.mxu1 %v493_v25  ;;  %v489_v25 = vld [vmem:[%s2183_s21 + $0x4d0] sm:$0xff] }
  0xa4   : > { %844 = vmatmul.mubr.f32.gmra.mrb[46].mxu0 %v450_v30  ;;  %v372_v30 = vld [vmem:[%s2183_s21 + $0x128] sm:$0xff] }
  0xa5   : > { %1109 = vmatmul.mubr.f32.gmra.mrb[46].mxu1 %v492_v26  ;;  %848 = vmatprep.mubr.f32.mxu0 %v456_v28  ;;  %v494_v26 = vld [vmem:[%s2183_s21 + $0x4f8] sm:$0xff] }
  0xa6   : > { %1757 = vmatprep.mubr.msk.f32.mxu1 %vm567_vm0, %v339_v29 }
  0xa8   : > { %849 = vmatmul.mubr.f32.gmra.mrb[48].mxu0 %v455_v36 }
  0xa9   : > { %1758 = vmatmul.mubr.msk.f32.vlgmr.msra.gmra.mrb[48].mxu1 %vm567_vm0, %v344_v31  ;;  %853 = vmatprep.mubr.f32.mxu0 %v461_v32 }
  0xaa   : > { %1760 = vmatprep.mubr.msk.f32.mxu1 %vm567_vm0, %v349_v33 }
  0xac   : > { %854 = vmatmul.mubr.f32.gmra.mrb[50].mxu0 %v460_v44 }
  0xad   : > { %1761 = vmatmul.mubr.msk.f32.gmra.mrb[50].mxu1 %vm567_vm0, %v354_v35  ;;  %858 = vmatprep.mubr.f32.mxu0 %v466_v37 }
  0xae   : > { %1763 = vmatprep.mubr.msk.f32.mxu1 %vm567_vm0, %v359_v38 }
  0xb0   : > { %859 = vmatmul.mubr.f32.gmra.mrb[52].mxu0 %v465_v50 }
  0xb1   : > { %1764 = vmatmul.mubr.msk.f32.gmra.mrb[52].mxu1 %vm567_vm0, %v364_v39  ;;  %863 = vmatprep.mubr.f32.mxu0 %v471_v40 }
  0xb2   : > { %1766 = vmatprep.mubr.msk.f32.mxu1 %vm567_vm0, %v369_v41 }
  0xb4   : > { %864 = vmatmul.mubr.f32.gmra.mrb[54].mxu0 %v470_v56 }
  0xb5   : > { %1767 = vmatmul.mubr.msk.f32.gmra.mrb[54].mxu1 %vm567_vm0, %v374_v42  ;;  %868 = vmatprep.mubr.f32.mxu0 %v476_v45 }
  0xb6   : > { %1769 = vmatprep.mubr.msk.f32.mxu1 %vm567_vm0, %v379_v46 }
  0xb8   : > { %869 = vmatmul.mubr.f32.gmra.mrb[56].mxu0 %v475_v62 }
  0xb9   : > { %1770 = vmatmul.mubr.msk.f32.gmra.mrb[56].mxu1 %vm567_vm0, %v384_v47  ;;  %873 = vmatprep.mubr.f32.mxu0 %v481_v48 }
  0xba   : > { %1772 = vmatprep.mubr.msk.f32.mxu1 %vm567_vm0, %v389_v49 }
  0xbc   : > { %874 = vmatmul.mubr.f32.gmra.mrb[58].mxu0 %v480_v5 }
  0xbd   : > { %1773 = vmatmul.mubr.msk.f32.gmra.mrb[58].mxu1 %vm567_vm0, %v394_v51  ;;  %878 = vmatprep.mubr.f32.mxu0 %v486_v52 }
  0xbe   : > { %1775 = vmatprep.mubr.msk.f32.mxu1 %vm567_vm0, %v399_v53 }
  0xc0   : > { %879 = vmatmul.mubr.f32.gmra.mrb[60].mxu0 %v485_v13 }
  0xc1   : > { %1776 = vmatmul.mubr.msk.f32.gmra.mrb[60].mxu1 %vm567_vm0, %v404_v54  ;;  %883 = vmatprep.mubr.f32.mxu0 %v491_v55 }
  0xc2   : > { %1778 = vmatprep.mubr.msk.f32.mxu1 %vm567_vm0, %v409_v57 }
  0xc4   : > { %884 = vmatmul.mubr.f32.gmra.mrb[62].mxu0 %v490_v20 }
  0xc5   : > { %1779 = vmatmul.mubr.msk.f32.gmra.mrb[62].mxu1 %vm567_vm0, %v414_v58  ;;  %953 = vmatprep.mubr.f32.mxu0 %v338_v59 }
  0xc6   : > { %1781 = vmatprep.mubr.msk.f32.mxu1 %vm567_vm0, %v419_v60 }
  0xc8   : > { %954 = vmatmul.mubr.f32.vlgmr.msra.gmra.mrb[0].mxu0 %v337_v27 }
  0xc9   : > { %1782 = vmatmul.mubr.msk.f32.gmra.mrb[64].mxu1 %vm567_vm0, %v424_v8  ;;  %958 = vmatprep.mubr.f32.mxu0 %v343_v61 }
  0xca   : > { %1784 = vmatprep.mubr.msk.f32.mxu1 %vm567_vm0, %v429_v63 }
  0xcc   : > { %959 = vmatmul.mubr.f32.gmra.mrb[2].mxu0 %v342_v3 }
  0xcd   : > { %1785 = vmatmul.mubr.msk.f32.gmra.mrb[66].mxu1 %vm567_vm0, %v434_v34  ;;  %963 = vmatprep.mubr.f32.mxu0 %v348_v0 }
  0xce   : > { %1787 = vmatprep.mubr.msk.f32.mxu1 %vm567_vm0, %v439_v1 }
  0xd0   : > { %964 = vmatmul.mubr.f32.gmra.mrb[4].mxu0 %v347_v2 }
  0xd1   : > { %1788 = vmatmul.mubr.msk.f32.gmra.mrb[68].mxu1 %vm567_vm0, %v444_v43  ;;  %968 = vmatprep.mubr.f32.mxu0 %v353_v4 }
  0xd2   : > { %1790 = vmatprep.mubr.msk.f32.mxu1 %vm567_vm0, %v449_v6 }
  0xd4   : > { %969 = vmatmul.mubr.f32.gmra.mrb[6].mxu0 %v352_v7 }
  0xd5   : > { %1791 = vmatmul.mubr.msk.f32.gmra.mrb[70].mxu1 %vm567_vm0, %v454_v9  ;;  %973 = vmatprep.mubr.f32.mxu0 %v358_v10 }
  0xd6   : > { %1793 = vmatprep.mubr.msk.f32.mxu1 %vm567_vm0, %v459_v12 }
  0xd8   : > { %974 = vmatmul.mubr.f32.gmra.mrb[8].mxu0 %v357_v11 }
  0xd9   : > { %1794 = vmatmul.mubr.msk.f32.gmra.mrb[72].mxu1 %vm567_vm0, %v464_v14  ;;  %978 = vmatprep.mubr.f32.mxu0 %v363_v15 }
  0xda   : > { %1796 = vmatprep.mubr.msk.f32.mxu1 %vm567_vm0, %v469_v16 }
  0xdc   : > { %979 = vmatmul.mubr.f32.gmra.mrb[10].mxu0 %v362_v18 }
  0xdd   : > { %1797 = vmatmul.mubr.msk.f32.gmra.mrb[74].mxu1 %vm567_vm0, %v474_v17  ;;  %983 = vmatprep.mubr.f32.mxu0 %v368_v19 }
  0xde   : > { %1799 = vmatprep.mubr.msk.f32.mxu1 %vm567_vm0, %v479_v21 }
  0xe0   : > { %984 = vmatmul.mubr.f32.gmra.mrb[12].mxu0 %v367_v24 }
  0xe1   : > { %1800 = vmatmul.mubr.msk.f32.gmra.mrb[76].mxu1 %vm567_vm0, %v484_v22  ;;  %988 = vmatprep.mubr.f32.mxu0 %v373_v23 }
  0xe2   : > { %1802 = vmatprep.mubr.msk.f32.mxu1 %vm567_vm0, %v489_v25 }
  0xe4   : > { %989 = vmatmul.mubr.f32.gmra.mrb[14].mxu0 %v372_v30 }
  0xe5   : > { %1803 = vmatmul.mubr.msk.f32.gmra.mrb[78].mxu1 %vm567_vm0, %v494_v26 }
 0x11c   : > { %v995_v28 = vpop.f32.mrb[0].mxu1 }
 0x11d   : > { %v997_v29 = vpop.f32.mrb[1].mxu1 }
 0x120   : > { %v1000_v36 = vpop.f32.mrb[2].mxu1 }
 0x121   : > { %v1002_v31 = vpop.f32.mrb[3].mxu1 }
 0x124   : > { %v1005_v32 = vpop.f32.mrb[4].mxu1 }
 0x125   : > { %v1007_v33 = vpop.f32.mrb[5].mxu1 }
 0x128   : > { %v1010_v44 = vpop.f32.mrb[6].mxu1 }
 0x129   : > { %v1012_v35 = vpop.f32.mrb[7].mxu1 }
 0x12c   : > { %v1015_v37 = vpop.f32.mrb[8].mxu1 }
 0x12d   : > { %v1017_v38 = vpop.f32.mrb[9].mxu1 }
 0x130   : > { %v1020_v50 = vpop.f32.mrb[10].mxu1 }
 0x131   : > { %v1022_v39 = vpop.f32.mrb[11].mxu1 }
 0x134   : > { %v1025_v40 = vpop.f32.mrb[12].mxu1 }
 0x135   : > { %v1027_v41 = vpop.f32.mrb[13].mxu1 }
 0x138   : > { %v1030_v56 = vpop.f32.mrb[14].mxu1 }
 0x139   : > { %v1032_v42 = vpop.f32.mrb[15].mxu1 }
 0x13b   : > { %v770_v45 = vpop.f32.mrb[16].mxu0 }
 0x13c   : > { %v2609_v46 = vadd.f32 %v995_v28, %v770_v45  ;;  %v1035_v62 = vpop.f32.mrb[16].mxu1  ;;  %v772_v47 = vpop.f32.mrb[17].mxu0 }
 0x13d   : > { %v1037_v48 = vpop.f32.mrb[17].mxu1 }
 0x13f   : > { %v775_v49 = vpop.f32.mrb[18].mxu0 }
 0x140   : > { %v2611_v5 = vadd.f32 %v1000_v36, %v775_v49  ;;  %v1040_v51 = vpop.f32.mrb[18].mxu1  ;;  %v777_v52 = vpop.f32.mrb[19].mxu0 }
 0x141   : > { %v1042_v53 = vpop.f32.mrb[19].mxu1 }
 0x143   : > { %v780_v13 = vpop.f32.mrb[20].mxu0 }
 0x144   : > { %v2613_v54 = vadd.f32 %v1005_v32, %v780_v13  ;;  %v1045_v55 = vpop.f32.mrb[20].mxu1  ;;  %v782_v57 = vpop.f32.mrb[21].mxu0 }
 0x145   : > { %v1047_v20 = vpop.f32.mrb[21].mxu1 }
 0x147   : > { %v785_v58 = vpop.f32.mrb[22].mxu0 }
 0x148   : > { %v2615_v59 = vadd.f32 %v1010_v44, %v785_v58  ;;  %v1050_v60 = vpop.f32.mrb[22].mxu1  ;;  %v787_v27 = vpop.f32.mrb[23].mxu0 }
 0x149   : > { %v1052_v8 = vpop.f32.mrb[23].mxu1 }
 0x14b   : > { %v790_v61 = vpop.f32.mrb[24].mxu0 }
 0x14c   : > { %v2617_v63 = vadd.f32 %v1015_v37, %v790_v61  ;;  %v1055_v3 = vpop.f32.mrb[24].mxu1  ;;  %v792_v34 = vpop.f32.mrb[25].mxu0 }
 0x14d   : > { %v1057_v0 = vpop.f32.mrb[25].mxu1 }
 0x14f   : > { %v795_v1 = vpop.f32.mrb[26].mxu0 }
 0x150   : > { %v2619_v2 = vadd.f32 %v1020_v50, %v795_v1  ;;  %v1060_v43 = vpop.f32.mrb[26].mxu1  ;;  %v797_v4 = vpop.f32.mrb[27].mxu0 }
 0x151   : > { %v1062_v6 = vpop.f32.mrb[27].mxu1 }
 0x153   : > { %v800_v7 = vpop.f32.mrb[28].mxu0 }
 0x154   : > { %v2621_v9 = vadd.f32 %v1025_v40, %v800_v7  ;;  %v1065_v10 = vpop.f32.mrb[28].mxu1  ;;  %v802_v12 = vpop.f32.mrb[29].mxu0 }
 0x155   : > { %v1067_v11 = vpop.f32.mrb[29].mxu1 }
 0x157   : > { %v805_v14 = vpop.f32.mrb[30].mxu0 }
 0x158   : > { %v2623_v15 = vadd.f32 %v1030_v56, %v805_v14  ;;  %v1070_v16 = vpop.f32.mrb[30].mxu1  ;;  %v807_v18 = vpop.f32.mrb[31].mxu0 }
 0x159   : > { %v1072_v17 = vpop.f32.mrb[31].mxu1 }
 0x15b   : > { %v810_v19 = vpop.f32.mrb[32].mxu0 }
 0x15c   : > { %v2625_v21 = vadd.f32 %v1035_v62, %v810_v19  ;;  %v1075_v24 = vpop.f32.mrb[32].mxu1  ;;  %v812_v22 = vpop.f32.mrb[33].mxu0 }
 0x15d   : > { %v1077_v23 = vpop.f32.mrb[33].mxu1 }
 0x15f   : > { %v815_v25 = vpop.f32.mrb[34].mxu0 }
 0x160   : > { %v2627_v30 = vadd.f32 %v1040_v51, %v815_v25  ;;  %v1080_v26 = vpop.f32.mrb[34].mxu1  ;;  %v817_v28 = vpop.f32.mrb[35].mxu0 }
 0x161   : > { %v1082_v29 = vpop.f32.mrb[35].mxu1 }
 0x162   : > { %v2670_v29 = vld [vmem:[%s2791_s2] ss:$0 sm:$0xff] }
 0x163   : > { %v820_v36 = vpop.f32.mrb[36].mxu0 }
 0x164   : > { %v2629_v31 = vadd.f32 %v1045_v55, %v820_v36  ;;  %v1085_v32 = vpop.f32.mrb[36].mxu1  ;;  %v822_v33 = vpop.f32.mrb[37].mxu0 }
 0x165   : > { %v1087_v44 = vpop.f32.mrb[37].mxu1 }
 0x167   : > { %v825_v35 = vpop.f32.mrb[38].mxu0 }
 0x168   : > { %v2631_v37 = vadd.f32 %v1050_v60, %v825_v35  ;;  %v1090_v38 = vpop.f32.mrb[38].mxu1  ;;  %v827_v50 = vpop.f32.mrb[39].mxu0 }
 0x169   : > { %v1092_v39 = vpop.f32.mrb[39].mxu1 }
 0x16b   : > { %v830_v40 = vpop.f32.mrb[40].mxu0 }
 0x16c   : > { %v2633_v41 = vadd.f32 %v1055_v3, %v830_v40  ;;  %v1095_v56 = vpop.f32.mrb[40].mxu1  ;;  %v832_v42 = vpop.f32.mrb[41].mxu0 }
 0x16d   : > { %v1097_v45 = vpop.f32.mrb[41].mxu1 }
 0x16f   : > { %v835_v62 = vpop.f32.mrb[42].mxu0 }
 0x170   : > { %v2635_v47 = vadd.f32 %v1060_v43, %v835_v62  ;;  %v1100_v48 = vpop.f32.mrb[42].mxu1  ;;  %v837_v49 = vpop.f32.mrb[43].mxu0 }
 0x171   : > { %v1102_v51 = vpop.f32.mrb[43].mxu1 }
 0x173   : > { %v840_v52 = vpop.f32.mrb[44].mxu0 }
 0x174   : > { %v2637_v53 = vadd.f32 %v1065_v10, %v840_v52  ;;  %v1105_v13 = vpop.f32.mrb[44].mxu1  ;;  %v842_v55 = vpop.f32.mrb[45].mxu0 }
 0x175   : > { %v1107_v57 = vpop.f32.mrb[45].mxu1 }
 0x177   : > { %v845_v20 = vpop.f32.mrb[46].mxu0 }
 0x178   : > { %v2639_v58 = vadd.f32 %v1070_v16, %v845_v20  ;;  %v1110_v60 = vpop.f32.mrb[46].mxu1  ;;  %v847_v27 = vpop.f32.mrb[47].mxu0 }
 0x179   : > { %v1112_v8 = vpop.f32.mrb[47].mxu1 }
 0x17b   : > { %v850_v61 = vpop.f32.mrb[48].mxu0 }
 0x17c   : > { %v2641_v3 = vadd.f32 %v1075_v24, %v850_v61  ;;  %v2643_v34 = vpop.f32.mrb[48].mxu1  ;;  %v852_v0 = vpop.f32.mrb[49].mxu0 }
 0x17d   : > { %v2645_v1 = vpop.f32.mrb[49].mxu1 }
 0x17f   : > { %v855_v43 = vpop.f32.mrb[50].mxu0 }
 0x180   : > { %v2647_v4 = vadd.f32 %v1080_v26, %v855_v43  ;;  %v2649_v6 = vpop.f32.mrb[50].mxu1  ;;  %v857_v7 = vpop.f32.mrb[51].mxu0 }
 0x181   : > { %v2651_v10 = vpop.f32.mrb[51].mxu1 }
 0x183   : > { %v860_v12 = vpop.f32.mrb[52].mxu0 }
 0x184   : > { %v2653_v11 = vadd.f32 %v1085_v32, %v860_v12  ;;  %v2655_v14 = vpop.f32.mrb[52].mxu1  ;;  %v862_v16 = vpop.f32.mrb[53].mxu0 }
 0x185   : > { %v2657_v18 = vpop.f32.mrb[53].mxu1 }
 0x187   : > { %v865_v17 = vpop.f32.mrb[54].mxu0 }
 0x188   : > { %v2659_v19 = vadd.f32 %v1090_v38, %v865_v17  ;;  %v2661_v24 = vpop.f32.mrb[54].mxu1  ;;  %v867_v22 = vpop.f32.mrb[55].mxu0 }
 0x189   : > { %v2663_v23 = vpop.f32.mrb[55].mxu1 }
 0x18b   : > { %v870_v25 = vpop.f32.mrb[56].mxu0 }
 0x18c   : > { %v2665_v26 = vadd.f32 %v1095_v56, %v870_v25  ;;  %v1771_v28 = vpop.f32.mrb[56].mxu1  ;;  %v872_v36 = vpop.f32.mrb[57].mxu0 }
 0x18d   : > { %v1226_v32 = vadd.f32 %v1771_v28, %v2611_v5  ;;  %v1220_v33 = vpop.f32.mrb[57].mxu1 }
 0x18e   : > { %v1221_v44 = vadd.f32 %v1220_v33, %v2609_v46 }
 0x18f   : > { %v1454_v35 = vadd.f32 %v2670_v29, %v1226_v32  ;;  %v875_v38 = vpop.f32.mrb[58].mxu0 }
 0x190   : > { %v1453_v50 = vadd.f32 %v2670_v29, %v1221_v44  ;;  %v2682_v39 = vadd.f32 %v1100_v48, %v875_v38  ;;  %v1774_v40 = vpop.f32.mrb[58].mxu1  ;;  %v877_v56 = vpop.f32.mrb[59].mxu0 }
 0x191   : > { %v1486_v5 = vmax.f32 %v1454_v35, 0.0  ;;  %v1236_v42 = vadd.f32 %v1774_v40, %v2615_v59  ;;  %v1230_v46 = vpop.f32.mrb[59].mxu1 }
 0x192   : > { %v1485_v45 = vmax.f32 %v1453_v50, 0.0  ;;  %v1231_v62 = vadd.f32 %v1230_v46, %v2613_v54 }
 0x193   : > { %1518 = vst [vmem:[%s2679_s8 + $0x48] sm:$0xff] %v1486_v5  ;;  %v1456_v49 = vadd.f32 %v2670_v29, %v1236_v42  ;;  %v880_v51 = vpop.f32.mrb[60].mxu0 }
 0x194   : > { %1517 = vst [vmem:[%s2679_s8 + $0x40] sm:$0xff] %v1485_v45  ;;  %v1455_v52 = vadd.f32 %v2670_v29, %v1231_v62  ;;  %v2690_v48 = vadd.f32 %v1105_v13, %v880_v51  ;;  %v1777_v55 = vpop.f32.mrb[60].mxu1  ;;  %v882_v57 = vpop.f32.mrb[61].mxu0 }
 0x195   : > { %v1488_v20 = vmax.f32 %v1456_v49, 0.0  ;;  %v1246_v59 = vadd.f32 %v1777_v55, %v2619_v2  ;;  %v1240_v27 = vpop.f32.mrb[61].mxu1 }
 0x196   : > { %v1487_v8 = vmax.f32 %v1455_v52, 0.0  ;;  %v1241_v54 = vadd.f32 %v1240_v27, %v2617_v63 }
 0x197   : > { %1520 = vst [vmem:[%s2679_s8 + $0x58] sm:$0xff] %v1488_v20  ;;  %v1458_v61 = vadd.f32 %v2670_v29, %v1246_v59  ;;  %v885_v0 = vpop.f32.mrb[62].mxu0 }
 0x198   : > { %1519 = vst [vmem:[%s2679_s8 + $0x50] sm:$0xff] %v1487_v8  ;;  %v1457_v43 = vadd.f32 %v2670_v29, %v1241_v54  ;;  %v2698_v13 = vadd.f32 %v1110_v60, %v885_v0  ;;  %v1780_v7 = vpop.f32.mrb[62].mxu1  ;;  %v887_v12 = vpop.f32.mrb[63].mxu0 }
 0x199   : > { %v1490_v16 = vmax.f32 %v1458_v61, 0.0  ;;  %v1256_v2 = vadd.f32 %v1780_v7, %v2623_v15  ;;  %v1250_v17 = vpop.f32.mrb[63].mxu1 }
 0x19a   : > { %v1489_v22 = vmax.f32 %v1457_v43, 0.0  ;;  %v1251_v63 = vadd.f32 %v1250_v17, %v2621_v9 }
 0x19b   : > { %1522 = vst [vmem:[%s2679_s8 + $0x68] sm:$0xff] %v1490_v16  ;;  %v1460_v25 = vadd.f32 %v2670_v29, %v1256_v2  ;;  %v955_v28 = vpop.f32.mrb[0].mxu0 }
 0x19c   : > { %1521 = vst [vmem:[%s2679_s8 + $0x60] sm:$0xff] %v1489_v22  ;;  %v1459_v36 = vadd.f32 %v2670_v29, %v1251_v63  ;;  %v1181_v60 = vadd.f32 %v2645_v1, %v955_v28  ;;  %v1783_v32 = vpop.f32.mrb[64].mxu1  ;;  %v957_v33 = vpop.f32.mrb[1].mxu0 }
 0x19d   : > { %v1492_v44 = vmax.f32 %v1460_v25, 0.0  ;;  %v1266_v15 = vadd.f32 %v1783_v32, %v2627_v30  ;;  %v1260_v35 = vpop.f32.mrb[65].mxu1 }
 0x19e   : > { %v1491_v38 = vmax.f32 %v1459_v36, 0.0  ;;  %v1445_v9 = vadd.f32 %v2670_v29, %v1181_v60  ;;  %v1261_v50 = vadd.f32 %v1260_v35, %v2625_v21 }
 0x19f   : > { %1524 = vst [vmem:[%s2679_s8 + $0x78] sm:$0xff] %v1492_v44  ;;  %v1462_v40 = vadd.f32 %v2670_v29, %v1266_v15  ;;  %v960_v56 = vpop.f32.mrb[2].mxu0 }
 0x1a0   : > { %1523 = vst [vmem:[%s2679_s8 + $0x70] sm:$0xff] %v1491_v38  ;;  %v1477_v1 = vmax.f32 %v1445_v9, 0.0  ;;  %v1461_v5 = vadd.f32 %v2670_v29, %v1261_v50  ;;  %v1186_v42 = vadd.f32 %v2643_v34, %v960_v56  ;;  %v1786_v30 = vpop.f32.mrb[66].mxu1  ;;  %v962_v46 = vpop.f32.mrb[3].mxu0 }
 0x1a1   : > { %v1494_v45 = vmax.f32 %v1462_v40, 0.0  ;;  %v1276_v62 = vadd.f32 %v1786_v30, %v2631_v37  ;;  %v1270_v49 = vpop.f32.mrb[67].mxu1 }
 0x1a2   : > { %1509 = vst [vmem:[%s2679_s8] sm:$0xff] %v1477_v1  ;;  %v1493_v21 = vmax.f32 %v1461_v5, 0.0  ;;  %v1446_v51 = vadd.f32 %v2670_v29, %v1186_v42  ;;  %v1271_v52 = vadd.f32 %v1270_v49, %v2629_v31 }
 0x1a3   : > { %1526 = vst [vmem:[%s2679_s8 + $0x88] sm:$0xff] %v1494_v45  ;;  %v1464_v55 = vadd.f32 %v2670_v29, %v1276_v62  ;;  %v965_v57 = vpop.f32.mrb[4].mxu0 }
 0x1a4   : > { %1525 = vst [vmem:[%s2679_s8 + $0x80] sm:$0xff] %v1493_v21  ;;  %v1478_v34 = vmax.f32 %v1446_v51, 0.0  ;;  %v1463_v20 = vadd.f32 %v2670_v29, %v1271_v52  ;;  %v1191_v37 = vadd.f32 %v2651_v10, %v965_v57  ;;  %v1789_v59 = vpop.f32.mrb[68].mxu1  ;;  %v967_v27 = vpop.f32.mrb[5].mxu0 }
 0x1a5   : > { %v1496_v8 = vmax.f32 %v1464_v55, 0.0  ;;  %v1286_v54 = vadd.f32 %v1789_v59, %v2635_v47  ;;  %v1280_v61 = vpop.f32.mrb[69].mxu1 }
 0x1a6   : > { %1510 = vst [vmem:[%s2679_s8 + $0x8] sm:$0xff] %v1478_v34  ;;  %v1495_v31 = vmax.f32 %v1463_v20, 0.0  ;;  %v1447_v0 = vadd.f32 %v2670_v29, %v1191_v37  ;;  %v1281_v43 = vadd.f32 %v1280_v61, %v2633_v41 }
 0x1a7   : > { %1528 = vst [vmem:[%s2679_s8 + $0x98] sm:$0xff] %v1496_v8  ;;  %v1466_v7 = vadd.f32 %v2670_v29, %v1286_v54  ;;  %v970_v12 = vpop.f32.mrb[6].mxu0 }
 0x1a8   : > { %1527 = vst [vmem:[%s2679_s8 + $0x90] sm:$0xff] %v1495_v31  ;;  %v1479_v10 = vmax.f32 %v1447_v0, 0.0  ;;  %v1465_v16 = vadd.f32 %v2670_v29, %v1281_v43  ;;  %v1196_v47 = vadd.f32 %v2649_v6, %v970_v12  ;;  %v1792_v2 = vpop.f32.mrb[70].mxu1  ;;  %v972_v17 = vpop.f32.mrb[7].mxu0 }
 0x1a9   : > { %v1498_v22 = vmax.f32 %v1466_v7, 0.0  ;;  %v1296_v63 = vadd.f32 %v1792_v2, %v2639_v58  ;;  %v1290_v25 = vpop.f32.mrb[71].mxu1 }
 0x1aa   : > { %1511 = vst [vmem:[%s2679_s8 + $0x10] sm:$0xff] %v1479_v10  ;;  %v1497_v41 = vmax.f32 %v1465_v16, 0.0  ;;  %v1448_v28 = vadd.f32 %v2670_v29, %v1196_v47  ;;  %v1291_v36 = vadd.f32 %v1290_v25, %v2637_v53 }
 0x1ab   : > { %1530 = vst [vmem:[%s2679_s8 + $0xa8] sm:$0xff] %v1498_v22  ;;  %v1468_v60 = vadd.f32 %v2670_v29, %v1296_v63  ;;  %v975_v32 = vpop.f32.mrb[8].mxu0 }
 0x1ac   : > { %1529 = vst [vmem:[%s2679_s8 + $0xa0] sm:$0xff] %v1497_v41  ;;  %v1480_v6 = vmax.f32 %v1448_v28, 0.0  ;;  %v1467_v33 = vadd.f32 %v2670_v29, %v1291_v36  ;;  %v1201_v58 = vadd.f32 %v2657_v18, %v975_v32  ;;  %v1795_v44 = vpop.f32.mrb[72].mxu1  ;;  %v977_v15 = vpop.f32.mrb[9].mxu0 }
 0x1ad   : > { %v1500_v35 = vmax.f32 %v1468_v60, 0.0  ;;  %v1306_v38 = vadd.f32 %v1795_v44, %v2647_v4  ;;  %v1300_v9 = vpop.f32.mrb[73].mxu1 }
 0x1ae   : > { %1512 = vst [vmem:[%s2679_s8 + $0x18] sm:$0xff] %v1480_v6  ;;  %v1499_v53 = vmax.f32 %v1467_v33, 0.0  ;;  %v1449_v50 = vadd.f32 %v2670_v29, %v1201_v58  ;;  %v1301_v40 = vadd.f32 %v1300_v9, %v2641_v3 }
 0x1af   : > { %1532 = vst [vmem:[%s2679_s8 + $0xb8] sm:$0xff] %v1500_v35  ;;  %v1470_v56 = vadd.f32 %v2670_v29, %v1306_v38  ;;  %v980_v1 = vpop.f32.mrb[10].mxu0 }
 0x1b0   : > { %1531 = vst [vmem:[%s2679_s8 + $0xb0] sm:$0xff] %v1499_v53  ;;  %v1481_v18 = vmax.f32 %v1449_v50, 0.0  ;;  %v1469_v5 = vadd.f32 %v2670_v29, %v1301_v40  ;;  %v1206_v4 = vadd.f32 %v2655_v14, %v980_v1  ;;  %v1798_v42 = vpop.f32.mrb[74].mxu1  ;;  %v982_v30 = vpop.f32.mrb[11].mxu0 }
 0x1b1   : > { %v1502_v46 = vmax.f32 %v1470_v56, 0.0  ;;  %v1316_v45 = vadd.f32 %v1798_v42, %v2659_v19  ;;  %v1310_v62 = vpop.f32.mrb[75].mxu1 }
 0x1b2   : > { %1513 = vst [vmem:[%s2679_s8 + $0x20] sm:$0xff] %v1481_v18  ;;  %v1501_v3 = vmax.f32 %v1469_v5, 0.0  ;;  %v1450_v49 = vadd.f32 %v2670_v29, %v1206_v4  ;;  %v1311_v21 = vadd.f32 %v1310_v62, %v2653_v11 }
 0x1b3   : > { %1534 = vst [vmem:[%s2679_s8 + $0xc8] sm:$0xff] %v1502_v46  ;;  %v1472_v51 = vadd.f32 %v2670_v29, %v1316_v45  ;;  %v985_v52 = vpop.f32.mrb[12].mxu0 }
 0x1b4   : > { %1533 = vst [vmem:[%s2679_s8 + $0xc0] sm:$0xff] %v1501_v3  ;;  %v1482_v14 = vmax.f32 %v1450_v49, 0.0  ;;  %v1471_v55 = vadd.f32 %v2670_v29, %v1311_v21  ;;  %v1211_v19 = vadd.f32 %v2663_v23, %v985_v52  ;;  %v1801_v57 = vpop.f32.mrb[76].mxu1  ;;  %v987_v34 = vpop.f32.mrb[13].mxu0 }
 0x1b5   : > { %v1504_v20 = vmax.f32 %v1472_v51, 0.0  ;;  %v1326_v37 = vadd.f32 %v1801_v57, %v2682_v39  ;;  %v1320_v59 = vpop.f32.mrb[77].mxu1 }
 0x1b6   : > { %1514 = vst [vmem:[%s2679_s8 + $0x28] sm:$0xff] %v1482_v14  ;;  %v1503_v11 = vmax.f32 %v1471_v55, 0.0  ;;  %v1451_v27 = vadd.f32 %v2670_v29, %v1211_v19  ;;  %v1321_v8 = vadd.f32 %v1320_v59, %v2665_v26 }
 0x1b7   : > { %1536 = vst [vmem:[%s2679_s8 + $0xd8] sm:$0xff] %v1504_v20  ;;  %v1474_v54 = vadd.f32 %v2670_v29, %v1326_v37  ;;  %v990_v61 = vpop.f32.mrb[14].mxu0 }
 0x1b8   : > { %1535 = vst [vmem:[%s2679_s8 + $0xd0] sm:$0xff] %v1503_v11  ;;  %v1483_v23 = vmax.f32 %v1451_v27, 0.0  ;;  %v1473_v31 = vadd.f32 %v2670_v29, %v1321_v8  ;;  %v1216_v39 = vadd.f32 %v2661_v24, %v990_v61  ;;  %v1804_v0 = vpop.f32.mrb[78].mxu1  ;;  %v992_v43 = vpop.f32.mrb[15].mxu0 }
 0x1b9   : > { %v1506_v7 = vmax.f32 %v1474_v54, 0.0  ;;  %v1336_v26 = vadd.f32 %v1804_v0, %v2698_v13  ;;  %v1330_v12 = vpop.f32.mrb[79].mxu1 }
 0x1ba   : > { %1515 = vst [vmem:[%s2679_s8 + $0x30] sm:$0xff] %v1483_v23  ;;  %v1505_v10 = vmax.f32 %v1473_v31, 0.0  ;;  %v1452_v16 = vadd.f32 %v2670_v29, %v1216_v39  ;;  %v1331_v47 = vadd.f32 %v1330_v12, %v2690_v48 }
 0x1bb   : > { %1538 = vst [vmem:[%s2679_s8 + $0xe8] sm:$0xff] %v1506_v7  ;;  %v1476_v2 = vadd.f32 %v2670_v29, %v1336_v26 }
 0x1bc   : > { %1537 = vst [vmem:[%s2679_s8 + $0xe0] sm:$0xff] %v1505_v10  ;;  %v1484_v24 = vmax.f32 %v1452_v16, 0.0  ;;  %v1475_v17 = vadd.f32 %v2670_v29, %v1331_v47 }
 0x1bd   : > { %v1508_v22 = vmax.f32 %v1476_v2, 0.0 }
 0x1be   : > { %1516 = vst [vmem:[%s2679_s8 + $0x38] sm:$0xff] %v1484_v24  ;;  %v1507_v63 = vmax.f32 %v1475_v17, 0.0 }
 0x1bf   : > { %1540 = vst [vmem:[%s2679_s8 + $0xf8] sm:$0xff] %v1508_v22 }
 0x1c0   : > { %1539 = vst [vmem:[%s2679_s8 + $0xf0] sm:$0xff] %v1507_v63 }
 0x1c1 PF: > { %s13_s14 = sadd.s32 1, %s2037_s14   ;;  %s2793_s12 = smov %s2033_s13 }
 0x1c2   : > { %p10_p5 = scmp.ge.s32.totalorder %s13_s14, 7   ;;  %s2794_s13 = smov %s2796_s15 }
 0x1c4   :  { %12 = sbr.rel (!%p10_p5) target bundleno = 2 (0x2), region = 76 }

// kernel: simclr_stage1_forward.9
= control target key start
LH: loop header
LB: loop body
LE: loop exit
PB: predicated region body
PF: predicated region fallthrough
CT: control target
= control target key end

     0   :  { %s1546_s12 = smov 0   ;;  %s1548_s13 = smov 0   ;;  %s2032_s0 = inlined_call_operand.vmem [shape: f32[248,1152], index: 0, kind: input, shape index: {}]   ;;  %s2033_s1 = inlined_call_operand.vmem [shape: f32[1152,256], index: 1, kind: input, shape index: {}]   ;;  %s2034_s2 = inlined_call_operand.vmem [shape: f32[1,256], index: 2, kind: input, shape index: {}]   ;;  %s2035_s3 = inlined_call_operand.vmem [shape: f32[248,256], index: 3, kind: output, shape index: {}]  }
   0x1   :  { %s1550_s14 = smov 0   ;;  %s1552_s15 = smov 0  }
   0x2   :  { %s1554_s16 = smov 0  }
   0x3 LB: > { %s25_s17 = sadd.s32 1, %s1518_s15  ;;  %p48_p1 = scmp.ne.s32.totalorder %s1510_s13, %s1506_s12  ;;  %s1522_s16 = sphi %s1554_s16, %s13_s16   ;;  %s1518_s15 = sphi %s1552_s15, %s2039_s15   ;;  %s1514_s14 = sphi %s1550_s14, %s2038_s14   ;;  %s1510_s13 = sphi %s1548_s13, %s2037_s13   ;;  %s1506_s12 = sphi %s1546_s12, %s2036_s12  }
   0x4   : > { %p26_p0 = scmp.ge.s32.totalorder %s25_s17, 9  ;;  %p49_p2 = scmp.eq.s32.totalorder %s1522_s16, 0 }
   0x5   : > { %s41_s19 = sadd.s32 1, %s1510_s13  ;;  %p1379_p5 = scmp.ge.s32.totalorder %s1522_s16, 9 }
   0x6   : > { %s2041_s17 = smov (%p26_p0, %s25_s17), 0  ;;  %p50_p3 = por %p49_p2, %p48_p1 }
   0x7   : > { %s37_s18 = ssub.s32 %s1518_s15, %s2041_s17  ;;  %164 = sbr.rel (%p1379_p5) target bundleno = 34 (0x22), region = 20 }
   0x8   : > { %p39_p4 = scmp.eq.s32.totalorder %s37_s18, 0 }
   0xa   : > { %s1581_s20 = scalar_select %p39_p4, %s1510_s13, %s41_s19  }
   0xe   : > { %167 = sbr.rel (!%p50_p3) target bundleno = 34 (0x22), region = 24  ;;  %s169_s21 = sand.u32 (%p50_p3), 1, %s1510_s13  }
   0xf   : > { %s1380_s22 = sshll.u32 (%p50_p3), %s1518_s15, 3  ;;  %s1440_s23 = smul.u32 (%p50_p3), 248, %s169_s21 }
  0x10   : > { %s1589_s26 = scalar_lea.vmem (%p50_p3), %s2032_s0, %s1380_s22 }
  0x11   : > { %v264_v0 = vld [vmem:[%s1589_s26] sm:$0xff] (%p50_p3)  ;;  %v266_v1 = vld [vmem:[%s1589_s26 + $0x48] sm:$0xff] (%p50_p3)  ;;  %v268_v2 = vld [vmem:[%s1589_s26 + $0x90] sm:$0xff] (%p50_p3)  ;;  %s1597_s27 = scalar_lea.vmem (%p50_p3), [#allocation3], %s1440_s23 }
  0x12   : > { %v270_v3 = vld [vmem:[%s1589_s26 + $0xd8] sm:$0xff] (%p50_p3)  ;;  %v272_v4 = vld [vmem:[%s1589_s26 + $0x120] sm:$0xff] (%p50_p3)  ;;  %v274_v5 = vld [vmem:[%s1589_s26 + $0x168] sm:$0xff] (%p50_p3)  ;;  %265 = vst [vmem:[%s1597_s27] sm:$0xff] (%p50_p3), %v264_v0 }
  0x13   : > { %267 = vst [vmem:[%s1597_s27 + $0x8] sm:$0xff] (%p50_p3), %v266_v1  ;;  %269 = vst [vmem:[%s1597_s27 + $0x10] sm:$0xff] (%p50_p3), %v268_v2  ;;  %v276_v6 = vld [vmem:[%s1589_s26 + $0x1b0] sm:$0xff] (%p50_p3)  ;;  %v278_v7 = vld [vmem:[%s1589_s26 + $0x1f8] sm:$0xff] (%p50_p3) }
  0x14   : > { %271 = vst [vmem:[%s1597_s27 + $0x18] sm:$0xff] (%p50_p3), %v270_v3  ;;  %273 = vst [vmem:[%s1597_s27 + $0x20] sm:$0xff] (%p50_p3), %v272_v4  ;;  %v280_v8 = vld [vmem:[%s1589_s26 + $0x240] sm:$0xff] (%p50_p3)  ;;  %v282_v9 = vld [vmem:[%s1589_s26 + $0x288] sm:$0xff] (%p50_p3) }
  0x15   : > { %275 = vst [vmem:[%s1597_s27 + $0x28] sm:$0xff] %v274_v5  ;;  %277 = vst [vmem:[%s1597_s27 + $0x30] sm:$0xff] %v276_v6  ;;  %v284_v10 = vld [vmem:[%s1589_s26 + $0x2d0] sm:$0xff]  ;;  %v286_v11 = vld [vmem:[%s1589_s26 + $0x318] sm:$0xff] }
  0x16   : > { %279 = vst [vmem:[%s1597_s27 + $0x38] sm:$0xff] %v278_v7  ;;  %281 = vst [vmem:[%s1597_s27 + $0x40] sm:$0xff] %v280_v8  ;;  %v288_v12 = vld [vmem:[%s1589_s26 + $0x360] sm:$0xff]  ;;  %v290_v13 = vld [vmem:[%s1589_s26 + $0x3a8] sm:$0xff] }
  0x17   : > { %283 = vst [vmem:[%s1597_s27 + $0x48] sm:$0xff] %v282_v9  ;;  %285 = vst [vmem:[%s1597_s27 + $0x50] sm:$0xff] %v284_v10  ;;  %v292_v14 = vld [vmem:[%s1589_s26 + $0x3f0] sm:$0xff]  ;;  %v294_v15 = vld [vmem:[%s1589_s26 + $0x438] sm:$0xff] }
  0x18   : > { %287 = vst [vmem:[%s1597_s27 + $0x58] sm:$0xff] %v286_v11  ;;  %289 = vst [vmem:[%s1597_s27 + $0x60] sm:$0xff] %v288_v12  ;;  %v296_v16 = vld [vmem:[%s1589_s26 + $0x480] sm:$0xff]  ;;  %v298_v17 = vld [vmem:[%s1589_s26 + $0x4c8] sm:$0xff] }
  0x19   : > { %291 = vst [vmem:[%s1597_s27 + $0x68] sm:$0xff] %v290_v13  ;;  %293 = vst [vmem:[%s1597_s27 + $0x70] sm:$0xff] %v292_v14  ;;  %v300_v18 = vld [vmem:[%s1589_s26 + $0x510] sm:$0xff]  ;;  %v302_v19 = vld [vmem:[%s1589_s26 + $0x558] sm:$0xff] }
  0x1a   : > { %295 = vst [vmem:[%s1597_s27 + $0x78] sm:$0xff] %v294_v15  ;;  %297 = vst [vmem:[%s1597_s27 + $0x80] sm:$0xff] %v296_v16  ;;  %v304_v20 = vld [vmem:[%s1589_s26 + $0x5a0] sm:$0xff]  ;;  %v306_v21 = vld [vmem:[%s1589_s26 + $0x5e8] sm:$0xff] }
  0x1b   : > { %299 = vst [vmem:[%s1597_s27 + $0x88] sm:$0xff] %v298_v17  ;;  %301 = vst [vmem:[%s1597_s27 + $0x90] sm:$0xff] %v300_v18  ;;  %v308_v22 = vld [vmem:[%s1589_s26 + $0x630] sm:$0xff]  ;;  %v310_v23 = vld [vmem:[%s1589_s26 + $0x678] sm:$0xff] }
  0x1c   : > { %303 = vst [vmem:[%s1597_s27 + $0x98] sm:$0xff] %v302_v19  ;;  %305 = vst [vmem:[%s1597_s27 + $0xa0] sm:$0xff] %v304_v20  ;;  %v312_v24 = vld [vmem:[%s1589_s26 + $0x6c0] sm:$0xff]  ;;  %v314_v25 = vld [vmem:[%s1589_s26 + $0x708] sm:$0xff] }
  0x1d   : > { %307 = vst [vmem:[%s1597_s27 + $0xa8] sm:$0xff] %v306_v21  ;;  %309 = vst [vmem:[%s1597_s27 + $0xb0] sm:$0xff] %v308_v22  ;;  %v316_v26 = vld [vmem:[%s1589_s26 + $0x750] sm:$0xff]  ;;  %v318_v27 = vld [vmem:[%s1589_s26 + $0x798] sm:$0xff] }
  0x1e   : > { %311 = vst [vmem:[%s1597_s27 + $0xb8] sm:$0xff] %v310_v23  ;;  %313 = vst [vmem:[%s1597_s27 + $0xc0] sm:$0xff] %v312_v24  ;;  %v320_v28 = vld [vmem:[%s1589_s26 + $0x7e0] sm:$0xff]  ;;  %v322_v29 = vld [vmem:[%s1589_s26 + $0x828] sm:$0xff] }
  0x1f   : > { %315 = vst [vmem:[%s1597_s27 + $0xc8] sm:$0xff] %v314_v25  ;;  %317 = vst [vmem:[%s1597_s27 + $0xd0] sm:$0xff] %v316_v26  ;;  %v324_v30 = vld [vmem:[%s1589_s26 + $0x870] sm:$0xff] }
  0x20   : > { %319 = vst [vmem:[%s1597_s27 + $0xd8] sm:$0xff] %v318_v27  ;;  %321 = vst [vmem:[%s1597_s27 + $0xe0] sm:$0xff] %v320_v28 }
  0x21   : > { %323 = vst [vmem:[%s1597_s27 + $0xe8] sm:$0xff] %v322_v29  ;;  %325 = vst [vmem:[%s1597_s27 + $0xf0] sm:$0xff] %v324_v30 }
  0x22 PF: > { %p1381_p6 = scmp.ge.s32.totalorder %s1522_s16, 1  ;;  %p345_p7 = scmp.lt.s32.totalorder %s1522_s16, 10 }
  0x24   : > { %p346_p8 = pnand %p1381_p6, %p345_p7 }
  0x25   : > { %s352_s28 = sand.u32 (!%p346_p8), 1, %s1506_s12   ;;  %s1382_s29 = sshll.u32 (!%p346_p8), %s1514_s14, 4 }
  0x26   : > { %349 = sbr.rel (%p346_p8) target bundleno = 415 (0x19f), region = 66  ;;  %p397_p9 = scmp.lt.s32.totalorder (!%p346_p8), %s1382_s29, 143 }
  0x27   : > { %s1441_s30 = smul.u32 (!%p346_p8), 248, %s352_s28  ;;  %p1385_p10 = scmp.ne.s32.totalorder (!%p346_p8), %s1514_s14, 0 }
  0x29   : > { %s1664_s8 = scalar_lea.vmem (!%p346_p8), [#allocation3], %s1441_s30 }
  0x2d   : > { %s2043_s29 = smov (!%p397_p9, %s1382_s29), 143  ;;  %427 = sbr.rel (%p1385_p10) target bundleno = 78 (0x4e), region = 74 }
  0x2e   : > { %s1391_s4 = sshll.u32 %s2043_s29, 4  ;;  %v1524_v31 = vmov (!%p1385_p10), 0.0  }
  0x2f   : > { %s1662_s7 = scalar_lea.vmem %s2033_s1, %s1391_s4  ;;  %428 = vst [vmem:[#allocation2] sm:$0xff] (!%p1385_p10), %v1524_v31  ;;  %429 = vst [vmem:[#allocation2 + $0x8] sm:$0xff] (!%p1385_p10), %v1524_v31 }
  0x30   : > { %430 = vst [vmem:[#allocation2 + $0x10] sm:$0xff] (!%p1385_p10), %v1524_v31  ;;  %431 = vst [vmem:[#allocation2 + $0x18] sm:$0xff] (!%p1385_p10), %v1524_v31 }
  0x31   : > { %432 = vst [vmem:[#allocation2 + $0x20] sm:$0xff] (!%p1385_p10), %v1524_v31  ;;  %433 = vst [vmem:[#allocation2 + $0x28] sm:$0xff] (!%p1385_p10), %v1524_v31 }
  0x32   : > { %434 = vst [vmem:[#allocation2 + $0x30] sm:$0xff] (!%p1385_p10), %v1524_v31  ;;  %435 = vst [vmem:[#allocation2 + $0x38] sm:$0xff] (!%p1385_p10), %v1524_v31 }
  0x33   : > { %436 = vst [vmem:[#allocation2 + $0x40] sm:$0xff] (!%p1385_p10), %v1524_v31  ;;  %437 = vst [vmem:[#allocation2 + $0x48] sm:$0xff] (!%p1385_p10), %v1524_v31 }
  0x34   : > { %438 = vst [vmem:[#allocation2 + $0x50] sm:$0xff] %v1524_v31  ;;  %439 = vst [vmem:[#allocation2 + $0x58] sm:$0xff] %v1524_v31 }
  0x35   : > { %440 = vst [vmem:[#allocation2 + $0x60] sm:$0xff] %v1524_v31  ;;  %441 = vst [vmem:[#allocation2 + $0x68] sm:$0xff] %v1524_v31 }
  0x36   : > { %442 = vst [vmem:[#allocation2 + $0x70] sm:$0xff] %v1524_v31  ;;  %443 = vst [vmem:[#allocation2 + $0x78] sm:$0xff] %v1524_v31 }
  0x37   : > { %444 = vst [vmem:[#allocation2 + $0x80] sm:$0xff] %v1524_v31  ;;  %445 = vst [vmem:[#allocation2 + $0x88] sm:$0xff] %v1524_v31 }
  0x38   : > { %446 = vst [vmem:[#allocation2 + $0x90] sm:$0xff] %v1524_v31  ;;  %447 = vst [vmem:[#allocation2 + $0x98] sm:$0xff] %v1524_v31 }
  0x39   : > { %448 = vst [vmem:[#allocation2 + $0xa0] sm:$0xff] %v1524_v31  ;;  %449 = vst [vmem:[#allocation2 + $0xa8] sm:$0xff] %v1524_v31 }
  0x3a   : > { %450 = vst [vmem:[#allocation2 + $0xb0] sm:$0xff] %v1524_v31  ;;  %451 = vst [vmem:[#allocation2 + $0xb8] sm:$0xff] %v1524_v31 }
  0x3b   : > { %452 = vst [vmem:[#allocation2 + $0xc0] sm:$0xff] %v1524_v31  ;;  %453 = vst [vmem:[#allocation2 + $0xc8] sm:$0xff] %v1524_v31 }
  0x3c   : > { %454 = vst [vmem:[#allocation2 + $0xd0] sm:$0xff] %v1524_v31  ;;  %455 = vst [vmem:[#allocation2 + $0xd8] sm:$0xff] %v1524_v31 }
  0x3d   : > { %456 = vst [vmem:[#allocation2 + $0xe0] sm:$0xff] %v1524_v31  ;;  %457 = vst [vmem:[#allocation2 + $0xe8] sm:$0xff] %v1524_v31 }
  0x3e   : > { %458 = vst [vmem:[#allocation2 + $0xf0] sm:$0xff] %v1524_v31  ;;  %459 = vst [vmem:[#allocation2 + $0xf8] sm:$0xff] %v1524_v31 }
  0x3f   : > { %460 = vst [vmem:[#allocation2 + $0x100] sm:$0xff] %v1524_v31  ;;  %461 = vst [vmem:[#allocation2 + $0x108] sm:$0xff] %v1524_v31 }
  0x40   : > { %462 = vst [vmem:[#allocation2 + $0x110] sm:$0xff] %v1524_v31  ;;  %463 = vst [vmem:[#allocation2 + $0x118] sm:$0xff] %v1524_v31 }
  0x41   : > { %464 = vst [vmem:[#allocation2 + $0x120] sm:$0xff] %v1524_v31  ;;  %465 = vst [vmem:[#allocation2 + $0x128] sm:$0xff] %v1524_v31 }
  0x42   : > { %466 = vst [vmem:[#allocation2 + $0x130] sm:$0xff] %v1524_v31  ;;  %467 = vst [vmem:[#allocation2 + $0x138] sm:$0xff] %v1524_v31 }
  0x43   : > { %468 = vst [vmem:[#allocation2 + $0x140] sm:$0xff] %v1524_v31  ;;  %469 = vst [vmem:[#allocation2 + $0x148] sm:$0xff] %v1524_v31 }
  0x44   : > { %470 = vst [vmem:[#allocation2 + $0x150] sm:$0xff] %v1524_v31  ;;  %471 = vst [vmem:[#allocation2 + $0x158] sm:$0xff] %v1524_v31 }
  0x45   : > { %472 = vst [vmem:[#allocation2 + $0x160] sm:$0xff] %v1524_v31  ;;  %473 = vst [vmem:[#allocation2 + $0x168] sm:$0xff] %v1524_v31 }
  0x46   : > { %474 = vst [vmem:[#allocation2 + $0x170] sm:$0xff] %v1524_v31  ;;  %475 = vst [vmem:[#allocation2 + $0x178] sm:$0xff] %v1524_v31 }
  0x47   : > { %476 = vst [vmem:[#allocation2 + $0x180] sm:$0xff] %v1524_v31  ;;  %477 = vst [vmem:[#allocation2 + $0x188] sm:$0xff] %v1524_v31 }
  0x48   : > { %478 = vst [vmem:[#allocation2 + $0x190] sm:$0xff] %v1524_v31  ;;  %479 = vst [vmem:[#allocation2 + $0x198] sm:$0xff] %v1524_v31 }
  0x49   : > { %480 = vst [vmem:[#allocation2 + $0x1a0] sm:$0xff] %v1524_v31  ;;  %481 = vst [vmem:[#allocation2 + $0x1a8] sm:$0xff] %v1524_v31 }
  0x4a   : > { %482 = vst [vmem:[#allocation2 + $0x1b0] sm:$0xff] %v1524_v31  ;;  %483 = vst [vmem:[#allocation2 + $0x1b8] sm:$0xff] %v1524_v31 }
  0x4b   : > { %484 = vst [vmem:[#allocation2 + $0x1c0] sm:$0xff] %v1524_v31  ;;  %485 = vst [vmem:[#allocation2 + $0x1c8] sm:$0xff] %v1524_v31 }
  0x4c   : > { %486 = vst [vmem:[#allocation2 + $0x1d0] sm:$0xff] %v1524_v31  ;;  %487 = vst [vmem:[#allocation2 + $0x1d8] sm:$0xff] %v1524_v31 }
  0x4d   : > { %488 = vst [vmem:[#allocation2 + $0x1e0] sm:$0xff] %v1524_v31  ;;  %489 = vst [vmem:[#allocation2 + $0x1e8] sm:$0xff] %v1524_v31 }
  0x4e PF: > { %v584_v32 = vld [vmem:[%s1662_s7 + $0x8] sm:$0xff]  ;;  %v586_v33 = vld [vmem:[%s1662_s7 + $0x18] sm:$0xff]  ;;  %v583_v34 = vld [vmem:[%s1662_s7] sm:$0xff]  ;;  %v1525_v39 = vmov 0.0   ;;  %p1386_p11 = scmp.ne.s32.totalorder %s1514_s14, 8 }
  0x4f   : > { %v1392_v35 = vpack.c.bf16 %v586_v33, %v584_v32  ;;  %v585_v36 = vld [vmem:[%s1662_s7 + $0x10] sm:$0xff]  ;;  %v588_v37 = vld [vmem:[%s1662_s7 + $0x28] sm:$0xff]  ;;  %v590_v38 = vld [vmem:[%s1662_s7 + $0x38] sm:$0xff]  ;;  %679 = vmatprep.mubr.f32.mxu0 %v1525_v39  ;;  %775 = vmatprep.mubr.f32.mxu1 %v1525_v39 }
  0x50   : > { %v1394_v40 = vpack.c.bf16 %v585_v36, %v583_v34  ;;  %v1396_v41 = vpack.c.bf16 %v590_v38, %v588_v37  ;;  %v587_v42 = vld [vmem:[%s1662_s7 + $0x20] sm:$0xff]  ;;  %v589_v43 = vld [vmem:[%s1662_s7 + $0x30] sm:$0xff]  ;;  %v592_v44 = vld [vmem:[%s1662_s7 + $0x48] sm:$0xff] }
  0x51   : > { %1393 = vmatprep.subr.bf16.mxu0 %v1392_v35  ;;  %1424 = vmatprep.subr.bf16.mxu1 %v1392_v35  ;;  %v594_v45 = vld [vmem:[%s1662_s7 + $0x58] sm:$0xff]  ;;  %v1398_v46 = vpack.c.bf16 %v589_v43, %v587_v42  ;;  %v591_v48 = vld [vmem:[%s1662_s7 + $0x40] sm:$0xff]  ;;  %v593_v49 = vld [vmem:[%s1662_s7 + $0x50] sm:$0xff] }
  0x52   : > { %1395 = vmatpush1.bf16.msra.mxu0 %v1394_v40  ;;  %1432 = vmatpush1.bf16.msra.mxu1 %v1394_v40  ;;  %v1400_v47 = vpack.c.bf16 %v594_v45, %v592_v44  ;;  %v596_v50 = vld [vmem:[%s1662_s7 + $0x68] sm:$0xff]  ;;  %v598_v51 = vld [vmem:[%s1662_s7 + $0x78] sm:$0xff]  ;;  %v1402_v52 = vpack.c.bf16 %v593_v49, %v591_v48  ;;  %v595_v54 = vld [vmem:[%s1662_s7 + $0x60] sm:$0xff] }
  0x53   : > { %1397 = vmatprep.subr.bf16.mxu0 %v1396_v41  ;;  %1425 = vmatprep.subr.bf16.mxu1 %v1396_v41  ;;  %v1404_v53 = vpack.c.bf16 %v598_v51, %v596_v50  ;;  %v597_v55 = vld [vmem:[%s1662_s7 + $0x70] sm:$0xff]  ;;  %v600_v56 = vld [vmem:[%s1662_s7 + $0x88] sm:$0xff]  ;;  %v602_v57 = vld [vmem:[%s1662_s7 + $0x98] sm:$0xff] }
  0x54   : > { %v1406_v58 = vpack.c.bf16 %v597_v55, %v595_v54  ;;  %v1408_v59 = vpack.c.bf16 %v602_v57, %v600_v56  ;;  %v599_v60 = vld [vmem:[%s1662_s7 + $0x80] sm:$0xff]  ;;  %v601_v61 = vld [vmem:[%s1662_s7 + $0x90] sm:$0xff]  ;;  %v604_v62 = vld [vmem:[%s1662_s7 + $0xa8] sm:$0xff] }
  0x55   : > { %v606_v63 = vld [vmem:[%s1662_s7 + $0xb8] sm:$0xff]  ;;  %v1410_v0 = vpack.c.bf16 %v601_v61, %v599_v60  ;;  %v603_v2 = vld [vmem:[%s1662_s7 + $0xa0] sm:$0xff]  ;;  %v605_v3 = vld [vmem:[%s1662_s7 + $0xb0] sm:$0xff] }
  0x56   : > { %1399 = vmatpush1.bf16.msra.mxu0 %v1398_v46  ;;  %1433 = vmatpush1.bf16.msra.mxu1 %v1398_v46  ;;  %v1412_v1 = vpack.c.bf16 %v606_v63, %v604_v62  ;;  %v608_v4 = vld [vmem:[%s1662_s7 + $0xc8] sm:$0xff]  ;;  %v610_v5 = vld [vmem:[%s1662_s7 + $0xd8] sm:$0xff]  ;;  %v1414_v6 = vpack.c.bf16 %v605_v3, %v603_v2  ;;  %v607_v8 = vld [vmem:[%s1662_s7 + $0xc0] sm:$0xff] }
  0x57   : > { %1401 = vmatprep.subr.bf16.mxu0 %v1400_v47  ;;  %1426 = vmatprep.subr.bf16.mxu1 %v1400_v47  ;;  %v1416_v7 = vpack.c.bf16 %v610_v5, %v608_v4  ;;  %v609_v9 = vld [vmem:[%s1662_s7 + $0xd0] sm:$0xff]  ;;  %v612_v10 = vld [vmem:[%s1662_s7 + $0xe8] sm:$0xff]  ;;  %v614_v11 = vld [vmem:[%s1662_s7 + $0xf8] sm:$0xff] }
  0x58   : > { %v1418_v12 = vpack.c.bf16 %v609_v9, %v607_v8  ;;  %v1420_v13 = vpack.c.bf16 %v614_v11, %v612_v10  ;;  %v611_v14 = vld [vmem:[%s1662_s7 + $0xe0] sm:$0xff]  ;;  %v613_v15 = vld [vmem:[%s1662_s7 + $0xf0] sm:$0xff]  ;;  %v491_v51 = vld [vmem:[#allocation2 + $0x8] sm:$0xff] }
  0x59   : > { %v1422_v16 = vpack.c.bf16 %v613_v15, %v611_v14  ;;  %v552_v17 = vld [vmem:[%s1664_s8] sm:$0xff]  ;;  %v553_v19 = vld [vmem:[%s1664_s8 + $0x8] sm:$0xff]  ;;  %v554_v21 = vld [vmem:[%s1664_s8 + $0x10] sm:$0xff] }
  0x5a   : > { %1403 = vmatpush1.bf16.msra.mxu0 %v1402_v52  ;;  %1434 = vmatpush1.bf16.msra.mxu1 %v1402_v52  ;;  %v568_v18 = vld [vmem:[%s1664_s8 + $0x80] sm:$0xff]  ;;  %v569_v20 = vld [vmem:[%s1664_s8 + $0x88] sm:$0xff]  ;;  %v570_v22 = vld [vmem:[%s1664_s8 + $0x90] sm:$0xff] }
  0x5b   : > { %1405 = vmatprep.subr.bf16.mxu0 %v1404_v53  ;;  %1427 = vmatprep.subr.bf16.mxu1 %v1404_v53  ;;  %v555_v23 = vld [vmem:[%s1664_s8 + $0x18] sm:$0xff]  ;;  %v556_v25 = vld [vmem:[%s1664_s8 + $0x20] sm:$0xff]  ;;  %v557_v27 = vld [vmem:[%s1664_s8 + $0x28] sm:$0xff] }
  0x5c   : > { %v571_v24 = vld [vmem:[%s1664_s8 + $0x98] sm:$0xff]  ;;  %v572_v26 = vld [vmem:[%s1664_s8 + $0xa0] sm:$0xff]  ;;  %v573_v28 = vld [vmem:[%s1664_s8 + $0xa8] sm:$0xff] }
  0x5d   : > { %v558_v29 = vld [vmem:[%s1664_s8 + $0x30] sm:$0xff]  ;;  %v559_v31 = vld [vmem:[%s1664_s8 + $0x38] sm:$0xff]  ;;  %v560_v33 = vld [vmem:[%s1664_s8 + $0x40] sm:$0xff] }
  0x5e   : > { %1407 = vmatpush1.bf16.msra.mxu0 %v1406_v58  ;;  %1435 = vmatpush1.bf16.msra.mxu1 %v1406_v58  ;;  %v574_v30 = vld [vmem:[%s1664_s8 + $0xb0] sm:$0xff]  ;;  %v575_v32 = vld [vmem:[%s1664_s8 + $0xb8] sm:$0xff]  ;;  %v576_v34 = vld [vmem:[%s1664_s8 + $0xc0] sm:$0xff] }
  0x5f   : > { %1409 = vmatprep.subr.bf16.mxu0 %v1408_v59  ;;  %1428 = vmatprep.subr.bf16.mxu1 %v1408_v59  ;;  %v561_v35 = vld [vmem:[%s1664_s8 + $0x48] sm:$0xff]  ;;  %v562_v37 = vld [vmem:[%s1664_s8 + $0x50] sm:$0xff]  ;;  %v563_v40 = vld [vmem:[%s1664_s8 + $0x58] sm:$0xff] }
  0x60   : > { %v577_v36 = vld [vmem:[%s1664_s8 + $0xc8] sm:$0xff]  ;;  %v578_v38 = vld [vmem:[%s1664_s8 + $0xd0] sm:$0xff]  ;;  %v579_v41 = vld [vmem:[%s1664_s8 + $0xd8] sm:$0xff] }
  0x61   : > { %v564_v42 = vld [vmem:[%s1664_s8 + $0x60] sm:$0xff]  ;;  %v565_v44 = vld [vmem:[%s1664_s8 + $0x68] sm:$0xff]  ;;  %v566_v46 = vld [vmem:[%s1664_s8 + $0x70] sm:$0xff] }
  0x62   : > { %1411 = vmatpush1.bf16.msra.mxu0 %v1410_v0  ;;  %1436 = vmatpush1.bf16.msra.mxu1 %v1410_v0  ;;  %v580_v43 = vld [vmem:[%s1664_s8 + $0xe0] sm:$0xff]  ;;  %v581_v45 = vld [vmem:[%s1664_s8 + $0xe8] sm:$0xff]  ;;  %v582_v47 = vld [vmem:[%s1664_s8 + $0xf0] sm:$0xff] }
  0x63   : > { %1413 = vmatprep.subr.bf16.mxu0 %v1412_v1  ;;  %1429 = vmatprep.subr.bf16.mxu1 %v1412_v1  ;;  %v567_v48 = vld [vmem:[%s1664_s8 + $0x78] sm:$0xff]  ;;  %v492_v60 = vld [vmem:[#allocation2 + $0x10] sm:$0xff]  ;;  %v493_v63 = vld [vmem:[#allocation2 + $0x18] sm:$0xff] }
  0x64   : > { %v490_v49 = vld [vmem:[#allocation2] sm:$0xff]  ;;  %v523_v52 = vld [vmem:[#allocation2 + $0x108] sm:$0xff]  ;;  %v524_v62 = vld [vmem:[#allocation2 + $0x110] sm:$0xff] }
  0x65   : > { %v522_v50 = vld [vmem:[#allocation2 + $0x100] sm:$0xff]  ;;  %v495_v10 = vld [vmem:[#allocation2 + $0x28] sm:$0xff] }
  0x66   : > { %1415 = vmatpush1.bf16.msra.mxu0 %v1414_v6  ;;  %1437 = vmatpush1.bf16.msra.mxu1 %v1414_v6  ;;  %v526_v9 = vld [vmem:[#allocation2 + $0x120] sm:$0xff]  ;;  %v527_v11 = vld [vmem:[#allocation2 + $0x128] sm:$0xff] }
  0x67   : > { %1417 = vmatprep.subr.bf16.mxu0 %v1416_v7  ;;  %1430 = vmatprep.subr.bf16.mxu1 %v1416_v7  ;;  %v494_v7 = vld [vmem:[#allocation2 + $0x20] sm:$0xff] }
  0x6a   : > { %1419 = vmatpush1.bf16.msra.mxu0 %v1418_v12  ;;  %1438 = vmatpush1.bf16.msra.mxu1 %v1418_v12 }
  0x6b   : > { %1421 = vmatprep.subr.bf16.mxu0 %v1420_v13  ;;  %1431 = vmatprep.subr.bf16.mxu1 %v1420_v13 }
  0x6e   : > { %1423 = vmatpush1.bf16.msra.mxu0 %v1422_v16  ;;  %1439 = vmatpush1.bf16.msra.mxu1 %v1422_v16 }
  0x71   : > { %680 = vmatmul.mubr.f32.vlgmr.msra.gmra.mrb[0].mxu0 %v552_v17  ;;  %776 = vmatmul.mubr.f32.vlgmr.msra.gmra.mrb[0].mxu1 %v568_v18 }
  0x72   : > { %685 = vmatprep.mubr.f32.mxu0 %v1525_v39  ;;  %781 = vmatprep.mubr.f32.mxu1 %v1525_v39 }
  0x75   : > { %686 = vmatmul.mubr.f32.gmra.mrb[2].mxu0 %v553_v19  ;;  %782 = vmatmul.mubr.f32.gmra.mrb[2].mxu1 %v569_v20  ;;  %v496_v19 = vld [vmem:[#allocation2 + $0x30] sm:$0xff] }
  0x76   : > { %691 = vmatprep.mubr.f32.mxu0 %v1525_v39  ;;  %787 = vmatprep.mubr.f32.mxu1 %v1525_v39 }
  0x79   : > { %692 = vmatmul.mubr.f32.gmra.mrb[4].mxu0 %v554_v21  ;;  %788 = vmatmul.mubr.f32.gmra.mrb[4].mxu1 %v570_v22  ;;  %v528_v21 = vld [vmem:[#allocation2 + $0x130] sm:$0xff]  ;;  %v497_v22 = vld [vmem:[#allocation2 + $0x38] sm:$0xff] }
  0x7a   : > { %697 = vmatprep.mubr.f32.mxu0 %v1525_v39  ;;  %793 = vmatprep.mubr.f32.mxu1 %v1525_v39 }
  0x7d   : > { %698 = vmatmul.mubr.f32.gmra.mrb[6].mxu0 %v555_v23  ;;  %794 = vmatmul.mubr.f32.gmra.mrb[6].mxu1 %v571_v24  ;;  %v529_v23 = vld [vmem:[#allocation2 + $0x138] sm:$0xff] }
  0x7e   : > { %703 = vmatprep.mubr.f32.mxu0 %v1525_v39  ;;  %799 = vmatprep.mubr.f32.mxu1 %v1525_v39 }
  0x81   : > { %704 = vmatmul.mubr.f32.gmra.mrb[8].mxu0 %v556_v25  ;;  %800 = vmatmul.mubr.f32.gmra.mrb[8].mxu1 %v572_v26 }
  0x82   : > { %709 = vmatprep.mubr.f32.mxu0 %v1525_v39  ;;  %805 = vmatprep.mubr.f32.mxu1 %v1525_v39 }
  0x85   : > { %710 = vmatmul.mubr.f32.gmra.mrb[10].mxu0 %v557_v27  ;;  %806 = vmatmul.mubr.f32.gmra.mrb[10].mxu1 %v573_v28 }
  0x86   : > { %715 = vmatprep.mubr.f32.mxu0 %v1525_v39  ;;  %811 = vmatprep.mubr.f32.mxu1 %v1525_v39 }
  0x89   : > { %716 = vmatmul.mubr.f32.gmra.mrb[12].mxu0 %v558_v29  ;;  %812 = vmatmul.mubr.f32.gmra.mrb[12].mxu1 %v574_v30 }
  0x8a   : > { %721 = vmatprep.mubr.f32.mxu0 %v1525_v39  ;;  %817 = vmatprep.mubr.f32.mxu1 %v1525_v39 }
  0x8d   : > { %722 = vmatmul.mubr.f32.gmra.mrb[14].mxu0 %v559_v31  ;;  %818 = vmatmul.mubr.f32.gmra.mrb[14].mxu1 %v575_v32  ;;  %v498_v31 = vld [vmem:[#allocation2 + $0x40] sm:$0xff] }
  0x8e   : > { %727 = vmatprep.mubr.f32.mxu0 %v1525_v39  ;;  %823 = vmatprep.mubr.f32.mxu1 %v1525_v39 }
  0x91   : > { %728 = vmatmul.mubr.f32.gmra.mrb[16].mxu0 %v560_v33  ;;  %824 = vmatmul.mubr.f32.gmra.mrb[16].mxu1 %v576_v34  ;;  %v530_v33 = vld [vmem:[#allocation2 + $0x140] sm:$0xff]  ;;  %v499_v34 = vld [vmem:[#allocation2 + $0x48] sm:$0xff] }
  0x92   : > { %733 = vmatprep.mubr.f32.mxu0 %v1525_v39  ;;  %829 = vmatprep.mubr.f32.mxu1 %v1525_v39 }
  0x95   : > { %734 = vmatmul.mubr.f32.gmra.mrb[18].mxu0 %v561_v35  ;;  %830 = vmatmul.mubr.f32.gmra.mrb[18].mxu1 %v577_v36  ;;  %v531_v35 = vld [vmem:[#allocation2 + $0x148] sm:$0xff] }
  0x96   : > { %739 = vmatprep.mubr.f32.mxu0 %v1525_v39  ;;  %835 = vmatprep.mubr.f32.mxu1 %v1525_v39 }
  0x99   : > { %740 = vmatmul.mubr.f32.gmra.mrb[20].mxu0 %v562_v37  ;;  %836 = vmatmul.mubr.f32.gmra.mrb[20].mxu1 %v578_v38 }
  0x9a   : > { %745 = vmatprep.mubr.f32.mxu0 %v1525_v39  ;;  %841 = vmatprep.mubr.f32.mxu1 %v1525_v39 }
  0x9d   : > { %746 = vmatmul.mubr.f32.gmra.mrb[22].mxu0 %v563_v40  ;;  %842 = vmatmul.mubr.f32.gmra.mrb[22].mxu1 %v579_v41 }
  0x9e   : > { %751 = vmatprep.mubr.f32.mxu0 %v1525_v39  ;;  %847 = vmatprep.mubr.f32.mxu1 %v1525_v39 }
  0xa1   : > { %752 = vmatmul.mubr.f32.gmra.mrb[24].mxu0 %v564_v42  ;;  %848 = vmatmul.mubr.f32.gmra.mrb[24].mxu1 %v580_v43 }
  0xa2   : > { %757 = vmatprep.mubr.f32.mxu0 %v1525_v39  ;;  %853 = vmatprep.mubr.f32.mxu1 %v1525_v39 }
  0xa5   : > { %758 = vmatmul.mubr.f32.gmra.mrb[26].mxu0 %v565_v44  ;;  %854 = vmatmul.mubr.f32.gmra.mrb[26].mxu1 %v581_v45  ;;  %v500_v44 = vld [vmem:[#allocation2 + $0x50] sm:$0xff] }
  0xa6   : > { %763 = vmatprep.mubr.f32.mxu0 %v1525_v39  ;;  %859 = vmatprep.mubr.f32.mxu1 %v1525_v39 }
  0xa9   : > { %764 = vmatmul.mubr.f32.gmra.mrb[28].mxu0 %v566_v46  ;;  %860 = vmatmul.mubr.f32.gmra.mrb[28].mxu1 %v582_v47  ;;  %v532_v46 = vld [vmem:[#allocation2 + $0x150] sm:$0xff]  ;;  %v501_v47 = vld [vmem:[#allocation2 + $0x58] sm:$0xff] }
  0xaa   : > { %769 = vmatprep.mubr.f32.mxu0 %v1525_v39  ;;  %v525_v39 = vld [vmem:[#allocation2 + $0x118] sm:$0xff] }
  0xad   : > { %770 = vmatmul.mubr.f32.gmra.mrb[30].mxu0 %v567_v48  ;;  %v533_v48 = vld [vmem:[#allocation2 + $0x158] sm:$0xff] }
 0x144   : > { %v681_v53 = vpop.f32.mrb[0].mxu0  ;;  %v777_v54 = vpop.f32.mrb[0].mxu1 }
 0x145   : > { %v866_v55 = vadd.f32 %v681_v53, %v490_v49  ;;  %v683_v56 = vpop.f32.mrb[1].mxu0  ;;  %v898_v57 = vadd.f32 %v777_v54, %v522_v50  ;;  %v779_v58 = vpop.f32.mrb[1].mxu1 }
 0x146   : > { %v867_v59 = vadd.f32 %v683_v56, %v491_v51  ;;  %v899_v61 = vadd.f32 %v779_v58, %v523_v52  ;;  %v502_v56 = vld [vmem:[#allocation2 + $0x60] sm:$0xff] }
 0x147   : > { %928 = vst [vmem:[#allocation2] sm:$0xff] %v866_v55  ;;  %960 = vst [vmem:[#allocation2 + $0x100] sm:$0xff] %v898_v57  ;;  %v534_v58 = vld [vmem:[#allocation2 + $0x160] sm:$0xff] }
 0x148   : > { %929 = vst [vmem:[#allocation2 + $0x8] sm:$0xff] %v867_v59  ;;  %v687_v0 = vpop.f32.mrb[2].mxu0  ;;  %961 = vst [vmem:[#allocation2 + $0x108] sm:$0xff] %v899_v61  ;;  %v783_v1 = vpop.f32.mrb[2].mxu1  ;;  %v503_v59 = vld [vmem:[#allocation2 + $0x68] sm:$0xff] }
 0x149   : > { %v868_v2 = vadd.f32 %v687_v0, %v492_v60  ;;  %v689_v3 = vpop.f32.mrb[3].mxu0  ;;  %v900_v4 = vadd.f32 %v783_v1, %v524_v62  ;;  %v785_v5 = vpop.f32.mrb[3].mxu1  ;;  %v535_v60 = vld [vmem:[#allocation2 + $0x168] sm:$0xff] }
 0x14a   : > { %v869_v6 = vadd.f32 %v689_v3, %v493_v63  ;;  %v901_v8 = vadd.f32 %v785_v5, %v525_v39  ;;  %v504_v3 = vld [vmem:[#allocation2 + $0x70] sm:$0xff] }
 0x14b   : > { %930 = vst [vmem:[#allocation2 + $0x10] sm:$0xff] %v868_v2  ;;  %962 = vst [vmem:[#allocation2 + $0x110] sm:$0xff] %v900_v4  ;;  %v536_v5 = vld [vmem:[#allocation2 + $0x170] sm:$0xff] }
 0x14c   : > { %931 = vst [vmem:[#allocation2 + $0x18] sm:$0xff] %v869_v6  ;;  %v693_v12 = vpop.f32.mrb[4].mxu0  ;;  %963 = vst [vmem:[#allocation2 + $0x118] sm:$0xff] %v901_v8  ;;  %v789_v13 = vpop.f32.mrb[4].mxu1  ;;  %v505_v6 = vld [vmem:[#allocation2 + $0x78] sm:$0xff] }
 0x14d   : > { %v870_v14 = vadd.f32 %v693_v12, %v494_v7  ;;  %v695_v15 = vpop.f32.mrb[5].mxu0  ;;  %v902_v16 = vadd.f32 %v789_v13, %v526_v9  ;;  %v791_v17 = vpop.f32.mrb[5].mxu1  ;;  %v537_v7 = vld [vmem:[#allocation2 + $0x178] sm:$0xff] }
 0x14e   : > { %v871_v18 = vadd.f32 %v695_v15, %v495_v10  ;;  %v903_v20 = vadd.f32 %v791_v17, %v527_v11  ;;  %v506_v15 = vld [vmem:[#allocation2 + $0x80] sm:$0xff] }
 0x14f   : > { %932 = vst [vmem:[#allocation2 + $0x20] sm:$0xff] %v870_v14  ;;  %964 = vst [vmem:[#allocation2 + $0x120] sm:$0xff] %v902_v16  ;;  %v538_v17 = vld [vmem:[#allocation2 + $0x180] sm:$0xff] }
 0x150   : > { %933 = vst [vmem:[#allocation2 + $0x28] sm:$0xff] %v871_v18  ;;  %v699_v24 = vpop.f32.mrb[6].mxu0  ;;  %965 = vst [vmem:[#allocation2 + $0x128] sm:$0xff] %v903_v20  ;;  %v795_v25 = vpop.f32.mrb[6].mxu1  ;;  %v507_v18 = vld [vmem:[#allocation2 + $0x88] sm:$0xff] }
 0x151   : > { %v872_v26 = vadd.f32 %v699_v24, %v496_v19  ;;  %v701_v27 = vpop.f32.mrb[7].mxu0  ;;  %v904_v28 = vadd.f32 %v795_v25, %v528_v21  ;;  %v797_v29 = vpop.f32.mrb[7].mxu1  ;;  %v539_v19 = vld [vmem:[#allocation2 + $0x188] sm:$0xff] }
 0x152   : > { %v873_v30 = vadd.f32 %v701_v27, %v497_v22  ;;  %v905_v32 = vadd.f32 %v797_v29, %v529_v23  ;;  %v508_v27 = vld [vmem:[#allocation2 + $0x90] sm:$0xff] }
 0x153   : > { %934 = vst [vmem:[#allocation2 + $0x30] sm:$0xff] %v872_v26  ;;  %966 = vst [vmem:[#allocation2 + $0x130] sm:$0xff] %v904_v28  ;;  %v540_v29 = vld [vmem:[#allocation2 + $0x190] sm:$0xff] }
 0x154   : > { %935 = vst [vmem:[#allocation2 + $0x38] sm:$0xff] %v873_v30  ;;  %v705_v36 = vpop.f32.mrb[8].mxu0  ;;  %967 = vst [vmem:[#allocation2 + $0x138] sm:$0xff] %v905_v32  ;;  %v801_v37 = vpop.f32.mrb[8].mxu1  ;;  %v509_v30 = vld [vmem:[#allocation2 + $0x98] sm:$0xff] }
 0x155   : > { %v874_v38 = vadd.f32 %v705_v36, %v498_v31  ;;  %v707_v40 = vpop.f32.mrb[9].mxu0  ;;  %v906_v41 = vadd.f32 %v801_v37, %v530_v33  ;;  %v803_v42 = vpop.f32.mrb[9].mxu1  ;;  %v541_v31 = vld [vmem:[#allocation2 + $0x198] sm:$0xff] }
 0x156   : > { %v875_v43 = vadd.f32 %v707_v40, %v499_v34  ;;  %v907_v45 = vadd.f32 %v803_v42, %v531_v35  ;;  %v510_v40 = vld [vmem:[#allocation2 + $0xa0] sm:$0xff] }
 0x157   : > { %936 = vst [vmem:[#allocation2 + $0x40] sm:$0xff] %v874_v38  ;;  %968 = vst [vmem:[#allocation2 + $0x140] sm:$0xff] %v906_v41  ;;  %v542_v42 = vld [vmem:[#allocation2 + $0x1a0] sm:$0xff] }
 0x158   : > { %937 = vst [vmem:[#allocation2 + $0x48] sm:$0xff] %v875_v43  ;;  %v711_v49 = vpop.f32.mrb[10].mxu0  ;;  %969 = vst [vmem:[#allocation2 + $0x148] sm:$0xff] %v907_v45  ;;  %v807_v50 = vpop.f32.mrb[10].mxu1  ;;  %v511_v43 = vld [vmem:[#allocation2 + $0xa8] sm:$0xff] }
 0x159   : > { %v876_v51 = vadd.f32 %v711_v49, %v500_v44  ;;  %v713_v52 = vpop.f32.mrb[11].mxu0  ;;  %v908_v53 = vadd.f32 %v807_v50, %v532_v46  ;;  %v809_v54 = vpop.f32.mrb[11].mxu1  ;;  %v543_v44 = vld [vmem:[#allocation2 + $0x1a8] sm:$0xff] }
 0x15a   : > { %v877_v55 = vadd.f32 %v713_v52, %v501_v47  ;;  %v909_v57 = vadd.f32 %v809_v54, %v533_v48  ;;  %v512_v52 = vld [vmem:[#allocation2 + $0xb0] sm:$0xff] }
 0x15b   : > { %938 = vst [vmem:[#allocation2 + $0x50] sm:$0xff] %v876_v51  ;;  %970 = vst [vmem:[#allocation2 + $0x150] sm:$0xff] %v908_v53  ;;  %v544_v54 = vld [vmem:[#allocation2 + $0x1b0] sm:$0xff] }
 0x15c   : > { %939 = vst [vmem:[#allocation2 + $0x58] sm:$0xff] %v877_v55  ;;  %v717_v61 = vpop.f32.mrb[12].mxu0  ;;  %971 = vst [vmem:[#allocation2 + $0x158] sm:$0xff] %v909_v57  ;;  %v813_v62 = vpop.f32.mrb[12].mxu1  ;;  %v513_v55 = vld [vmem:[#allocation2 + $0xb8] sm:$0xff] }
 0x15d   : > { %v878_v63 = vadd.f32 %v717_v61, %v502_v56  ;;  %v719_v39 = vpop.f32.mrb[13].mxu0  ;;  %v910_v0 = vadd.f32 %v813_v62, %v534_v58  ;;  %v815_v1 = vpop.f32.mrb[13].mxu1  ;;  %v545_v56 = vld [vmem:[#allocation2 + $0x1b8] sm:$0xff] }
 0x15e   : > { %v879_v2 = vadd.f32 %v719_v39, %v503_v59  ;;  %v911_v4 = vadd.f32 %v815_v1, %v535_v60  ;;  %v514_v39 = vld [vmem:[#allocation2 + $0xc0] sm:$0xff] }
 0x15f   : > { %940 = vst [vmem:[#allocation2 + $0x60] sm:$0xff] %v878_v63  ;;  %972 = vst [vmem:[#allocation2 + $0x160] sm:$0xff] %v910_v0  ;;  %v546_v1 = vld [vmem:[#allocation2 + $0x1c0] sm:$0xff] }
 0x160   : > { %941 = vst [vmem:[#allocation2 + $0x68] sm:$0xff] %v879_v2  ;;  %v723_v8 = vpop.f32.mrb[14].mxu0  ;;  %973 = vst [vmem:[#allocation2 + $0x168] sm:$0xff] %v911_v4  ;;  %v819_v9 = vpop.f32.mrb[14].mxu1  ;;  %v515_v2 = vld [vmem:[#allocation2 + $0xc8] sm:$0xff] }
 0x161   : > { %v880_v10 = vadd.f32 %v723_v8, %v504_v3  ;;  %v725_v11 = vpop.f32.mrb[15].mxu0  ;;  %v912_v12 = vadd.f32 %v819_v9, %v536_v5  ;;  %v821_v13 = vpop.f32.mrb[15].mxu1  ;;  %v547_v3 = vld [vmem:[#allocation2 + $0x1c8] sm:$0xff] }
 0x162   : > { %v881_v14 = vadd.f32 %v725_v11, %v505_v6  ;;  %v913_v16 = vadd.f32 %v821_v13, %v537_v7  ;;  %v516_v11 = vld [vmem:[#allocation2 + $0xd0] sm:$0xff] }
 0x163   : > { %942 = vst [vmem:[#allocation2 + $0x70] sm:$0xff] %v880_v10  ;;  %974 = vst [vmem:[#allocation2 + $0x170] sm:$0xff] %v912_v12  ;;  %v548_v13 = vld [vmem:[#allocation2 + $0x1d0] sm:$0xff] }
 0x164   : > { %943 = vst [vmem:[#allocation2 + $0x78] sm:$0xff] %v881_v14  ;;  %v729_v20 = vpop.f32.mrb[16].mxu0  ;;  %975 = vst [vmem:[#allocation2 + $0x178] sm:$0xff] %v913_v16  ;;  %v825_v21 = vpop.f32.mrb[16].mxu1  ;;  %v517_v14 = vld [vmem:[#allocation2 + $0xd8] sm:$0xff] }
 0x165   : > { %v882_v22 = vadd.f32 %v729_v20, %v506_v15  ;;  %v731_v23 = vpop.f32.mrb[17].mxu0  ;;  %v914_v24 = vadd.f32 %v825_v21, %v538_v17  ;;  %v827_v25 = vpop.f32.mrb[17].mxu1  ;;  %v549_v15 = vld [vmem:[#allocation2 + $0x1d8] sm:$0xff] }
 0x166   : > { %v883_v26 = vadd.f32 %v731_v23, %v507_v18  ;;  %v915_v28 = vadd.f32 %v827_v25, %v539_v19  ;;  %v518_v23 = vld [vmem:[#allocation2 + $0xe0] sm:$0xff] }
 0x167   : > { %944 = vst [vmem:[#allocation2 + $0x80] sm:$0xff] %v882_v22  ;;  %976 = vst [vmem:[#allocation2 + $0x180] sm:$0xff] %v914_v24  ;;  %v550_v25 = vld [vmem:[#allocation2 + $0x1e0] sm:$0xff] }
 0x168   : > { %945 = vst [vmem:[#allocation2 + $0x88] sm:$0xff] %v883_v26  ;;  %v735_v32 = vpop.f32.mrb[18].mxu0  ;;  %977 = vst [vmem:[#allocation2 + $0x188] sm:$0xff] %v915_v28  ;;  %v831_v33 = vpop.f32.mrb[18].mxu1  ;;  %v519_v26 = vld [vmem:[#allocation2 + $0xe8] sm:$0xff] }
 0x169   : > { %v884_v34 = vadd.f32 %v735_v32, %v508_v27  ;;  %v737_v35 = vpop.f32.mrb[19].mxu0  ;;  %v916_v36 = vadd.f32 %v831_v33, %v540_v29  ;;  %v833_v37 = vpop.f32.mrb[19].mxu1  ;;  %v551_v27 = vld [vmem:[#allocation2 + $0x1e8] sm:$0xff] }
 0x16a   : > { %v885_v38 = vadd.f32 %v737_v35, %v509_v30  ;;  %v917_v41 = vadd.f32 %v833_v37, %v541_v31  ;;  %v520_v35 = vld [vmem:[#allocation2 + $0xf0] sm:$0xff]  ;;  %v521_v37 = vld [vmem:[#allocation2 + $0xf8] sm:$0xff] }
 0x16b   : > { %946 = vst [vmem:[#allocation2 + $0x90] sm:$0xff] %v884_v34  ;;  %978 = vst [vmem:[#allocation2 + $0x190] sm:$0xff] %v916_v36 }
 0x16c   : > { %947 = vst [vmem:[#allocation2 + $0x98] sm:$0xff] %v885_v38  ;;  %v741_v45 = vpop.f32.mrb[20].mxu0  ;;  %979 = vst [vmem:[#allocation2 + $0x198] sm:$0xff] %v917_v41  ;;  %v837_v46 = vpop.f32.mrb[20].mxu1 }
 0x16d   : > { %v886_v47 = vadd.f32 %v741_v45, %v510_v40  ;;  %v743_v48 = vpop.f32.mrb[21].mxu0  ;;  %v918_v49 = vadd.f32 %v837_v46, %v542_v42  ;;  %v839_v50 = vpop.f32.mrb[21].mxu1  ;;  %v1056_v45 = vld [vmem:[%s2034_s2] sm:$0x3] (!%p1386_p11) }
 0x16e   : > { %v887_v51 = vadd.f32 %v743_v48, %v511_v43  ;;  %v919_v53 = vadd.f32 %v839_v50, %v543_v44  ;;  %v1058_v43 = vlaneseq (!%p1386_p11)  ;;  %v994_v46 = vld [vmem:[#allocation2] sm:$0xff] (!%p1386_p11)  ;;  %v995_v48 = vld [vmem:[#allocation2 + $0x8] sm:$0xff] (!%p1386_p11)  ;;  %v996_v50 = vld [vmem:[#allocation2 + $0x10] sm:$0xff] (!%p1386_p11) }
 0x16f   : > { %948 = vst [vmem:[#allocation2 + $0xa0] sm:$0xff] %v886_v47  ;;  %980 = vst [vmem:[#allocation2 + $0x1a0] sm:$0xff] %v918_v49 }
 0x170   : > { %949 = vst [vmem:[#allocation2 + $0xa8] sm:$0xff] %v887_v51  ;;  %v747_v57 = vpop.f32.mrb[22].mxu0  ;;  %981 = vst [vmem:[#allocation2 + $0x1a8] sm:$0xff] %v919_v53  ;;  %v843_v58 = vpop.f32.mrb[22].mxu1  ;;  %v1059_v44 = vshrl.u32 (!%p1386_p11), %v1058_v43, 7  ;;  %v997_v51 = vld [vmem:[#allocation2 + $0x18] sm:$0xff] (!%p1386_p11) }
 0x171   : > { %v888_v59 = vadd.f32 %v747_v57, %v512_v52  ;;  %v749_v60 = vpop.f32.mrb[23].mxu0  ;;  %v920_v61 = vadd.f32 %v843_v58, %v544_v54  ;;  %v845_v62 = vpop.f32.mrb[23].mxu1  ;;  %v998_v52 = vld [vmem:[#allocation2 + $0x20] sm:$0xff] (!%p1386_p11)  ;;  %v1001_v57 = vld [vmem:[#allocation2 + $0x38] sm:$0xff] (!%p1386_p11) }
 0x172   : > { %v889_v63 = vadd.f32 %v749_v60, %v513_v55  ;;  %v921_v0 = vadd.f32 %v845_v62, %v545_v56  ;;  %v1060_v47 = vsub.s32 (!%p1386_p11), 0, %v1059_v44  ;;  %v1064_v49 = vsub.s32 (!%p1386_p11), 1, %v1059_v44  ;;  %v999_v55 = vld [vmem:[#allocation2 + $0x28] sm:$0xff] (!%p1386_p11)  ;;  %v1000_v56 = vld [vmem:[#allocation2 + $0x30] sm:$0xff] (!%p1386_p11)  ;;  %v1002_v62 = vld [vmem:[#allocation2 + $0x40] sm:$0xff] (!%p1386_p11) }
 0x173   : > { %950 = vst [vmem:[#allocation2 + $0xb0] sm:$0xff] %v888_v59  ;;  %982 = vst [vmem:[#allocation2 + $0x1b0] sm:$0xff] %v920_v61 }
 0x174   : > { %951 = vst [vmem:[#allocation2 + $0xb8] sm:$0xff] %v889_v63  ;;  %v753_v4 = vpop.f32.mrb[24].mxu0  ;;  %983 = vst [vmem:[#allocation2 + $0x1b8] sm:$0xff] %v921_v0  ;;  %v849_v5 = vpop.f32.mrb[24].mxu1  ;;  %v1765_v53 = vrot.slane (!%p1386_p11), %v1056_v45, %v1060_v47  ;;  %v1767_v54 = vrot.slane (!%p1386_p11), %v1056_v45, %v1064_v49  ;;  %v1003_v63 = vld [vmem:[#allocation2 + $0x48] sm:$0xff] (!%p1386_p11) }
 0x175   : > { %v890_v6 = vadd.f32 %v753_v4, %v514_v39  ;;  %v755_v7 = vpop.f32.mrb[25].mxu0  ;;  %v922_v8 = vadd.f32 %v849_v5, %v546_v1  ;;  %v851_v9 = vpop.f32.mrb[25].mxu1  ;;  %v1004_v39 = vld [vmem:[#allocation2 + $0x50] sm:$0xff] (!%p1386_p11)  ;;  %v1005_v4 = vld [vmem:[#allocation2 + $0x58] sm:$0xff] (!%p1386_p11)  ;;  %v1006_v5 = vld [vmem:[#allocation2 + $0x60] sm:$0xff] (!%p1386_p11) }
 0x176   : > { %v891_v10 = vadd.f32 %v755_v7, %v515_v2  ;;  %v923_v12 = vadd.f32 %v851_v9, %v547_v3  ;;  %v1068_v58 = vadd.f32 (!%p1386_p11), %v1765_v53, %v994_v46  ;;  %v1069_v59 = vadd.f32 (!%p1386_p11), %v1767_v54, %v995_v48 }
 0x177   : > { %952 = vst [vmem:[#allocation2 + $0xc0] sm:$0xff] %v890_v6  ;;  %984 = vst [vmem:[#allocation2 + $0x1c0] sm:$0xff] %v922_v8  ;;  %v1070_v60 = vadd.f32 (!%p1386_p11), %v1765_v53, %v996_v50  ;;  %v1071_v61 = vadd.f32 (!%p1386_p11), %v1767_v54, %v997_v51  ;;  %v1072_v0 = vadd.f32 (!%p1386_p11), %v1765_v53, %v998_v52  ;;  %v1007_v6 = vld [vmem:[#allocation2 + $0x68] sm:$0xff] (!%p1386_p11) }
 0x178   : > { %953 = vst [vmem:[#allocation2 + $0xc8] sm:$0xff] %v891_v10  ;;  %v759_v16 = vpop.f32.mrb[26].mxu0  ;;  %985 = vst [vmem:[#allocation2 + $0x1c8] sm:$0xff] %v923_v12  ;;  %v855_v17 = vpop.f32.mrb[26].mxu1  ;;  %v1073_v1 = vadd.f32 (!%p1386_p11), %v1767_v54, %v999_v55  ;;  %v1074_v2 = vadd.f32 (!%p1386_p11), %v1765_v53, %v1000_v56  ;;  %v1075_v3 = vadd.f32 (!%p1386_p11), %v1767_v54, %v1001_v57  ;;  %v1130_v7 = vmax.f32 (!%p1386_p11), %v1068_v58, 0.0  ;;  %v1009_v12 = vld [vmem:[#allocation2 + $0x78] sm:$0xff] (!%p1386_p11) }
 0x179   : > { %v892_v18 = vadd.f32 %v759_v16, %v516_v11  ;;  %v761_v19 = vpop.f32.mrb[27].mxu0  ;;  %v924_v20 = vadd.f32 %v855_v17, %v548_v13  ;;  %v857_v21 = vpop.f32.mrb[27].mxu1  ;;  %v1131_v8 = vmax.f32 (!%p1386_p11), %v1069_v59, 0.0  ;;  %v1132_v9 = vmax.f32 (!%p1386_p11), %v1070_v60, 0.0  ;;  %v1008_v11 = vld [vmem:[#allocation2 + $0x70] sm:$0xff] (!%p1386_p11) }
 0x17a   : > { %v893_v22 = vadd.f32 %v761_v19, %v517_v14  ;;  %v925_v24 = vadd.f32 %v857_v21, %v549_v15  ;;  %v1133_v10 = vmax.f32 (!%p1386_p11), %v1071_v61, 0.0  ;;  %v1134_v13 = vmax.f32 (!%p1386_p11), %v1072_v0, 0.0  ;;  %1192 = vst [vmem:[%s2035_s3] sm:$0xff] (!%p1386_p11), %v1130_v7  ;;  %v1010_v21 = vld [vmem:[#allocation2 + $0x80] sm:$0xff] (!%p1386_p11) }
 0x17b   : > { %954 = vst [vmem:[#allocation2 + $0xd0] sm:$0xff] %v892_v18  ;;  %986 = vst [vmem:[#allocation2 + $0x1d0] sm:$0xff] %v924_v20  ;;  %v1135_v14 = vmax.f32 (!%p1386_p11), %v1073_v1, 0.0  ;;  %v1136_v15 = vmax.f32 (!%p1386_p11), %v1074_v2, 0.0  ;;  %v1137_v16 = vmax.f32 (!%p1386_p11), %v1075_v3, 0.0  ;;  %v1076_v17 = vadd.f32 (!%p1386_p11), %v1765_v53, %v1002_v62  ;;  %v1026_v7 = vld [vmem:[#allocation2 + $0x100] sm:$0xff] (!%p1386_p11) }
 0x17c   : > { %955 = vst [vmem:[#allocation2 + $0xd8] sm:$0xff] %v893_v22  ;;  %v765_v28 = vpop.f32.mrb[28].mxu0  ;;  %987 = vst [vmem:[#allocation2 + $0x1d8] sm:$0xff] %v925_v24  ;;  %v861_v29 = vpop.f32.mrb[28].mxu1  ;;  %v1077_v18 = vadd.f32 (!%p1386_p11), %v1767_v54, %v1003_v63  ;;  %v1078_v19 = vadd.f32 (!%p1386_p11), %v1765_v53, %v1004_v39  ;;  %v1079_v20 = vadd.f32 (!%p1386_p11), %v1767_v54, %v1005_v4  ;;  %v1011_v22 = vld [vmem:[#allocation2 + $0x88] sm:$0xff] (!%p1386_p11) }
 0x17d   : > { %v894_v30 = vadd.f32 %v765_v28, %v518_v23  ;;  %v767_v31 = vpop.f32.mrb[29].mxu0  ;;  %v926_v32 = vadd.f32 %v861_v29, %v550_v25  ;;  %v863_v33 = vpop.f32.mrb[29].mxu1  ;;  %1193 = vst [vmem:[%s2035_s3 + $0x8] sm:$0xff] (!%p1386_p11), %v1131_v8  ;;  %1194 = vst [vmem:[%s2035_s3 + $0x10] sm:$0xff] (!%p1386_p11), %v1132_v9  ;;  %v1012_v23 = vld [vmem:[#allocation2 + $0x90] sm:$0xff] (!%p1386_p11)  ;;  %v1080_v24 = vadd.f32 (!%p1386_p11), %v1765_v53, %v1006_v5  ;;  %v1013_v28 = vld [vmem:[#allocation2 + $0x98] sm:$0xff] (!%p1386_p11) }
 0x17e   : > { %v895_v34 = vadd.f32 %v767_v31, %v519_v26  ;;  %v927_v36 = vadd.f32 %v863_v33, %v551_v27  ;;  %993 = sbr.rel (%p1386_p11) target bundleno = 415 (0x19f), region = 78  ;;  %1195 = vst [vmem:[%s2035_s3 + $0x18] sm:$0xff] (!%p1386_p11), %v1133_v10  ;;  %1196 = vst [vmem:[%s2035_s3 + $0x20] sm:$0xff] (!%p1386_p11), %v1134_v13  ;;  %v1081_v25 = vadd.f32 (!%p1386_p11), %v1767_v54, %v1007_v6  ;;  %v1014_v29 = vld [vmem:[#allocation2 + $0xa0] sm:$0xff] (!%p1386_p11)  ;;  %v1138_v31 = vmax.f32 (!%p1386_p11), %v1076_v17, 0.0  ;;  %v1027_v8 = vld [vmem:[#allocation2 + $0x108] sm:$0xff] (!%p1386_p11) }
 0x17f   : > { %956 = vst [vmem:[#allocation2 + $0xe0] sm:$0xff] %v894_v30  ;;  %988 = vst [vmem:[#allocation2 + $0x1e0] sm:$0xff] %v926_v32  ;;  %v1082_v26 = vadd.f32 (!%p1386_p11), %v1765_v53, %v1008_v11  ;;  %v1083_v27 = vadd.f32 (!%p1386_p11), %v1767_v54, %v1009_v12  ;;  %v1015_v30 = vld [vmem:[#allocation2 + $0xa8] sm:$0xff] (!%p1386_p11)  ;;  %v1139_v32 = vmax.f32 (!%p1386_p11), %v1077_v18, 0.0  ;;  %v1140_v33 = vmax.f32 (!%p1386_p11), %v1078_v19, 0.0  ;;  %v1018_v46 = vld [vmem:[#allocation2 + $0xc0] sm:$0xff] (!%p1386_p11) }
 0x180   : > { %957 = vst [vmem:[#allocation2 + $0xe8] sm:$0xff] %v895_v34  ;;  %v771_v38 = vpop.f32.mrb[30].mxu0  ;;  %989 = vst [vmem:[#allocation2 + $0x1e8] sm:$0xff] %v927_v36  ;;  %v1141_v34 = vmax.f32 (!%p1386_p11), %v1079_v20, 0.0  ;;  %v1017_v36 = vld [vmem:[#allocation2 + $0xb8] sm:$0xff] (!%p1386_p11)  ;;  %v1085_v43 = vadd.f32 (!%p1386_p11), %v1767_v54, %v1011_v22  ;;  %v1086_v44 = vadd.f32 (!%p1386_p11), %v1765_v53, %v1012_v23  ;;  %v1087_v45 = vadd.f32 (!%p1386_p11), %v1767_v54, %v1013_v28  ;;  %v1019_v47 = vld [vmem:[#allocation2 + $0xc8] sm:$0xff] (!%p1386_p11) }
 0x181   : > { %v896_v40 = vadd.f32 %v771_v38, %v520_v35  ;;  %v773_v41 = vpop.f32.mrb[31].mxu0  ;;  %1197 = vst [vmem:[%s2035_s3 + $0x28] sm:$0xff] (!%p1386_p11), %v1135_v14  ;;  %1198 = vst [vmem:[%s2035_s3 + $0x30] sm:$0xff] (!%p1386_p11), %v1136_v15  ;;  %v1016_v35 = vld [vmem:[#allocation2 + $0xb0] sm:$0xff] (!%p1386_p11)  ;;  %v1143_v38 = vmax.f32 (!%p1386_p11), %v1081_v25, 0.0  ;;  %v1088_v49 = vadd.f32 (!%p1386_p11), %v1765_v53, %v1014_v29  ;;  %v1089_v50 = vadd.f32 (!%p1386_p11), %v1767_v54, %v1015_v30  ;;  %v1029_v14 = vld [vmem:[#allocation2 + $0x118] sm:$0xff] (!%p1386_p11) }
 0x182   : > { %v897_v42 = vadd.f32 %v773_v41, %v521_v37  ;;  %1199 = vst [vmem:[%s2035_s3 + $0x38] sm:$0xff] (!%p1386_p11), %v1137_v16  ;;  %v1142_v37 = vmax.f32 (!%p1386_p11), %v1080_v24, 0.0  ;;  %v1145_v41 = vmax.f32 (!%p1386_p11), %v1083_v27, 0.0  ;;  %1200 = vst [vmem:[%s2035_s3 + $0x40] sm:$0xff] (!%p1386_p11), %v1138_v31  ;;  %v1020_v48 = vld [vmem:[#allocation2 + $0xd0] sm:$0xff] (!%p1386_p11)  ;;  %v1090_v51 = vadd.f32 (!%p1386_p11), %v1765_v53, %v1016_v35  ;;  %v1030_v15 = vld [vmem:[#allocation2 + $0x120] sm:$0xff] (!%p1386_p11) }
 0x183   : > { %958 = vst [vmem:[#allocation2 + $0xf0] sm:$0xff] %v896_v40  ;;  %v1144_v40 = vmax.f32 (!%p1386_p11), %v1082_v26, 0.0  ;;  %1201 = vst [vmem:[%s2035_s3 + $0x48] sm:$0xff] (!%p1386_p11), %v1139_v32  ;;  %v1091_v52 = vadd.f32 (!%p1386_p11), %v1767_v54, %v1017_v36  ;;  %v1021_v55 = vld [vmem:[#allocation2 + $0xd8] sm:$0xff] (!%p1386_p11)  ;;  %v1147_v59 = vmax.f32 (!%p1386_p11), %v1085_v43, 0.0  ;;  %v1148_v60 = vmax.f32 (!%p1386_p11), %v1086_v44, 0.0 }
 0x184   : > { %959 = vst [vmem:[#allocation2 + $0xf8] sm:$0xff] %v897_v42  ;;  %1202 = vst [vmem:[%s2035_s3 + $0x50] sm:$0xff] (!%p1386_p11), %v1140_v33  ;;  %v1084_v42 = vadd.f32 (!%p1386_p11), %v1765_v53, %v1010_v21  ;;  %v1149_v61 = vmax.f32 (!%p1386_p11), %v1087_v45, 0.0  ;;  %v1150_v39 = vmax.f32 (!%p1386_p11), %v1088_v49, 0.0  ;;  %v1151_v0 = vmax.f32 (!%p1386_p11), %v1089_v50, 0.0  ;;  %v1028_v9 = vld [vmem:[#allocation2 + $0x110] sm:$0xff] (!%p1386_p11) }
 0x185   : > { %1203 = vst [vmem:[%s2035_s3 + $0x58] sm:$0xff] %v1141_v34  ;;  %1204 = vst [vmem:[%s2035_s3 + $0x60] sm:$0xff] %v1142_v37  ;;  %v1152_v1 = vmax.f32 %v1090_v51, 0.0  ;;  %v1153_v2 = vmax.f32 %v1091_v52, 0.0  ;;  %v1092_v3 = vadd.f32 %v1765_v53, %v1018_v46  ;;  %v1093_v4 = vadd.f32 %v1767_v54, %v1019_v47  ;;  %v1031_v16 = vld [vmem:[#allocation2 + $0x128] sm:$0xff]  ;;  %v1032_v21 = vld [vmem:[#allocation2 + $0x130] sm:$0xff] }
 0x186   : > { %1205 = vst [vmem:[%s2035_s3 + $0x68] sm:$0xff] %v1143_v38  ;;  %1206 = vst [vmem:[%s2035_s3 + $0x70] sm:$0xff] %v1144_v40  ;;  %v1022_v56 = vld [vmem:[#allocation2 + $0xe0] sm:$0xff]  ;;  %v1146_v58 = vmax.f32 %v1084_v42, 0.0  ;;  %v1094_v5 = vadd.f32 %v1765_v53, %v1020_v48  ;;  %v1095_v6 = vadd.f32 %v1767_v54, %v1021_v55  ;;  %v1033_v22 = vld [vmem:[#allocation2 + $0x138] sm:$0xff]  ;;  %v1100_v27 = vadd.f32 %v1765_v53, %v1026_v7 }
 0x187   : > { %1207 = vst [vmem:[%s2035_s3 + $0x78] sm:$0xff] %v1145_v41  ;;  %v1023_v57 = vld [vmem:[#allocation2 + $0xe8] sm:$0xff]  ;;  %1209 = vst [vmem:[%s2035_s3 + $0x88] sm:$0xff] %v1147_v59  ;;  %v1096_v10 = vadd.f32 %v1765_v53, %v1022_v56  ;;  %v1154_v17 = vmax.f32 %v1092_v3, 0.0  ;;  %v1155_v18 = vmax.f32 %v1093_v4, 0.0  ;;  %v1101_v28 = vadd.f32 %v1767_v54, %v1027_v8  ;;  %v1034_v31 = vld [vmem:[#allocation2 + $0x140] sm:$0xff] }
 0x188   : > { %1208 = vst [vmem:[%s2035_s3 + $0x80] sm:$0xff] %v1146_v58  ;;  %1210 = vst [vmem:[%s2035_s3 + $0x90] sm:$0xff] %v1148_v60  ;;  %v1097_v11 = vadd.f32 %v1767_v54, %v1023_v57  ;;  %v1156_v19 = vmax.f32 %v1094_v5, 0.0  ;;  %v1157_v20 = vmax.f32 %v1095_v6, 0.0  ;;  %v1102_v29 = vadd.f32 %v1765_v53, %v1028_v9  ;;  %v1035_v32 = vld [vmem:[#allocation2 + $0x148] sm:$0xff]  ;;  %v1036_v33 = vld [vmem:[#allocation2 + $0x150] sm:$0xff] }
 0x189   : > { %1211 = vst [vmem:[%s2035_s3 + $0x98] sm:$0xff] %v1149_v61  ;;  %1212 = vst [vmem:[%s2035_s3 + $0xa0] sm:$0xff] %v1150_v39  ;;  %v1158_v23 = vmax.f32 %v1096_v10, 0.0  ;;  %v1103_v30 = vadd.f32 %v1767_v54, %v1029_v14  ;;  %v1104_v34 = vadd.f32 %v1765_v53, %v1030_v15  ;;  %v1105_v35 = vadd.f32 %v1767_v54, %v1031_v16  ;;  %v1037_v38 = vld [vmem:[#allocation2 + $0x158] sm:$0xff]  ;;  %v1038_v40 = vld [vmem:[#allocation2 + $0x160] sm:$0xff] }
 0x18a   : > { %v1024_v62 = vld [vmem:[#allocation2 + $0xf0] sm:$0xff]  ;;  %1213 = vst [vmem:[%s2035_s3 + $0xa8] sm:$0xff] %v1151_v0  ;;  %1214 = vst [vmem:[%s2035_s3 + $0xb0] sm:$0xff] %v1152_v1  ;;  %v1159_v24 = vmax.f32 %v1097_v11, 0.0  ;;  %v1106_v36 = vadd.f32 %v1765_v53, %v1032_v21  ;;  %v1107_v37 = vadd.f32 %v1767_v54, %v1033_v22  ;;  %v1039_v41 = vld [vmem:[#allocation2 + $0x168] sm:$0xff]  ;;  %v1162_v42 = vmax.f32 %v1100_v27, 0.0 }
 0x18b   : > { %v1025_v63 = vld [vmem:[#allocation2 + $0xf8] sm:$0xff]  ;;  %1215 = vst [vmem:[%s2035_s3 + $0xb8] sm:$0xff] %v1153_v2  ;;  %v1098_v12 = vadd.f32 %v1765_v53, %v1024_v62  ;;  %1216 = vst [vmem:[%s2035_s3 + $0xc0] sm:$0xff] %v1154_v17  ;;  %v1163_v43 = vmax.f32 %v1101_v28, 0.0  ;;  %v1164_v44 = vmax.f32 %v1102_v29, 0.0  ;;  %v1165_v45 = vmax.f32 %v1103_v30, 0.0 }
 0x18c   : > { %v1099_v13 = vadd.f32 %v1767_v54, %v1025_v63  ;;  %1217 = vst [vmem:[%s2035_s3 + $0xc8] sm:$0xff] %v1155_v18  ;;  %1218 = vst [vmem:[%s2035_s3 + $0xd0] sm:$0xff] %v1156_v19  ;;  %v1040_v46 = vld [vmem:[#allocation2 + $0x170] sm:$0xff]  ;;  %v1041_v47 = vld [vmem:[#allocation2 + $0x178] sm:$0xff]  ;;  %v1166_v48 = vmax.f32 %v1104_v34, 0.0  ;;  %v1167_v49 = vmax.f32 %v1105_v35, 0.0  ;;  %v1108_v52 = vadd.f32 %v1765_v53, %v1034_v31 }
 0x18d   : > { %v1160_v25 = vmax.f32 %v1098_v12, 0.0  ;;  %1219 = vst [vmem:[%s2035_s3 + $0xd8] sm:$0xff] %v1157_v20  ;;  %1220 = vst [vmem:[%s2035_s3 + $0xe0] sm:$0xff] %v1158_v23  ;;  %v1168_v50 = vmax.f32 %v1106_v36, 0.0  ;;  %v1169_v51 = vmax.f32 %v1107_v37, 0.0  ;;  %v1109_v55 = vadd.f32 %v1767_v54, %v1035_v32  ;;  %v1042_v58 = vld [vmem:[#allocation2 + $0x180] sm:$0xff] }
 0x18e   : > { %v1161_v26 = vmax.f32 %v1099_v13, 0.0  ;;  %1221 = vst [vmem:[%s2035_s3 + $0xe8] sm:$0xff] %v1159_v24  ;;  %1224 = vst [vmem:[%s2035_s3 + $0x100] sm:$0xff] %v1162_v42  ;;  %v1110_v56 = vadd.f32 %v1765_v53, %v1036_v33  ;;  %v1111_v57 = vadd.f32 %v1767_v54, %v1037_v38  ;;  %v1043_v59 = vld [vmem:[#allocation2 + $0x188] sm:$0xff]  ;;  %v1044_v60 = vld [vmem:[#allocation2 + $0x190] sm:$0xff]  ;;  %v1112_v61 = vadd.f32 %v1765_v53, %v1038_v40 }
 0x18f   : > { %1222 = vst [vmem:[%s2035_s3 + $0xf0] sm:$0xff] %v1160_v25  ;;  %1225 = vst [vmem:[%s2035_s3 + $0x108] sm:$0xff] %v1163_v43  ;;  %v1113_v62 = vadd.f32 %v1767_v54, %v1039_v41  ;;  %v1114_v63 = vadd.f32 %v1765_v53, %v1040_v46  ;;  %v1115_v39 = vadd.f32 %v1767_v54, %v1041_v47  ;;  %v1045_v0 = vld [vmem:[#allocation2 + $0x198] sm:$0xff]  ;;  %v1046_v1 = vld [vmem:[#allocation2 + $0x1a0] sm:$0xff]  ;;  %v1170_v3 = vmax.f32 %v1108_v52, 0.0 }
 0x190   : > { %1223 = vst [vmem:[%s2035_s3 + $0xf8] sm:$0xff] %v1161_v26  ;;  %1226 = vst [vmem:[%s2035_s3 + $0x110] sm:$0xff] %v1164_v44  ;;  %v1047_v2 = vld [vmem:[#allocation2 + $0x1a8] sm:$0xff]  ;;  %v1171_v4 = vmax.f32 %v1109_v55, 0.0  ;;  %v1172_v5 = vmax.f32 %v1110_v56, 0.0  ;;  %v1173_v6 = vmax.f32 %v1111_v57, 0.0  ;;  %v1116_v13 = vadd.f32 %v1765_v53, %v1042_v58 }
 0x191   : > { %1227 = vst [vmem:[%s2035_s3 + $0x118] sm:$0xff] %v1165_v45  ;;  %1228 = vst [vmem:[%s2035_s3 + $0x120] sm:$0xff] %v1166_v48  ;;  %v1048_v7 = vld [vmem:[#allocation2 + $0x1b0] sm:$0xff]  ;;  %v1049_v8 = vld [vmem:[#allocation2 + $0x1b8] sm:$0xff]  ;;  %v1174_v9 = vmax.f32 %v1112_v61, 0.0  ;;  %v1175_v10 = vmax.f32 %v1113_v62, 0.0  ;;  %v1117_v14 = vadd.f32 %v1767_v54, %v1043_v59  ;;  %v1118_v15 = vadd.f32 %v1765_v53, %v1044_v60 }
 0x192   : > { %1229 = vst [vmem:[%s2035_s3 + $0x128] sm:$0xff] %v1167_v49  ;;  %1230 = vst [vmem:[%s2035_s3 + $0x130] sm:$0xff] %v1168_v50  ;;  %v1176_v11 = vmax.f32 %v1114_v63, 0.0  ;;  %v1177_v12 = vmax.f32 %v1115_v39, 0.0  ;;  %v1119_v16 = vadd.f32 %v1767_v54, %v1045_v0  ;;  %v1050_v17 = vld [vmem:[#allocation2 + $0x1c0] sm:$0xff]  ;;  %v1120_v18 = vadd.f32 %v1765_v53, %v1046_v1  ;;  %v1051_v22 = vld [vmem:[#allocation2 + $0x1c8] sm:$0xff] }
 0x193   : > { %1231 = vst [vmem:[%s2035_s3 + $0x138] sm:$0xff] %v1169_v51  ;;  %1232 = vst [vmem:[%s2035_s3 + $0x140] sm:$0xff] %v1170_v3  ;;  %v1121_v19 = vadd.f32 %v1767_v54, %v1047_v2  ;;  %v1122_v20 = vadd.f32 %v1765_v53, %v1048_v7  ;;  %v1123_v21 = vadd.f32 %v1767_v54, %v1049_v8  ;;  %v1052_v23 = vld [vmem:[#allocation2 + $0x1d0] sm:$0xff]  ;;  %v1053_v24 = vld [vmem:[#allocation2 + $0x1d8] sm:$0xff]  ;;  %v1178_v25 = vmax.f32 %v1116_v13, 0.0 }
 0x194   : > { %1233 = vst [vmem:[%s2035_s3 + $0x148] sm:$0xff] %v1171_v4  ;;  %1234 = vst [vmem:[%s2035_s3 + $0x150] sm:$0xff] %v1172_v5  ;;  %v1179_v26 = vmax.f32 %v1117_v14, 0.0  ;;  %v1180_v27 = vmax.f32 %v1118_v15, 0.0  ;;  %v1181_v28 = vmax.f32 %v1119_v16, 0.0  ;;  %v1054_v29 = vld [vmem:[#allocation2 + $0x1e0] sm:$0xff]  ;;  %v1124_v35 = vadd.f32 %v1765_v53, %v1050_v17 }
 0x195   : > { %1235 = vst [vmem:[%s2035_s3 + $0x158] sm:$0xff] %v1173_v6  ;;  %1236 = vst [vmem:[%s2035_s3 + $0x160] sm:$0xff] %v1174_v9  ;;  %v1055_v30 = vld [vmem:[#allocation2 + $0x1e8] sm:$0xff]  ;;  %v1182_v31 = vmax.f32 %v1120_v18, 0.0  ;;  %v1183_v32 = vmax.f32 %v1121_v19, 0.0  ;;  %v1184_v33 = vmax.f32 %v1122_v20, 0.0  ;;  %v1125_v36 = vadd.f32 %v1767_v54, %v1051_v22 }
 0x196   : > { %1237 = vst [vmem:[%s2035_s3 + $0x168] sm:$0xff] %v1175_v10  ;;  %1238 = vst [vmem:[%s2035_s3 + $0x170] sm:$0xff] %v1176_v11  ;;  %v1185_v34 = vmax.f32 %v1123_v21, 0.0  ;;  %v1126_v37 = vadd.f32 %v1765_v53, %v1052_v23  ;;  %v1127_v38 = vadd.f32 %v1767_v54, %v1053_v24  ;;  %v1128_v40 = vadd.f32 %v1765_v53, %v1054_v29 }
 0x197   : > { %1239 = vst [vmem:[%s2035_s3 + $0x178] sm:$0xff] %v1177_v12  ;;  %1240 = vst [vmem:[%s2035_s3 + $0x180] sm:$0xff] %v1178_v25  ;;  %v1129_v41 = vadd.f32 %v1767_v54, %v1055_v30  ;;  %v1186_v42 = vmax.f32 %v1124_v35, 0.0  ;;  %v1187_v43 = vmax.f32 %v1125_v36, 0.0 }
 0x198   : > { %1241 = vst [vmem:[%s2035_s3 + $0x188] sm:$0xff] %v1179_v26  ;;  %1242 = vst [vmem:[%s2035_s3 + $0x190] sm:$0xff] %v1180_v27  ;;  %v1188_v44 = vmax.f32 %v1126_v37, 0.0  ;;  %v1189_v45 = vmax.f32 %v1127_v38, 0.0  ;;  %v1190_v46 = vmax.f32 %v1128_v40, 0.0 }
 0x199   : > { %1243 = vst [vmem:[%s2035_s3 + $0x198] sm:$0xff] %v1181_v28  ;;  %1244 = vst [vmem:[%s2035_s3 + $0x1a0] sm:$0xff] %v1182_v31  ;;  %v1191_v47 = vmax.f32 %v1129_v41, 0.0 }
 0x19a   : > { %1245 = vst [vmem:[%s2035_s3 + $0x1a8] sm:$0xff] %v1183_v32  ;;  %1246 = vst [vmem:[%s2035_s3 + $0x1b0] sm:$0xff] %v1184_v33 }
 0x19b   : > { %1247 = vst [vmem:[%s2035_s3 + $0x1b8] sm:$0xff] %v1185_v34  ;;  %1248 = vst [vmem:[%s2035_s3 + $0x1c0] sm:$0xff] %v1186_v42 }
 0x19c   : > { %1249 = vst [vmem:[%s2035_s3 + $0x1c8] sm:$0xff] %v1187_v43  ;;  %1250 = vst [vmem:[%s2035_s3 + $0x1d0] sm:$0xff] %v1188_v44 }
 0x19d   : > { %1251 = vst [vmem:[%s2035_s3 + $0x1d8] sm:$0xff] %v1189_v45  ;;  %1252 = vst [vmem:[%s2035_s3 + $0x1e0] sm:$0xff] %v1190_v46 }
 0x19e   : > { %1253 = vst [vmem:[%s2035_s3 + $0x1e8] sm:$0xff] %v1191_v47 }
 0x19f PF: > { %s13_s16 = sadd.s32 1, %s1522_s16   ;;  %s2036_s12 = smov %s1510_s13 }
 0x1a0   : > { %p10_p12 = scmp.ge.s32.totalorder %s13_s16, 11   ;;  %s2037_s13 = smov %s1581_s20 }
 0x1a1   : > { %s2038_s14 = smov %s1518_s15  ;;  %s2039_s15 = smov %s2041_s17 }
 0x1a2   :  { %12 = sbr.rel (!%p10_p12) target bundleno = 3 (0x3), region = 119 }

// kernel: simclr_stage1_forward.10
= control target key start
LH: loop header
LB: loop body
LE: loop exit
PB: predicated region body
PF: predicated region fallthrough
CT: control target
= control target key end

     0   :  { %s975_s12 = smov 0   ;;  %s977_s13 = smov 0   ;;  %s1169_s0 = inlined_call_operand.vmem [shape: f32[56,2304], index: 0, kind: input, shape index: {}]   ;;  %s1170_s1 = inlined_call_operand.vmem [shape: f32[2304,256], index: 1, kind: input, shape index: {}]   ;;  %s1171_s2 = inlined_call_operand.vmem [shape: f32[1,256], index: 2, kind: input, shape index: {}]   ;;  %s1172_s3 = inlined_call_operand.vmem [shape: f32[56,256], index: 3, kind: output, shape index: {}]  }
   0x1   :  { %s979_s14 = smov 0   ;;  %s981_s15 = smov 0  }
   0x2   :  { %s983_s16 = smov 0  }
   0x3 LB: > { %s25_s17 = sadd.s32 1, %s948_s15  ;;  %p48_p1 = scmp.ne.s32.totalorder %s940_s13, %s936_s12  ;;  %s952_s16 = sphi %s983_s16, %s13_s16   ;;  %s948_s15 = sphi %s981_s15, %s1176_s15   ;;  %s944_s14 = sphi %s979_s14, %s1175_s14   ;;  %s940_s13 = sphi %s977_s13, %s1174_s13   ;;  %s936_s12 = sphi %s975_s12, %s1173_s12  }
   0x4   : > { %p26_p0 = scmp.ge.s32.totalorder %s25_s17, 9  ;;  %p49_p2 = scmp.eq.s32.totalorder %s952_s16, 0 }
   0x5   : > { %s41_s19 = sadd.s32 1, %s940_s13  ;;  %p760_p5 = scmp.ge.s32.totalorder %s952_s16, 9 }
   0x6   : > { %s1178_s17 = smov (%p26_p0, %s25_s17), 0  ;;  %p50_p3 = por %p49_p2, %p48_p1 }
   0x7   : > { %s37_s18 = ssub.s32 %s948_s15, %s1178_s17  ;;  %164 = sbr.rel (%p760_p5) target bundleno = 26 (0x1a), region = 20 }
   0x8   : > { %p39_p4 = scmp.eq.s32.totalorder %s37_s18, 0 }
   0xa   : > { %s1010_s20 = scalar_select %p39_p4, %s940_s13, %s41_s19  }
   0xe   : > { %167 = sbr.rel (!%p50_p3) target bundleno = 26 (0x1a), region = 24  ;;  %s169_s21 = sand.u32 (%p50_p3), 1, %s940_s13  }
   0xf   : > { %s773_s22 = sshll.u32 (%p50_p3), %s948_s15, 4  ;;  %s871_s23 = smul.u32 (%p50_p3), 112, %s169_s21 }
  0x10   : > { %s177_s26 = scalar_lea.vmem (%p50_p3), %s1169_s0, %s773_s22 }
  0x11   : > { %v190_v0 = vld [vmem:[%s177_s26] sm:$0xff] (%p50_p3)  ;;  %v192_v1 = vld [vmem:[%s177_s26 + $0x8] sm:$0xff] (%p50_p3)  ;;  %v194_v2 = vld [vmem:[%s177_s26 + $0x90] sm:$0xff] (%p50_p3)  ;;  %s171_s27 = scalar_lea.vmem (%p50_p3), [#allocation3], %s871_s23 }
  0x12   : > { %v196_v3 = vld [vmem:[%s177_s26 + $0x98] sm:$0xff] (%p50_p3)  ;;  %v198_v4 = vld [vmem:[%s177_s26 + $0x120] sm:$0xff] (%p50_p3)  ;;  %v200_v5 = vld [vmem:[%s177_s26 + $0x128] sm:$0xff] (%p50_p3)  ;;  %191 = vst [vmem:[%s171_s27] sm:$0xff] (%p50_p3), %v190_v0 }
  0x13   : > { %193 = vst [vmem:[%s171_s27 + $0x8] sm:$0xff] (%p50_p3), %v192_v1  ;;  %195 = vst [vmem:[%s171_s27 + $0x10] sm:$0xff] (%p50_p3), %v194_v2  ;;  %v202_v6 = vld [vmem:[%s177_s26 + $0x1b0] sm:$0xff] (%p50_p3)  ;;  %v204_v7 = vld [vmem:[%s177_s26 + $0x1b8] sm:$0xff] (%p50_p3) }
  0x14   : > { %197 = vst [vmem:[%s171_s27 + $0x18] sm:$0xff] (%p50_p3), %v196_v3  ;;  %199 = vst [vmem:[%s171_s27 + $0x20] sm:$0xff] (%p50_p3), %v198_v4  ;;  %v206_v8 = vld [vmem:[%s177_s26 + $0x240] sm:$0xff] (%p50_p3)  ;;  %v208_v9 = vld [vmem:[%s177_s26 + $0x248] sm:$0xff] (%p50_p3) }
  0x15   : > { %201 = vst [vmem:[%s171_s27 + $0x28] sm:$0xff] %v200_v5  ;;  %203 = vst [vmem:[%s171_s27 + $0x30] sm:$0xff] %v202_v6  ;;  %v210_v10 = vld [vmem:[%s177_s26 + $0x2d0] sm:$0xff]  ;;  %v212_v11 = vld [vmem:[%s177_s26 + $0x2d8] sm:$0xff] }
  0x16   : > { %205 = vst [vmem:[%s171_s27 + $0x38] sm:$0xff] %v204_v7  ;;  %207 = vst [vmem:[%s171_s27 + $0x40] sm:$0xff] %v206_v8  ;;  %v214_v12 = vld [vmem:[%s177_s26 + $0x360] sm:$0xff]  ;;  %v216_v13 = vld [vmem:[%s177_s26 + $0x368] sm:$0xff] }
  0x17   : > { %209 = vst [vmem:[%s171_s27 + $0x48] sm:$0xff] %v208_v9  ;;  %211 = vst [vmem:[%s171_s27 + $0x50] sm:$0xff] %v210_v10 }
  0x18   : > { %213 = vst [vmem:[%s171_s27 + $0x58] sm:$0xff] %v212_v11  ;;  %215 = vst [vmem:[%s171_s27 + $0x60] sm:$0xff] %v214_v12 }
  0x19   : > { %217 = vst [vmem:[%s171_s27 + $0x68] sm:$0xff] %v216_v13 }
  0x1a PF: > { %p763_p6 = scmp.ge.s32.totalorder %s952_s16, 1  ;;  %p237_p7 = scmp.lt.s32.totalorder %s952_s16, 10 }
  0x1c   : > { %p238_p8 = pnand %p763_p6, %p237_p7 }
  0x1d   : > { %s244_s28 = sand.u32 (!%p238_p8), 1, %s936_s12   ;;  %s764_s29 = sshll.u32 (!%p238_p8), %s944_s14, 5 }
  0x1e   : > { %241 = sbr.rel (%p238_p8) target bundleno = 353 (0x161), region = 51  ;;  %p290_p9 = scmp.lt.s32.totalorder (!%p238_p8), %s764_s29, 287 }
  0x1f   : > { %s872_s30 = smul.u32 (!%p238_p8), 112, %s244_s28  ;;  %p767_p10 = scmp.ne.s32.totalorder (!%p238_p8), %s944_s14, 0 }
  0x21   : > { %s1027_s8 = scalar_lea.vmem (!%p238_p8), [#allocation3], %s872_s30 }
  0x25   : > { %s1180_s29 = smov (!%p290_p9, %s764_s29), 287  ;;  %320 = sbr.rel (%p767_p10) target bundleno = 46 (0x2e), region = 59 }
  0x26   : > { %s774_s4 = sshll.u32 %s1180_s29, 4  ;;  %v954_v14 = vmov (!%p767_p10), 0.0  }
  0x27   : > { %s1025_s7 = scalar_lea.vmem %s1170_s1, %s774_s4  ;;  %321 = vst [vmem:[#allocation2] sm:$0xff] (!%p767_p10), %v954_v14  ;;  %322 = vst [vmem:[#allocation2 + $0x8] sm:$0xff] (!%p767_p10), %v954_v14 }
  0x28   : > { %323 = vst [vmem:[#allocation2 + $0x10] sm:$0xff] (!%p767_p10), %v954_v14  ;;  %324 = vst [vmem:[#allocation2 + $0x18] sm:$0xff] (!%p767_p10), %v954_v14 }
  0x29   : > { %325 = vst [vmem:[#allocation2 + $0x20] sm:$0xff] (!%p767_p10), %v954_v14  ;;  %326 = vst [vmem:[#allocation2 + $0x28] sm:$0xff] (!%p767_p10), %v954_v14 }
  0x2a   : > { %327 = vst [vmem:[#allocation2 + $0x30] sm:$0xff] (!%p767_p10), %v954_v14  ;;  %328 = vst [vmem:[#allocation2 + $0x38] sm:$0xff] (!%p767_p10), %v954_v14 }
  0x2b   : > { %329 = vst [vmem:[#allocation2 + $0x40] sm:$0xff] (!%p767_p10), %v954_v14  ;;  %330 = vst [vmem:[#allocation2 + $0x48] sm:$0xff] (!%p767_p10), %v954_v14 }
  0x2c   : > { %331 = vst [vmem:[#allocation2 + $0x50] sm:$0xff] %v954_v14  ;;  %332 = vst [vmem:[#allocation2 + $0x58] sm:$0xff] %v954_v14 }
  0x2d   : > { %333 = vst [vmem:[#allocation2 + $0x60] sm:$0xff] %v954_v14  ;;  %334 = vst [vmem:[#allocation2 + $0x68] sm:$0xff] %v954_v14 }
  0x2e PF: > { %v364_v15 = vld [vmem:[%s1025_s7 + $0x8] sm:$0xff]  ;;  %v366_v16 = vld [vmem:[%s1025_s7 + $0x18] sm:$0xff]  ;;  %v363_v17 = vld [vmem:[%s1025_s7] sm:$0xff]  ;;  %p768_p11 = scmp.ne.s32.totalorder %s944_s14, 8 }
  0x2f   : > { %v775_v18 = vpack.c.bf16 %v366_v16, %v364_v15  ;;  %v365_v19 = vld [vmem:[%s1025_s7 + $0x10] sm:$0xff]  ;;  %v368_v20 = vld [vmem:[%s1025_s7 + $0x28] sm:$0xff]  ;;  %v370_v21 = vld [vmem:[%s1025_s7 + $0x38] sm:$0xff] }
  0x30   : > { %v777_v22 = vpack.c.bf16 %v365_v19, %v363_v17  ;;  %v779_v23 = vpack.c.bf16 %v370_v21, %v368_v20  ;;  %v367_v24 = vld [vmem:[%s1025_s7 + $0x20] sm:$0xff]  ;;  %v369_v25 = vld [vmem:[%s1025_s7 + $0x30] sm:$0xff]  ;;  %v372_v26 = vld [vmem:[%s1025_s7 + $0x48] sm:$0xff] }
  0x31   : > { %776 = vmatprep.subr.bf16.mxu0 %v775_v18  ;;  %839 = vmatprep.subr.bf16.mxu1 %v775_v18  ;;  %v374_v27 = vld [vmem:[%s1025_s7 + $0x58] sm:$0xff]  ;;  %v781_v28 = vpack.c.bf16 %v369_v25, %v367_v24  ;;  %v371_v30 = vld [vmem:[%s1025_s7 + $0x40] sm:$0xff]  ;;  %v373_v31 = vld [vmem:[%s1025_s7 + $0x50] sm:$0xff] }
  0x32   : > { %778 = vmatpush1.bf16.msra.mxu0 %v777_v22  ;;  %855 = vmatpush1.bf16.msra.mxu1 %v777_v22  ;;  %v783_v29 = vpack.c.bf16 %v374_v27, %v372_v26  ;;  %v376_v32 = vld [vmem:[%s1025_s7 + $0x68] sm:$0xff]  ;;  %v378_v33 = vld [vmem:[%s1025_s7 + $0x78] sm:$0xff]  ;;  %v785_v34 = vpack.c.bf16 %v373_v31, %v371_v30  ;;  %v375_v36 = vld [vmem:[%s1025_s7 + $0x60] sm:$0xff] }
  0x33   : > { %780 = vmatprep.subr.bf16.mxu0 %v779_v23  ;;  %840 = vmatprep.subr.bf16.mxu1 %v779_v23  ;;  %v787_v35 = vpack.c.bf16 %v378_v33, %v376_v32  ;;  %v377_v37 = vld [vmem:[%s1025_s7 + $0x70] sm:$0xff]  ;;  %v380_v38 = vld [vmem:[%s1025_s7 + $0x88] sm:$0xff]  ;;  %v382_v39 = vld [vmem:[%s1025_s7 + $0x98] sm:$0xff] }
  0x34   : > { %v789_v40 = vpack.c.bf16 %v377_v37, %v375_v36  ;;  %v791_v41 = vpack.c.bf16 %v382_v39, %v380_v38  ;;  %v379_v42 = vld [vmem:[%s1025_s7 + $0x80] sm:$0xff]  ;;  %v381_v43 = vld [vmem:[%s1025_s7 + $0x90] sm:$0xff]  ;;  %v384_v44 = vld [vmem:[%s1025_s7 + $0xa8] sm:$0xff] }
  0x35   : > { %v386_v45 = vld [vmem:[%s1025_s7 + $0xb8] sm:$0xff]  ;;  %v793_v46 = vpack.c.bf16 %v381_v43, %v379_v42  ;;  %v383_v48 = vld [vmem:[%s1025_s7 + $0xa0] sm:$0xff]  ;;  %v385_v49 = vld [vmem:[%s1025_s7 + $0xb0] sm:$0xff] }
  0x36   : > { %782 = vmatpush1.bf16.msra.mxu0 %v781_v28  ;;  %856 = vmatpush1.bf16.msra.mxu1 %v781_v28  ;;  %v795_v47 = vpack.c.bf16 %v386_v45, %v384_v44  ;;  %v388_v50 = vld [vmem:[%s1025_s7 + $0xc8] sm:$0xff]  ;;  %v390_v51 = vld [vmem:[%s1025_s7 + $0xd8] sm:$0xff]  ;;  %v797_v52 = vpack.c.bf16 %v385_v49, %v383_v48  ;;  %v387_v54 = vld [vmem:[%s1025_s7 + $0xc0] sm:$0xff] }
  0x37   : > { %784 = vmatprep.subr.bf16.mxu0 %v783_v29  ;;  %841 = vmatprep.subr.bf16.mxu1 %v783_v29  ;;  %v799_v53 = vpack.c.bf16 %v390_v51, %v388_v50  ;;  %v389_v55 = vld [vmem:[%s1025_s7 + $0xd0] sm:$0xff]  ;;  %v350_v56 = vld [vmem:[%s1027_s8 + $0x8] sm:$0xff]  ;;  %v391_v62 = vld [vmem:[%s1025_s7 + $0xe0] sm:$0xff] }
  0x38   : > { %v392_v57 = vld [vmem:[%s1025_s7 + $0xe8] sm:$0xff]  ;;  %v394_v58 = vld [vmem:[%s1025_s7 + $0xf8] sm:$0xff]  ;;  %491 = vmatprep.mubr.f32.mxu0 %v350_v56  ;;  %v801_v60 = vpack.c.bf16 %v389_v55, %v387_v54  ;;  %v393_v63 = vld [vmem:[%s1025_s7 + $0xf0] sm:$0xff] }
  0x39   : > { %v358_v59 = vld [vmem:[%s1027_s8 + $0x48] sm:$0xff]  ;;  %v803_v61 = vpack.c.bf16 %v394_v58, %v392_v57  ;;  %v805_v2 = vpack.c.bf16 %v393_v63, %v391_v62  ;;  %v395_v4 = vld [vmem:[%s1025_s7 + $0x100] sm:$0xff]  ;;  %v397_v5 = vld [vmem:[%s1025_s7 + $0x110] sm:$0xff] }
  0x3a   : > { %786 = vmatpush1.bf16.msra.mxu0 %v785_v34  ;;  %857 = vmatpush1.bf16.msra.mxu1 %v785_v34  ;;  %v396_v0 = vld [vmem:[%s1025_s7 + $0x108] sm:$0xff]  ;;  %v398_v1 = vld [vmem:[%s1025_s7 + $0x118] sm:$0xff]  ;;  %v809_v8 = vpack.c.bf16 %v397_v5, %v395_v4  ;;  %v399_v10 = vld [vmem:[%s1025_s7 + $0x120] sm:$0xff] }
  0x3b   : > { %788 = vmatprep.subr.bf16.mxu0 %v787_v35  ;;  %842 = vmatprep.subr.bf16.mxu1 %v787_v35  ;;  %v807_v3 = vpack.c.bf16 %v398_v1, %v396_v0  ;;  %v400_v6 = vld [vmem:[%s1025_s7 + $0x128] sm:$0xff]  ;;  %v402_v7 = vld [vmem:[%s1025_s7 + $0x138] sm:$0xff]  ;;  %v401_v11 = vld [vmem:[%s1025_s7 + $0x130] sm:$0xff] }
  0x3c   : > { %515 = vmatprep.mubr.f32.mxu1 %v358_v59  ;;  %v811_v9 = vpack.c.bf16 %v402_v7, %v400_v6  ;;  %v404_v12 = vld [vmem:[%s1025_s7 + $0x148] sm:$0xff]  ;;  %v406_v13 = vld [vmem:[%s1025_s7 + $0x158] sm:$0xff]  ;;  %v813_v14 = vpack.c.bf16 %v401_v11, %v399_v10  ;;  %v403_v16 = vld [vmem:[%s1025_s7 + $0x140] sm:$0xff] }
  0x3d   : > { %v815_v15 = vpack.c.bf16 %v406_v13, %v404_v12  ;;  %v405_v17 = vld [vmem:[%s1025_s7 + $0x150] sm:$0xff]  ;;  %v408_v18 = vld [vmem:[%s1025_s7 + $0x168] sm:$0xff]  ;;  %v410_v19 = vld [vmem:[%s1025_s7 + $0x178] sm:$0xff] }
  0x3e   : > { %790 = vmatpush1.bf16.msra.mxu0 %v789_v40  ;;  %858 = vmatpush1.bf16.msra.mxu1 %v789_v40  ;;  %v817_v20 = vpack.c.bf16 %v405_v17, %v403_v16  ;;  %v819_v21 = vpack.c.bf16 %v410_v19, %v408_v18  ;;  %v407_v22 = vld [vmem:[%s1025_s7 + $0x160] sm:$0xff]  ;;  %v409_v23 = vld [vmem:[%s1025_s7 + $0x170] sm:$0xff]  ;;  %v412_v24 = vld [vmem:[%s1025_s7 + $0x188] sm:$0xff] }
  0x3f   : > { %792 = vmatprep.subr.bf16.mxu0 %v791_v41  ;;  %843 = vmatprep.subr.bf16.mxu1 %v791_v41  ;;  %v414_v25 = vld [vmem:[%s1025_s7 + $0x198] sm:$0xff]  ;;  %v821_v26 = vpack.c.bf16 %v409_v23, %v407_v22  ;;  %v411_v28 = vld [vmem:[%s1025_s7 + $0x180] sm:$0xff]  ;;  %v413_v29 = vld [vmem:[%s1025_s7 + $0x190] sm:$0xff] }
  0x40   : > { %v823_v27 = vpack.c.bf16 %v414_v25, %v412_v24  ;;  %v416_v30 = vld [vmem:[%s1025_s7 + $0x1a8] sm:$0xff]  ;;  %v418_v31 = vld [vmem:[%s1025_s7 + $0x1b8] sm:$0xff]  ;;  %v825_v32 = vpack.c.bf16 %v413_v29, %v411_v28  ;;  %v415_v34 = vld [vmem:[%s1025_s7 + $0x1a0] sm:$0xff] }
  0x41   : > { %v827_v33 = vpack.c.bf16 %v418_v31, %v416_v30  ;;  %v417_v35 = vld [vmem:[%s1025_s7 + $0x1b0] sm:$0xff]  ;;  %v420_v36 = vld [vmem:[%s1025_s7 + $0x1c8] sm:$0xff]  ;;  %v422_v37 = vld [vmem:[%s1025_s7 + $0x1d8] sm:$0xff] }
  0x42   : > { %794 = vmatpush1.bf16.msra.mxu0 %v793_v46  ;;  %859 = vmatpush1.bf16.msra.mxu1 %v793_v46  ;;  %v829_v38 = vpack.c.bf16 %v417_v35, %v415_v34  ;;  %v831_v39 = vpack.c.bf16 %v422_v37, %v420_v36  ;;  %v419_v40 = vld [vmem:[%s1025_s7 + $0x1c0] sm:$0xff]  ;;  %v421_v41 = vld [vmem:[%s1025_s7 + $0x1d0] sm:$0xff]  ;;  %v424_v42 = vld [vmem:[%s1025_s7 + $0x1e8] sm:$0xff] }
  0x43   : > { %796 = vmatprep.subr.bf16.mxu0 %v795_v47  ;;  %844 = vmatprep.subr.bf16.mxu1 %v795_v47  ;;  %v426_v43 = vld [vmem:[%s1025_s7 + $0x1f8] sm:$0xff]  ;;  %v833_v44 = vpack.c.bf16 %v421_v41, %v419_v40  ;;  %v423_v46 = vld [vmem:[%s1025_s7 + $0x1e0] sm:$0xff]  ;;  %v425_v47 = vld [vmem:[%s1025_s7 + $0x1f0] sm:$0xff] }
  0x44   : > { %v835_v45 = vpack.c.bf16 %v426_v43, %v424_v42  ;;  %v837_v48 = vpack.c.bf16 %v425_v47, %v423_v46  ;;  %v349_v49 = vld [vmem:[%s1027_s8] sm:$0xff]  ;;  %v352_v51 = vld [vmem:[%s1027_s8 + $0x18] sm:$0xff]  ;;  %v359_v54 = vld [vmem:[%s1027_s8 + $0x50] sm:$0xff] }
  0x45   : > { %v357_v50 = vld [vmem:[%s1027_s8 + $0x40] sm:$0xff]  ;;  %v354_v55 = vld [vmem:[%s1027_s8 + $0x28] sm:$0xff]  ;;  %v356_v59 = vld [vmem:[%s1027_s8 + $0x38] sm:$0xff] }
  0x46   : > { %798 = vmatpush1.bf16.msra.mxu0 %v797_v52  ;;  %860 = vmatpush1.bf16.msra.mxu1 %v797_v52  ;;  %v360_v52 = vld [vmem:[%s1027_s8 + $0x58] sm:$0xff]  ;;  %v362_v56 = vld [vmem:[%s1027_s8 + $0x68] sm:$0xff]  ;;  %v353_v57 = vld [vmem:[%s1027_s8 + $0x20] sm:$0xff] }
  0x47   : > { %800 = vmatprep.subr.bf16.mxu0 %v799_v53  ;;  %845 = vmatprep.subr.bf16.mxu1 %v799_v53  ;;  %v351_v53 = vld [vmem:[%s1027_s8 + $0x10] sm:$0xff]  ;;  %v361_v58 = vld [vmem:[%s1027_s8 + $0x60] sm:$0xff]  ;;  %v336_v63 = vld [vmem:[#allocation2 + $0x8] sm:$0xff] }
  0x48   : > { %v343_v62 = vld [vmem:[#allocation2 + $0x40] sm:$0xff]  ;;  %v344_v0 = vld [vmem:[#allocation2 + $0x48] sm:$0xff]  ;;  %v345_v10 = vld [vmem:[#allocation2 + $0x50] sm:$0xff] }
  0x49   : > { %v338_v11 = vld [vmem:[#allocation2 + $0x18] sm:$0xff]  ;;  %v347_v22 = vld [vmem:[#allocation2 + $0x60] sm:$0xff]  ;;  %v340_v23 = vld [vmem:[#allocation2 + $0x28] sm:$0xff] }
  0x4a   : > { %802 = vmatpush1.bf16.msra.mxu0 %v801_v60  ;;  %861 = vmatpush1.bf16.msra.mxu1 %v801_v60  ;;  %v355_v60 = vld [vmem:[%s1027_s8 + $0x30] sm:$0xff]  ;;  %v346_v12 = vld [vmem:[#allocation2 + $0x58] sm:$0xff]  ;;  %v348_v24 = vld [vmem:[#allocation2 + $0x68] sm:$0xff] }
  0x4b   : > { %804 = vmatprep.subr.bf16.mxu0 %v803_v61  ;;  %846 = vmatprep.subr.bf16.mxu1 %v803_v61  ;;  %v335_v61 = vld [vmem:[#allocation2] sm:$0xff]  ;;  %v342_v34 = vld [vmem:[#allocation2 + $0x38] sm:$0xff] }
  0x4c   : > { %v580_v41 = vld [vmem:[%s1171_s2] sm:$0x3] (!%p768_p11) }
  0x4e   : > { %806 = vmatpush1.bf16.msra.mxu0 %v805_v2  ;;  %862 = vmatpush1.bf16.msra.mxu1 %v805_v2 }
  0x4f   : > { %808 = vmatprep.subr.bf16.mxu0 %v807_v3  ;;  %847 = vmatprep.subr.bf16.mxu1 %v807_v3 }
  0x52   : > { %810 = vmatpush1.bf16.msra.mxu0 %v809_v8  ;;  %863 = vmatpush1.bf16.msra.mxu1 %v809_v8  ;;  %v337_v8 = vld [vmem:[#allocation2 + $0x10] sm:$0xff] }
  0x53   : > { %812 = vmatprep.subr.bf16.mxu0 %v811_v9  ;;  %848 = vmatprep.subr.bf16.mxu1 %v811_v9 }
  0x56   : > { %814 = vmatpush1.bf16.msra.mxu0 %v813_v14  ;;  %864 = vmatpush1.bf16.msra.mxu1 %v813_v14 }
  0x57   : > { %816 = vmatprep.subr.bf16.mxu0 %v815_v15  ;;  %849 = vmatprep.subr.bf16.mxu1 %v815_v15 }
  0x5a   : > { %818 = vmatpush1.bf16.msra.mxu0 %v817_v20  ;;  %865 = vmatpush1.bf16.msra.mxu1 %v817_v20  ;;  %v339_v20 = vld [vmem:[#allocation2 + $0x20] sm:$0xff] }
  0x5b   : > { %820 = vmatprep.subr.bf16.mxu0 %v819_v21  ;;  %850 = vmatprep.subr.bf16.mxu1 %v819_v21 }
  0x5e   : > { %822 = vmatpush1.bf16.msra.mxu0 %v821_v26  ;;  %866 = vmatpush1.bf16.msra.mxu1 %v821_v26 }
  0x5f   : > { %824 = vmatprep.subr.bf16.mxu0 %v823_v27  ;;  %851 = vmatprep.subr.bf16.mxu1 %v823_v27 }
  0x62   : > { %826 = vmatpush1.bf16.msra.mxu0 %v825_v32  ;;  %867 = vmatpush1.bf16.msra.mxu1 %v825_v32  ;;  %v341_v32 = vld [vmem:[#allocation2 + $0x30] sm:$0xff] }
  0x63   : > { %828 = vmatprep.subr.bf16.mxu0 %v827_v33  ;;  %852 = vmatprep.subr.bf16.mxu1 %v827_v33 }
  0x66   : > { %830 = vmatpush1.bf16.msra.mxu0 %v829_v38  ;;  %868 = vmatpush1.bf16.msra.mxu1 %v829_v38 }
  0x67   : > { %832 = vmatprep.subr.bf16.mxu0 %v831_v39  ;;  %853 = vmatprep.subr.bf16.mxu1 %v831_v39  ;;  %v582_v39 = vlaneseq (!%p768_p11) }
  0x69   : > { %v583_v40 = vshrl.u32 (!%p768_p11), %v582_v39, 7 }
  0x6a   : > { %834 = vmatpush1.bf16.msra.mxu0 %v833_v44  ;;  %869 = vmatpush1.bf16.msra.mxu1 %v833_v44 }
  0x6b   : > { %836 = vmatprep.subr.bf16.mxu0 %v835_v45  ;;  %854 = vmatprep.subr.bf16.mxu1 %v835_v45  ;;  %v584_v43 = vsub.s32 (!%p768_p11), 0, %v583_v40  ;;  %v588_v45 = vsub.s32 (!%p768_p11), 1, %v583_v40 }
  0x6e   : > { %838 = vmatpush1.bf16.msra.mxu0 %v837_v48  ;;  %870 = vmatpush1.bf16.msra.mxu1 %v837_v48 }
  0x71   : > { %492 = vmatmul.mubr.f32.vlgmr.msra.gmra.mrb[0].mxu0 %v349_v49  ;;  %516 = vmatmul.mubr.f32.vlgmr.msra.gmra.mrb[0].mxu1 %v357_v50  ;;  %v585_v49 = vrot.slane (!%p768_p11), %v580_v41, %v584_v43  ;;  %v589_v50 = vrot.slane (!%p768_p11), %v580_v41, %v588_v45 }
  0x72   : > { %497 = vmatprep.mubr.f32.mxu0 %v352_v51  ;;  %521 = vmatprep.mubr.f32.mxu1 %v360_v52 }
  0x75   : > { %498 = vmatmul.mubr.f32.gmra.mrb[2].mxu0 %v351_v53  ;;  %522 = vmatmul.mubr.f32.gmra.mrb[2].mxu1 %v359_v54 }
  0x76   : > { %503 = vmatprep.mubr.f32.mxu0 %v354_v55  ;;  %527 = vmatprep.mubr.f32.mxu1 %v362_v56 }
  0x79   : > { %504 = vmatmul.mubr.f32.gmra.mrb[4].mxu0 %v353_v57  ;;  %528 = vmatmul.mubr.f32.gmra.mrb[4].mxu1 %v361_v58 }
  0x7a   : > { %509 = vmatprep.mubr.f32.mxu0 %v356_v59 }
  0x7d   : > { %510 = vmatmul.mubr.f32.gmra.mrb[6].mxu0 %v355_v60 }
 0x144   : > { %v493_v1 = vpop.f32.mrb[0].mxu0  ;;  %v517_v2 = vpop.f32.mrb[0].mxu1 }
 0x145   : > { %v534_v3 = vadd.f32 %v493_v1, %v335_v61  ;;  %v495_v4 = vpop.f32.mrb[1].mxu0  ;;  %v542_v5 = vadd.f32 %v517_v2, %v343_v62  ;;  %v519_v6 = vpop.f32.mrb[1].mxu1 }
 0x146   : > { %v535_v7 = vadd.f32 %v495_v4, %v336_v63  ;;  %v543_v9 = vadd.f32 %v519_v6, %v344_v0 }
 0x147   : > { %548 = vst [vmem:[#allocation2] sm:$0xff] %v534_v3  ;;  %556 = vst [vmem:[#allocation2 + $0x40] sm:$0xff] %v542_v5 }
 0x148   : > { %549 = vst [vmem:[#allocation2 + $0x8] sm:$0xff] %v535_v7  ;;  %v499_v13 = vpop.f32.mrb[2].mxu0  ;;  %557 = vst [vmem:[#allocation2 + $0x48] sm:$0xff] %v543_v9  ;;  %v523_v14 = vpop.f32.mrb[2].mxu1 }
 0x149   : > { %v536_v15 = vadd.f32 %v499_v13, %v337_v8  ;;  %v501_v16 = vpop.f32.mrb[3].mxu0  ;;  %v544_v17 = vadd.f32 %v523_v14, %v345_v10  ;;  %v525_v18 = vpop.f32.mrb[3].mxu1 }
 0x14a   : > { %v537_v19 = vadd.f32 %v501_v16, %v338_v11  ;;  %v545_v21 = vadd.f32 %v525_v18, %v346_v12 }
 0x14b   : > { %550 = vst [vmem:[#allocation2 + $0x10] sm:$0xff] %v536_v15  ;;  %558 = vst [vmem:[#allocation2 + $0x50] sm:$0xff] %v544_v17 }
 0x14c   : > { %551 = vst [vmem:[#allocation2 + $0x18] sm:$0xff] %v537_v19  ;;  %v505_v25 = vpop.f32.mrb[4].mxu0  ;;  %559 = vst [vmem:[#allocation2 + $0x58] sm:$0xff] %v545_v21  ;;  %v529_v26 = vpop.f32.mrb[4].mxu1 }
 0x14d   : > { %v538_v27 = vadd.f32 %v505_v25, %v339_v20  ;;  %v507_v28 = vpop.f32.mrb[5].mxu0  ;;  %v546_v29 = vadd.f32 %v529_v26, %v347_v22  ;;  %v531_v30 = vpop.f32.mrb[5].mxu1 }
 0x14e   : > { %v539_v31 = vadd.f32 %v507_v28, %v340_v23  ;;  %v547_v33 = vadd.f32 %v531_v30, %v348_v24  ;;  %565 = sbr.rel (%p768_p11) target bundleno = 353 (0x161), region = 63  ;;  %v566_v42 = vld [vmem:[#allocation2] sm:$0xff] (!%p768_p11) }
 0x14f   : > { %552 = vst [vmem:[#allocation2 + $0x20] sm:$0xff] %v538_v27  ;;  %560 = vst [vmem:[#allocation2 + $0x60] sm:$0xff] %v546_v29  ;;  %v567_v44 = vld [vmem:[#allocation2 + $0x8] sm:$0xff] (!%p768_p11)  ;;  %v592_v54 = vadd.f32 (!%p768_p11), %v585_v49, %v566_v42  ;;  %v574_v58 = vld [vmem:[#allocation2 + $0x40] sm:$0xff] (!%p768_p11) }
 0x150   : > { %553 = vst [vmem:[#allocation2 + $0x28] sm:$0xff] %v539_v31  ;;  %v511_v35 = vpop.f32.mrb[6].mxu0  ;;  %561 = vst [vmem:[#allocation2 + $0x68] sm:$0xff] %v547_v33  ;;  %v593_v55 = vadd.f32 (!%p768_p11), %v589_v50, %v567_v44  ;;  %v575_v63 = vld [vmem:[#allocation2 + $0x48] sm:$0xff] (!%p768_p11)  ;;  %v600_v12 = vadd.f32 (!%p768_p11), %v585_v49, %v574_v58 }
 0x151   : > { %v540_v36 = vadd.f32 %v511_v35, %v341_v32  ;;  %v513_v37 = vpop.f32.mrb[7].mxu0  ;;  %v606_v2 = vmax.f32 (!%p768_p11), %v592_v54, 0.0  ;;  %v601_v13 = vadd.f32 (!%p768_p11), %v589_v50, %v575_v63 }
 0x152   : > { %v541_v38 = vadd.f32 %v513_v37, %v342_v34  ;;  %v568_v46 = vld [vmem:[#allocation2 + $0x10] sm:$0xff] (!%p768_p11)  ;;  %v607_v3 = vmax.f32 (!%p768_p11), %v593_v55, 0.0  ;;  %v614_v18 = vmax.f32 (!%p768_p11), %v600_v12, 0.0 }
 0x153   : > { %554 = vst [vmem:[#allocation2 + $0x30] sm:$0xff] %v540_v36  ;;  %v569_v47 = vld [vmem:[#allocation2 + $0x18] sm:$0xff] (!%p768_p11)  ;;  %v594_v56 = vadd.f32 (!%p768_p11), %v585_v49, %v568_v46  ;;  %v576_v0 = vld [vmem:[#allocation2 + $0x50] sm:$0xff] (!%p768_p11)  ;;  %620 = vst [vmem:[%s1172_s3] sm:$0xff] (!%p768_p11), %v606_v2  ;;  %v615_v19 = vmax.f32 (!%p768_p11), %v601_v13, 0.0 }
 0x154   : > { %555 = vst [vmem:[#allocation2 + $0x38] sm:$0xff] %v541_v38  ;;  %v595_v57 = vadd.f32 (!%p768_p11), %v589_v50, %v569_v47  ;;  %v577_v1 = vld [vmem:[#allocation2 + $0x58] sm:$0xff] (!%p768_p11)  ;;  %621 = vst [vmem:[%s1172_s3 + $0x8] sm:$0xff] (!%p768_p11), %v607_v3  ;;  %v602_v14 = vadd.f32 (!%p768_p11), %v585_v49, %v576_v0 }
 0x155   : > { %v608_v4 = vmax.f32 %v594_v56, 0.0  ;;  %v603_v15 = vadd.f32 %v589_v50, %v577_v1  ;;  %628 = vst [vmem:[%s1172_s3 + $0x40] sm:$0xff] %v614_v18  ;;  %629 = vst [vmem:[%s1172_s3 + $0x48] sm:$0xff] %v615_v19 }
 0x156   : > { %v570_v48 = vld [vmem:[#allocation2 + $0x20] sm:$0xff]  ;;  %v609_v5 = vmax.f32 %v595_v57, 0.0  ;;  %v616_v20 = vmax.f32 %v602_v14, 0.0 }
 0x157   : > { %v571_v51 = vld [vmem:[#allocation2 + $0x28] sm:$0xff]  ;;  %v596_v59 = vadd.f32 %v585_v49, %v570_v48  ;;  %v578_v6 = vld [vmem:[#allocation2 + $0x60] sm:$0xff]  ;;  %622 = vst [vmem:[%s1172_s3 + $0x10] sm:$0xff] %v608_v4  ;;  %v617_v21 = vmax.f32 %v603_v15, 0.0 }
 0x158   : > { %v597_v60 = vadd.f32 %v589_v50, %v571_v51  ;;  %v579_v7 = vld [vmem:[#allocation2 + $0x68] sm:$0xff]  ;;  %623 = vst [vmem:[%s1172_s3 + $0x18] sm:$0xff] %v609_v5  ;;  %v604_v16 = vadd.f32 %v585_v49, %v578_v6  ;;  %630 = vst [vmem:[%s1172_s3 + $0x50] sm:$0xff] %v616_v20 }
 0x159   : > { %v610_v8 = vmax.f32 %v596_v59, 0.0  ;;  %v605_v17 = vadd.f32 %v589_v50, %v579_v7  ;;  %631 = vst [vmem:[%s1172_s3 + $0x58] sm:$0xff] %v617_v21 }
 0x15a   : > { %v572_v52 = vld [vmem:[#allocation2 + $0x30] sm:$0xff]  ;;  %v611_v9 = vmax.f32 %v597_v60, 0.0  ;;  %v618_v22 = vmax.f32 %v604_v16, 0.0 }
 0x15b   : > { %v573_v53 = vld [vmem:[#allocation2 + $0x38] sm:$0xff]  ;;  %v598_v61 = vadd.f32 %v585_v49, %v572_v52  ;;  %624 = vst [vmem:[%s1172_s3 + $0x20] sm:$0xff] %v610_v8  ;;  %v619_v23 = vmax.f32 %v605_v17, 0.0 }
 0x15c   : > { %v599_v62 = vadd.f32 %v589_v50, %v573_v53  ;;  %625 = vst [vmem:[%s1172_s3 + $0x28] sm:$0xff] %v611_v9  ;;  %632 = vst [vmem:[%s1172_s3 + $0x60] sm:$0xff] %v618_v22 }
 0x15d   : > { %v612_v10 = vmax.f32 %v598_v61, 0.0  ;;  %633 = vst [vmem:[%s1172_s3 + $0x68] sm:$0xff] %v619_v23 }
 0x15e   : > { %v613_v11 = vmax.f32 %v599_v62, 0.0 }
 0x15f   : > { %626 = vst [vmem:[%s1172_s3 + $0x30] sm:$0xff] %v612_v10 }
 0x160   : > { %627 = vst [vmem:[%s1172_s3 + $0x38] sm:$0xff] %v613_v11 }
 0x161 PF: > { %s13_s16 = sadd.s32 1, %s952_s16   ;;  %s1173_s12 = smov %s940_s13 }
 0x162   : > { %p10_p12 = scmp.ge.s32.totalorder %s13_s16, 11   ;;  %s1174_s13 = smov %s1010_s20 }
 0x163   : > { %s1175_s14 = smov %s948_s15  ;;  %s1176_s15 = smov %s1178_s17 }
 0x164   :  { %12 = sbr.rel (!%p10_p12) target bundleno = 3 (0x3), region = 104 }

// kernel: simclr_stage1_forward.11
= control target key start
LH: loop header
LB: loop body
LE: loop exit
PB: predicated region body
PF: predicated region fallthrough
CT: control target
= control target key end

     0   :  { %s1069_s15 = smov 0   ;;  %s1071_s16 = smov 0   ;;  %s1269_s0 = inlined_call_operand.vmem [shape: f32[8,6400], index: 0, kind: input, shape index: {}]   ;;  %s1270_s1 = inlined_call_operand.vmem [shape: f32[6400,512], index: 1, kind: input, shape index: {}]   ;;  %s1271_s2 = inlined_call_operand.vmem [shape: f32[1,512], index: 2, kind: input, shape index: {}]   ;;  %s1272_s3 = inlined_call_operand.vmem [shape: f32[8,512], index: 3, kind: output, shape index: {0}]   ;;  %s1273_s4 = inlined_call_operand.vmem [shape: f32[8,512], index: 4, kind: output, shape index: {1}]  }
   0x1   :  { %s1073_s17 = smov 0  }
   0x2 LB: > { %s27_s18 = sadd.s32 1, %s1037_s16  ;;  %p849_p0 = scmp.ge.s32.totalorder %s1041_s17, 1  ;;  %s1041_s17 = sphi %s1073_s17, %s15_s17   ;;  %s1037_s16 = sphi %s1071_s16, %s1275_s16   ;;  %s1033_s15 = sphi %s1069_s15, %s1274_s15  }
   0x3   : > { %p28_p1 = scmp.ge.s32.totalorder %s27_s18, 25  ;;  %p224_p2 = scmp.lt.s32.totalorder %s1041_s17, 26 }
   0x5   : > { %s1277_s18 = smov (%p28_p1, %s27_s18), 0  ;;  %p225_p3 = pnand %p849_p0, %p224_p2 }
   0x6   : > { %s850_s19 = sshll.u32 (!%p225_p3), %s1033_s15, 1  ;;  %s852_s20 = sshll.u32 (!%p225_p3), %s1033_s15, 5 }
   0x7   : > { %228 = sbr.rel (%p225_p3) target bundleno = 486 (0x1e6), region = 32  ;;  %p284_p4 = scmp.lt.s32.totalorder (!%p225_p3), %s850_s19, 49 }
   0x8   : > { %p293_p5 = scmp.lt.s32.totalorder (!%p225_p3), %s852_s20, 799  ;;  %p855_p6 = scmp.ne.s32.totalorder (!%p225_p3), %s1033_s15, 0 }
   0xe   : > { %s1279_s19 = smov (!%p284_p4, %s850_s19), 49  ;;  %s1281_s20 = smov (!%p293_p5, %s852_s20), 799 }
   0xf   : > { %s851_s21 = sshll.u32 %s1279_s19, 3  ;;  %s863_s25 = sshll.u32 %s1281_s20, 5  ;;  %v1043_v0 = vmov (!%p855_p6), 0.0  }
  0x10   : > { %s1094_s24 = scalar_lea.vmem %s1269_s0, %s851_s21  ;;  %s1099_s28 = scalar_lea.vmem %s1270_s1, %s863_s25  ;;  %332 = vst [vmem:[#allocation2] sm:$0xff] (!%p855_p6), %v1043_v0  ;;  %333 = vst [vmem:[#allocation2 + $0x8] sm:$0xff] (!%p855_p6), %v1043_v0 }
  0x11   : > { %331 = sbr.rel (%p855_p6) target bundleno = 24 (0x18), region = 36  ;;  %334 = vst [vmem:[#allocation2 + $0x10] sm:$0xff] (!%p855_p6), %v1043_v0  ;;  %335 = vst [vmem:[#allocation2 + $0x18] sm:$0xff] (!%p855_p6), %v1043_v0 }
  0x18 PF: > { %v343_v1 = vld [vmem:[%s1099_s28 + $0x8] sm:$0xff]  ;;  %v345_v3 = vld [vmem:[%s1099_s28 + $0x18] sm:$0xff]  ;;  %v342_v6 = vld [vmem:[%s1099_s28] sm:$0xff]  ;;  %p856_p7 = scmp.ne.s32.totalorder %s1033_s15, 24 }
  0x19   : > { %v347_v2 = vld [vmem:[%s1099_s28 + $0x28] sm:$0xff]  ;;  %v349_v5 = vld [vmem:[%s1099_s28 + $0x38] sm:$0xff]  ;;  %v346_v7 = vld [vmem:[%s1099_s28 + $0x20] sm:$0xff] }
  0x1a   : > { %v864_v4 = vpack.c.bf16 %v347_v2, %v343_v1  ;;  %v928_v8 = vpack.c.bf16 %v349_v5, %v345_v3  ;;  %v866_v9 = vpack.c.bf16 %v346_v7, %v342_v6  ;;  %v344_v10 = vld [vmem:[%s1099_s28 + $0x10] sm:$0xff]  ;;  %v351_v12 = vld [vmem:[%s1099_s28 + $0x48] sm:$0xff]  ;;  %v353_v15 = vld [vmem:[%s1099_s28 + $0x58] sm:$0xff] }
  0x1b   : > { %v348_v11 = vld [vmem:[%s1099_s28 + $0x30] sm:$0xff]  ;;  %v355_v14 = vld [vmem:[%s1099_s28 + $0x68] sm:$0xff]  ;;  %v357_v16 = vld [vmem:[%s1099_s28 + $0x78] sm:$0xff] }
  0x1c   : > { %865 = vmatprep.subr.bf16.mxu0 %v864_v4  ;;  %v930_v13 = vpack.c.bf16 %v348_v11, %v344_v10  ;;  %929 = vmatprep.subr.bf16.mxu1 %v928_v8  ;;  %v868_v17 = vpack.c.bf16 %v355_v14, %v351_v12  ;;  %v932_v18 = vpack.c.bf16 %v357_v16, %v353_v15  ;;  %v350_v19 = vld [vmem:[%s1099_s28 + $0x40] sm:$0xff]  ;;  %v352_v21 = vld [vmem:[%s1099_s28 + $0x50] sm:$0xff]  ;;  %v359_v24 = vld [vmem:[%s1099_s28 + $0x88] sm:$0xff] }
  0x1d   : > { %867 = vmatpush1.bf16.msra.mxu0 %v866_v9  ;;  %v354_v20 = vld [vmem:[%s1099_s28 + $0x60] sm:$0xff]  ;;  %v356_v23 = vld [vmem:[%s1099_s28 + $0x70] sm:$0xff]  ;;  %v363_v25 = vld [vmem:[%s1099_s28 + $0xa8] sm:$0xff] }
  0x1e   : > { %931 = vmatpush1.bf16.msra.mxu1 %v930_v13  ;;  %v870_v22 = vpack.c.bf16 %v354_v20, %v350_v19  ;;  %869 = vmatprep.subr.bf16.mxu0 %v868_v17  ;;  %v934_v26 = vpack.c.bf16 %v356_v23, %v352_v21  ;;  %v872_v27 = vpack.c.bf16 %v363_v25, %v359_v24  ;;  %v361_v28 = vld [vmem:[%s1099_s28 + $0x98] sm:$0xff]  ;;  %v358_v30 = vld [vmem:[%s1099_s28 + $0x80] sm:$0xff]  ;;  %v360_v33 = vld [vmem:[%s1099_s28 + $0x90] sm:$0xff] }
  0x1f   : > { %933 = vmatprep.subr.bf16.mxu1 %v932_v18  ;;  %v365_v29 = vld [vmem:[%s1099_s28 + $0xb8] sm:$0xff]  ;;  %v362_v32 = vld [vmem:[%s1099_s28 + $0xa0] sm:$0xff]  ;;  %v364_v34 = vld [vmem:[%s1099_s28 + $0xb0] sm:$0xff] }
  0x20   : > { %v936_v31 = vpack.c.bf16 %v365_v29, %v361_v28  ;;  %v874_v35 = vpack.c.bf16 %v362_v32, %v358_v30  ;;  %v367_v36 = vld [vmem:[%s1099_s28 + $0xc8] sm:$0xff]  ;;  %v369_v38 = vld [vmem:[%s1099_s28 + $0xd8] sm:$0xff]  ;;  %v938_v39 = vpack.c.bf16 %v364_v34, %v360_v33  ;;  %v366_v42 = vld [vmem:[%s1099_s28 + $0xc0] sm:$0xff] }
  0x21   : > { %871 = vmatpush1.bf16.msra.mxu0 %v870_v22  ;;  %v371_v37 = vld [vmem:[%s1099_s28 + $0xe8] sm:$0xff]  ;;  %v373_v41 = vld [vmem:[%s1099_s28 + $0xf8] sm:$0xff]  ;;  %v370_v43 = vld [vmem:[%s1099_s28 + $0xe0] sm:$0xff] }
  0x22   : > { %935 = vmatpush1.bf16.msra.mxu1 %v934_v26  ;;  %873 = vmatprep.subr.bf16.mxu0 %v872_v27  ;;  %v876_v40 = vpack.c.bf16 %v371_v37, %v367_v36  ;;  %v940_v44 = vpack.c.bf16 %v373_v41, %v369_v38  ;;  %v368_v45 = vld [vmem:[%s1099_s28 + $0xd0] sm:$0xff]  ;;  %v375_v47 = vld [vmem:[%s1099_s28 + $0x108] sm:$0xff]  ;;  %v377_v49 = vld [vmem:[%s1099_s28 + $0x118] sm:$0xff]  ;;  %v878_v51 = vpack.c.bf16 %v370_v43, %v366_v42 }
  0x23   : > { %937 = vmatprep.subr.bf16.mxu1 %v936_v31  ;;  %v372_v46 = vld [vmem:[%s1099_s28 + $0xf0] sm:$0xff]  ;;  %v379_v48 = vld [vmem:[%s1099_s28 + $0x128] sm:$0xff]  ;;  %v381_v50 = vld [vmem:[%s1099_s28 + $0x138] sm:$0xff] }
  0x24   : > { %v942_v52 = vpack.c.bf16 %v372_v46, %v368_v45  ;;  %v880_v53 = vpack.c.bf16 %v379_v48, %v375_v47  ;;  %v374_v54 = vld [vmem:[%s1099_s28 + $0x100] sm:$0xff]  ;;  %v376_v56 = vld [vmem:[%s1099_s28 + $0x110] sm:$0xff]  ;;  %v944_v57 = vpack.c.bf16 %v381_v50, %v377_v49  ;;  %v383_v59 = vld [vmem:[%s1099_s28 + $0x148] sm:$0xff] }
  0x25   : > { %875 = vmatpush1.bf16.msra.mxu0 %v874_v35  ;;  %v378_v55 = vld [vmem:[%s1099_s28 + $0x120] sm:$0xff]  ;;  %v380_v58 = vld [vmem:[%s1099_s28 + $0x130] sm:$0xff]  ;;  %v387_v60 = vld [vmem:[%s1099_s28 + $0x168] sm:$0xff] }
  0x26   : > { %939 = vmatpush1.bf16.msra.mxu1 %v938_v39  ;;  %877 = vmatprep.subr.bf16.mxu0 %v876_v40  ;;  %v385_v61 = vld [vmem:[%s1099_s28 + $0x158] sm:$0xff]  ;;  %v882_v63 = vpack.c.bf16 %v378_v55, %v374_v54  ;;  %v946_v0 = vpack.c.bf16 %v380_v58, %v376_v56  ;;  %v884_v1 = vpack.c.bf16 %v387_v60, %v383_v59  ;;  %v382_v2 = vld [vmem:[%s1099_s28 + $0x140] sm:$0xff]  ;;  %v384_v4 = vld [vmem:[%s1099_s28 + $0x150] sm:$0xff] }
  0x27   : > { %941 = vmatprep.subr.bf16.mxu1 %v940_v44  ;;  %v389_v62 = vld [vmem:[%s1099_s28 + $0x178] sm:$0xff]  ;;  %v386_v3 = vld [vmem:[%s1099_s28 + $0x160] sm:$0xff]  ;;  %v388_v6 = vld [vmem:[%s1099_s28 + $0x170] sm:$0xff] }
  0x28   : > { %v948_v5 = vpack.c.bf16 %v389_v62, %v385_v61  ;;  %v391_v7 = vld [vmem:[%s1099_s28 + $0x188] sm:$0xff]  ;;  %v393_v9 = vld [vmem:[%s1099_s28 + $0x198] sm:$0xff]  ;;  %v886_v11 = vpack.c.bf16 %v386_v3, %v382_v2  ;;  %v950_v12 = vpack.c.bf16 %v388_v6, %v384_v4  ;;  %v390_v14 = vld [vmem:[%s1099_s28 + $0x180] sm:$0xff] }
  0x29   : > { %879 = vmatpush1.bf16.msra.mxu0 %v878_v51  ;;  %v395_v8 = vld [vmem:[%s1099_s28 + $0x1a8] sm:$0xff]  ;;  %v397_v10 = vld [vmem:[%s1099_s28 + $0x1b8] sm:$0xff]  ;;  %v394_v15 = vld [vmem:[%s1099_s28 + $0x1a0] sm:$0xff] }
  0x2a   : > { %943 = vmatpush1.bf16.msra.mxu1 %v942_v52  ;;  %881 = vmatprep.subr.bf16.mxu0 %v880_v53  ;;  %v888_v13 = vpack.c.bf16 %v395_v8, %v391_v7  ;;  %v392_v16 = vld [vmem:[%s1099_s28 + $0x190] sm:$0xff]  ;;  %v952_v17 = vpack.c.bf16 %v397_v10, %v393_v9  ;;  %v399_v19 = vld [vmem:[%s1099_s28 + $0x1c8] sm:$0xff]  ;;  %v401_v21 = vld [vmem:[%s1099_s28 + $0x1d8] sm:$0xff]  ;;  %v890_v23 = vpack.c.bf16 %v394_v15, %v390_v14 }
  0x2b   : > { %945 = vmatprep.subr.bf16.mxu1 %v944_v57  ;;  %v396_v18 = vld [vmem:[%s1099_s28 + $0x1b0] sm:$0xff]  ;;  %v403_v20 = vld [vmem:[%s1099_s28 + $0x1e8] sm:$0xff]  ;;  %v405_v22 = vld [vmem:[%s1099_s28 + $0x1f8] sm:$0xff] }
  0x2c   : > { %v954_v24 = vpack.c.bf16 %v396_v18, %v392_v16  ;;  %v892_v25 = vpack.c.bf16 %v403_v20, %v399_v19  ;;  %v398_v26 = vld [vmem:[%s1099_s28 + $0x1c0] sm:$0xff]  ;;  %v400_v28 = vld [vmem:[%s1099_s28 + $0x1d0] sm:$0xff]  ;;  %v956_v29 = vpack.c.bf16 %v405_v22, %v401_v21  ;;  %v407_v31 = vld [vmem:[%s1099_s28 + $0x208] sm:$0xff] }
  0x2d   : > { %883 = vmatpush1.bf16.msra.mxu0 %v882_v63  ;;  %v402_v27 = vld [vmem:[%s1099_s28 + $0x1e0] sm:$0xff]  ;;  %v404_v30 = vld [vmem:[%s1099_s28 + $0x1f0] sm:$0xff]  ;;  %v411_v32 = vld [vmem:[%s1099_s28 + $0x228] sm:$0xff] }
  0x2e   : > { %947 = vmatpush1.bf16.msra.mxu1 %v946_v0  ;;  %885 = vmatprep.subr.bf16.mxu0 %v884_v1  ;;  %v409_v33 = vld [vmem:[%s1099_s28 + $0x218] sm:$0xff]  ;;  %v894_v35 = vpack.c.bf16 %v402_v27, %v398_v26  ;;  %v958_v36 = vpack.c.bf16 %v404_v30, %v400_v28  ;;  %v896_v37 = vpack.c.bf16 %v411_v32, %v407_v31  ;;  %v406_v38 = vld [vmem:[%s1099_s28 + $0x200] sm:$0xff]  ;;  %v408_v40 = vld [vmem:[%s1099_s28 + $0x210] sm:$0xff] }
  0x2f   : > { %949 = vmatprep.subr.bf16.mxu1 %v948_v5  ;;  %v413_v34 = vld [vmem:[%s1099_s28 + $0x238] sm:$0xff]  ;;  %v410_v39 = vld [vmem:[%s1099_s28 + $0x220] sm:$0xff]  ;;  %v412_v42 = vld [vmem:[%s1099_s28 + $0x230] sm:$0xff] }
  0x30   : > { %v960_v41 = vpack.c.bf16 %v413_v34, %v409_v33  ;;  %v415_v43 = vld [vmem:[%s1099_s28 + $0x248] sm:$0xff]  ;;  %v417_v45 = vld [vmem:[%s1099_s28 + $0x258] sm:$0xff]  ;;  %v898_v47 = vpack.c.bf16 %v410_v39, %v406_v38  ;;  %v962_v48 = vpack.c.bf16 %v412_v42, %v408_v40  ;;  %v414_v50 = vld [vmem:[%s1099_s28 + $0x240] sm:$0xff] }
  0x31   : > { %887 = vmatpush1.bf16.msra.mxu0 %v886_v11  ;;  %v419_v44 = vld [vmem:[%s1099_s28 + $0x268] sm:$0xff]  ;;  %v421_v46 = vld [vmem:[%s1099_s28 + $0x278] sm:$0xff]  ;;  %v418_v51 = vld [vmem:[%s1099_s28 + $0x260] sm:$0xff] }
  0x32   : > { %951 = vmatpush1.bf16.msra.mxu1 %v950_v12  ;;  %889 = vmatprep.subr.bf16.mxu0 %v888_v13  ;;  %v900_v49 = vpack.c.bf16 %v419_v44, %v415_v43  ;;  %v416_v52 = vld [vmem:[%s1099_s28 + $0x250] sm:$0xff]  ;;  %v964_v53 = vpack.c.bf16 %v421_v46, %v417_v45  ;;  %v423_v55 = vld [vmem:[%s1099_s28 + $0x288] sm:$0xff]  ;;  %v425_v57 = vld [vmem:[%s1099_s28 + $0x298] sm:$0xff]  ;;  %v902_v59 = vpack.c.bf16 %v418_v51, %v414_v50 }
  0x33   : > { %953 = vmatprep.subr.bf16.mxu1 %v952_v17  ;;  %v420_v54 = vld [vmem:[%s1099_s28 + $0x270] sm:$0xff]  ;;  %v427_v56 = vld [vmem:[%s1099_s28 + $0x2a8] sm:$0xff]  ;;  %v429_v58 = vld [vmem:[%s1099_s28 + $0x2b8] sm:$0xff] }
  0x34   : > { %v966_v60 = vpack.c.bf16 %v420_v54, %v416_v52  ;;  %v904_v61 = vpack.c.bf16 %v427_v56, %v423_v55  ;;  %v422_v62 = vld [vmem:[%s1099_s28 + $0x280] sm:$0xff]  ;;  %v424_v0 = vld [vmem:[%s1099_s28 + $0x290] sm:$0xff]  ;;  %v968_v1 = vpack.c.bf16 %v429_v58, %v425_v57  ;;  %v431_v3 = vld [vmem:[%s1099_s28 + $0x2c8] sm:$0xff] }
  0x35   : > { %891 = vmatpush1.bf16.msra.mxu0 %v890_v23  ;;  %v426_v63 = vld [vmem:[%s1099_s28 + $0x2a0] sm:$0xff]  ;;  %v428_v2 = vld [vmem:[%s1099_s28 + $0x2b0] sm:$0xff]  ;;  %v435_v4 = vld [vmem:[%s1099_s28 + $0x2e8] sm:$0xff] }
  0x36   : > { %955 = vmatpush1.bf16.msra.mxu1 %v954_v24  ;;  %893 = vmatprep.subr.bf16.mxu0 %v892_v25  ;;  %v433_v5 = vld [vmem:[%s1099_s28 + $0x2d8] sm:$0xff]  ;;  %v906_v7 = vpack.c.bf16 %v426_v63, %v422_v62  ;;  %v430_v8 = vld [vmem:[%s1099_s28 + $0x2c0] sm:$0xff]  ;;  %v970_v9 = vpack.c.bf16 %v428_v2, %v424_v0  ;;  %v908_v10 = vpack.c.bf16 %v435_v4, %v431_v3  ;;  %v432_v12 = vld [vmem:[%s1099_s28 + $0x2d0] sm:$0xff] }
  0x37   : > { %957 = vmatprep.subr.bf16.mxu1 %v956_v29  ;;  %v437_v6 = vld [vmem:[%s1099_s28 + $0x2f8] sm:$0xff]  ;;  %v434_v11 = vld [vmem:[%s1099_s28 + $0x2e0] sm:$0xff]  ;;  %v436_v13 = vld [vmem:[%s1099_s28 + $0x2f0] sm:$0xff] }
  0x38   : > { %v972_v14 = vpack.c.bf16 %v437_v6, %v433_v5  ;;  %v439_v15 = vld [vmem:[%s1099_s28 + $0x308] sm:$0xff]  ;;  %v441_v18 = vld [vmem:[%s1099_s28 + $0x318] sm:$0xff]  ;;  %v910_v20 = vpack.c.bf16 %v434_v11, %v430_v8  ;;  %v974_v21 = vpack.c.bf16 %v436_v13, %v432_v12  ;;  %v438_v23 = vld [vmem:[%s1099_s28 + $0x300] sm:$0xff] }
  0x39   : > { %895 = vmatpush1.bf16.msra.mxu0 %v894_v35  ;;  %v443_v16 = vld [vmem:[%s1099_s28 + $0x328] sm:$0xff]  ;;  %v445_v19 = vld [vmem:[%s1099_s28 + $0x338] sm:$0xff]  ;;  %v442_v24 = vld [vmem:[%s1099_s28 + $0x320] sm:$0xff] }
  0x3a   : > { %959 = vmatpush1.bf16.msra.mxu1 %v958_v36  ;;  %897 = vmatprep.subr.bf16.mxu0 %v896_v37  ;;  %v341_v17 = vld [vmem:[%s1094_s24 + $0x8] sm:$0xff]  ;;  %v912_v22 = vpack.c.bf16 %v443_v16, %v439_v15  ;;  %v440_v25 = vld [vmem:[%s1099_s28 + $0x310] sm:$0xff]  ;;  %v976_v26 = vpack.c.bf16 %v445_v19, %v441_v18  ;;  %v449_v30 = vld [vmem:[%s1099_s28 + $0x358] sm:$0xff]  ;;  %v914_v32 = vpack.c.bf16 %v442_v24, %v438_v23  ;;  %v630_v15 = vlaneseq (!%p856_p7) }
  0x3b   : > { %961 = vmatprep.subr.bf16.mxu1 %v960_v41  ;;  %534 = vmatprep.mubr.f32.mxu0 %v341_v17  ;;  %v444_v27 = vld [vmem:[%s1099_s28 + $0x330] sm:$0xff]  ;;  %v447_v28 = vld [vmem:[%s1099_s28 + $0x348] sm:$0xff]  ;;  %v453_v31 = vld [vmem:[%s1099_s28 + $0x378] sm:$0xff] }
  0x3c   : > { %605 = vmatprep.mubr.f32.mxu1 %v341_v17  ;;  %v451_v29 = vld [vmem:[%s1099_s28 + $0x368] sm:$0xff]  ;;  %v978_v33 = vpack.c.bf16 %v444_v27, %v440_v25  ;;  %v446_v35 = vld [vmem:[%s1099_s28 + $0x340] sm:$0xff]  ;;  %v448_v37 = vld [vmem:[%s1099_s28 + $0x350] sm:$0xff]  ;;  %v980_v38 = vpack.c.bf16 %v453_v31, %v449_v30  ;;  %v631_v16 = vshrl.u32 (!%p856_p7), %v630_v15, 7 }
  0x3d   : > { %899 = vmatpush1.bf16.msra.mxu0 %v898_v47  ;;  %v916_v34 = vpack.c.bf16 %v451_v29, %v447_v28  ;;  %v450_v36 = vld [vmem:[%s1099_s28 + $0x360] sm:$0xff]  ;;  %v452_v39 = vld [vmem:[%s1099_s28 + $0x370] sm:$0xff]  ;;  %v455_v40 = vld [vmem:[%s1099_s28 + $0x388] sm:$0xff] }
  0x3e   : > { %963 = vmatpush1.bf16.msra.mxu1 %v962_v48  ;;  %901 = vmatprep.subr.bf16.mxu0 %v900_v49  ;;  %v459_v41 = vld [vmem:[%s1099_s28 + $0x3a8] sm:$0xff]  ;;  %v457_v42 = vld [vmem:[%s1099_s28 + $0x398] sm:$0xff]  ;;  %v918_v44 = vpack.c.bf16 %v450_v36, %v446_v35  ;;  %v982_v45 = vpack.c.bf16 %v452_v39, %v448_v37  ;;  %v454_v47 = vld [vmem:[%s1099_s28 + $0x380] sm:$0xff]  ;;  %v632_v19 = vsub.s32 (!%p856_p7), 0, %v631_v16 }
  0x3f   : > { %965 = vmatprep.subr.bf16.mxu1 %v964_v53  ;;  %v461_v43 = vld [vmem:[%s1099_s28 + $0x3b8] sm:$0xff]  ;;  %v920_v46 = vpack.c.bf16 %v459_v41, %v455_v40  ;;  %v458_v48 = vld [vmem:[%s1099_s28 + $0x3a0] sm:$0xff]  ;;  %v456_v49 = vld [vmem:[%s1099_s28 + $0x390] sm:$0xff] }
  0x40   : > { %v984_v50 = vpack.c.bf16 %v461_v43, %v457_v42  ;;  %v460_v51 = vld [vmem:[%s1099_s28 + $0x3b0] sm:$0xff]  ;;  %v463_v52 = vld [vmem:[%s1099_s28 + $0x3c8] sm:$0xff]  ;;  %v465_v54 = vld [vmem:[%s1099_s28 + $0x3d8] sm:$0xff]  ;;  %v922_v56 = vpack.c.bf16 %v458_v48, %v454_v47 }
  0x41   : > { %903 = vmatpush1.bf16.msra.mxu0 %v902_v59  ;;  %v467_v53 = vld [vmem:[%s1099_s28 + $0x3e8] sm:$0xff]  ;;  %v469_v55 = vld [vmem:[%s1099_s28 + $0x3f8] sm:$0xff]  ;;  %v986_v57 = vpack.c.bf16 %v460_v51, %v456_v49  ;;  %v462_v59 = vld [vmem:[%s1099_s28 + $0x3c0] sm:$0xff] }
  0x42   : > { %967 = vmatpush1.bf16.msra.mxu1 %v966_v60  ;;  %905 = vmatprep.subr.bf16.mxu0 %v904_v61  ;;  %v924_v58 = vpack.c.bf16 %v467_v53, %v463_v52  ;;  %v466_v60 = vld [vmem:[%s1099_s28 + $0x3e0] sm:$0xff]  ;;  %v988_v61 = vpack.c.bf16 %v469_v55, %v465_v54  ;;  %v464_v62 = vld [vmem:[%s1099_s28 + $0x3d0] sm:$0xff]  ;;  %v337_v5 = vld [vmem:[#allocation2 + $0x8] sm:$0xff] }
  0x43   : > { %969 = vmatprep.subr.bf16.mxu1 %v968_v1  ;;  %v468_v63 = vld [vmem:[%s1099_s28 + $0x3f0] sm:$0xff]  ;;  %v926_v0 = vpack.c.bf16 %v466_v60, %v462_v59  ;;  %v340_v2 = vld [vmem:[%s1094_s24] sm:$0xff] }
  0x44   : > { %v990_v1 = vpack.c.bf16 %v468_v63, %v464_v62  ;;  %v336_v3 = vld [vmem:[#allocation2] sm:$0xff]  ;;  %v338_v4 = vld [vmem:[#allocation2 + $0x10] sm:$0xff] }
  0x45   : > { %907 = vmatpush1.bf16.msra.mxu0 %v906_v7  ;;  %v339_v7 = vld [vmem:[#allocation2 + $0x18] sm:$0xff]  ;;  %v628_v17 = vld [vmem:[%s1271_s2] sm:$0xf] (!%p856_p7) }
  0x46   : > { %971 = vmatpush1.bf16.msra.mxu1 %v970_v9  ;;  %909 = vmatprep.subr.bf16.mxu0 %v908_v10 }
  0x47   : > { %973 = vmatprep.subr.bf16.mxu1 %v972_v14 }
  0x49   : > { %911 = vmatpush1.bf16.msra.mxu0 %v910_v20  ;;  %v636_v20 = vsub.s32 (!%p856_p7), 1, %v631_v16 }
  0x4a   : > { %975 = vmatpush1.bf16.msra.mxu1 %v974_v21  ;;  %913 = vmatprep.subr.bf16.mxu0 %v912_v22  ;;  %v640_v21 = vsub.s32 (!%p856_p7), 2, %v631_v16  ;;  %v644_v22 = vsub.s32 (!%p856_p7), 3, %v631_v16 }
  0x4b   : > { %977 = vmatprep.subr.bf16.mxu1 %v976_v26  ;;  %v633_v26 = vrot.slane (!%p856_p7), %v628_v17, %v632_v19  ;;  %v637_v27 = vrot.slane (!%p856_p7), %v628_v17, %v636_v20 }
  0x4c   : > { %v641_v28 = vrot.slane (!%p856_p7), %v628_v17, %v640_v21  ;;  %v645_v29 = vrot.slane (!%p856_p7), %v628_v17, %v644_v22 }
  0x4d   : > { %915 = vmatpush1.bf16.msra.mxu0 %v914_v32 }
  0x4e   : > { %979 = vmatpush1.bf16.msra.mxu1 %v978_v33  ;;  %917 = vmatprep.subr.bf16.mxu0 %v916_v34 }
  0x4f   : > { %981 = vmatprep.subr.bf16.mxu1 %v980_v38 }
  0x51   : > { %919 = vmatpush1.bf16.msra.mxu0 %v918_v44 }
  0x52   : > { %983 = vmatpush1.bf16.msra.mxu1 %v982_v45  ;;  %921 = vmatprep.subr.bf16.mxu0 %v920_v46 }
  0x53   : > { %985 = vmatprep.subr.bf16.mxu1 %v984_v50 }
  0x55   : > { %923 = vmatpush1.bf16.msra.mxu0 %v922_v56 }
  0x56   : > { %987 = vmatpush1.bf16.msra.mxu1 %v986_v57  ;;  %925 = vmatprep.subr.bf16.mxu0 %v924_v58 }
  0x57   : > { %989 = vmatprep.subr.bf16.mxu1 %v988_v61 }
  0x59   : > { %927 = vmatpush1.bf16.msra.mxu0 %v926_v0 }
  0x5a   : > { %991 = vmatpush1.bf16.msra.mxu1 %v990_v1 }
  0x5c   : > { %535 = vmatmul.mubr.f32.vlgmr.msra.gmra.mrb[0].mxu0 %v340_v2 }
  0x5d   : > { %606 = vmatmul.mubr.f32.vlgmr.msra.gmra.mrb[0].mxu1 %v340_v2 }
 0x12e   : > { %623 = sbr.rel (%p856_p7) target bundleno = 486 (0x1e6), region = 40 }
 0x12f   : > { %v536_v6 = vpop.f32.mrb[0].mxu0 }
 0x130   : > { %v612_v8 = vadd.f32 %v536_v6, %v336_v3  ;;  %v607_v9 = vpop.f32.mrb[0].mxu1  ;;  %v538_v10 = vpop.f32.mrb[1].mxu0 }
 0x131   : > { %v614_v11 = vadd.f32 %v607_v9, %v338_v4  ;;  %v613_v12 = vadd.f32 %v538_v10, %v337_v5  ;;  %v609_v13 = vpop.f32.mrb[1].mxu1 }
 0x132   : > { %616 = vst [vmem:[#allocation2] sm:$0xff] %v612_v8  ;;  %v615_v14 = vadd.f32 %v609_v13, %v339_v7 }
 0x133   : > { %618 = vst [vmem:[#allocation2 + $0x10] sm:$0xff] %v614_v11  ;;  %617 = vst [vmem:[#allocation2 + $0x8] sm:$0xff] %v613_v12 }
 0x134   : > { %619 = vst [vmem:[#allocation2 + $0x18] sm:$0xff] %v615_v14 }
 0x139   : > { %v624_v18 = vld [vmem:[#allocation2] sm:$0xff] }
 0x13a   : > { %v625_v23 = vld [vmem:[#allocation2 + $0x8] sm:$0xff]  ;;  %v626_v24 = vld [vmem:[#allocation2 + $0x10] sm:$0xff]  ;;  %v650_v30 = vadd.f32 %v633_v26, %v624_v18 }
 0x13b   : > { %v627_v25 = vld [vmem:[#allocation2 + $0x18] sm:$0xff]  ;;  %v651_v31 = vadd.f32 %v637_v27, %v625_v23  ;;  %v652_v32 = vadd.f32 %v641_v28, %v626_v24 }
 0x13c   : > { %v653_v33 = vadd.f32 %v645_v29, %v627_v25  ;;  %v654_v34 = vmax.f32 %v650_v30, 0.0 }
 0x13d   : > { %v655_v35 = vmax.f32 %v651_v31, 0.0  ;;  %v656_v36 = vmax.f32 %v652_v32, 0.0 }
 0x13e   : > { %v657_v37 = vmax.f32 %v653_v33, 0.0  ;;  %658 = vst [vmem:[%s1272_s3] sm:$0xff] %v654_v34  ;;  %v662_v38 = vmul.f32 %v654_v34, %v654_v34 }
 0x13f   : > { %659 = vst [vmem:[%s1272_s3 + $0x8] sm:$0xff] %v655_v35  ;;  %660 = vst [vmem:[%s1272_s3 + $0x10] sm:$0xff] %v656_v36  ;;  %v663_v39 = vmul.f32 %v655_v35, %v655_v35  ;;  %v664_v40 = vmul.f32 %v656_v36, %v656_v36 }
 0x140   : > { %661 = vst [vmem:[%s1272_s3 + $0x18] sm:$0xff] %v657_v37  ;;  %v665_v41 = vmul.f32 %v657_v37, %v657_v37 }
 0x141   : > { %v666_v42 = vadd.f32 %v663_v39, %v662_v38 }
 0x143   : > { %v667_v43 = vadd.f32 %v666_v42, %v664_v40 }
 0x145   : > { %v668_v44 = vadd.f32 %v667_v43, %v665_v41 }
 0x147   : > { %669 = vadd.xlane.f32.xlu0 %v668_v44 }
 0x1d4   : > { %v670_v45 = vpop.xlane.xlu0 %669 }
 0x1d5   : > { %v671_v46 = vmax.f32 %v670_v45, 1e-24 }
 0x1d7   : > { %1017 = vrsqrt.f32 %v671_v46 }
 0x1e1   : > { %v1018_v47 = vpop.eup %1017 }
 0x1e2   : > { %v673_v48 = vmul.f32 %v1018_v47, %v654_v34  ;;  %v674_v49 = vmul.f32 %v1018_v47, %v655_v35  ;;  %v675_v50 = vmul.f32 %v1018_v47, %v656_v36  ;;  %v676_v51 = vmul.f32 %v1018_v47, %v657_v37 }
 0x1e4   : > { %677 = vst [vmem:[%s1273_s4] sm:$0xff] %v673_v48  ;;  %678 = vst [vmem:[%s1273_s4 + $0x8] sm:$0xff] %v674_v49 }
 0x1e5   : > { %679 = vst [vmem:[%s1273_s4 + $0x10] sm:$0xff] %v675_v50  ;;  %680 = vst [vmem:[%s1273_s4 + $0x18] sm:$0xff] %v676_v51 }
 0x1e6 PF: > { %s15_s17 = sadd.s32 1, %s1041_s17   ;;  %s1274_s15 = smov %s1037_s16 }
 0x1e7   : > { %p12_p8 = scmp.ge.s32.totalorder %s15_s17, 27   ;;  %s1275_s16 = smov %s1277_s18 }
 0x1e9   :  { %14 = sbr.rel (!%p12_p8) target bundleno = 2 (0x2), region = 88 }

// kernel: simclr_stage1_forward.12
= control target key start
LH: loop header
LB: loop body
LE: loop exit
PB: predicated region body
PF: predicated region fallthrough
CT: control target
= control target key end

     0   :  { %s1215_s12 = smov 0   ;;  %s1217_s13 = smov 0   ;;  %s1685_s0 = inlined_call_operand.vmem [shape: f32[8,512], index: 0, kind: input, shape index: {}]   ;;  %s1686_s1 = inlined_call_operand.vmem [shape: f32[512,512], index: 1, kind: input, shape index: {}]   ;;  %s1687_s2 = inlined_call_operand.vmem [shape: f32[1,512], index: 2, kind: input, shape index: {}]   ;;  %s1688_s3 = inlined_call_operand.vmem [shape: f32[8,512], index: 3, kind: output, shape index: {}]  }
   0x1   :  { %s1219_s14 = smov 0   ;;  %s1221_s15 = smov 0  }
   0x2   :  { %s1223_s16 = smov 0  }
   0x3 LB: > { %s28_s17 = sadd.s32 1, %s1189_s15  ;;  %p76_p1 = scmp.ne.s32.totalorder %s1181_s13, %s1177_s12  ;;  %s1193_s16 = sphi %s1223_s16, %s13_s16   ;;  %s1189_s15 = sphi %s1221_s15, %s1692_s15   ;;  %s1185_s14 = sphi %s1219_s14, %s1691_s14   ;;  %s1181_s13 = sphi %s1217_s13, %s1690_s13   ;;  %s1177_s12 = sphi %s1215_s12, %s1689_s12  }
   0x4   : > { %p30_p0 = scmp.ge.s32.totalorder %s28_s17, 2  ;;  %p77_p2 = scmp.eq.s32.totalorder %s1193_s16, 0 }
   0x5   : > { %s69_s19 = sadd.s32 1, %s1181_s13  ;;  %p973_p5 = scmp.ge.s32.totalorder %s1193_s16, 2 }
   0x6   : > { %s1694_s17 = smov (%p30_p0, %s28_s17), 0  ;;  %p78_p3 = por %p77_p2, %p76_p1 }
   0x7   : > { %s65_s18 = ssub.s32 %s1189_s15, %s1694_s17  ;;  %169 = sbr.rel (%p973_p5) target bundleno = 82 (0x52), region = 20 }
   0x8   : > { %p67_p4 = scmp.eq.s32.totalorder %s65_s18, 0 }
   0xa   : > { %s1250_s20 = scalar_select %p67_p4, %s1181_s13, %s69_s19  }
   0xe   : > { %172 = sbr.rel (!%p78_p3) target bundleno = 82 (0x52), region = 24  ;;  %s174_s21 = sand.u32 (%p78_p3), 1, %s1181_s13  }
   0xf   : > { %s984_s22 = sshll.u32 (%p78_p3), %s1189_s15, 4  ;;  %s974_s23 = sshll.u32 (%p78_p3), %s174_s21, 10 }
  0x10   : > { %s1258_s26 = scalar_lea.vmem (%p78_p3), %s1686_s1, %s984_s22  ;;  %s1263_s27 = scalar_lea.vmem (%p78_p3), [#allocation3], %s974_s23 }
  0x11   : > { %v195_v0 = vld [vmem:[%s1258_s26] sm:$0xff] (%p78_p3)  ;;  %v197_v1 = vld [vmem:[%s1258_s26 + $0x8] sm:$0xff] (%p78_p3) }
  0x12   : > { %v199_v2 = vld [vmem:[%s1258_s26 + $0x20] sm:$0xff] (%p78_p3)  ;;  %196 = vst [vmem:[%s1263_s27] sm:$0xff] (%p78_p3), %v195_v0  ;;  %198 = vst [vmem:[%s1263_s27 + $0x8] sm:$0xff] (%p78_p3), %v197_v1  ;;  %v201_v3 = vld [vmem:[%s1258_s26 + $0x28] sm:$0xff] (%p78_p3) }
  0x13   : > { %200 = vst [vmem:[%s1263_s27 + $0x10] sm:$0xff] (%p78_p3), %v199_v2  ;;  %v203_v4 = vld [vmem:[%s1258_s26 + $0x40] sm:$0xff] (%p78_p3)  ;;  %v205_v5 = vld [vmem:[%s1258_s26 + $0x48] sm:$0xff] (%p78_p3)  ;;  %202 = vst [vmem:[%s1263_s27 + $0x18] sm:$0xff] (%p78_p3), %v201_v3 }
  0x14   : > { %204 = vst [vmem:[%s1263_s27 + $0x20] sm:$0xff] (%p78_p3), %v203_v4  ;;  %206 = vst [vmem:[%s1263_s27 + $0x28] sm:$0xff] (%p78_p3), %v205_v5  ;;  %v207_v6 = vld [vmem:[%s1258_s26 + $0x60] sm:$0xff] (%p78_p3)  ;;  %v209_v7 = vld [vmem:[%s1258_s26 + $0x68] sm:$0xff] (%p78_p3) }
  0x15   : > { %v211_v8 = vld [vmem:[%s1258_s26 + $0x80] sm:$0xff]  ;;  %208 = vst [vmem:[%s1263_s27 + $0x30] sm:$0xff] %v207_v6  ;;  %210 = vst [vmem:[%s1263_s27 + $0x38] sm:$0xff] %v209_v7  ;;  %v213_v9 = vld [vmem:[%s1258_s26 + $0x88] sm:$0xff] }
  0x16   : > { %212 = vst [vmem:[%s1263_s27 + $0x40] sm:$0xff] %v211_v8  ;;  %v215_v10 = vld [vmem:[%s1258_s26 + $0xa0] sm:$0xff]  ;;  %v217_v11 = vld [vmem:[%s1258_s26 + $0xa8] sm:$0xff]  ;;  %214 = vst [vmem:[%s1263_s27 + $0x48] sm:$0xff] %v213_v9 }
  0x17   : > { %216 = vst [vmem:[%s1263_s27 + $0x50] sm:$0xff] %v215_v10  ;;  %218 = vst [vmem:[%s1263_s27 + $0x58] sm:$0xff] %v217_v11  ;;  %v219_v12 = vld [vmem:[%s1258_s26 + $0xc0] sm:$0xff]  ;;  %v221_v13 = vld [vmem:[%s1258_s26 + $0xc8] sm:$0xff] }
  0x18   : > { %v223_v14 = vld [vmem:[%s1258_s26 + $0xe0] sm:$0xff]  ;;  %220 = vst [vmem:[%s1263_s27 + $0x60] sm:$0xff] %v219_v12  ;;  %222 = vst [vmem:[%s1263_s27 + $0x68] sm:$0xff] %v221_v13  ;;  %v225_v15 = vld [vmem:[%s1258_s26 + $0xe8] sm:$0xff] }
  0x19   : > { %224 = vst [vmem:[%s1263_s27 + $0x70] sm:$0xff] %v223_v14  ;;  %v227_v16 = vld [vmem:[%s1258_s26 + $0x100] sm:$0xff]  ;;  %v229_v17 = vld [vmem:[%s1258_s26 + $0x108] sm:$0xff]  ;;  %226 = vst [vmem:[%s1263_s27 + $0x78] sm:$0xff] %v225_v15 }
  0x1a   : > { %228 = vst [vmem:[%s1263_s27 + $0x80] sm:$0xff] %v227_v16  ;;  %230 = vst [vmem:[%s1263_s27 + $0x88] sm:$0xff] %v229_v17  ;;  %v231_v18 = vld [vmem:[%s1258_s26 + $0x120] sm:$0xff]  ;;  %v233_v19 = vld [vmem:[%s1258_s26 + $0x128] sm:$0xff] }
  0x1b   : > { %v235_v20 = vld [vmem:[%s1258_s26 + $0x140] sm:$0xff]  ;;  %232 = vst [vmem:[%s1263_s27 + $0x90] sm:$0xff] %v231_v18  ;;  %234 = vst [vmem:[%s1263_s27 + $0x98] sm:$0xff] %v233_v19  ;;  %v237_v21 = vld [vmem:[%s1258_s26 + $0x148] sm:$0xff] }
  0x1c   : > { %236 = vst [vmem:[%s1263_s27 + $0xa0] sm:$0xff] %v235_v20  ;;  %v239_v22 = vld [vmem:[%s1258_s26 + $0x160] sm:$0xff]  ;;  %v241_v23 = vld [vmem:[%s1258_s26 + $0x168] sm:$0xff]  ;;  %238 = vst [vmem:[%s1263_s27 + $0xa8] sm:$0xff] %v237_v21 }
  0x1d   : > { %240 = vst [vmem:[%s1263_s27 + $0xb0] sm:$0xff] %v239_v22  ;;  %242 = vst [vmem:[%s1263_s27 + $0xb8] sm:$0xff] %v241_v23  ;;  %v243_v24 = vld [vmem:[%s1258_s26 + $0x180] sm:$0xff]  ;;  %v245_v25 = vld [vmem:[%s1258_s26 + $0x188] sm:$0xff] }
  0x1e   : > { %v247_v26 = vld [vmem:[%s1258_s26 + $0x1a0] sm:$0xff]  ;;  %244 = vst [vmem:[%s1263_s27 + $0xc0] sm:$0xff] %v243_v24  ;;  %246 = vst [vmem:[%s1263_s27 + $0xc8] sm:$0xff] %v245_v25  ;;  %v249_v27 = vld [vmem:[%s1258_s26 + $0x1a8] sm:$0xff] }
  0x1f   : > { %248 = vst [vmem:[%s1263_s27 + $0xd0] sm:$0xff] %v247_v26  ;;  %v251_v28 = vld [vmem:[%s1258_s26 + $0x1c0] sm:$0xff]  ;;  %v253_v29 = vld [vmem:[%s1258_s26 + $0x1c8] sm:$0xff]  ;;  %250 = vst [vmem:[%s1263_s27 + $0xd8] sm:$0xff] %v249_v27 }
  0x20   : > { %252 = vst [vmem:[%s1263_s27 + $0xe0] sm:$0xff] %v251_v28  ;;  %254 = vst [vmem:[%s1263_s27 + $0xe8] sm:$0xff] %v253_v29  ;;  %v255_v30 = vld [vmem:[%s1258_s26 + $0x1e0] sm:$0xff]  ;;  %v257_v31 = vld [vmem:[%s1258_s26 + $0x1e8] sm:$0xff] }
  0x21   : > { %v259_v32 = vld [vmem:[%s1258_s26 + $0x200] sm:$0xff]  ;;  %256 = vst [vmem:[%s1263_s27 + $0xf0] sm:$0xff] %v255_v30  ;;  %258 = vst [vmem:[%s1263_s27 + $0xf8] sm:$0xff] %v257_v31  ;;  %v261_v33 = vld [vmem:[%s1258_s26 + $0x208] sm:$0xff] }
  0x22   : > { %260 = vst [vmem:[%s1263_s27 + $0x100] sm:$0xff] %v259_v32  ;;  %v263_v34 = vld [vmem:[%s1258_s26 + $0x220] sm:$0xff]  ;;  %v265_v35 = vld [vmem:[%s1258_s26 + $0x228] sm:$0xff]  ;;  %262 = vst [vmem:[%s1263_s27 + $0x108] sm:$0xff] %v261_v33 }
  0x23   : > { %264 = vst [vmem:[%s1263_s27 + $0x110] sm:$0xff] %v263_v34  ;;  %266 = vst [vmem:[%s1263_s27 + $0x118] sm:$0xff] %v265_v35  ;;  %v267_v36 = vld [vmem:[%s1258_s26 + $0x240] sm:$0xff]  ;;  %v269_v37 = vld [vmem:[%s1258_s26 + $0x248] sm:$0xff] }
  0x24   : > { %v271_v38 = vld [vmem:[%s1258_s26 + $0x260] sm:$0xff]  ;;  %268 = vst [vmem:[%s1263_s27 + $0x120] sm:$0xff] %v267_v36  ;;  %270 = vst [vmem:[%s1263_s27 + $0x128] sm:$0xff] %v269_v37  ;;  %v273_v39 = vld [vmem:[%s1258_s26 + $0x268] sm:$0xff] }
  0x25   : > { %272 = vst [vmem:[%s1263_s27 + $0x130] sm:$0xff] %v271_v38  ;;  %v275_v40 = vld [vmem:[%s1258_s26 + $0x280] sm:$0xff]  ;;  %v277_v41 = vld [vmem:[%s1258_s26 + $0x288] sm:$0xff]  ;;  %274 = vst [vmem:[%s1263_s27 + $0x138] sm:$0xff] %v273_v39 }
  0x26   : > { %276 = vst [vmem:[%s1263_s27 + $0x140] sm:$0xff] %v275_v40  ;;  %278 = vst [vmem:[%s1263_s27 + $0x148] sm:$0xff] %v277_v41  ;;  %v279_v42 = vld [vmem:[%s1258_s26 + $0x2a0] sm:$0xff]  ;;  %v281_v43 = vld [vmem:[%s1258_s26 + $0x2a8] sm:$0xff] }
  0x27   : > { %v283_v44 = vld [vmem:[%s1258_s26 + $0x2c0] sm:$0xff]  ;;  %280 = vst [vmem:[%s1263_s27 + $0x150] sm:$0xff] %v279_v42  ;;  %282 = vst [vmem:[%s1263_s27 + $0x158] sm:$0xff] %v281_v43  ;;  %v285_v45 = vld [vmem:[%s1258_s26 + $0x2c8] sm:$0xff] }
  0x28   : > { %284 = vst [vmem:[%s1263_s27 + $0x160] sm:$0xff] %v283_v44  ;;  %v287_v46 = vld [vmem:[%s1258_s26 + $0x2e0] sm:$0xff]  ;;  %v289_v47 = vld [vmem:[%s1258_s26 + $0x2e8] sm:$0xff]  ;;  %286 = vst [vmem:[%s1263_s27 + $0x168] sm:$0xff] %v285_v45 }
  0x29   : > { %288 = vst [vmem:[%s1263_s27 + $0x170] sm:$0xff] %v287_v46  ;;  %290 = vst [vmem:[%s1263_s27 + $0x178] sm:$0xff] %v289_v47  ;;  %v291_v48 = vld [vmem:[%s1258_s26 + $0x300] sm:$0xff]  ;;  %v293_v49 = vld [vmem:[%s1258_s26 + $0x308] sm:$0xff] }
  0x2a   : > { %v295_v50 = vld [vmem:[%s1258_s26 + $0x320] sm:$0xff]  ;;  %292 = vst [vmem:[%s1263_s27 + $0x180] sm:$0xff] %v291_v48  ;;  %294 = vst [vmem:[%s1263_s27 + $0x188] sm:$0xff] %v293_v49  ;;  %v297_v51 = vld [vmem:[%s1258_s26 + $0x328] sm:$0xff] }
  0x2b   : > { %296 = vst [vmem:[%s1263_s27 + $0x190] sm:$0xff] %v295_v50  ;;  %v299_v52 = vld [vmem:[%s1258_s26 + $0x340] sm:$0xff]  ;;  %v301_v53 = vld [vmem:[%s1258_s26 + $0x348] sm:$0xff]  ;;  %298 = vst [vmem:[%s1263_s27 + $0x198] sm:$0xff] %v297_v51 }
  0x2c   : > { %300 = vst [vmem:[%s1263_s27 + $0x1a0] sm:$0xff] %v299_v52  ;;  %302 = vst [vmem:[%s1263_s27 + $0x1a8] sm:$0xff] %v301_v53  ;;  %v303_v54 = vld [vmem:[%s1258_s26 + $0x360] sm:$0xff]  ;;  %v305_v55 = vld [vmem:[%s1258_s26 + $0x368] sm:$0xff] }
  0x2d   : > { %v307_v56 = vld [vmem:[%s1258_s26 + $0x380] sm:$0xff]  ;;  %304 = vst [vmem:[%s1263_s27 + $0x1b0] sm:$0xff] %v303_v54  ;;  %306 = vst [vmem:[%s1263_s27 + $0x1b8] sm:$0xff] %v305_v55  ;;  %v309_v57 = vld [vmem:[%s1258_s26 + $0x388] sm:$0xff] }
  0x2e   : > { %308 = vst [vmem:[%s1263_s27 + $0x1c0] sm:$0xff] %v307_v56  ;;  %v311_v58 = vld [vmem:[%s1258_s26 + $0x3a0] sm:$0xff]  ;;  %v313_v59 = vld [vmem:[%s1258_s26 + $0x3a8] sm:$0xff]  ;;  %310 = vst [vmem:[%s1263_s27 + $0x1c8] sm:$0xff] %v309_v57 }
  0x2f   : > { %312 = vst [vmem:[%s1263_s27 + $0x1d0] sm:$0xff] %v311_v58  ;;  %314 = vst [vmem:[%s1263_s27 + $0x1d8] sm:$0xff] %v313_v59  ;;  %v315_v60 = vld [vmem:[%s1258_s26 + $0x3c0] sm:$0xff]  ;;  %v317_v61 = vld [vmem:[%s1258_s26 + $0x3c8] sm:$0xff] }
  0x30   : > { %v319_v62 = vld [vmem:[%s1258_s26 + $0x3e0] sm:$0xff]  ;;  %316 = vst [vmem:[%s1263_s27 + $0x1e0] sm:$0xff] %v315_v60  ;;  %318 = vst [vmem:[%s1263_s27 + $0x1e8] sm:$0xff] %v317_v61  ;;  %v321_v63 = vld [vmem:[%s1258_s26 + $0x3e8] sm:$0xff] }
  0x31   : > { %320 = vst [vmem:[%s1263_s27 + $0x1f0] sm:$0xff] %v319_v62  ;;  %v323_v0 = vld [vmem:[%s1258_s26 + $0x400] sm:$0xff]  ;;  %v325_v1 = vld [vmem:[%s1258_s26 + $0x408] sm:$0xff]  ;;  %322 = vst [vmem:[%s1263_s27 + $0x1f8] sm:$0xff] %v321_v63 }
  0x32   : > { %324 = vst [vmem:[%s1263_s27 + $0x200] sm:$0xff] %v323_v0  ;;  %326 = vst [vmem:[%s1263_s27 + $0x208] sm:$0xff] %v325_v1  ;;  %v327_v2 = vld [vmem:[%s1258_s26 + $0x420] sm:$0xff]  ;;  %v329_v3 = vld [vmem:[%s1258_s26 + $0x428] sm:$0xff] }
  0x33   : > { %v331_v4 = vld [vmem:[%s1258_s26 + $0x440] sm:$0xff]  ;;  %328 = vst [vmem:[%s1263_s27 + $0x210] sm:$0xff] %v327_v2  ;;  %330 = vst [vmem:[%s1263_s27 + $0x218] sm:$0xff] %v329_v3  ;;  %v333_v5 = vld [vmem:[%s1258_s26 + $0x448] sm:$0xff] }
  0x34   : > { %332 = vst [vmem:[%s1263_s27 + $0x220] sm:$0xff] %v331_v4  ;;  %v335_v6 = vld [vmem:[%s1258_s26 + $0x460] sm:$0xff]  ;;  %v337_v7 = vld [vmem:[%s1258_s26 + $0x468] sm:$0xff]  ;;  %334 = vst [vmem:[%s1263_s27 + $0x228] sm:$0xff] %v333_v5 }
  0x35   : > { %336 = vst [vmem:[%s1263_s27 + $0x230] sm:$0xff] %v335_v6  ;;  %338 = vst [vmem:[%s1263_s27 + $0x238] sm:$0xff] %v337_v7  ;;  %v339_v8 = vld [vmem:[%s1258_s26 + $0x480] sm:$0xff]  ;;  %v341_v9 = vld [vmem:[%s1258_s26 + $0x488] sm:$0xff] }
  0x36   : > { %v343_v10 = vld [vmem:[%s1258_s26 + $0x4a0] sm:$0xff]  ;;  %340 = vst [vmem:[%s1263_s27 + $0x240] sm:$0xff] %v339_v8  ;;  %342 = vst [vmem:[%s1263_s27 + $0x248] sm:$0xff] %v341_v9  ;;  %v345_v11 = vld [vmem:[%s1258_s26 + $0x4a8] sm:$0xff] }
  0x37   : > { %344 = vst [vmem:[%s1263_s27 + $0x250] sm:$0xff] %v343_v10  ;;  %v347_v12 = vld [vmem:[%s1258_s26 + $0x4c0] sm:$0xff]  ;;  %v349_v13 = vld [vmem:[%s1258_s26 + $0x4c8] sm:$0xff]  ;;  %346 = vst [vmem:[%s1263_s27 + $0x258] sm:$0xff] %v345_v11 }
  0x38   : > { %348 = vst [vmem:[%s1263_s27 + $0x260] sm:$0xff] %v347_v12  ;;  %350 = vst [vmem:[%s1263_s27 + $0x268] sm:$0xff] %v349_v13  ;;  %v351_v14 = vld [vmem:[%s1258_s26 + $0x4e0] sm:$0xff]  ;;  %v353_v15 = vld [vmem:[%s1258_s26 + $0x4e8] sm:$0xff] }
  0x39   : > { %v355_v16 = vld [vmem:[%s1258_s26 + $0x500] sm:$0xff]  ;;  %352 = vst [vmem:[%s1263_s27 + $0x270] sm:$0xff] %v351_v14  ;;  %354 = vst [vmem:[%s1263_s27 + $0x278] sm:$0xff] %v353_v15  ;;  %v357_v17 = vld [vmem:[%s1258_s26 + $0x508] sm:$0xff] }
  0x3a   : > { %356 = vst [vmem:[%s1263_s27 + $0x280] sm:$0xff] %v355_v16  ;;  %v359_v18 = vld [vmem:[%s1258_s26 + $0x520] sm:$0xff]  ;;  %v361_v19 = vld [vmem:[%s1258_s26 + $0x528] sm:$0xff]  ;;  %358 = vst [vmem:[%s1263_s27 + $0x288] sm:$0xff] %v357_v17 }
  0x3b   : > { %360 = vst [vmem:[%s1263_s27 + $0x290] sm:$0xff] %v359_v18  ;;  %362 = vst [vmem:[%s1263_s27 + $0x298] sm:$0xff] %v361_v19  ;;  %v363_v20 = vld [vmem:[%s1258_s26 + $0x540] sm:$0xff]  ;;  %v365_v21 = vld [vmem:[%s1258_s26 + $0x548] sm:$0xff] }
  0x3c   : > { %v367_v22 = vld [vmem:[%s1258_s26 + $0x560] sm:$0xff]  ;;  %364 = vst [vmem:[%s1263_s27 + $0x2a0] sm:$0xff] %v363_v20  ;;  %366 = vst [vmem:[%s1263_s27 + $0x2a8] sm:$0xff] %v365_v21  ;;  %v369_v23 = vld [vmem:[%s1258_s26 + $0x568] sm:$0xff] }
  0x3d   : > { %368 = vst [vmem:[%s1263_s27 + $0x2b0] sm:$0xff] %v367_v22  ;;  %v371_v24 = vld [vmem:[%s1258_s26 + $0x580] sm:$0xff]  ;;  %v373_v25 = vld [vmem:[%s1258_s26 + $0x588] sm:$0xff]  ;;  %370 = vst [vmem:[%s1263_s27 + $0x2b8] sm:$0xff] %v369_v23 }
  0x3e   : > { %372 = vst [vmem:[%s1263_s27 + $0x2c0] sm:$0xff] %v371_v24  ;;  %374 = vst [vmem:[%s1263_s27 + $0x2c8] sm:$0xff] %v373_v25  ;;  %v375_v26 = vld [vmem:[%s1258_s26 + $0x5a0] sm:$0xff]  ;;  %v377_v27 = vld [vmem:[%s1258_s26 + $0x5a8] sm:$0xff] }
  0x3f   : > { %v379_v28 = vld [vmem:[%s1258_s26 + $0x5c0] sm:$0xff]  ;;  %376 = vst [vmem:[%s1263_s27 + $0x2d0] sm:$0xff] %v375_v26  ;;  %378 = vst [vmem:[%s1263_s27 + $0x2d8] sm:$0xff] %v377_v27  ;;  %v381_v29 = vld [vmem:[%s1258_s26 + $0x5c8] sm:$0xff] }
  0x40   : > { %380 = vst [vmem:[%s1263_s27 + $0x2e0] sm:$0xff] %v379_v28  ;;  %v383_v30 = vld [vmem:[%s1258_s26 + $0x5e0] sm:$0xff]  ;;  %v385_v31 = vld [vmem:[%s1258_s26 + $0x5e8] sm:$0xff]  ;;  %382 = vst [vmem:[%s1263_s27 + $0x2e8] sm:$0xff] %v381_v29 }
  0x41   : > { %384 = vst [vmem:[%s1263_s27 + $0x2f0] sm:$0xff] %v383_v30  ;;  %386 = vst [vmem:[%s1263_s27 + $0x2f8] sm:$0xff] %v385_v31  ;;  %v387_v32 = vld [vmem:[%s1258_s26 + $0x600] sm:$0xff]  ;;  %v389_v33 = vld [vmem:[%s1258_s26 + $0x608] sm:$0xff] }
  0x42   : > { %v391_v34 = vld [vmem:[%s1258_s26 + $0x620] sm:$0xff]  ;;  %388 = vst [vmem:[%s1263_s27 + $0x300] sm:$0xff] %v387_v32  ;;  %390 = vst [vmem:[%s1263_s27 + $0x308] sm:$0xff] %v389_v33  ;;  %v393_v35 = vld [vmem:[%s1258_s26 + $0x628] sm:$0xff] }
  0x43   : > { %392 = vst [vmem:[%s1263_s27 + $0x310] sm:$0xff] %v391_v34  ;;  %v395_v36 = vld [vmem:[%s1258_s26 + $0x640] sm:$0xff]  ;;  %v397_v37 = vld [vmem:[%s1258_s26 + $0x648] sm:$0xff]  ;;  %394 = vst [vmem:[%s1263_s27 + $0x318] sm:$0xff] %v393_v35 }
  0x44   : > { %396 = vst [vmem:[%s1263_s27 + $0x320] sm:$0xff] %v395_v36  ;;  %398 = vst [vmem:[%s1263_s27 + $0x328] sm:$0xff] %v397_v37  ;;  %v399_v38 = vld [vmem:[%s1258_s26 + $0x660] sm:$0xff]  ;;  %v401_v39 = vld [vmem:[%s1258_s26 + $0x668] sm:$0xff] }
  0x45   : > { %v403_v40 = vld [vmem:[%s1258_s26 + $0x680] sm:$0xff]  ;;  %400 = vst [vmem:[%s1263_s27 + $0x330] sm:$0xff] %v399_v38  ;;  %402 = vst [vmem:[%s1263_s27 + $0x338] sm:$0xff] %v401_v39  ;;  %v405_v41 = vld [vmem:[%s1258_s26 + $0x688] sm:$0xff] }
  0x46   : > { %404 = vst [vmem:[%s1263_s27 + $0x340] sm:$0xff] %v403_v40  ;;  %v407_v42 = vld [vmem:[%s1258_s26 + $0x6a0] sm:$0xff]  ;;  %v409_v43 = vld [vmem:[%s1258_s26 + $0x6a8] sm:$0xff]  ;;  %406 = vst [vmem:[%s1263_s27 + $0x348] sm:$0xff] %v405_v41 }
  0x47   : > { %408 = vst [vmem:[%s1263_s27 + $0x350] sm:$0xff] %v407_v42  ;;  %410 = vst [vmem:[%s1263_s27 + $0x358] sm:$0xff] %v409_v43  ;;  %v411_v44 = vld [vmem:[%s1258_s26 + $0x6c0] sm:$0xff]  ;;  %v413_v45 = vld [vmem:[%s1258_s26 + $0x6c8] sm:$0xff] }
  0x48   : > { %v415_v46 = vld [vmem:[%s1258_s26 + $0x6e0] sm:$0xff]  ;;  %412 = vst [vmem:[%s1263_s27 + $0x360] sm:$0xff] %v411_v44  ;;  %414 = vst [vmem:[%s1263_s27 + $0x368] sm:$0xff] %v413_v45  ;;  %v417_v47 = vld [vmem:[%s1258_s26 + $0x6e8] sm:$0xff] }
  0x49   : > { %416 = vst [vmem:[%s1263_s27 + $0x370] sm:$0xff] %v415_v46  ;;  %v419_v48 = vld [vmem:[%s1258_s26 + $0x700] sm:$0xff]  ;;  %v421_v49 = vld [vmem:[%s1258_s26 + $0x708] sm:$0xff]  ;;  %418 = vst [vmem:[%s1263_s27 + $0x378] sm:$0xff] %v417_v47 }
  0x4a   : > { %420 = vst [vmem:[%s1263_s27 + $0x380] sm:$0xff] %v419_v48  ;;  %422 = vst [vmem:[%s1263_s27 + $0x388] sm:$0xff] %v421_v49  ;;  %v423_v50 = vld [vmem:[%s1258_s26 + $0x720] sm:$0xff]  ;;  %v425_v51 = vld [vmem:[%s1258_s26 + $0x728] sm:$0xff] }
  0x4b   : > { %v427_v52 = vld [vmem:[%s1258_s26 + $0x740] sm:$0xff]  ;;  %424 = vst [vmem:[%s1263_s27 + $0x390] sm:$0xff] %v423_v50  ;;  %426 = vst [vmem:[%s1263_s27 + $0x398] sm:$0xff] %v425_v51  ;;  %v429_v53 = vld [vmem:[%s1258_s26 + $0x748] sm:$0xff] }
  0x4c   : > { %428 = vst [vmem:[%s1263_s27 + $0x3a0] sm:$0xff] %v427_v52  ;;  %v431_v54 = vld [vmem:[%s1258_s26 + $0x760] sm:$0xff]  ;;  %v433_v55 = vld [vmem:[%s1258_s26 + $0x768] sm:$0xff]  ;;  %430 = vst [vmem:[%s1263_s27 + $0x3a8] sm:$0xff] %v429_v53 }
  0x4d   : > { %432 = vst [vmem:[%s1263_s27 + $0x3b0] sm:$0xff] %v431_v54  ;;  %434 = vst [vmem:[%s1263_s27 + $0x3b8] sm:$0xff] %v433_v55  ;;  %v435_v56 = vld [vmem:[%s1258_s26 + $0x780] sm:$0xff]  ;;  %v437_v57 = vld [vmem:[%s1258_s26 + $0x788] sm:$0xff] }
  0x4e   : > { %v439_v58 = vld [vmem:[%s1258_s26 + $0x7a0] sm:$0xff]  ;;  %436 = vst [vmem:[%s1263_s27 + $0x3c0] sm:$0xff] %v435_v56  ;;  %438 = vst [vmem:[%s1263_s27 + $0x3c8] sm:$0xff] %v437_v57  ;;  %v441_v59 = vld [vmem:[%s1258_s26 + $0x7a8] sm:$0xff] }
  0x4f   : > { %440 = vst [vmem:[%s1263_s27 + $0x3d0] sm:$0xff] %v439_v58  ;;  %v443_v60 = vld [vmem:[%s1258_s26 + $0x7c0] sm:$0xff]  ;;  %v445_v61 = vld [vmem:[%s1258_s26 + $0x7c8] sm:$0xff]  ;;  %442 = vst [vmem:[%s1263_s27 + $0x3d8] sm:$0xff] %v441_v59 }
  0x50   : > { %444 = vst [vmem:[%s1263_s27 + $0x3e0] sm:$0xff] %v443_v60  ;;  %446 = vst [vmem:[%s1263_s27 + $0x3e8] sm:$0xff] %v445_v61  ;;  %v447_v62 = vld [vmem:[%s1258_s26 + $0x7e0] sm:$0xff]  ;;  %v449_v63 = vld [vmem:[%s1258_s26 + $0x7e8] sm:$0xff] }
  0x51   : > { %448 = vst [vmem:[%s1263_s27 + $0x3f0] sm:$0xff] %v447_v62  ;;  %450 = vst [vmem:[%s1263_s27 + $0x3f8] sm:$0xff] %v449_v63 }
  0x52 PF: > { %p977_p6 = scmp.ge.s32.totalorder %s1193_s16, 1  ;;  %p463_p7 = scmp.lt.s32.totalorder %s1193_s16, 3 }
  0x54   : > { %p464_p8 = pnand %p977_p6, %p463_p7 }
  0x55   : > { %s470_s28 = sand.u32 (!%p464_p8), 1, %s1177_s12   ;;  %v546_v0 = vld [vmem:[%s1685_s0 + $0x8] sm:$0xff] (!%p464_p8)  ;;  %v548_v1 = vld [vmem:[%s1685_s0 + $0x18] sm:$0xff] (!%p464_p8)  ;;  %s979_s12 = sshll.u32 (!%p464_p8), %s1185_s14, 1 }
  0x56   : > { %467 = sbr.rel (%p464_p8) target bundleno = 376 (0x178), region = 51  ;;  %s978_s6 = sshll.u32 (!%p464_p8), %s470_s28, 10  ;;  %741 = vmatprep.mubr.f32.mxu1 (!%p464_p8), %v546_v0  ;;  %812 = vmatprep.mubr.f32.mxu0 (!%p464_p8), %v548_v1 }
  0x57   : > { %s1527_s7 = scalar_lea.vmem (!%p464_p8), [#allocation3], %s978_s6  ;;  %p523_p9 = scmp.lt.s32.totalorder (!%p464_p8), %s979_s12, 3 }
  0x58   : > { %v550_v2 = vld [vmem:[%s1527_s7 + $0x8] sm:$0xff] (!%p464_p8)  ;;  %v552_v3 = vld [vmem:[%s1527_s7 + $0x18] sm:$0xff] (!%p464_p8)  ;;  %v549_v7 = vld [vmem:[%s1527_s7] sm:$0xff] (!%p464_p8) }
  0x59   : > { %v614_v4 = vld [vmem:[%s1527_s7 + $0x208] sm:$0xff] (!%p464_p8)  ;;  %v985_v5 = vpack.c.bf16 (!%p464_p8), %v552_v3, %v550_v2  ;;  %v616_v6 = vld [vmem:[%s1527_s7 + $0x218] sm:$0xff] (!%p464_p8)  ;;  %v551_v8 = vld [vmem:[%s1527_s7 + $0x10] sm:$0xff] (!%p464_p8) }
  0x5a   : > { %v1049_v9 = vpack.c.bf16 (!%p464_p8), %v616_v6, %v614_v4  ;;  %v987_v10 = vpack.c.bf16 (!%p464_p8), %v551_v8, %v549_v7  ;;  %v613_v11 = vld [vmem:[%s1527_s7 + $0x200] sm:$0xff] (!%p464_p8)  ;;  %v615_v12 = vld [vmem:[%s1527_s7 + $0x210] sm:$0xff] (!%p464_p8)  ;;  %v554_v13 = vld [vmem:[%s1527_s7 + $0x28] sm:$0xff] (!%p464_p8) }
  0x5b   : > { %986 = vmatprep.subr.bf16.mxu1 (!%p464_p8), %v985_v5  ;;  %v1051_v14 = vpack.c.bf16 (!%p464_p8), %v615_v12, %v613_v11  ;;  %v556_v15 = vld [vmem:[%s1527_s7 + $0x38] sm:$0xff] (!%p464_p8)  ;;  %v618_v16 = vld [vmem:[%s1527_s7 + $0x228] sm:$0xff] (!%p464_p8)  ;;  %v553_v20 = vld [vmem:[%s1527_s7 + $0x20] sm:$0xff] (!%p464_p8) }
  0x5c   : > { %v620_v17 = vld [vmem:[%s1527_s7 + $0x238] sm:$0xff] (!%p464_p8)  ;;  %1050 = vmatprep.subr.bf16.mxu0 (!%p464_p8), %v1049_v9  ;;  %988 = vmatpush1.bf16.msra.mxu1 (!%p464_p8), %v987_v10  ;;  %v989_v18 = vpack.c.bf16 (!%p464_p8), %v556_v15, %v554_v13  ;;  %v555_v21 = vld [vmem:[%s1527_s7 + $0x30] sm:$0xff] (!%p464_p8)  ;;  %v617_v22 = vld [vmem:[%s1527_s7 + $0x220] sm:$0xff] (!%p464_p8) }
  0x5d   : > { %v1053_v19 = vpack.c.bf16 %v620_v17, %v618_v16  ;;  %1052 = vmatpush1.bf16.msra.mxu0 %v1051_v14  ;;  %v991_v23 = vpack.c.bf16 %v555_v21, %v553_v20  ;;  %v619_v24 = vld [vmem:[%s1527_s7 + $0x230] sm:$0xff]  ;;  %v558_v25 = vld [vmem:[%s1527_s7 + $0x48] sm:$0xff]  ;;  %v560_v26 = vld [vmem:[%s1527_s7 + $0x58] sm:$0xff]  ;;  %s1696_s12 = smov (!%p523_p9, %s979_s12), 3 }
  0x5e   : > { %990 = vmatprep.subr.bf16.mxu1 %v989_v18  ;;  %v1055_v27 = vpack.c.bf16 %v619_v24, %v617_v22  ;;  %v993_v28 = vpack.c.bf16 %v560_v26, %v558_v25  ;;  %v622_v29 = vld [vmem:[%s1527_s7 + $0x248] sm:$0xff]  ;;  %v624_v30 = vld [vmem:[%s1527_s7 + $0x258] sm:$0xff]  ;;  %v557_v31 = vld [vmem:[%s1527_s7 + $0x40] sm:$0xff]  ;;  %s525_s21 = scalar_lea.vmem %s1687_s2, %s1696_s12  ;;  %s981_s22 = sshll.u32 %s1696_s12, 3 }
  0x5f   : > { %1054 = vmatprep.subr.bf16.mxu0 %v1053_v19  ;;  %v1057_v32 = vpack.c.bf16 %v624_v30, %v622_v29  ;;  %v559_v33 = vld [vmem:[%s1527_s7 + $0x50] sm:$0xff]  ;;  %v621_v34 = vld [vmem:[%s1527_s7 + $0x240] sm:$0xff]  ;;  %v562_v37 = vld [vmem:[%s1527_s7 + $0x68] sm:$0xff]  ;;  %s535_s24 = scalar_lea.vmem %s1688_s3, %s981_s22 }
  0x60   : > { %v623_v35 = vld [vmem:[%s1527_s7 + $0x250] sm:$0xff]  ;;  %992 = vmatpush1.bf16.msra.mxu1 %v991_v23  ;;  %v995_v36 = vpack.c.bf16 %v559_v33, %v557_v31  ;;  %v564_v38 = vld [vmem:[%s1527_s7 + $0x78] sm:$0xff]  ;;  %v626_v39 = vld [vmem:[%s1527_s7 + $0x268] sm:$0xff] }
  0x61   : > { %1056 = vmatpush1.bf16.msra.mxu0 %v1055_v27  ;;  %994 = vmatprep.subr.bf16.mxu1 %v993_v28  ;;  %v1059_v40 = vpack.c.bf16 %v623_v35, %v621_v34  ;;  %v997_v41 = vpack.c.bf16 %v564_v38, %v562_v37  ;;  %v628_v42 = vld [vmem:[%s1527_s7 + $0x278] sm:$0xff]  ;;  %v561_v43 = vld [vmem:[%s1527_s7 + $0x60] sm:$0xff]  ;;  %v563_v44 = vld [vmem:[%s1527_s7 + $0x70] sm:$0xff] }
  0x62   : > { %1058 = vmatprep.subr.bf16.mxu0 %v1057_v32  ;;  %v1061_v45 = vpack.c.bf16 %v628_v42, %v626_v39  ;;  %v625_v46 = vld [vmem:[%s1527_s7 + $0x260] sm:$0xff]  ;;  %v627_v47 = vld [vmem:[%s1527_s7 + $0x270] sm:$0xff]  ;;  %v566_v48 = vld [vmem:[%s1527_s7 + $0x88] sm:$0xff]  ;;  %v999_v52 = vpack.c.bf16 %v563_v44, %v561_v43 }
  0x63   : > { %v568_v49 = vld [vmem:[%s1527_s7 + $0x98] sm:$0xff]  ;;  %v630_v50 = vld [vmem:[%s1527_s7 + $0x288] sm:$0xff]  ;;  %v1063_v53 = vpack.c.bf16 %v627_v47, %v625_v46  ;;  %v565_v55 = vld [vmem:[%s1527_s7 + $0x80] sm:$0xff] }
  0x64   : > { %v632_v51 = vld [vmem:[%s1527_s7 + $0x298] sm:$0xff]  ;;  %996 = vmatpush1.bf16.msra.mxu1 %v995_v36  ;;  %v1001_v54 = vpack.c.bf16 %v568_v49, %v566_v48  ;;  %v567_v56 = vld [vmem:[%s1527_s7 + $0x90] sm:$0xff]  ;;  %v629_v57 = vld [vmem:[%s1527_s7 + $0x280] sm:$0xff] }
  0x65   : > { %1060 = vmatpush1.bf16.msra.mxu0 %v1059_v40  ;;  %998 = vmatprep.subr.bf16.mxu1 %v997_v41  ;;  %v1065_v58 = vpack.c.bf16 %v632_v51, %v630_v50  ;;  %v631_v59 = vld [vmem:[%s1527_s7 + $0x290] sm:$0xff]  ;;  %v570_v60 = vld [vmem:[%s1527_s7 + $0xa8] sm:$0xff]  ;;  %v572_v61 = vld [vmem:[%s1527_s7 + $0xb8] sm:$0xff]  ;;  %v1003_v0 = vpack.c.bf16 %v567_v56, %v565_v55 }
  0x66   : > { %1062 = vmatprep.subr.bf16.mxu0 %v1061_v45  ;;  %v634_v62 = vld [vmem:[%s1527_s7 + $0x2a8] sm:$0xff]  ;;  %v636_v63 = vld [vmem:[%s1527_s7 + $0x2b8] sm:$0xff]  ;;  %v1067_v1 = vpack.c.bf16 %v631_v59, %v629_v57  ;;  %v1005_v2 = vpack.c.bf16 %v572_v61, %v570_v60  ;;  %v569_v3 = vld [vmem:[%s1527_s7 + $0xa0] sm:$0xff] }
  0x67   : > { %v571_v4 = vld [vmem:[%s1527_s7 + $0xb0] sm:$0xff]  ;;  %v633_v5 = vld [vmem:[%s1527_s7 + $0x2a0] sm:$0xff]  ;;  %v1069_v6 = vpack.c.bf16 %v636_v63, %v634_v62  ;;  %v574_v8 = vld [vmem:[%s1527_s7 + $0xc8] sm:$0xff] }
  0x68   : > { %1000 = vmatpush1.bf16.msra.mxu1 %v999_v52  ;;  %v635_v7 = vld [vmem:[%s1527_s7 + $0x2b0] sm:$0xff]  ;;  %v576_v9 = vld [vmem:[%s1527_s7 + $0xd8] sm:$0xff]  ;;  %v638_v10 = vld [vmem:[%s1527_s7 + $0x2c8] sm:$0xff]  ;;  %v1007_v12 = vpack.c.bf16 %v571_v4, %v569_v3 }
  0x69   : > { %1064 = vmatpush1.bf16.msra.mxu0 %v1063_v53  ;;  %1002 = vmatprep.subr.bf16.mxu1 %v1001_v54  ;;  %v640_v11 = vld [vmem:[%s1527_s7 + $0x2d8] sm:$0xff]  ;;  %v1071_v13 = vpack.c.bf16 %v635_v7, %v633_v5  ;;  %v1009_v14 = vpack.c.bf16 %v576_v9, %v574_v8  ;;  %v573_v15 = vld [vmem:[%s1527_s7 + $0xc0] sm:$0xff]  ;;  %v575_v16 = vld [vmem:[%s1527_s7 + $0xd0] sm:$0xff] }
  0x6a   : > { %1066 = vmatprep.subr.bf16.mxu0 %v1065_v58  ;;  %v637_v17 = vld [vmem:[%s1527_s7 + $0x2c0] sm:$0xff]  ;;  %v1073_v18 = vpack.c.bf16 %v640_v11, %v638_v10  ;;  %v639_v19 = vld [vmem:[%s1527_s7 + $0x2d0] sm:$0xff]  ;;  %v578_v20 = vld [vmem:[%s1527_s7 + $0xe8] sm:$0xff]  ;;  %v1011_v24 = vpack.c.bf16 %v575_v16, %v573_v15 }
  0x6b   : > { %v580_v21 = vld [vmem:[%s1527_s7 + $0xf8] sm:$0xff]  ;;  %v642_v22 = vld [vmem:[%s1527_s7 + $0x2e8] sm:$0xff]  ;;  %v1075_v25 = vpack.c.bf16 %v639_v19, %v637_v17  ;;  %v577_v27 = vld [vmem:[%s1527_s7 + $0xe0] sm:$0xff] }
  0x6c   : > { %1004 = vmatpush1.bf16.msra.mxu1 %v1003_v0  ;;  %v644_v23 = vld [vmem:[%s1527_s7 + $0x2f8] sm:$0xff]  ;;  %v1013_v26 = vpack.c.bf16 %v580_v21, %v578_v20  ;;  %v579_v28 = vld [vmem:[%s1527_s7 + $0xf0] sm:$0xff]  ;;  %v641_v29 = vld [vmem:[%s1527_s7 + $0x2e0] sm:$0xff] }
  0x6d   : > { %1068 = vmatpush1.bf16.msra.mxu0 %v1067_v1  ;;  %1006 = vmatprep.subr.bf16.mxu1 %v1005_v2  ;;  %v1077_v30 = vpack.c.bf16 %v644_v23, %v642_v22  ;;  %v643_v31 = vld [vmem:[%s1527_s7 + $0x2f0] sm:$0xff]  ;;  %v582_v32 = vld [vmem:[%s1527_s7 + $0x108] sm:$0xff]  ;;  %v584_v33 = vld [vmem:[%s1527_s7 + $0x118] sm:$0xff]  ;;  %v1015_v36 = vpack.c.bf16 %v579_v28, %v577_v27 }
  0x6e   : > { %1070 = vmatprep.subr.bf16.mxu0 %v1069_v6  ;;  %v646_v34 = vld [vmem:[%s1527_s7 + $0x308] sm:$0xff]  ;;  %v648_v35 = vld [vmem:[%s1527_s7 + $0x318] sm:$0xff]  ;;  %v1079_v37 = vpack.c.bf16 %v643_v31, %v641_v29  ;;  %v1017_v38 = vpack.c.bf16 %v584_v33, %v582_v32  ;;  %v581_v39 = vld [vmem:[%s1527_s7 + $0x100] sm:$0xff] }
  0x6f   : > { %v583_v40 = vld [vmem:[%s1527_s7 + $0x110] sm:$0xff]  ;;  %v645_v41 = vld [vmem:[%s1527_s7 + $0x300] sm:$0xff]  ;;  %v1081_v42 = vpack.c.bf16 %v648_v35, %v646_v34  ;;  %v586_v44 = vld [vmem:[%s1527_s7 + $0x128] sm:$0xff] }
  0x70   : > { %1008 = vmatpush1.bf16.msra.mxu1 %v1007_v12  ;;  %v647_v43 = vld [vmem:[%s1527_s7 + $0x310] sm:$0xff]  ;;  %v588_v45 = vld [vmem:[%s1527_s7 + $0x138] sm:$0xff]  ;;  %v650_v46 = vld [vmem:[%s1527_s7 + $0x328] sm:$0xff]  ;;  %v1019_v48 = vpack.c.bf16 %v583_v40, %v581_v39 }
  0x71   : > { %1072 = vmatpush1.bf16.msra.mxu0 %v1071_v13  ;;  %1010 = vmatprep.subr.bf16.mxu1 %v1009_v14  ;;  %v652_v47 = vld [vmem:[%s1527_s7 + $0x338] sm:$0xff]  ;;  %v1083_v49 = vpack.c.bf16 %v647_v43, %v645_v41  ;;  %v1021_v50 = vpack.c.bf16 %v588_v45, %v586_v44  ;;  %v585_v51 = vld [vmem:[%s1527_s7 + $0x120] sm:$0xff]  ;;  %v587_v52 = vld [vmem:[%s1527_s7 + $0x130] sm:$0xff] }
  0x72   : > { %1074 = vmatprep.subr.bf16.mxu0 %v1073_v18  ;;  %v649_v53 = vld [vmem:[%s1527_s7 + $0x320] sm:$0xff]  ;;  %v1085_v54 = vpack.c.bf16 %v652_v47, %v650_v46  ;;  %v651_v55 = vld [vmem:[%s1527_s7 + $0x330] sm:$0xff]  ;;  %v590_v56 = vld [vmem:[%s1527_s7 + $0x148] sm:$0xff]  ;;  %v1023_v60 = vpack.c.bf16 %v587_v52, %v585_v51 }
  0x73   : > { %v592_v57 = vld [vmem:[%s1527_s7 + $0x158] sm:$0xff]  ;;  %v654_v58 = vld [vmem:[%s1527_s7 + $0x348] sm:$0xff]  ;;  %v1087_v61 = vpack.c.bf16 %v651_v55, %v649_v53  ;;  %v589_v63 = vld [vmem:[%s1527_s7 + $0x140] sm:$0xff] }
  0x74   : > { %1012 = vmatpush1.bf16.msra.mxu1 %v1011_v24  ;;  %v656_v59 = vld [vmem:[%s1527_s7 + $0x358] sm:$0xff]  ;;  %v1025_v62 = vpack.c.bf16 %v592_v57, %v590_v56  ;;  %v591_v0 = vld [vmem:[%s1527_s7 + $0x150] sm:$0xff]  ;;  %v653_v1 = vld [vmem:[%s1527_s7 + $0x340] sm:$0xff] }
  0x75   : > { %1076 = vmatpush1.bf16.msra.mxu0 %v1075_v25  ;;  %1014 = vmatprep.subr.bf16.mxu1 %v1013_v26  ;;  %v1089_v2 = vpack.c.bf16 %v656_v59, %v654_v58  ;;  %v655_v3 = vld [vmem:[%s1527_s7 + $0x350] sm:$0xff]  ;;  %v594_v4 = vld [vmem:[%s1527_s7 + $0x168] sm:$0xff]  ;;  %v596_v5 = vld [vmem:[%s1527_s7 + $0x178] sm:$0xff]  ;;  %v1027_v8 = vpack.c.bf16 %v591_v0, %v589_v63 }
  0x76   : > { %1078 = vmatprep.subr.bf16.mxu0 %v1077_v30  ;;  %v658_v6 = vld [vmem:[%s1527_s7 + $0x368] sm:$0xff]  ;;  %v660_v7 = vld [vmem:[%s1527_s7 + $0x378] sm:$0xff]  ;;  %v1091_v9 = vpack.c.bf16 %v655_v3, %v653_v1  ;;  %v1029_v10 = vpack.c.bf16 %v596_v5, %v594_v4  ;;  %v593_v11 = vld [vmem:[%s1527_s7 + $0x160] sm:$0xff]  ;;  %v830_v4 = vlaneseq }
  0x77   : > { %v595_v12 = vld [vmem:[%s1527_s7 + $0x170] sm:$0xff]  ;;  %v657_v13 = vld [vmem:[%s1527_s7 + $0x360] sm:$0xff]  ;;  %v1093_v14 = vpack.c.bf16 %v660_v7, %v658_v6  ;;  %v598_v16 = vld [vmem:[%s1527_s7 + $0x188] sm:$0xff] }
  0x78   : > { %1016 = vmatpush1.bf16.msra.mxu1 %v1015_v36  ;;  %v659_v15 = vld [vmem:[%s1527_s7 + $0x370] sm:$0xff]  ;;  %v600_v17 = vld [vmem:[%s1527_s7 + $0x198] sm:$0xff]  ;;  %v662_v18 = vld [vmem:[%s1527_s7 + $0x388] sm:$0xff]  ;;  %v1031_v20 = vpack.c.bf16 %v595_v12, %v593_v11  ;;  %v831_v5 = vshrl.u32 %v830_v4, 7 }
  0x79   : > { %1080 = vmatpush1.bf16.msra.mxu0 %v1079_v37  ;;  %1018 = vmatprep.subr.bf16.mxu1 %v1017_v38  ;;  %v664_v19 = vld [vmem:[%s1527_s7 + $0x398] sm:$0xff]  ;;  %v1095_v21 = vpack.c.bf16 %v659_v15, %v657_v13  ;;  %v1033_v22 = vpack.c.bf16 %v600_v17, %v598_v16  ;;  %v597_v23 = vld [vmem:[%s1527_s7 + $0x180] sm:$0xff]  ;;  %v599_v24 = vld [vmem:[%s1527_s7 + $0x190] sm:$0xff] }
  0x7a   : > { %1082 = vmatprep.subr.bf16.mxu0 %v1081_v42  ;;  %v661_v25 = vld [vmem:[%s1527_s7 + $0x380] sm:$0xff]  ;;  %v1097_v26 = vpack.c.bf16 %v664_v19, %v662_v18  ;;  %v663_v27 = vld [vmem:[%s1527_s7 + $0x390] sm:$0xff]  ;;  %v602_v28 = vld [vmem:[%s1527_s7 + $0x1a8] sm:$0xff]  ;;  %v1035_v32 = vpack.c.bf16 %v599_v24, %v597_v23  ;;  %v832_v6 = vsub.s32 0, %v831_v5 }
  0x7b   : > { %v604_v29 = vld [vmem:[%s1527_s7 + $0x1b8] sm:$0xff]  ;;  %v666_v30 = vld [vmem:[%s1527_s7 + $0x3a8] sm:$0xff]  ;;  %v1099_v33 = vpack.c.bf16 %v663_v27, %v661_v25  ;;  %v601_v35 = vld [vmem:[%s1527_s7 + $0x1a0] sm:$0xff] }
  0x7c   : > { %1020 = vmatpush1.bf16.msra.mxu1 %v1019_v48  ;;  %v668_v31 = vld [vmem:[%s1527_s7 + $0x3b8] sm:$0xff]  ;;  %v1037_v34 = vpack.c.bf16 %v604_v29, %v602_v28  ;;  %v603_v36 = vld [vmem:[%s1527_s7 + $0x1b0] sm:$0xff]  ;;  %v665_v37 = vld [vmem:[%s1527_s7 + $0x3a0] sm:$0xff] }
  0x7d   : > { %1084 = vmatpush1.bf16.msra.mxu0 %v1083_v49  ;;  %1022 = vmatprep.subr.bf16.mxu1 %v1021_v50  ;;  %v1101_v38 = vpack.c.bf16 %v668_v31, %v666_v30  ;;  %v667_v39 = vld [vmem:[%s1527_s7 + $0x3b0] sm:$0xff]  ;;  %v606_v40 = vld [vmem:[%s1527_s7 + $0x1c8] sm:$0xff]  ;;  %v608_v41 = vld [vmem:[%s1527_s7 + $0x1d8] sm:$0xff]  ;;  %v1039_v44 = vpack.c.bf16 %v603_v36, %v601_v35 }
  0x7e   : > { %1086 = vmatprep.subr.bf16.mxu0 %v1085_v54  ;;  %v670_v42 = vld [vmem:[%s1527_s7 + $0x3c8] sm:$0xff]  ;;  %v672_v43 = vld [vmem:[%s1527_s7 + $0x3d8] sm:$0xff]  ;;  %v1103_v45 = vpack.c.bf16 %v667_v39, %v665_v37  ;;  %v1041_v46 = vpack.c.bf16 %v608_v41, %v606_v40  ;;  %v605_v47 = vld [vmem:[%s1527_s7 + $0x1c0] sm:$0xff] }
  0x7f   : > { %v607_v48 = vld [vmem:[%s1527_s7 + $0x1d0] sm:$0xff]  ;;  %v669_v49 = vld [vmem:[%s1527_s7 + $0x3c0] sm:$0xff]  ;;  %v1105_v50 = vpack.c.bf16 %v672_v43, %v670_v42  ;;  %v610_v52 = vld [vmem:[%s1527_s7 + $0x1e8] sm:$0xff] }
  0x80   : > { %1024 = vmatpush1.bf16.msra.mxu1 %v1023_v60  ;;  %v671_v51 = vld [vmem:[%s1527_s7 + $0x3d0] sm:$0xff]  ;;  %v612_v53 = vld [vmem:[%s1527_s7 + $0x1f8] sm:$0xff]  ;;  %v674_v54 = vld [vmem:[%s1527_s7 + $0x3e8] sm:$0xff]  ;;  %v1043_v56 = vpack.c.bf16 %v607_v48, %v605_v47 }
  0x81   : > { %1088 = vmatpush1.bf16.msra.mxu0 %v1087_v61  ;;  %1026 = vmatprep.subr.bf16.mxu1 %v1025_v62  ;;  %v676_v55 = vld [vmem:[%s1527_s7 + $0x3f8] sm:$0xff]  ;;  %v1107_v57 = vpack.c.bf16 %v671_v51, %v669_v49  ;;  %v1045_v58 = vpack.c.bf16 %v612_v53, %v610_v52  ;;  %v609_v59 = vld [vmem:[%s1527_s7 + $0x1e0] sm:$0xff]  ;;  %v611_v60 = vld [vmem:[%s1527_s7 + $0x1f0] sm:$0xff] }
  0x82   : > { %1090 = vmatprep.subr.bf16.mxu0 %v1089_v2  ;;  %v1109_v61 = vpack.c.bf16 %v676_v55, %v674_v54  ;;  %v673_v62 = vld [vmem:[%s1527_s7 + $0x3e0] sm:$0xff]  ;;  %v675_v63 = vld [vmem:[%s1527_s7 + $0x3f0] sm:$0xff]  ;;  %v1047_v0 = vpack.c.bf16 %v611_v60, %v609_v59 }
  0x83   : > { %v1111_v1 = vpack.c.bf16 %v675_v63, %v673_v62  ;;  %v545_v2 = vld [vmem:[%s1685_s0] sm:$0xff]  ;;  %v547_v3 = vld [vmem:[%s1685_s0 + $0x10] sm:$0xff] }
  0x84   : > { %1028 = vmatpush1.bf16.msra.mxu1 %v1027_v8  ;;  %v828_v7 = vld [vmem:[%s525_s21] sm:$0x3]  ;;  %v836_v8 = vsub.s32 1, %v831_v5 }
  0x85   : > { %1092 = vmatpush1.bf16.msra.mxu0 %v1091_v9  ;;  %1030 = vmatprep.subr.bf16.mxu1 %v1029_v10  ;;  %v833_v10 = vrot.slane %v828_v7, %v832_v6 }
  0x86   : > { %1094 = vmatprep.subr.bf16.mxu0 %v1093_v14  ;;  %v837_v13 = vrot.slane %v828_v7, %v836_v8 }
  0x88   : > { %1032 = vmatpush1.bf16.msra.mxu1 %v1031_v20 }
  0x89   : > { %1096 = vmatpush1.bf16.msra.mxu0 %v1095_v21  ;;  %1034 = vmatprep.subr.bf16.mxu1 %v1033_v22 }
  0x8a   : > { %1098 = vmatprep.subr.bf16.mxu0 %v1097_v26 }
  0x8c   : > { %1036 = vmatpush1.bf16.msra.mxu1 %v1035_v32 }
  0x8d   : > { %1100 = vmatpush1.bf16.msra.mxu0 %v1099_v33  ;;  %1038 = vmatprep.subr.bf16.mxu1 %v1037_v34 }
  0x8e   : > { %1102 = vmatprep.subr.bf16.mxu0 %v1101_v38 }
  0x90   : > { %1040 = vmatpush1.bf16.msra.mxu1 %v1039_v44 }
  0x91   : > { %1104 = vmatpush1.bf16.msra.mxu0 %v1103_v45  ;;  %1042 = vmatprep.subr.bf16.mxu1 %v1041_v46 }
  0x92   : > { %1106 = vmatprep.subr.bf16.mxu0 %v1105_v50 }
  0x94   : > { %1044 = vmatpush1.bf16.msra.mxu1 %v1043_v56 }
  0x95   : > { %1108 = vmatpush1.bf16.msra.mxu0 %v1107_v57  ;;  %1046 = vmatprep.subr.bf16.mxu1 %v1045_v58 }
  0x96   : > { %1110 = vmatprep.subr.bf16.mxu0 %v1109_v61 }
  0x98   : > { %1048 = vmatpush1.bf16.msra.mxu1 %v1047_v0 }
  0x99   : > { %1112 = vmatpush1.bf16.msra.mxu0 %v1111_v1 }
  0x9b   : > { %742 = vmatmul.mubr.f32.vlgmr.msra.gmra.mrb[0].mxu1 %v545_v2 }
  0x9c   : > { %813 = vmatmul.mubr.f32.vlgmr.msra.gmra.mrb[0].mxu0 %v547_v3 }
 0x16e   : > { %v743_v9 = vpop.f32.mrb[0].mxu1 }
 0x16f   : > { %v814_v11 = vpop.f32.mrb[0].mxu0  ;;  %v745_v12 = vpop.f32.mrb[1].mxu1 }
 0x170   : > { %v815_v14 = vadd.f32 %v814_v11, %v743_v9  ;;  %v816_v15 = vpop.f32.mrb[1].mxu0 }
 0x171   : > { %v817_v16 = vadd.f32 %v816_v15, %v745_v12 }
 0x172   : > { %v840_v17 = vadd.f32 %v833_v10, %v815_v14 }
 0x173   : > { %v841_v18 = vadd.f32 %v837_v13, %v817_v16 }
 0x174   : > { %v842_v19 = vmax.f32 %v840_v17, 0.0 }
 0x175   : > { %v843_v20 = vmax.f32 %v841_v18, 0.0 }
 0x176   : > { %844 = vst [vmem:[%s535_s24] sm:$0xff] %v842_v19 }
 0x177   : > { %845 = vst [vmem:[%s535_s24 + $0x8] sm:$0xff] %v843_v20 }
 0x178 PF: > { %s13_s16 = sadd.s32 1, %s1193_s16   ;;  %s1689_s12 = smov %s1181_s13 }
 0x179   : > { %p10_p10 = scmp.ge.s32.totalorder %s13_s16, 4   ;;  %s1690_s13 = smov %s1250_s20 }
 0x17a   : > { %s1691_s14 = smov %s1189_s15  ;;  %s1692_s15 = smov %s1694_s17 }
 0x17b   :  { %12 = sbr.rel (!%p10_p10) target bundleno = 3 (0x3), region = 104 }

// kernel: simclr_stage1_forward.13
= control target key start
LH: loop header
LB: loop body
LE: loop exit
PB: predicated region body
PF: predicated region fallthrough
CT: control target
= control target key end

     0   :  { %s1779_s0 = inlined_call_operand.vmem [shape: f32[8,512], index: 0, kind: input, shape index: {}]   ;;  %s1780_s1 = inlined_call_operand.vmem [shape: f32[512,512], index: 1, kind: input, shape index: {}]   ;;  %s1781_s2 = inlined_call_operand.vmem [shape: f32[1,512], index: 2, kind: input, shape index: {}]   ;;  %s1782_s3 = inlined_call_operand.hbm [shape: f32[8,512], index: 3, kind: output, shape index: {0}]   ;;  %s1783_s4 = inlined_call_operand.vmem [shape: f32[8,512], index: 4, kind: output, shape index: {1}]  }
   0x1   :  { %v34_v0 = vld [vmem:[%s1780_s1 + $0x8] sm:$0xff]  ;;  %v36_v2 = vld [vmem:[%s1780_s1 + $0x18] sm:$0xff]  ;;  %v33_v5 = vld [vmem:[%s1780_s1] sm:$0xff] }
   0x2   :  { %v38_v1 = vld [vmem:[%s1780_s1 + $0x28] sm:$0xff]  ;;  %v40_v4 = vld [vmem:[%s1780_s1 + $0x38] sm:$0xff]  ;;  %v37_v6 = vld [vmem:[%s1780_s1 + $0x20] sm:$0xff] }
   0x3   :  { %v659_v3 = vpack.c.bf16 %v38_v1, %v34_v0  ;;  %v787_v7 = vpack.c.bf16 %v40_v4, %v36_v2  ;;  %v661_v8 = vpack.c.bf16 %v37_v6, %v33_v5  ;;  %v35_v9 = vld [vmem:[%s1780_s1 + $0x10] sm:$0xff]  ;;  %v42_v11 = vld [vmem:[%s1780_s1 + $0x48] sm:$0xff]  ;;  %v44_v14 = vld [vmem:[%s1780_s1 + $0x58] sm:$0xff] }
   0x4   :  { %v39_v10 = vld [vmem:[%s1780_s1 + $0x30] sm:$0xff]  ;;  %v46_v13 = vld [vmem:[%s1780_s1 + $0x68] sm:$0xff]  ;;  %v48_v15 = vld [vmem:[%s1780_s1 + $0x78] sm:$0xff] }
   0x5   :  { %660 = vmatprep.subr.bf16.mxu0 %v659_v3  ;;  %v789_v12 = vpack.c.bf16 %v39_v10, %v35_v9  ;;  %788 = vmatprep.subr.bf16.mxu1 %v787_v7  ;;  %v663_v16 = vpack.c.bf16 %v46_v13, %v42_v11  ;;  %v791_v17 = vpack.c.bf16 %v48_v15, %v44_v14  ;;  %v41_v18 = vld [vmem:[%s1780_s1 + $0x40] sm:$0xff]  ;;  %v43_v20 = vld [vmem:[%s1780_s1 + $0x50] sm:$0xff]  ;;  %v50_v23 = vld [vmem:[%s1780_s1 + $0x88] sm:$0xff] }
   0x6   :  { %662 = vmatpush1.bf16.msra.mxu0 %v661_v8  ;;  %v45_v19 = vld [vmem:[%s1780_s1 + $0x60] sm:$0xff]  ;;  %v47_v22 = vld [vmem:[%s1780_s1 + $0x70] sm:$0xff]  ;;  %v54_v24 = vld [vmem:[%s1780_s1 + $0xa8] sm:$0xff] }
   0x7   :  { %790 = vmatpush1.bf16.msra.mxu1 %v789_v12  ;;  %v665_v21 = vpack.c.bf16 %v45_v19, %v41_v18  ;;  %664 = vmatprep.subr.bf16.mxu0 %v663_v16  ;;  %v793_v25 = vpack.c.bf16 %v47_v22, %v43_v20  ;;  %v667_v26 = vpack.c.bf16 %v54_v24, %v50_v23  ;;  %v52_v27 = vld [vmem:[%s1780_s1 + $0x98] sm:$0xff]  ;;  %v49_v29 = vld [vmem:[%s1780_s1 + $0x80] sm:$0xff]  ;;  %v51_v32 = vld [vmem:[%s1780_s1 + $0x90] sm:$0xff] }
   0x8   :  { %792 = vmatprep.subr.bf16.mxu1 %v791_v17  ;;  %v56_v28 = vld [vmem:[%s1780_s1 + $0xb8] sm:$0xff]  ;;  %v53_v31 = vld [vmem:[%s1780_s1 + $0xa0] sm:$0xff]  ;;  %v55_v33 = vld [vmem:[%s1780_s1 + $0xb0] sm:$0xff] }
   0x9   :  { %v795_v30 = vpack.c.bf16 %v56_v28, %v52_v27  ;;  %v669_v34 = vpack.c.bf16 %v53_v31, %v49_v29  ;;  %v58_v35 = vld [vmem:[%s1780_s1 + $0xc8] sm:$0xff]  ;;  %v60_v37 = vld [vmem:[%s1780_s1 + $0xd8] sm:$0xff]  ;;  %v797_v38 = vpack.c.bf16 %v55_v33, %v51_v32  ;;  %v57_v41 = vld [vmem:[%s1780_s1 + $0xc0] sm:$0xff] }
   0xa   :  { %666 = vmatpush1.bf16.msra.mxu0 %v665_v21  ;;  %v62_v36 = vld [vmem:[%s1780_s1 + $0xe8] sm:$0xff]  ;;  %v64_v40 = vld [vmem:[%s1780_s1 + $0xf8] sm:$0xff]  ;;  %v61_v42 = vld [vmem:[%s1780_s1 + $0xe0] sm:$0xff] }
   0xb   :  { %794 = vmatpush1.bf16.msra.mxu1 %v793_v25  ;;  %668 = vmatprep.subr.bf16.mxu0 %v667_v26  ;;  %v671_v39 = vpack.c.bf16 %v62_v36, %v58_v35  ;;  %v799_v43 = vpack.c.bf16 %v64_v40, %v60_v37  ;;  %v59_v44 = vld [vmem:[%s1780_s1 + $0xd0] sm:$0xff]  ;;  %v66_v46 = vld [vmem:[%s1780_s1 + $0x108] sm:$0xff]  ;;  %v68_v48 = vld [vmem:[%s1780_s1 + $0x118] sm:$0xff]  ;;  %v673_v50 = vpack.c.bf16 %v61_v42, %v57_v41 }
   0xc   :  { %796 = vmatprep.subr.bf16.mxu1 %v795_v30  ;;  %v63_v45 = vld [vmem:[%s1780_s1 + $0xf0] sm:$0xff]  ;;  %v70_v47 = vld [vmem:[%s1780_s1 + $0x128] sm:$0xff]  ;;  %v72_v49 = vld [vmem:[%s1780_s1 + $0x138] sm:$0xff] }
   0xd   :  { %v801_v51 = vpack.c.bf16 %v63_v45, %v59_v44  ;;  %v675_v52 = vpack.c.bf16 %v70_v47, %v66_v46  ;;  %v65_v53 = vld [vmem:[%s1780_s1 + $0x100] sm:$0xff]  ;;  %v67_v55 = vld [vmem:[%s1780_s1 + $0x110] sm:$0xff]  ;;  %v803_v56 = vpack.c.bf16 %v72_v49, %v68_v48  ;;  %v74_v58 = vld [vmem:[%s1780_s1 + $0x148] sm:$0xff] }
   0xe   :  { %670 = vmatpush1.bf16.msra.mxu0 %v669_v34  ;;  %v69_v54 = vld [vmem:[%s1780_s1 + $0x120] sm:$0xff]  ;;  %v71_v57 = vld [vmem:[%s1780_s1 + $0x130] sm:$0xff]  ;;  %v78_v59 = vld [vmem:[%s1780_s1 + $0x168] sm:$0xff] }
   0xf   :  { %798 = vmatpush1.bf16.msra.mxu1 %v797_v38  ;;  %672 = vmatprep.subr.bf16.mxu0 %v671_v39  ;;  %v76_v60 = vld [vmem:[%s1780_s1 + $0x158] sm:$0xff]  ;;  %v677_v62 = vpack.c.bf16 %v69_v54, %v65_v53  ;;  %v805_v63 = vpack.c.bf16 %v71_v57, %v67_v55  ;;  %v679_v0 = vpack.c.bf16 %v78_v59, %v74_v58  ;;  %v73_v1 = vld [vmem:[%s1780_s1 + $0x140] sm:$0xff]  ;;  %v75_v3 = vld [vmem:[%s1780_s1 + $0x150] sm:$0xff] }
  0x10   :  { %800 = vmatprep.subr.bf16.mxu1 %v799_v43  ;;  %v80_v61 = vld [vmem:[%s1780_s1 + $0x178] sm:$0xff]  ;;  %v77_v2 = vld [vmem:[%s1780_s1 + $0x160] sm:$0xff]  ;;  %v79_v5 = vld [vmem:[%s1780_s1 + $0x170] sm:$0xff] }
  0x11   :  { %v807_v4 = vpack.c.bf16 %v80_v61, %v76_v60  ;;  %v82_v6 = vld [vmem:[%s1780_s1 + $0x188] sm:$0xff]  ;;  %v84_v8 = vld [vmem:[%s1780_s1 + $0x198] sm:$0xff]  ;;  %v681_v10 = vpack.c.bf16 %v77_v2, %v73_v1  ;;  %v809_v11 = vpack.c.bf16 %v79_v5, %v75_v3  ;;  %v81_v13 = vld [vmem:[%s1780_s1 + $0x180] sm:$0xff] }
  0x12   :  { %674 = vmatpush1.bf16.msra.mxu0 %v673_v50  ;;  %v86_v7 = vld [vmem:[%s1780_s1 + $0x1a8] sm:$0xff]  ;;  %v88_v9 = vld [vmem:[%s1780_s1 + $0x1b8] sm:$0xff]  ;;  %v85_v14 = vld [vmem:[%s1780_s1 + $0x1a0] sm:$0xff] }
  0x13   :  { %802 = vmatpush1.bf16.msra.mxu1 %v801_v51  ;;  %676 = vmatprep.subr.bf16.mxu0 %v675_v52  ;;  %v683_v12 = vpack.c.bf16 %v86_v7, %v82_v6  ;;  %v83_v15 = vld [vmem:[%s1780_s1 + $0x190] sm:$0xff]  ;;  %v811_v16 = vpack.c.bf16 %v88_v9, %v84_v8  ;;  %v90_v18 = vld [vmem:[%s1780_s1 + $0x1c8] sm:$0xff]  ;;  %v92_v20 = vld [vmem:[%s1780_s1 + $0x1d8] sm:$0xff]  ;;  %v685_v22 = vpack.c.bf16 %v85_v14, %v81_v13 }
  0x14   :  { %804 = vmatprep.subr.bf16.mxu1 %v803_v56  ;;  %v87_v17 = vld [vmem:[%s1780_s1 + $0x1b0] sm:$0xff]  ;;  %v94_v19 = vld [vmem:[%s1780_s1 + $0x1e8] sm:$0xff]  ;;  %v96_v21 = vld [vmem:[%s1780_s1 + $0x1f8] sm:$0xff] }
  0x15   :  { %v813_v23 = vpack.c.bf16 %v87_v17, %v83_v15  ;;  %v687_v24 = vpack.c.bf16 %v94_v19, %v90_v18  ;;  %v89_v25 = vld [vmem:[%s1780_s1 + $0x1c0] sm:$0xff]  ;;  %v91_v27 = vld [vmem:[%s1780_s1 + $0x1d0] sm:$0xff]  ;;  %v815_v28 = vpack.c.bf16 %v96_v21, %v92_v20  ;;  %v98_v30 = vld [vmem:[%s1780_s1 + $0x208] sm:$0xff] }
  0x16   :  { %678 = vmatpush1.bf16.msra.mxu0 %v677_v62  ;;  %v93_v26 = vld [vmem:[%s1780_s1 + $0x1e0] sm:$0xff]  ;;  %v95_v29 = vld [vmem:[%s1780_s1 + $0x1f0] sm:$0xff]  ;;  %v102_v31 = vld [vmem:[%s1780_s1 + $0x228] sm:$0xff] }
  0x17   :  { %806 = vmatpush1.bf16.msra.mxu1 %v805_v63  ;;  %680 = vmatprep.subr.bf16.mxu0 %v679_v0  ;;  %v100_v32 = vld [vmem:[%s1780_s1 + $0x218] sm:$0xff]  ;;  %v689_v34 = vpack.c.bf16 %v93_v26, %v89_v25  ;;  %v817_v35 = vpack.c.bf16 %v95_v29, %v91_v27  ;;  %v691_v36 = vpack.c.bf16 %v102_v31, %v98_v30  ;;  %v97_v37 = vld [vmem:[%s1780_s1 + $0x200] sm:$0xff]  ;;  %v99_v39 = vld [vmem:[%s1780_s1 + $0x210] sm:$0xff] }
  0x18   :  { %808 = vmatprep.subr.bf16.mxu1 %v807_v4  ;;  %v104_v33 = vld [vmem:[%s1780_s1 + $0x238] sm:$0xff]  ;;  %v101_v38 = vld [vmem:[%s1780_s1 + $0x220] sm:$0xff]  ;;  %v103_v41 = vld [vmem:[%s1780_s1 + $0x230] sm:$0xff] }
  0x19   :  { %v819_v40 = vpack.c.bf16 %v104_v33, %v100_v32  ;;  %v106_v42 = vld [vmem:[%s1780_s1 + $0x248] sm:$0xff]  ;;  %v108_v44 = vld [vmem:[%s1780_s1 + $0x258] sm:$0xff]  ;;  %v693_v46 = vpack.c.bf16 %v101_v38, %v97_v37  ;;  %v821_v47 = vpack.c.bf16 %v103_v41, %v99_v39  ;;  %v105_v49 = vld [vmem:[%s1780_s1 + $0x240] sm:$0xff] }
  0x1a   :  { %682 = vmatpush1.bf16.msra.mxu0 %v681_v10  ;;  %v110_v43 = vld [vmem:[%s1780_s1 + $0x268] sm:$0xff]  ;;  %v112_v45 = vld [vmem:[%s1780_s1 + $0x278] sm:$0xff]  ;;  %v109_v50 = vld [vmem:[%s1780_s1 + $0x260] sm:$0xff] }
  0x1b   :  { %810 = vmatpush1.bf16.msra.mxu1 %v809_v11  ;;  %684 = vmatprep.subr.bf16.mxu0 %v683_v12  ;;  %v695_v48 = vpack.c.bf16 %v110_v43, %v106_v42  ;;  %v107_v51 = vld [vmem:[%s1780_s1 + $0x250] sm:$0xff]  ;;  %v823_v52 = vpack.c.bf16 %v112_v45, %v108_v44  ;;  %v114_v54 = vld [vmem:[%s1780_s1 + $0x288] sm:$0xff]  ;;  %v116_v56 = vld [vmem:[%s1780_s1 + $0x298] sm:$0xff]  ;;  %v697_v58 = vpack.c.bf16 %v109_v50, %v105_v49 }
  0x1c   :  { %812 = vmatprep.subr.bf16.mxu1 %v811_v16  ;;  %v111_v53 = vld [vmem:[%s1780_s1 + $0x270] sm:$0xff]  ;;  %v118_v55 = vld [vmem:[%s1780_s1 + $0x2a8] sm:$0xff]  ;;  %v120_v57 = vld [vmem:[%s1780_s1 + $0x2b8] sm:$0xff] }
  0x1d   :  { %v825_v59 = vpack.c.bf16 %v111_v53, %v107_v51  ;;  %v699_v60 = vpack.c.bf16 %v118_v55, %v114_v54  ;;  %v113_v61 = vld [vmem:[%s1780_s1 + $0x280] sm:$0xff]  ;;  %v115_v63 = vld [vmem:[%s1780_s1 + $0x290] sm:$0xff]  ;;  %v827_v0 = vpack.c.bf16 %v120_v57, %v116_v56  ;;  %v122_v2 = vld [vmem:[%s1780_s1 + $0x2c8] sm:$0xff] }
  0x1e   :  { %686 = vmatpush1.bf16.msra.mxu0 %v685_v22  ;;  %v117_v62 = vld [vmem:[%s1780_s1 + $0x2a0] sm:$0xff]  ;;  %v119_v1 = vld [vmem:[%s1780_s1 + $0x2b0] sm:$0xff]  ;;  %v126_v3 = vld [vmem:[%s1780_s1 + $0x2e8] sm:$0xff] }
  0x1f   :  { %814 = vmatpush1.bf16.msra.mxu1 %v813_v23  ;;  %688 = vmatprep.subr.bf16.mxu0 %v687_v24  ;;  %v124_v4 = vld [vmem:[%s1780_s1 + $0x2d8] sm:$0xff]  ;;  %v701_v6 = vpack.c.bf16 %v117_v62, %v113_v61  ;;  %v121_v7 = vld [vmem:[%s1780_s1 + $0x2c0] sm:$0xff]  ;;  %v829_v8 = vpack.c.bf16 %v119_v1, %v115_v63  ;;  %v703_v9 = vpack.c.bf16 %v126_v3, %v122_v2  ;;  %v123_v11 = vld [vmem:[%s1780_s1 + $0x2d0] sm:$0xff] }
  0x20   :  { %816 = vmatprep.subr.bf16.mxu1 %v815_v28  ;;  %v128_v5 = vld [vmem:[%s1780_s1 + $0x2f8] sm:$0xff]  ;;  %v125_v10 = vld [vmem:[%s1780_s1 + $0x2e0] sm:$0xff]  ;;  %v127_v12 = vld [vmem:[%s1780_s1 + $0x2f0] sm:$0xff] }
  0x21   :  { %v831_v13 = vpack.c.bf16 %v128_v5, %v124_v4  ;;  %v130_v14 = vld [vmem:[%s1780_s1 + $0x308] sm:$0xff]  ;;  %v132_v17 = vld [vmem:[%s1780_s1 + $0x318] sm:$0xff]  ;;  %v705_v19 = vpack.c.bf16 %v125_v10, %v121_v7  ;;  %v833_v20 = vpack.c.bf16 %v127_v12, %v123_v11  ;;  %v129_v22 = vld [vmem:[%s1780_s1 + $0x300] sm:$0xff] }
  0x22   :  { %690 = vmatpush1.bf16.msra.mxu0 %v689_v34  ;;  %v134_v15 = vld [vmem:[%s1780_s1 + $0x328] sm:$0xff]  ;;  %v136_v18 = vld [vmem:[%s1780_s1 + $0x338] sm:$0xff]  ;;  %v133_v23 = vld [vmem:[%s1780_s1 + $0x320] sm:$0xff] }
  0x23   :  { %818 = vmatpush1.bf16.msra.mxu1 %v817_v35  ;;  %692 = vmatprep.subr.bf16.mxu0 %v691_v36  ;;  %v30_v16 = vld [vmem:[%s1779_s0 + $0x8] sm:$0xff]  ;;  %v707_v21 = vpack.c.bf16 %v134_v15, %v130_v14  ;;  %v131_v24 = vld [vmem:[%s1780_s1 + $0x310] sm:$0xff]  ;;  %v835_v25 = vpack.c.bf16 %v136_v18, %v132_v17  ;;  %v140_v29 = vld [vmem:[%s1780_s1 + $0x358] sm:$0xff]  ;;  %v709_v31 = vpack.c.bf16 %v133_v23, %v129_v22 }
  0x24   :  { %820 = vmatprep.subr.bf16.mxu1 %v819_v40  ;;  %353 = vmatprep.mubr.f32.mxu0 %v30_v16  ;;  %v135_v26 = vld [vmem:[%s1780_s1 + $0x330] sm:$0xff]  ;;  %v138_v27 = vld [vmem:[%s1780_s1 + $0x348] sm:$0xff]  ;;  %v144_v30 = vld [vmem:[%s1780_s1 + $0x378] sm:$0xff] }
  0x25   :  { %495 = vmatprep.mubr.f32.mxu1 %v30_v16  ;;  %v142_v28 = vld [vmem:[%s1780_s1 + $0x368] sm:$0xff]  ;;  %v837_v32 = vpack.c.bf16 %v135_v26, %v131_v24  ;;  %v137_v34 = vld [vmem:[%s1780_s1 + $0x340] sm:$0xff]  ;;  %v139_v36 = vld [vmem:[%s1780_s1 + $0x350] sm:$0xff]  ;;  %v839_v37 = vpack.c.bf16 %v144_v30, %v140_v29 }
  0x26   :  { %694 = vmatpush1.bf16.msra.mxu0 %v693_v46  ;;  %v711_v33 = vpack.c.bf16 %v142_v28, %v138_v27  ;;  %v141_v35 = vld [vmem:[%s1780_s1 + $0x360] sm:$0xff]  ;;  %v143_v38 = vld [vmem:[%s1780_s1 + $0x370] sm:$0xff]  ;;  %v146_v39 = vld [vmem:[%s1780_s1 + $0x388] sm:$0xff] }
  0x27   :  { %822 = vmatpush1.bf16.msra.mxu1 %v821_v47  ;;  %696 = vmatprep.subr.bf16.mxu0 %v695_v48  ;;  %v150_v40 = vld [vmem:[%s1780_s1 + $0x3a8] sm:$0xff]  ;;  %v148_v41 = vld [vmem:[%s1780_s1 + $0x398] sm:$0xff]  ;;  %v713_v43 = vpack.c.bf16 %v141_v35, %v137_v34  ;;  %v841_v44 = vpack.c.bf16 %v143_v38, %v139_v36  ;;  %v145_v46 = vld [vmem:[%s1780_s1 + $0x380] sm:$0xff] }
  0x28   :  { %824 = vmatprep.subr.bf16.mxu1 %v823_v52  ;;  %v152_v42 = vld [vmem:[%s1780_s1 + $0x3b8] sm:$0xff]  ;;  %v715_v45 = vpack.c.bf16 %v150_v40, %v146_v39  ;;  %v149_v47 = vld [vmem:[%s1780_s1 + $0x3a0] sm:$0xff]  ;;  %v147_v48 = vld [vmem:[%s1780_s1 + $0x390] sm:$0xff] }
  0x29   :  { %v843_v49 = vpack.c.bf16 %v152_v42, %v148_v41  ;;  %v151_v50 = vld [vmem:[%s1780_s1 + $0x3b0] sm:$0xff]  ;;  %v154_v51 = vld [vmem:[%s1780_s1 + $0x3c8] sm:$0xff]  ;;  %v156_v53 = vld [vmem:[%s1780_s1 + $0x3d8] sm:$0xff]  ;;  %v717_v55 = vpack.c.bf16 %v149_v47, %v145_v46 }
  0x2a   :  { %698 = vmatpush1.bf16.msra.mxu0 %v697_v58  ;;  %v158_v52 = vld [vmem:[%s1780_s1 + $0x3e8] sm:$0xff]  ;;  %v160_v54 = vld [vmem:[%s1780_s1 + $0x3f8] sm:$0xff]  ;;  %v845_v56 = vpack.c.bf16 %v151_v50, %v147_v48  ;;  %v153_v58 = vld [vmem:[%s1780_s1 + $0x3c0] sm:$0xff] }
  0x2b   :  { %826 = vmatpush1.bf16.msra.mxu1 %v825_v59  ;;  %700 = vmatprep.subr.bf16.mxu0 %v699_v60  ;;  %v719_v57 = vpack.c.bf16 %v158_v52, %v154_v51  ;;  %v157_v59 = vld [vmem:[%s1780_s1 + $0x3e0] sm:$0xff]  ;;  %v155_v60 = vld [vmem:[%s1780_s1 + $0x3d0] sm:$0xff]  ;;  %v847_v61 = vpack.c.bf16 %v160_v54, %v156_v53  ;;  %v162_v63 = vld [vmem:[%s1780_s1 + $0x408] sm:$0xff] }
  0x2c   :  { %828 = vmatprep.subr.bf16.mxu1 %v827_v0  ;;  %v159_v62 = vld [vmem:[%s1780_s1 + $0x3f0] sm:$0xff]  ;;  %v166_v0 = vld [vmem:[%s1780_s1 + $0x428] sm:$0xff]  ;;  %v164_v1 = vld [vmem:[%s1780_s1 + $0x418] sm:$0xff]  ;;  %v721_v3 = vpack.c.bf16 %v157_v59, %v153_v58 }
  0x2d   :  { %v168_v2 = vld [vmem:[%s1780_s1 + $0x438] sm:$0xff]  ;;  %v849_v4 = vpack.c.bf16 %v159_v62, %v155_v60  ;;  %v723_v5 = vpack.c.bf16 %v166_v0, %v162_v63  ;;  %v165_v7 = vld [vmem:[%s1780_s1 + $0x420] sm:$0xff]  ;;  %v167_v10 = vld [vmem:[%s1780_s1 + $0x430] sm:$0xff] }
  0x2e   :  { %702 = vmatpush1.bf16.msra.mxu0 %v701_v6  ;;  %v161_v6 = vld [vmem:[%s1780_s1 + $0x400] sm:$0xff]  ;;  %v170_v11 = vld [vmem:[%s1780_s1 + $0x448] sm:$0xff]  ;;  %v176_v14 = vld [vmem:[%s1780_s1 + $0x478] sm:$0xff] }
  0x2f   :  { %830 = vmatpush1.bf16.msra.mxu1 %v829_v8  ;;  %704 = vmatprep.subr.bf16.mxu0 %v703_v9  ;;  %v163_v8 = vld [vmem:[%s1780_s1 + $0x410] sm:$0xff]  ;;  %v851_v9 = vpack.c.bf16 %v168_v2, %v164_v1  ;;  %v174_v12 = vld [vmem:[%s1780_s1 + $0x468] sm:$0xff]  ;;  %v29_v15 = vld [vmem:[%s1779_s0] sm:$0xff]  ;;  %v725_v16 = vpack.c.bf16 %v165_v7, %v161_v6 }
  0x30   :  { %832 = vmatprep.subr.bf16.mxu1 %v831_v13  ;;  %v172_v13 = vld [vmem:[%s1780_s1 + $0x458] sm:$0xff]  ;;  %v853_v17 = vpack.c.bf16 %v167_v10, %v163_v8  ;;  %v727_v18 = vpack.c.bf16 %v174_v12, %v170_v11  ;;  %v175_v23 = vld [vmem:[%s1780_s1 + $0x470] sm:$0xff]  ;;  %v178_v24 = vld [vmem:[%s1780_s1 + $0x488] sm:$0xff] }
  0x31   :  { %v855_v22 = vpack.c.bf16 %v176_v14, %v172_v13  ;;  %v180_v26 = vld [vmem:[%s1780_s1 + $0x498] sm:$0xff]  ;;  %v183_v35 = vld [vmem:[%s1780_s1 + $0x4b0] sm:$0xff]  ;;  %v186_v36 = vld [vmem:[%s1780_s1 + $0x4c8] sm:$0xff] }
  0x32   :  { %706 = vmatpush1.bf16.msra.mxu0 %v705_v19  ;;  %v169_v19 = vld [vmem:[%s1780_s1 + $0x440] sm:$0xff]  ;;  %v184_v27 = vld [vmem:[%s1780_s1 + $0x4b8] sm:$0xff]  ;;  %v191_v47 = vld [vmem:[%s1780_s1 + $0x4f0] sm:$0xff] }
  0x33   :  { %834 = vmatpush1.bf16.msra.mxu1 %v833_v20  ;;  %708 = vmatprep.subr.bf16.mxu0 %v707_v21  ;;  %v173_v20 = vld [vmem:[%s1780_s1 + $0x460] sm:$0xff]  ;;  %v171_v21 = vld [vmem:[%s1780_s1 + $0x450] sm:$0xff]  ;;  %v859_v34 = vpack.c.bf16 %v184_v27, %v180_v26  ;;  %v188_v38 = vld [vmem:[%s1780_s1 + $0x4d8] sm:$0xff] }
  0x34   :  { %836 = vmatprep.subr.bf16.mxu1 %v835_v25  ;;  %v182_v25 = vld [vmem:[%s1780_s1 + $0x4a8] sm:$0xff]  ;;  %v729_v28 = vpack.c.bf16 %v173_v20, %v169_v19  ;;  %v857_v29 = vpack.c.bf16 %v175_v23, %v171_v21  ;;  %v192_v39 = vld [vmem:[%s1780_s1 + $0x4f8] sm:$0xff]  ;;  %v199_v59 = vld [vmem:[%s1780_s1 + $0x530] sm:$0xff] }
  0x35   :  { %v731_v30 = vpack.c.bf16 %v182_v25, %v178_v24  ;;  %v863_v46 = vpack.c.bf16 %v192_v39, %v188_v38  ;;  %v194_v48 = vld [vmem:[%s1780_s1 + $0x508] sm:$0xff]  ;;  %v196_v50 = vld [vmem:[%s1780_s1 + $0x518] sm:$0xff]  ;;  %v207_v7 = vld [vmem:[%s1780_s1 + $0x570] sm:$0xff] }
  0x36   :  { %710 = vmatpush1.bf16.msra.mxu0 %v709_v31  ;;  %v177_v31 = vld [vmem:[%s1780_s1 + $0x480] sm:$0xff]  ;;  %v200_v51 = vld [vmem:[%s1780_s1 + $0x538] sm:$0xff]  ;;  %v202_v60 = vld [vmem:[%s1780_s1 + $0x548] sm:$0xff] }
  0x37   :  { %838 = vmatpush1.bf16.msra.mxu1 %v837_v32  ;;  %712 = vmatprep.subr.bf16.mxu0 %v711_v33  ;;  %v181_v32 = vld [vmem:[%s1780_s1 + $0x4a0] sm:$0xff]  ;;  %v179_v33 = vld [vmem:[%s1780_s1 + $0x490] sm:$0xff]  ;;  %v867_v58 = vpack.c.bf16 %v200_v51, %v196_v50  ;;  %v204_v62 = vld [vmem:[%s1780_s1 + $0x558] sm:$0xff] }
  0x38   :  { %840 = vmatprep.subr.bf16.mxu1 %v839_v37  ;;  %v190_v37 = vld [vmem:[%s1780_s1 + $0x4e8] sm:$0xff]  ;;  %v733_v40 = vpack.c.bf16 %v181_v32, %v177_v31  ;;  %v861_v41 = vpack.c.bf16 %v183_v35, %v179_v33  ;;  %v208_v63 = vld [vmem:[%s1780_s1 + $0x578] sm:$0xff]  ;;  %v209_v13 = vld [vmem:[%s1780_s1 + $0x580] sm:$0xff] }
  0x39   :  { %v735_v42 = vpack.c.bf16 %v190_v37, %v186_v36  ;;  %v871_v6 = vpack.c.bf16 %v208_v63, %v204_v62  ;;  %v210_v8 = vld [vmem:[%s1780_s1 + $0x588] sm:$0xff]  ;;  %v212_v10 = vld [vmem:[%s1780_s1 + $0x598] sm:$0xff]  ;;  %v213_v14 = vld [vmem:[%s1780_s1 + $0x5a0] sm:$0xff] }
  0x3a   :  { %714 = vmatpush1.bf16.msra.mxu0 %v713_v43  ;;  %v185_v43 = vld [vmem:[%s1780_s1 + $0x4c0] sm:$0xff]  ;;  %v216_v11 = vld [vmem:[%s1780_s1 + $0x5b8] sm:$0xff]  ;;  %v218_v19 = vld [vmem:[%s1780_s1 + $0x5c8] sm:$0xff] }
  0x3b   :  { %842 = vmatpush1.bf16.msra.mxu1 %v841_v44  ;;  %716 = vmatprep.subr.bf16.mxu0 %v715_v45  ;;  %v189_v44 = vld [vmem:[%s1780_s1 + $0x4e0] sm:$0xff]  ;;  %v187_v45 = vld [vmem:[%s1780_s1 + $0x4d0] sm:$0xff]  ;;  %v875_v20 = vpack.c.bf16 %v216_v11, %v212_v10  ;;  %v222_v21 = vld [vmem:[%s1780_s1 + $0x5e8] sm:$0xff] }
  0x3c   :  { %844 = vmatprep.subr.bf16.mxu1 %v843_v49  ;;  %v198_v49 = vld [vmem:[%s1780_s1 + $0x528] sm:$0xff]  ;;  %v737_v52 = vpack.c.bf16 %v189_v44, %v185_v43  ;;  %v865_v53 = vpack.c.bf16 %v191_v47, %v187_v45 }
  0x3d   :  { %v739_v54 = vpack.c.bf16 %v198_v49, %v194_v48 }
  0x3e   :  { %718 = vmatpush1.bf16.msra.mxu0 %v717_v55  ;;  %v193_v55 = vld [vmem:[%s1780_s1 + $0x500] sm:$0xff] }
  0x3f   :  { %846 = vmatpush1.bf16.msra.mxu1 %v845_v56  ;;  %720 = vmatprep.subr.bf16.mxu0 %v719_v57  ;;  %v197_v56 = vld [vmem:[%s1780_s1 + $0x520] sm:$0xff]  ;;  %v195_v57 = vld [vmem:[%s1780_s1 + $0x510] sm:$0xff] }
  0x40   :  { %848 = vmatprep.subr.bf16.mxu1 %v847_v61  ;;  %v206_v61 = vld [vmem:[%s1780_s1 + $0x568] sm:$0xff]  ;;  %v741_v0 = vpack.c.bf16 %v197_v56, %v193_v55  ;;  %v869_v1 = vpack.c.bf16 %v199_v59, %v195_v57 }
  0x41   :  { %v743_v2 = vpack.c.bf16 %v206_v61, %v202_v60 }
  0x42   :  { %722 = vmatpush1.bf16.msra.mxu0 %v721_v3  ;;  %v201_v3 = vld [vmem:[%s1780_s1 + $0x540] sm:$0xff] }
  0x43   :  { %850 = vmatpush1.bf16.msra.mxu1 %v849_v4  ;;  %724 = vmatprep.subr.bf16.mxu0 %v723_v5  ;;  %v205_v4 = vld [vmem:[%s1780_s1 + $0x560] sm:$0xff]  ;;  %v203_v5 = vld [vmem:[%s1780_s1 + $0x550] sm:$0xff] }
  0x44   :  { %852 = vmatprep.subr.bf16.mxu1 %v851_v9  ;;  %v214_v9 = vld [vmem:[%s1780_s1 + $0x5a8] sm:$0xff]  ;;  %v745_v12 = vpack.c.bf16 %v205_v4, %v201_v3 }
  0x45   :  { %354 = vmatmul.mubr.f32.vlgmr.msra.gmra.mrb[0].mxu0 %v29_v15 }
  0x46   :  { %726 = vmatpush1.bf16.msra.mxu0 %v725_v16  ;;  %496 = vmatmul.mubr.f32.vlgmr.msra.gmra.mrb[0].mxu1 %v29_v15  ;;  %v873_v15 = vpack.c.bf16 %v207_v7, %v203_v5  ;;  %v747_v16 = vpack.c.bf16 %v214_v9, %v210_v8 }
  0x47   :  { %854 = vmatpush1.bf16.msra.mxu1 %v853_v17  ;;  %728 = vmatprep.subr.bf16.mxu0 %v727_v18  ;;  %v211_v17 = vld [vmem:[%s1780_s1 + $0x590] sm:$0xff] }
  0x48   :  { %856 = vmatprep.subr.bf16.mxu1 %v855_v22  ;;  %v215_v18 = vld [vmem:[%s1780_s1 + $0x5b0] sm:$0xff]  ;;  %v32_v22 = vld [vmem:[%s1779_s0 + $0x18] sm:$0xff] }
  0x4a   :  { %730 = vmatpush1.bf16.msra.mxu0 %v729_v28 }
  0x4b   :  { %858 = vmatpush1.bf16.msra.mxu1 %v857_v29  ;;  %732 = vmatprep.subr.bf16.mxu0 %v731_v30 }
  0x4c   :  { %860 = vmatprep.subr.bf16.mxu1 %v859_v34 }
  0x4e   :  { %734 = vmatpush1.bf16.msra.mxu0 %v733_v40 }
  0x4f   :  { %862 = vmatpush1.bf16.msra.mxu1 %v861_v41  ;;  %736 = vmatprep.subr.bf16.mxu0 %v735_v42 }
  0x50   :  { %864 = vmatprep.subr.bf16.mxu1 %v863_v46 }
  0x52   :  { %738 = vmatpush1.bf16.msra.mxu0 %v737_v52 }
  0x53   :  { %866 = vmatpush1.bf16.msra.mxu1 %v865_v53  ;;  %740 = vmatprep.subr.bf16.mxu0 %v739_v54 }
  0x54   :  { %868 = vmatprep.subr.bf16.mxu1 %v867_v58 }
  0x56   :  { %742 = vmatpush1.bf16.msra.mxu0 %v741_v0 }
  0x57   :  { %870 = vmatpush1.bf16.msra.mxu1 %v869_v1  ;;  %744 = vmatprep.subr.bf16.mxu0 %v743_v2 }
  0x58   :  { %872 = vmatprep.subr.bf16.mxu1 %v871_v6 }
  0x59   :  { %10 = vsyncpa [#allocation4], 0  ;;  %v220_v23 = vld [vmem:[%s1780_s1 + $0x5d8] sm:$0xff]  ;;  %424 = vmatprep.mubr.f32.mxu0 %v32_v22  ;;  %566 = vmatprep.mubr.f32.mxu1 %v32_v22  ;;  %v749_v25 = vpack.c.bf16 %v213_v14, %v209_v13  ;;  %v877_v26 = vpack.c.bf16 %v215_v18, %v211_v17  ;;  %v751_v27 = vpack.c.bf16 %v222_v21, %v218_v19  ;;  %v217_v28 = vld [vmem:[%s1780_s1 + $0x5c0] sm:$0xff] }
  0x5a   :  { %v224_v24 = vld [vmem:[%s1780_s1 + $0x5f8] sm:$0xff]  ;;  %746 = vmatpush1.bf16.msra.mxu0 %v745_v12  ;;  %v221_v29 = vld [vmem:[%s1780_s1 + $0x5e0] sm:$0xff]  ;;  %v219_v30 = vld [vmem:[%s1780_s1 + $0x5d0] sm:$0xff] }
  0x5b   :  { %874 = vmatpush1.bf16.msra.mxu1 %v873_v15  ;;  %748 = vmatprep.subr.bf16.mxu0 %v747_v16  ;;  %v879_v31 = vpack.c.bf16 %v224_v24, %v220_v23  ;;  %v223_v32 = vld [vmem:[%s1780_s1 + $0x5f0] sm:$0xff]  ;;  %v226_v33 = vld [vmem:[%s1780_s1 + $0x608] sm:$0xff]  ;;  %v228_v35 = vld [vmem:[%s1780_s1 + $0x618] sm:$0xff]  ;;  %v753_v37 = vpack.c.bf16 %v221_v29, %v217_v28 }
  0x5c   :  { %876 = vmatprep.subr.bf16.mxu1 %v875_v20  ;;  %v230_v34 = vld [vmem:[%s1780_s1 + $0x628] sm:$0xff]  ;;  %v232_v36 = vld [vmem:[%s1780_s1 + $0x638] sm:$0xff]  ;;  %v881_v38 = vpack.c.bf16 %v223_v32, %v219_v30  ;;  %v225_v40 = vld [vmem:[%s1780_s1 + $0x600] sm:$0xff] }
  0x5d   :  { %v755_v39 = vpack.c.bf16 %v230_v34, %v226_v33  ;;  %v229_v41 = vld [vmem:[%s1780_s1 + $0x620] sm:$0xff]  ;;  %v227_v42 = vld [vmem:[%s1780_s1 + $0x610] sm:$0xff]  ;;  %v883_v43 = vpack.c.bf16 %v232_v36, %v228_v35  ;;  %v234_v45 = vld [vmem:[%s1780_s1 + $0x648] sm:$0xff] }
  0x5e   :  { %750 = vmatpush1.bf16.msra.mxu0 %v749_v25  ;;  %v231_v44 = vld [vmem:[%s1780_s1 + $0x630] sm:$0xff]  ;;  %v238_v46 = vld [vmem:[%s1780_s1 + $0x668] sm:$0xff]  ;;  %v236_v47 = vld [vmem:[%s1780_s1 + $0x658] sm:$0xff]  ;;  %v757_v49 = vpack.c.bf16 %v229_v41, %v225_v40 }
  0x5f   :  { %878 = vmatpush1.bf16.msra.mxu1 %v877_v26  ;;  %752 = vmatprep.subr.bf16.mxu0 %v751_v27  ;;  %v240_v48 = vld [vmem:[%s1780_s1 + $0x678] sm:$0xff]  ;;  %v885_v50 = vpack.c.bf16 %v231_v44, %v227_v42  ;;  %v759_v51 = vpack.c.bf16 %v238_v46, %v234_v45  ;;  %v233_v52 = vld [vmem:[%s1780_s1 + $0x640] sm:$0xff]  ;;  %v235_v54 = vld [vmem:[%s1780_s1 + $0x650] sm:$0xff] }
  0x60   :  { %880 = vmatprep.subr.bf16.mxu1 %v879_v31  ;;  %v237_v53 = vld [vmem:[%s1780_s1 + $0x660] sm:$0xff]  ;;  %v887_v55 = vpack.c.bf16 %v240_v48, %v236_v47  ;;  %v239_v56 = vld [vmem:[%s1780_s1 + $0x670] sm:$0xff]  ;;  %v242_v57 = vld [vmem:[%s1780_s1 + $0x688] sm:$0xff] }
  0x61   :  { %v246_v58 = vld [vmem:[%s1780_s1 + $0x6a8] sm:$0xff]  ;;  %v244_v59 = vld [vmem:[%s1780_s1 + $0x698] sm:$0xff]  ;;  %v761_v61 = vpack.c.bf16 %v237_v53, %v233_v52  ;;  %v889_v62 = vpack.c.bf16 %v239_v56, %v235_v54  ;;  %v241_v0 = vld [vmem:[%s1780_s1 + $0x680] sm:$0xff] }
  0x62   :  { %754 = vmatpush1.bf16.msra.mxu0 %v753_v37  ;;  %v248_v60 = vld [vmem:[%s1780_s1 + $0x6b8] sm:$0xff]  ;;  %v763_v63 = vpack.c.bf16 %v246_v58, %v242_v57  ;;  %v245_v1 = vld [vmem:[%s1780_s1 + $0x6a0] sm:$0xff]  ;;  %v243_v2 = vld [vmem:[%s1780_s1 + $0x690] sm:$0xff] }
  0x63   :  { %882 = vmatpush1.bf16.msra.mxu1 %v881_v38  ;;  %756 = vmatprep.subr.bf16.mxu0 %v755_v39  ;;  %v891_v3 = vpack.c.bf16 %v248_v60, %v244_v59  ;;  %v247_v4 = vld [vmem:[%s1780_s1 + $0x6b0] sm:$0xff]  ;;  %v250_v5 = vld [vmem:[%s1780_s1 + $0x6c8] sm:$0xff]  ;;  %v252_v7 = vld [vmem:[%s1780_s1 + $0x6d8] sm:$0xff]  ;;  %v765_v9 = vpack.c.bf16 %v245_v1, %v241_v0 }
  0x64   :  { %884 = vmatprep.subr.bf16.mxu1 %v883_v43  ;;  %v254_v6 = vld [vmem:[%s1780_s1 + $0x6e8] sm:$0xff]  ;;  %v256_v8 = vld [vmem:[%s1780_s1 + $0x6f8] sm:$0xff]  ;;  %v893_v10 = vpack.c.bf16 %v247_v4, %v243_v2  ;;  %v249_v12 = vld [vmem:[%s1780_s1 + $0x6c0] sm:$0xff]  ;;  %v590_v4 = vlaneseq }
  0x65   :  { %v767_v11 = vpack.c.bf16 %v254_v6, %v250_v5  ;;  %v253_v13 = vld [vmem:[%s1780_s1 + $0x6e0] sm:$0xff]  ;;  %v251_v14 = vld [vmem:[%s1780_s1 + $0x6d0] sm:$0xff]  ;;  %v895_v15 = vpack.c.bf16 %v256_v8, %v252_v7  ;;  %v258_v17 = vld [vmem:[%s1780_s1 + $0x708] sm:$0xff] }
  0x66   :  { %758 = vmatpush1.bf16.msra.mxu0 %v757_v49  ;;  %v255_v16 = vld [vmem:[%s1780_s1 + $0x6f0] sm:$0xff]  ;;  %v262_v18 = vld [vmem:[%s1780_s1 + $0x728] sm:$0xff]  ;;  %v260_v19 = vld [vmem:[%s1780_s1 + $0x718] sm:$0xff]  ;;  %v769_v21 = vpack.c.bf16 %v253_v13, %v249_v12  ;;  %v591_v5 = vshrl.u32 %v590_v4, 7 }
  0x67   :  { %886 = vmatpush1.bf16.msra.mxu1 %v885_v50  ;;  %760 = vmatprep.subr.bf16.mxu0 %v759_v51  ;;  %v264_v20 = vld [vmem:[%s1780_s1 + $0x738] sm:$0xff]  ;;  %v897_v22 = vpack.c.bf16 %v255_v16, %v251_v14  ;;  %v771_v23 = vpack.c.bf16 %v262_v18, %v258_v17  ;;  %v257_v24 = vld [vmem:[%s1780_s1 + $0x700] sm:$0xff]  ;;  %v259_v26 = vld [vmem:[%s1780_s1 + $0x710] sm:$0xff] }
  0x68   :  { %888 = vmatprep.subr.bf16.mxu1 %v887_v55  ;;  %v261_v25 = vld [vmem:[%s1780_s1 + $0x720] sm:$0xff]  ;;  %v899_v27 = vpack.c.bf16 %v264_v20, %v260_v19  ;;  %v263_v28 = vld [vmem:[%s1780_s1 + $0x730] sm:$0xff]  ;;  %v266_v29 = vld [vmem:[%s1780_s1 + $0x748] sm:$0xff]  ;;  %v592_v6 = vsub.s32 0, %v591_v5  ;;  %v600_v8 = vsub.s32 2, %v591_v5 }
  0x69   :  { %v270_v30 = vld [vmem:[%s1780_s1 + $0x768] sm:$0xff]  ;;  %v268_v31 = vld [vmem:[%s1780_s1 + $0x758] sm:$0xff]  ;;  %v773_v33 = vpack.c.bf16 %v261_v25, %v257_v24  ;;  %v901_v34 = vpack.c.bf16 %v263_v28, %v259_v26  ;;  %v265_v36 = vld [vmem:[%s1780_s1 + $0x740] sm:$0xff] }
  0x6a   :  { %762 = vmatpush1.bf16.msra.mxu0 %v761_v61  ;;  %v272_v32 = vld [vmem:[%s1780_s1 + $0x778] sm:$0xff]  ;;  %v775_v35 = vpack.c.bf16 %v270_v30, %v266_v29  ;;  %v269_v37 = vld [vmem:[%s1780_s1 + $0x760] sm:$0xff]  ;;  %v267_v38 = vld [vmem:[%s1780_s1 + $0x750] sm:$0xff] }
  0x6b   :  { %890 = vmatpush1.bf16.msra.mxu1 %v889_v62  ;;  %764 = vmatprep.subr.bf16.mxu0 %v763_v63  ;;  %v903_v39 = vpack.c.bf16 %v272_v32, %v268_v31  ;;  %v271_v40 = vld [vmem:[%s1780_s1 + $0x770] sm:$0xff]  ;;  %v274_v41 = vld [vmem:[%s1780_s1 + $0x788] sm:$0xff]  ;;  %v276_v43 = vld [vmem:[%s1780_s1 + $0x798] sm:$0xff]  ;;  %v777_v45 = vpack.c.bf16 %v269_v37, %v265_v36 }
  0x6c   :  { %892 = vmatprep.subr.bf16.mxu1 %v891_v3  ;;  %v278_v42 = vld [vmem:[%s1780_s1 + $0x7a8] sm:$0xff]  ;;  %v280_v44 = vld [vmem:[%s1780_s1 + $0x7b8] sm:$0xff]  ;;  %v905_v46 = vpack.c.bf16 %v271_v40, %v267_v38  ;;  %v273_v48 = vld [vmem:[%s1780_s1 + $0x780] sm:$0xff] }
  0x6d   :  { %v779_v47 = vpack.c.bf16 %v278_v42, %v274_v41  ;;  %v277_v49 = vld [vmem:[%s1780_s1 + $0x7a0] sm:$0xff]  ;;  %v275_v50 = vld [vmem:[%s1780_s1 + $0x790] sm:$0xff]  ;;  %v907_v51 = vpack.c.bf16 %v280_v44, %v276_v43  ;;  %v282_v53 = vld [vmem:[%s1780_s1 + $0x7c8] sm:$0xff] }
  0x6e   :  { %766 = vmatpush1.bf16.msra.mxu0 %v765_v9  ;;  %v279_v52 = vld [vmem:[%s1780_s1 + $0x7b0] sm:$0xff]  ;;  %v286_v54 = vld [vmem:[%s1780_s1 + $0x7e8] sm:$0xff]  ;;  %v284_v55 = vld [vmem:[%s1780_s1 + $0x7d8] sm:$0xff]  ;;  %v781_v57 = vpack.c.bf16 %v277_v49, %v273_v48  ;;  %v596_v9 = vsub.s32 1, %v591_v5 }
  0x6f   :  { %894 = vmatpush1.bf16.msra.mxu1 %v893_v10  ;;  %768 = vmatprep.subr.bf16.mxu0 %v767_v11  ;;  %v288_v56 = vld [vmem:[%s1780_s1 + $0x7f8] sm:$0xff]  ;;  %v909_v58 = vpack.c.bf16 %v279_v52, %v275_v50  ;;  %v783_v59 = vpack.c.bf16 %v286_v54, %v282_v53  ;;  %v281_v60 = vld [vmem:[%s1780_s1 + $0x7c0] sm:$0xff]  ;;  %v283_v63 = vld [vmem:[%s1780_s1 + $0x7d0] sm:$0xff]  ;;  %v604_v10 = vsub.s32 3, %v591_v5 }
  0x70   :  { %896 = vmatprep.subr.bf16.mxu1 %v895_v15  ;;  %v285_v61 = vld [vmem:[%s1780_s1 + $0x7e0] sm:$0xff]  ;;  %v911_v62 = vpack.c.bf16 %v288_v56, %v284_v55  ;;  %v287_v0 = vld [vmem:[%s1780_s1 + $0x7f0] sm:$0xff] }
  0x71   :  { %v785_v1 = vpack.c.bf16 %v285_v61, %v281_v60  ;;  %v913_v2 = vpack.c.bf16 %v287_v0, %v283_v63  ;;  %v31_v3 = vld [vmem:[%s1779_s0 + $0x10] sm:$0xff]  ;;  %v588_v7 = vld [vmem:[%s1781_s2] sm:$0xf]  ;;  %s946_s0 = smov [#allocation3]  }
  0x72   :  { %770 = vmatpush1.bf16.msra.mxu0 %v769_v21  ;;  %v593_v11 = vrot.slane %v588_v7, %v592_v6  ;;  %v601_v12 = vrot.slane %v588_v7, %v600_v8  ;;  %v597_v13 = vrot.slane %v588_v7, %v596_v9  ;;  %v605_v14 = vrot.slane %v588_v7, %v604_v10  ;;  %s647_s1 = sshll.u32 %s946_s0, 4  ;;  %s648_s1 = int_to_ptr.vmem [resolvable:$true] %s647_s1 }
  0x73   :  { %898 = vmatpush1.bf16.msra.mxu1 %v897_v22  ;;  %772 = vmatprep.subr.bf16.mxu0 %v771_v23  ;;  %s922_s2 = scalar_lea.vmem %s648_s1, 512  ;;  %p927_p1 = scmp.lt.s32.totalorder %s648_s1, %s648_s1 }
  0x74   :  { %900 = vmatprep.subr.bf16.mxu1 %v899_v27  ;;  %p923_p0 = scmp.ne.s32.totalorder %s648_s1, %s922_s2  ;;  %p928_p2 = scmp.lt.s32.totalorder %s922_s2, %s922_s2 }
  0x76   :  { %774 = vmatpush1.bf16.msra.mxu0 %v773_v33  ;;  %p929_p3 = por %p928_p2, %p927_p1 }
  0x77   :  { %902 = vmatpush1.bf16.msra.mxu1 %v901_v34  ;;  %776 = vmatprep.subr.bf16.mxu0 %v775_v35 }
  0x78   :  { %904 = vmatprep.subr.bf16.mxu1 %v903_v39  ;;  %p930_p4 = pnand %p929_p3, %p923_p0 }
  0x7a   :  { %778 = vmatpush1.bf16.msra.mxu0 %v777_v45 }
  0x7b   :  { %906 = vmatpush1.bf16.msra.mxu1 %v905_v46  ;;  %780 = vmatprep.subr.bf16.mxu0 %v779_v47 }
  0x7c   :  { %908 = vmatprep.subr.bf16.mxu1 %v907_v51 }
  0x7e   :  { %782 = vmatpush1.bf16.msra.mxu0 %v781_v57 }
  0x7f   :  { %910 = vmatpush1.bf16.msra.mxu1 %v909_v58  ;;  %784 = vmatprep.subr.bf16.mxu0 %v783_v59 }
  0x80   :  { %912 = vmatprep.subr.bf16.mxu1 %v911_v62 }
  0x82   :  { %786 = vmatpush1.bf16.msra.mxu0 %v785_v1 }
  0x83   :  { %914 = vmatpush1.bf16.msra.mxu1 %v913_v2 }
  0x85   :  { %425 = vmatmul.mubr.f32.vlgmr.msra.gmra.mrb[0].mxu0 %v31_v3 }
  0x86   :  { %567 = vmatmul.mubr.f32.vlgmr.msra.gmra.mrb[0].mxu1 %v31_v3 }
 0x158   :  { %v426_v15 = vpop.f32.mrb[0].mxu0 }
 0x159   :  { %v610_v16 = vadd.f32 %v593_v11, %v426_v15  ;;  %v568_v17 = vpop.f32.mrb[0].mxu1  ;;  %v428_v18 = vpop.f32.mrb[1].mxu0 }
 0x15a   :  { %v612_v19 = vadd.f32 %v601_v12, %v568_v17  ;;  %v611_v20 = vadd.f32 %v597_v13, %v428_v18  ;;  %v570_v21 = vpop.f32.mrb[1].mxu1 }
 0x15b   :  { %v614_v22 = vmax.f32 %v610_v16, 0.0  ;;  %v613_v23 = vadd.f32 %v605_v14, %v570_v21 }
 0x15c   :  { %v616_v24 = vmax.f32 %v612_v19, 0.0  ;;  %v615_v25 = vmax.f32 %v611_v20, 0.0 }
 0x15d   :  { %618 = vst [vmem:[#allocation3] sm:$0xff] %v614_v22  ;;  %v622_v26 = vmul.f32 %v614_v22, %v614_v22  ;;  %v617_v27 = vmax.f32 %v613_v23, 0.0 }
 0x15e   :  { %620 = vst [vmem:[#allocation3 + $0x10] sm:$0xff] %v616_v24  ;;  %619 = vst [vmem:[#allocation3 + $0x8] sm:$0xff] %v615_v25  ;;  %v623_v28 = vmul.f32 %v615_v25, %v615_v25  ;;  %v624_v29 = vmul.f32 %v616_v24, %v616_v24 }
 0x15f   :  { %621 = vst [vmem:[#allocation3 + $0x18] sm:$0xff] %v617_v27  ;;  %v625_v31 = vmul.f32 %v617_v27, %v617_v27 }
 0x160   :  { %v626_v30 = vadd.f32 %v623_v28, %v622_v26 }
 0x162   :  { %v627_v32 = vadd.f32 %v626_v30, %v624_v29 }
 0x164   :  { %v628_v33 = vadd.f32 %v627_v32, %v625_v31 }
 0x166   :  { %629 = vadd.xlane.f32.xlu0 %v628_v33 }
 0x167   :  { %933 = shalt.err (!%p930_p4)
}
 0x168   :  { %s934_s19 = scalar_lea.hbm %s1782_s3, 512 }
 0x169   :  { %p935_p5 = scmp.ne.s32.totalorder %s1782_s3, %s934_s19  ;;  %p938_p6 = scmp.lt.u32.totalorder %s934_s19, %s1782_s3 }
 0x16b   :  { %p940_p7 = pnand %p938_p6, %p935_p5 }
 0x16d   :  { %943 = shalt.err (!%p940_p7)
}
 0x16e   :  { %650 = dma.vmem_to_hbm [thread:$0]  %s648_s1, 512, %s1782_s3, [#allocation4]  }
 0x1f3   :  { %v630_v34 = vpop.xlane.xlu0 %629 }
 0x1f4   :  { %v631_v35 = vmax.f32 %v630_v34, 1e-24 }
 0x1f6   :  { %920 = vrsqrt.f32 %v631_v35 }
 0x200   :  { %v921_v36 = vpop.eup %920 }
 0x201   :  { %v633_v37 = vmul.f32 %v921_v36, %v614_v22  ;;  %v634_v38 = vmul.f32 %v921_v36, %v615_v25  ;;  %v635_v39 = vmul.f32 %v921_v36, %v616_v24  ;;  %v636_v40 = vmul.f32 %v921_v36, %v617_v27 }
 0x203   :  { %637 = vst [vmem:[%s1783_s4] sm:$0xff] %v633_v37  ;;  %638 = vst [vmem:[%s1783_s4 + $0x8] sm:$0xff] %v634_v38 }
 0x204   :  { %639 = vst [vmem:[%s1783_s4 + $0x10] sm:$0xff] %v635_v39  ;;  %640 = vst [vmem:[%s1783_s4 + $0x18] sm:$0xff] %v636_v40 }
 0x205   :  { %944 = dma.done.wait [#allocation4], 512  }
 0x206   :  { %945 = vsyncadd [#allocation4], 4294966784 }
 0x207   :  { %658 = vsyncpa [#allocation4], 1 }

</bundles_post_ra>
